<compile_context>
chip_gen: v6e
topology: v6e:2x2x1
jax: 0.10.0
libtpu: 0.0.40
codegen_flags: <defaults>
</compile_context>

<pallas_src>
import numpy as np
import jax
import jax.numpy as jnp
from jax.experimental import pallas as pl
from jax.experimental.pallas import tpu as pltpu

# ---------------- module hyper-parameters ---------------------------------------
DIM = 32            # dim
HEADS = 2           # heads
HEAD_DIM = 16       # head_dim
INNER = HEADS * HEAD_DIM          # 32
MLP_DIM = 64        # mlp_dim
WS = 3              # window_size
GRID_HW = 9         # nn.Fold(output_size=(9, 9)) hard-codes 9x9 spatial
NWIN_SIDE = (GRID_HW - WS) // 2 + 1   # stride-2 unfold -> 4
NWIN = NWIN_SIDE * NWIN_SIDE          # 16 windows
HALF = DIM // 2
LN_EPS = 1e-5
SCALE = HEAD_DIM ** (-0.5)            # 0.25 (exact power of two)
TOK = GRID_HW * GRID_HW               # 81 tokens per image
WTOK = NWIN * WS * WS                 # 144 window tokens per image
WCH = WS * WS * INNER                 # 288 flattened (wh, h, d) channel dim
NEG = -1e30                           # cross-window mask value


# ---------------- static index-plumbing tables (compile-time 0/1 matrices) ------
def _build_tables():
    # Unfold gather: (144, 81); row n*9+p picks pixel (2*wr+pr, 2*wc+pc)
    gat = np.zeros((WTOK, TOK), np.float32)
    for n in range(NWIN):
        wr, wc = divmod(n, NWIN_SIDE)
        for p in range(WS * WS):
            pr, pc = divmod(p, WS)
            gat[n * WS * WS + p, (2 * wr + pr) * GRID_HW + (2 * wc + pc)] = 1.0

    # EVH[h]: (16, 288); [d, w*32 + h*16 + d] = 1
    # (tiles o across the 9 wh column-blocks AND interleaves heads in one matmul)
    evh = np.zeros((HEADS, HEAD_DIM, WCH), np.float32)
    for h in range(HEADS):
        for w in range(WS * WS):
            for d in range(HEAD_DIM):
                evh[h, d, w * INNER + h * HEAD_DIM + d] = 1.0

    # DMASK32: (144, 288); [n*9+i, w*32+c] = (w == i)
    dmask = np.zeros((WTOK, WCH), np.float32)
    for n in range(NWIN):
        for i in range(WS * WS):
            dmask[n * WS * WS + i, i * INNER:(i + 1) * INNER] = 1.0

    # RSUM: (16, 144); [n, n*9+i] = 1  (collapses the 9 wh rows of a window)
    rsum = np.zeros((NWIN, WTOK), np.float32)
    for n in range(NWIN):
        rsum[n, n * WS * WS:(n + 1) * WS * WS] = 1.0

    # SFOLD_CAT: (288, 288); [cf*9+q0, q0*32+cf] = 1 (nn.Fold channel decomposition)
    sfold = np.zeros((WCH, WCH), np.float32)
    for cf in range(INNER):
        for q0 in range(WS * WS):
            sfold[cf * WS * WS + q0, q0 * INNER + cf] = 1.0

    # AFOLD_CAT: (81, 144); [(2*wr+i)*9+(2*wc+j), q0*16+n] = 1 (overlap scatter-add)
    afold = np.zeros((TOK, WS * WS * NWIN), np.float32)
    for q0 in range(WS * WS):
        i, j = divmod(q0, WS)
        for n in range(NWIN):
            wr, wc = divmod(n, NWIN_SIDE)
            afold[(2 * wr + i) * GRID_HW + (2 * wc + j), q0 * NWIN + n] = 1.0

    # block-diagonal (same-window) mask: (144, 144)
    blk = np.zeros((WTOK, WTOK), dtype=bool)
    for n in range(NWIN):
        blk[n * WS * WS:(n + 1) * WS * WS, n * WS * WS:(n + 1) * WS * WS] = True

    return gat, evh, dmask, rsum, sfold, afold, blk


(_GATHER, _EVH, _DMASK32, _RSUM, _SFOLD_CAT, _AFOLD_CAT, _BLK) = _build_tables()

# relative-position tables + unfold index tables (for bias build / reference)
_IDX = np.array([[a, b] for a in range(WS) for b in range(WS)])
_REL = _IDX[None, :, :] - _IDX[:, None, :] + WS - 1                   # (9, 9, 2)
_L = np.arange(NWIN)
_P = np.arange(WS * WS)
_ROW_IDX = 2 * (_L[:, None] // NWIN_SIDE) + (_P[None, :] // WS)       # (16, 9)
_COL_IDX = 2 * (_L[:, None] % NWIN_SIDE) + (_P[None, :] % WS)


# ---------------- in-kernel math helpers -----------------------------------------
def _recip(d):
    # EUP approx reciprocal + one Newton step: divide leaves the critical VPU path,
    # accuracy stays at ~f32 level (error ~eps^2 of the hardware approximation).
    r = pl.reciprocal(d, approx=True)
    return r * (2.0 - d * r)


def _gelu(x):
    # exact (erf-based) GELU via A&S 7.1.26, odd-symmetric form (no sign/select).
    a1, a2, a3, a4, a5 = 0.254829592, -0.284496736, 1.421413741, -1.453152027, 1.061405429
    pp = 0.3275911
    ax = jnp.abs(x)
    u = ax * 0.7071067811865476
    t = _recip(1.0 + pp * u)
    poly = ((((a5 * t + a4) * t + a3) * t + a2) * t + a1) * t
    e = jnp.exp(-u * u)
    # x>=0: 0.5*(x + x*(1-poly*e));  x<0: 0.5*x*poly*e   == 0.5*(x + |x|*(1-poly*e))
    return 0.5 * (x + ax * (1.0 - poly * e))


def _layernorm(x, g, b):
    mu = jnp.mean(x, axis=-1, keepdims=True)
    var = jnp.mean((x - mu) ** 2, axis=-1, keepdims=True)
    return (x - mu) * jax.lax.rsqrt(var + LN_EPS) * g + b


# ---------------- the fused kernel: one grid step = one batch element -------------
def block_kernel(
    x_ref,
    ln1_g_ref, ln1_b_ref, w_qkv_ref,
    w_o1_ref, b_o1_ref, lno_g_ref, lno_b_ref, w_o2_ref, b_o2_ref,
    ln2_g_ref, ln2_b_ref, w_m1_ref, b_m1_ref, w_m2_ref, b_m2_ref,
    gat_ref, bias_ref, evh_ref, dmask_ref, rsum_ref, sfold_ref, afold_ref,
    o_ref,
    tstk_ref,
):
    f32 = jnp.float32
    x = x_ref[0]                                                      # (81, 32)

    # 0/1 plumbing tables ship as bf16 (exact for 0/1); cast once per step.
    gat = gat_ref[...].astype(f32)                                    # (144, 81)
    evh = evh_ref[...].astype(f32)                                    # (2, 16, 288)
    dmask = dmask_ref[...].astype(f32)                                # (144, 288)
    rsum = rsum_ref[...].astype(f32)                                  # (16, 144)
    sfold = sfold_ref[...].astype(f32)                                # (288, 288)
    afold = afold_ref[...].astype(f32)                                # (81, 144)
    bias = bias_ref[...]                                              # (144, 144) f32

    # ---- attention block: Residual(PreNorm(WindowAttention)) ----
    y = _layernorm(x, ln1_g_ref[...], ln1_b_ref[...])
    # Unfold gather (static 0/1 matrix on the MXU): rows become (window, pos)
    ywin = jnp.dot(gat, y, preferred_element_type=f32)                # (144, 32)
    # single fused q/k/v projection for both heads
    qkv = jnp.dot(ywin, w_qkv_ref[...], preferred_element_type=f32)   # (144, 96)

    tiled = None                                                      # (144, 288)
    for h in range(HEADS):
        c0 = h * HEAD_DIM
        q = qkv[:, c0:c0 + HEAD_DIM] * SCALE                          # (144, 16)
        k = qkv[:, INNER + c0:INNER + c0 + HEAD_DIM]                  # (144, 16)
        v = qkv[:, 2 * INNER + c0:2 * INNER + c0 + HEAD_DIM]          # (144, 16)

        # block-diagonal batched scores for all 16 windows at once (A @ B^T form)
        s = jax.lax.dot_general(q, k, (((1,), (1,)), ((), ())),
                                preferred_element_type=f32) + bias    # (144, 144)
        s = s - jnp.max(s, axis=-1, keepdims=True)
        p = jnp.exp(s)                                                # cross-window -> exactly 0
        p = p * _recip(jnp.sum(p, axis=-1, keepdims=True))

        o_rows = jnp.dot(p, v, preferred_element_type=f32)            # (144, 16)
        # tile across the 9 wh column-blocks + interleave heads in one matmul
        th = jnp.dot(o_rows, evh[h], preferred_element_type=f32)      # (144, 288)
        tiled = th if tiled is None else tiled + th

    # oflat[n, wh*32 + h*16 + d] == attention_out[h, n, wh, d]
    oflat = jnp.dot(rsum, tiled * dmask, preferred_element_type=f32)  # (16, 288)
    # nn.Fold channel decomposition: t_all[n, q0*32 + cf] = data[cf*9 + q0, n]
    t_all = jnp.dot(oflat, sfold, preferred_element_type=f32)         # (16, 288)
    # restack the nine 32-lane blocks into rows so the scatter-add is one matmul
    for q0 in range(WS * WS):
        tstk_ref[q0 * NWIN:(q0 + 1) * NWIN, :] = t_all[:, q0 * INNER:(q0 + 1) * INNER]
    z = jnp.dot(afold, tstk_ref[...], preferred_element_type=f32)     # (81, 32)

    # to_out: Linear -> LayerNorm -> GELU -> Linear ; + residual x
    h1 = jnp.dot(z, w_o1_ref[...], preferred_element_type=f32) + b_o1_ref[...]
    h1 = _gelu(_layernorm(h1, lno_g_ref[...], lno_b_ref[...]))
    x1 = jnp.dot(h1, w_o2_ref[...], preferred_element_type=f32) + b_o2_ref[...] + x

    # ---- mlp block: Residual(PreNorm(FeedForward)); FF has its own +x residual ----
    y2 = _layernorm(x1, ln2_g_ref[...], ln2_b_ref[...])
    h2 = _gelu(jnp.dot(y2, w_m1_ref[...], preferred_element_type=f32) + b_m1_ref[...])
    out = jnp.dot(h2, w_m2_ref[...], preferred_element_type=f32) + b_m2_ref[...] + y2 + x1

    o_ref[0] = out


# ---------------- pallas_call wrapper ---------------------------------------------
_PARAM_ORDER = ("ln1_g", "ln1_b", "w_qkv",
                "w_o1", "b_o1", "lno_g", "lno_b", "w_o2", "b_o2",
                "ln2_g", "ln2_b", "w_m1", "b_m1", "w_m2", "b_m2")


def _const_spec(shape):
    nd = len(shape)
    return pl.BlockSpec(shape, lambda b, _nd=nd: (0,) * _nd)


def block_forward(x, params):
    B = x.shape[0]
    x3 = x.reshape(B, TOK, DIM)

    # relative positional bias tiled into the block-diagonal additive mask (f32)
    bias9 = params["pos_emb"][_REL[..., 0], _REL[..., 1]].astype(jnp.float32)   # (9, 9)
    biasmask = jnp.where(jnp.asarray(_BLK),
                         jnp.tile(bias9, (NWIN, NWIN)),
                         jnp.float32(NEG))                                       # (144, 144)

    weights = [params[k] for k in _PARAM_ORDER]
    # exact-0/1 tables as bf16 (halves constant DMA; cast back in-kernel)
    bf = jnp.bfloat16
    consts = [jnp.asarray(_GATHER, dtype=bf), biasmask,
              jnp.asarray(_EVH, dtype=bf), jnp.asarray(_DMASK32, dtype=bf),
              jnp.asarray(_RSUM, dtype=bf), jnp.asarray(_SFOLD_CAT, dtype=bf),
              jnp.asarray(_AFOLD_CAT, dtype=bf)]

    tok_spec = pl.BlockSpec((1, TOK, DIM), lambda b: (b, 0, 0))
    in_specs = [tok_spec] + [_const_spec(tuple(a.shape)) for a in weights + consts]

    out = pl.pallas_call(
        block_kernel,
        grid=(B,),
        in_specs=in_specs,
        out_specs=tok_spec,
        out_shape=jax.ShapeDtypeStruct((B, TOK, DIM), jnp.float32),
        scratch_shapes=[pltpu.VMEM((WS * WS * NWIN, INNER), jnp.float32)],
        compiler_params=pltpu.CompilerParams(dimension_semantics=("parallel",)),
    )(x3, *weights, *consts)
    return out.reshape(B, GRID_HW, GRID_HW, DIM)


# ---------------- plain-JAX reference (mirrors the PyTorch module) -----------------
def _ln_ref(x, g, b):
    mu = jnp.mean(x, -1, keepdims=True)
    var = jnp.mean((x - mu) ** 2, -1, keepdims=True)
    return (x - mu) * jax.lax.rsqrt(var + LN_EPS) * g + b


def block_forward_ref(x, params):
    B = x.shape[0]
    xf = x.reshape(B, TOK, DIM)
    y = _ln_ref(xf, params["ln1_g"], params["ln1_b"])
    qkv = y @ params["w_qkv"]
    qkv_img = qkv.reshape(B, GRID_HW, GRID_HW, 3 * INNER)
    windows = qkv_img[:, _ROW_IDX, _COL_IDX, :]                       # (B, 16, 9, 96)
    q, k, v = jnp.split(windows, 3, axis=-1)

    def heads(t):
        return t.reshape(B, NWIN, WS * WS, HEADS, HEAD_DIM).transpose(0, 3, 1, 2, 4)

    q, k, v = heads(q), heads(k), heads(v)
    bias9 = params["pos_emb"][_REL[..., 0], _REL[..., 1]]
    s = jnp.einsum("bhnid,bhnjd->bhnij", q, k) * SCALE + bias9
    p = jax.nn.softmax(s, axis=-1)
    o = jnp.einsum("bhnij,bhnjd->bhnid", p, v)
    data = jnp.transpose(o, (0, 3, 1, 4, 2)).reshape(B, WS * WS * INNER, NWIN)

    # nn.Fold(output_size=(9,9), kernel=(3,3), stride=2)
    data_fold = data.reshape(B, INNER, WS, WS, NWIN)
    folded = jnp.zeros((B, INNER, GRID_HW, GRID_HW), jnp.float32)
    for i in range(WS):
        for j in range(WS):
            patch = data_fold[:, :, i, j, :].reshape(B, INNER, NWIN_SIDE, NWIN_SIDE)
            folded = folded.at[:, :, i:i + 2 * NWIN_SIDE - 1:2,
                               j:j + 2 * NWIN_SIDE - 1:2].add(patch)
    z = jnp.transpose(folded, (0, 2, 3, 1)).reshape(B, TOK, INNER)

    h1 = z @ params["w_o1"] + params["b_o1"]
    h1 = jax.nn.gelu(_ln_ref(h1, params["lno_g"], params["lno_b"]), approximate=False)
    x1 = h1 @ params["w_o2"] + params["b_o2"] + xf

    y2 = _ln_ref(x1, params["ln2_g"], params["ln2_b"])
    h2 = jax.nn.gelu(y2 @ params["w_m1"] + params["b_m1"], approximate=False)
    out = h2 @ params["w_m2"] + params["b_m2"] + y2 + x1
    return out.reshape(B, GRID_HW, GRID_HW, DIM)


# ---------------- deterministic parameter construction -----------------------------
def make_params(key):
    ks = jax.random.split(key, 10)
    n = lambda k, s, sc=0.05: (sc * jax.random.normal(k, s)).astype(jnp.float32)
    return {
        "ln1_g": jnp.ones((1, DIM), jnp.float32),
        "ln1_b": jnp.zeros((1, DIM), jnp.float32),
        "w_qkv": n(ks[0], (DIM, 3 * INNER)),
        "pos_emb": jax.random.normal(ks[1], (2 * WS - 1, 2 * WS - 1)).astype(jnp.float32),
        "w_o1": n(ks[2], (INNER, HALF)), "b_o1": n(ks[3], (1, HALF)),
        "lno_g": jnp.ones((1, HALF), jnp.float32), "lno_b": jnp.zeros((1, HALF), jnp.float32),
        "w_o2": n(ks[4], (HALF, DIM)), "b_o2": n(ks[5], (1, DIM)),
        "ln2_g": jnp.ones((1, DIM), jnp.float32),
        "ln2_b": jnp.zeros((1, DIM), jnp.float32),
        "w_m1": n(ks[6], (DIM, MLP_DIM)), "b_m1": n(ks[7], (1, MLP_DIM)),
        "w_m2": n(ks[8], (MLP_DIM, DIM)), "b_m2": n(ks[9], (1, DIM)),
    }


if __name__ == "__main__":
    key = jax.random.PRNGKey(0)
    k_x, k_p = jax.random.split(key)
    B = 2
    x = jax.random.normal(k_x, (B, GRID_HW, GRID_HW, DIM), jnp.float32)
    params = make_params(k_p)

    fwd = jax.jit(lambda xx: block_forward(xx, params))
    out = jax.block_until_ready(fwd(x))
    assert out.shape == (B, GRID_HW, GRID_HW, DIM)
    assert bool(jnp.all(jnp.isfinite(out)))

    # numerical self-check against a plain-JAX mirror of the PyTorch module
    ref = jax.block_until_ready(jax.jit(lambda xx: block_forward_ref(xx, params))(x))
    err = float(jnp.max(jnp.abs(out - ref)))
    assert err < 2e-3, f"mismatch vs reference: {err}"
    print("KERNEL_OK")
</pallas_src>

<mosaic_0001>
module attributes {stable_mosaic.version = 11 : i64} {
  func.func @block_kernel(%arg0: i32, %arg1: memref<1x81x32xf32, #tpu.memory_space<vmem>>, %arg2: memref<1x32xf32, #tpu.memory_space<vmem>>, %arg3: memref<1x32xf32, #tpu.memory_space<vmem>>, %arg4: memref<32x96xf32, #tpu.memory_space<vmem>>, %arg5: memref<32x16xf32, #tpu.memory_space<vmem>>, %arg6: memref<1x16xf32, #tpu.memory_space<vmem>>, %arg7: memref<1x16xf32, #tpu.memory_space<vmem>>, %arg8: memref<1x16xf32, #tpu.memory_space<vmem>>, %arg9: memref<16x32xf32, #tpu.memory_space<vmem>>, %arg10: memref<1x32xf32, #tpu.memory_space<vmem>>, %arg11: memref<1x32xf32, #tpu.memory_space<vmem>>, %arg12: memref<1x32xf32, #tpu.memory_space<vmem>>, %arg13: memref<32x64xf32, #tpu.memory_space<vmem>>, %arg14: memref<1x64xf32, #tpu.memory_space<vmem>>, %arg15: memref<64x32xf32, #tpu.memory_space<vmem>>, %arg16: memref<1x32xf32, #tpu.memory_space<vmem>>, %arg17: memref<144x81xbf16, #tpu.memory_space<vmem>>, %arg18: memref<144x144xf32, #tpu.memory_space<vmem>>, %arg19: memref<2x16x288xbf16, #tpu.memory_space<vmem>>, %arg20: memref<144x288xbf16, #tpu.memory_space<vmem>>, %arg21: memref<16x144xbf16, #tpu.memory_space<vmem>>, %arg22: memref<288x288xbf16, #tpu.memory_space<vmem>>, %arg23: memref<81x144xbf16, #tpu.memory_space<vmem>>, %arg24: memref<1x81x32xf32, #tpu.memory_space<vmem>>, %arg25: memref<144x32xf32, #tpu.memory_space<vmem>>) attributes {dimension_semantics = [#tpu.dimension_semantics<parallel>], iteration_bounds = array<i64: 2>, scalar_prefetch = 0 : i64, scratch_operands = 1 : i64, tpu.core_type = #tpu.core_type<tc>, window_params = [{transform_indices = @transform_0, window_bounds = array<i64: 1, 81, 32>}, {pipeline_mode = #tpu.pipeline_mode<synchronous>, transform_indices = @transform_1, window_bounds = array<i64: 1, 32>}, {pipeline_mode = #tpu.pipeline_mode<synchronous>, transform_indices = @transform_2, window_bounds = array<i64: 1, 32>}, {pipeline_mode = #tpu.pipeline_mode<synchronous>, transform_indices = @transform_3, window_bounds = array<i64: 32, 96>}, {pipeline_mode = #tpu.pipeline_mode<synchronous>, transform_indices = @transform_4, window_bounds = array<i64: 32, 16>}, {pipeline_mode = #tpu.pipeline_mode<synchronous>, transform_indices = @transform_5, window_bounds = array<i64: 1, 16>}, {pipeline_mode = #tpu.pipeline_mode<synchronous>, transform_indices = @transform_6, window_bounds = array<i64: 1, 16>}, {pipeline_mode = #tpu.pipeline_mode<synchronous>, transform_indices = @transform_7, window_bounds = array<i64: 1, 16>}, {pipeline_mode = #tpu.pipeline_mode<synchronous>, transform_indices = @transform_8, window_bounds = array<i64: 16, 32>}, {pipeline_mode = #tpu.pipeline_mode<synchronous>, transform_indices = @transform_9, window_bounds = array<i64: 1, 32>}, {pipeline_mode = #tpu.pipeline_mode<synchronous>, transform_indices = @transform_10, window_bounds = array<i64: 1, 32>}, {pipeline_mode = #tpu.pipeline_mode<synchronous>, transform_indices = @transform_11, window_bounds = array<i64: 1, 32>}, {pipeline_mode = #tpu.pipeline_mode<synchronous>, transform_indices = @transform_12, window_bounds = array<i64: 32, 64>}, {pipeline_mode = #tpu.pipeline_mode<synchronous>, transform_indices = @transform_13, window_bounds = array<i64: 1, 64>}, {pipeline_mode = #tpu.pipeline_mode<synchronous>, transform_indices = @transform_14, window_bounds = array<i64: 64, 32>}, {pipeline_mode = #tpu.pipeline_mode<synchronous>, transform_indices = @transform_15, window_bounds = array<i64: 1, 32>}, {pipeline_mode = #tpu.pipeline_mode<synchronous>, transform_indices = @transform_16, window_bounds = array<i64: 144, 81>}, {pipeline_mode = #tpu.pipeline_mode<synchronous>, transform_indices = @transform_17, window_bounds = array<i64: 144, 144>}, {pipeline_mode = #tpu.pipeline_mode<synchronous>, transform_indices = @transform_18, window_bounds = array<i64: 2, 16, 288>}, {pipeline_mode = #tpu.pipeline_mode<synchronous>, transform_indices = @transform_19, window_bounds = array<i64: 144, 288>}, {pipeline_mode = #tpu.pipeline_mode<synchronous>, transform_indices = @transform_20, window_bounds = array<i64: 16, 144>}, {pipeline_mode = #tpu.pipeline_mode<synchronous>, transform_indices = @transform_21, window_bounds = array<i64: 288, 288>}, {pipeline_mode = #tpu.pipeline_mode<synchronous>, transform_indices = @transform_22, window_bounds = array<i64: 81, 144>}, {transform_indices = @transform_23, window_bounds = array<i64: 1, 81, 32>}]} {
    %c0 = arith.constant 0 : index
    %c0_0 = arith.constant 0 : index
    %c0_1 = arith.constant 0 : index
    %0 = vector.load %arg1[%c0, %c0_0, %c0_1] : memref<1x81x32xf32, #tpu.memory_space<vmem>>, vector<1x81x32xf32>
    %1 = vector.shape_cast %0 : vector<1x81x32xf32> to vector<81x32xf32>
    %c0_2 = arith.constant 0 : index
    %c0_3 = arith.constant 0 : index
    %2 = vector.load %arg17[%c0_2, %c0_3] : memref<144x81xbf16, #tpu.memory_space<vmem>>, vector<144x81xbf16>
    %3 = arith.extf %2 : vector<144x81xbf16> to vector<144x81xf32>
    %c0_4 = arith.constant 0 : index
    %c0_5 = arith.constant 0 : index
    %c0_6 = arith.constant 0 : index
    %4 = vector.load %arg19[%c0_4, %c0_5, %c0_6] : memref<2x16x288xbf16, #tpu.memory_space<vmem>>, vector<2x16x288xbf16>
    %5 = arith.extf %4 : vector<2x16x288xbf16> to vector<2x16x288xf32>
    %c0_7 = arith.constant 0 : index
    %c0_8 = arith.constant 0 : index
    %6 = vector.load %arg20[%c0_7, %c0_8] : memref<144x288xbf16, #tpu.memory_space<vmem>>, vector<144x288xbf16>
    %7 = arith.extf %6 : vector<144x288xbf16> to vector<144x288xf32>
    %c0_9 = arith.constant 0 : index
    %c0_10 = arith.constant 0 : index
    %8 = vector.load %arg21[%c0_9, %c0_10] : memref<16x144xbf16, #tpu.memory_space<vmem>>, vector<16x144xbf16>
    %9 = arith.extf %8 : vector<16x144xbf16> to vector<16x144xf32>
    %c0_11 = arith.constant 0 : index
    %c0_12 = arith.constant 0 : index
    %10 = vector.load %arg22[%c0_11, %c0_12] : memref<288x288xbf16, #tpu.memory_space<vmem>>, vector<288x288xbf16>
    %11 = arith.extf %10 : vector<288x288xbf16> to vector<288x288xf32>
    %c0_13 = arith.constant 0 : index
    %c0_14 = arith.constant 0 : index
    %12 = vector.load %arg23[%c0_13, %c0_14] : memref<81x144xbf16, #tpu.memory_space<vmem>>, vector<81x144xbf16>
    %13 = arith.extf %12 : vector<81x144xbf16> to vector<81x144xf32>
    %c0_15 = arith.constant 0 : index
    %c0_16 = arith.constant 0 : index
    %14 = vector.load %arg18[%c0_15, %c0_16] : memref<144x144xf32, #tpu.memory_space<vmem>>, vector<144x144xf32>
    %c0_17 = arith.constant 0 : index
    %c0_18 = arith.constant 0 : index
    %15 = vector.load %arg2[%c0_17, %c0_18] : memref<1x32xf32, #tpu.memory_space<vmem>>, vector<1x32xf32>
    %c0_19 = arith.constant 0 : index
    %c0_20 = arith.constant 0 : index
    %16 = vector.load %arg3[%c0_19, %c0_20] : memref<1x32xf32, #tpu.memory_space<vmem>>, vector<1x32xf32>
    %cst = arith.constant dense<0.000000e+00> : vector<81xf32>
    %17 = vector.multi_reduction <add>, %1, %cst [1] : vector<81x32xf32> to vector<81xf32>
    %18 = vector.shape_cast %17 : vector<81xf32> to vector<81x1xf32>
    %cst_21 = arith.constant 3.200000e+01 : f32
    %19 = vector.broadcast %cst_21 : f32 to vector<81x1xf32>
    %20 = arith.divf %18, %19 : vector<81x1xf32>
    %21 = vector.broadcast %20 : vector<81x1xf32> to vector<81x32xf32>
    %22 = arith.subf %1, %21 : vector<81x32xf32>
    %23 = arith.mulf %22, %22 : vector<81x32xf32>
    %cst_22 = arith.constant dense<0.000000e+00> : vector<81xf32>
    %24 = vector.multi_reduction <add>, %23, %cst_22 [1] : vector<81x32xf32> to vector<81xf32>
    %25 = vector.shape_cast %24 : vector<81xf32> to vector<81x1xf32>
    %cst_23 = arith.constant 3.200000e+01 : f32
    %26 = vector.broadcast %cst_23 : f32 to vector<81x1xf32>
    %27 = arith.divf %25, %26 : vector<81x1xf32>
    %28 = vector.broadcast %20 : vector<81x1xf32> to vector<81x32xf32>
    %29 = arith.subf %1, %28 : vector<81x32xf32>
    %cst_24 = arith.constant 9.99999974E-6 : f32
    %30 = vector.broadcast %cst_24 : f32 to vector<81x1xf32>
    %31 = arith.addf %27, %30 : vector<81x1xf32>
    %32 = math.rsqrt %31 : vector<81x1xf32>
    %33 = vector.broadcast %32 : vector<81x1xf32> to vector<81x32xf32>
    %34 = arith.mulf %29, %33 : vector<81x32xf32>
    %35 = vector.broadcast %15 : vector<1x32xf32> to vector<81x32xf32>
    %36 = arith.mulf %34, %35 : vector<81x32xf32>
    %37 = vector.broadcast %16 : vector<1x32xf32> to vector<81x32xf32>
    %38 = arith.addf %36, %37 : vector<81x32xf32>
    %cst_25 = arith.constant dense<0.000000e+00> : vector<144x32xf32>
    %39 = tpu.matmul %3, %38, %cst_25 {dimension_numbers = #tpu.dot_dimension_numbers<[1], [0], [0], [1], [0, 0, 1, 1], [], []>} : vector<144x81xf32>, vector<81x32xf32>, vector<144x32xf32> -> vector<144x32xf32>
    %c0_26 = arith.constant 0 : index
    %c0_27 = arith.constant 0 : index
    %40 = vector.load %arg4[%c0_26, %c0_27] : memref<32x96xf32, #tpu.memory_space<vmem>>, vector<32x96xf32>
    %cst_28 = arith.constant dense<0.000000e+00> : vector<144x96xf32>
    %41 = tpu.matmul %39, %40, %cst_28 {dimension_numbers = #tpu.dot_dimension_numbers<[1], [0], [0], [1], [0, 0, 1, 1], [], []>} : vector<144x32xf32>, vector<32x96xf32>, vector<144x96xf32> -> vector<144x96xf32>
    %42 = vector.extract_strided_slice %41 {offsets = [0, 0], sizes = [144, 16], strides = [1, 1]} : vector<144x96xf32> to vector<144x16xf32>
    %cst_29 = arith.constant 2.500000e-01 : f32
    %43 = vector.broadcast %cst_29 : f32 to vector<144x16xf32>
    %44 = arith.mulf %42, %43 : vector<144x16xf32>
    %45 = vector.extract_strided_slice %41 {offsets = [0, 32], sizes = [144, 16], strides = [1, 1]} : vector<144x96xf32> to vector<144x16xf32>
    %46 = vector.extract_strided_slice %41 {offsets = [0, 64], sizes = [144, 16], strides = [1, 1]} : vector<144x96xf32> to vector<144x16xf32>
    %cst_30 = arith.constant dense<0.000000e+00> : vector<144x144xf32>
    %47 = tpu.matmul %44, %45, %cst_30 {dimension_numbers = #tpu.dot_dimension_numbers<[1], [1], [0], [0], [0, 0, 1, 0], [], []>} : vector<144x16xf32>, vector<144x16xf32>, vector<144x144xf32> -> vector<144x144xf32>
    %48 = arith.addf %47, %14 : vector<144x144xf32>
    %cst_31 = arith.constant dense<0xFF800000> : vector<144xf32>
    %49 = vector.multi_reduction <maximumf>, %48, %cst_31 [1] : vector<144x144xf32> to vector<144xf32>
    %50 = vector.shape_cast %49 : vector<144xf32> to vector<144x1xf32>
    %51 = vector.broadcast %50 : vector<144x1xf32> to vector<144x144xf32>
    %52 = arith.subf %48, %51 : vector<144x144xf32>
    %53 = math.exp %52 : vector<144x144xf32>
    %cst_32 = arith.constant dense<0.000000e+00> : vector<144xf32>
    %54 = vector.multi_reduction <add>, %53, %cst_32 [1] : vector<144x144xf32> to vector<144xf32>
    %55 = vector.shape_cast %54 : vector<144xf32> to vector<144x1xf32>
    %56 = tpu.reciprocal %55 {approx = true} : vector<144x1xf32> -> vector<144x1xf32>
    %57 = arith.mulf %55, %56 : vector<144x1xf32>
    %cst_33 = arith.constant 2.000000e+00 : f32
    %58 = vector.broadcast %cst_33 : f32 to vector<144x1xf32>
    %59 = arith.subf %58, %57 : vector<144x1xf32>
    %60 = arith.mulf %56, %59 : vector<144x1xf32>
    %61 = vector.broadcast %60 : vector<144x1xf32> to vector<144x144xf32>
    %62 = arith.mulf %53, %61 : vector<144x144xf32>
    %cst_34 = arith.constant dense<0.000000e+00> : vector<144x16xf32>
    %63 = tpu.matmul %62, %46, %cst_34 {dimension_numbers = #tpu.dot_dimension_numbers<[1], [0], [0], [1], [0, 0, 1, 1], [], []>} : vector<144x144xf32>, vector<144x16xf32>, vector<144x16xf32> -> vector<144x16xf32>
    %64 = vector.extract_strided_slice %5 {offsets = [0, 0, 0], sizes = [1, 16, 288], strides = [1, 1, 1]} : vector<2x16x288xf32> to vector<1x16x288xf32>
    %65 = vector.shape_cast %64 : vector<1x16x288xf32> to vector<16x288xf32>
    %cst_35 = arith.constant dense<0.000000e+00> : vector<144x288xf32>
    %66 = tpu.matmul %63, %65, %cst_35 {dimension_numbers = #tpu.dot_dimension_numbers<[1], [0], [0], [1], [0, 0, 1, 1], [], []>} : vector<144x16xf32>, vector<16x288xf32>, vector<144x288xf32> -> vector<144x288xf32>
    %67 = vector.extract_strided_slice %41 {offsets = [0, 16], sizes = [144, 16], strides = [1, 1]} : vector<144x96xf32> to vector<144x16xf32>
    %cst_36 = arith.constant 2.500000e-01 : f32
    %68 = vector.broadcast %cst_36 : f32 to vector<144x16xf32>
    %69 = arith.mulf %67, %68 : vector<144x16xf32>
    %70 = vector.extract_strided_slice %41 {offsets = [0, 48], sizes = [144, 16], strides = [1, 1]} : vector<144x96xf32> to vector<144x16xf32>
    %71 = vector.extract_strided_slice %41 {offsets = [0, 80], sizes = [144, 16], strides = [1, 1]} : vector<144x96xf32> to vector<144x16xf32>
    %cst_37 = arith.constant dense<0.000000e+00> : vector<144x144xf32>
    %72 = tpu.matmul %69, %70, %cst_37 {dimension_numbers = #tpu.dot_dimension_numbers<[1], [1], [0], [0], [0, 0, 1, 0], [], []>} : vector<144x16xf32>, vector<144x16xf32>, vector<144x144xf32> -> vector<144x144xf32>
    %73 = arith.addf %72, %14 : vector<144x144xf32>
    %cst_38 = arith.constant dense<0xFF800000> : vector<144xf32>
    %74 = vector.multi_reduction <maximumf>, %73, %cst_38 [1] : vector<144x144xf32> to vector<144xf32>
    %75 = vector.shape_cast %74 : vector<144xf32> to vector<144x1xf32>
    %76 = vector.broadcast %75 : vector<144x1xf32> to vector<144x144xf32>
    %77 = arith.subf %73, %76 : vector<144x144xf32>
    %78 = math.exp %77 : vector<144x144xf32>
    %cst_39 = arith.constant dense<0.000000e+00> : vector<144xf32>
    %79 = vector.multi_reduction <add>, %78, %cst_39 [1] : vector<144x144xf32> to vector<144xf32>
    %80 = vector.shape_cast %79 : vector<144xf32> to vector<144x1xf32>
    %81 = tpu.reciprocal %80 {approx = true} : vector<144x1xf32> -> vector<144x1xf32>
    %82 = arith.mulf %80, %81 : vector<144x1xf32>
    %cst_40 = arith.constant 2.000000e+00 : f32
    %83 = vector.broadcast %cst_40 : f32 to vector<144x1xf32>
    %84 = arith.subf %83, %82 : vector<144x1xf32>
    %85 = arith.mulf %81, %84 : vector<144x1xf32>
    %86 = vector.broadcast %85 : vector<144x1xf32> to vector<144x144xf32>
    %87 = arith.mulf %78, %86 : vector<144x144xf32>
    %cst_41 = arith.constant dense<0.000000e+00> : vector<144x16xf32>
    %88 = tpu.matmul %87, %71, %cst_41 {dimension_numbers = #tpu.dot_dimension_numbers<[1], [0], [0], [1], [0, 0, 1, 1], [], []>} : vector<144x144xf32>, vector<144x16xf32>, vector<144x16xf32> -> vector<144x16xf32>
    %89 = vector.extract_strided_slice %5 {offsets = [1, 0, 0], sizes = [1, 16, 288], strides = [1, 1, 1]} : vector<2x16x288xf32> to vector<1x16x288xf32>
    %90 = vector.shape_cast %89 : vector<1x16x288xf32> to vector<16x288xf32>
    %cst_42 = arith.constant dense<0.000000e+00> : vector<144x288xf32>
    %91 = tpu.matmul %88, %90, %cst_42 {dimension_numbers = #tpu.dot_dimension_numbers<[1], [0], [0], [1], [0, 0, 1, 1], [], []>} : vector<144x16xf32>, vector<16x288xf32>, vector<144x288xf32> -> vector<144x288xf32>
    %92 = arith.addf %66, %91 : vector<144x288xf32>
    %93 = arith.mulf %92, %7 : vector<144x288xf32>
    %cst_43 = arith.constant dense<0.000000e+00> : vector<16x288xf32>
    %94 = tpu.matmul %9, %93, %cst_43 {dimension_numbers = #tpu.dot_dimension_numbers<[1], [0], [0], [1], [0, 0, 1, 1], [], []>} : vector<16x144xf32>, vector<144x288xf32>, vector<16x288xf32> -> vector<16x288xf32>
    %cst_44 = arith.constant dense<0.000000e+00> : vector<16x288xf32>
    %95 = tpu.matmul %94, %11, %cst_44 {dimension_numbers = #tpu.dot_dimension_numbers<[1], [0], [0], [1], [0, 0, 1, 1], [], []>} : vector<16x288xf32>, vector<288x288xf32>, vector<16x288xf32> -> vector<16x288xf32>
    %96 = vector.extract_strided_slice %95 {offsets = [0, 0], sizes = [16, 32], strides = [1, 1]} : vector<16x288xf32> to vector<16x32xf32>
    %c0_45 = arith.constant 0 : index
    %c0_46 = arith.constant 0 : index
    %97 = vector.load %arg25[%c0_45, %c0_46] : memref<144x32xf32, #tpu.memory_space<vmem>>, vector<16x32xf32>
    tpu.vector_store %arg25[%c0_45, %c0_46], %96 {strides = array<i32>} : memref<144x32xf32, #tpu.memory_space<vmem>>, vector<16x32xf32>,
    %98 = vector.extract_strided_slice %95 {offsets = [0, 32], sizes = [16, 32], strides = [1, 1]} : vector<16x288xf32> to vector<16x32xf32>
    %c16 = arith.constant 16 : index
    %c0_47 = arith.constant 0 : index
    %99 = vector.load %arg25[%c16, %c0_47] : memref<144x32xf32, #tpu.memory_space<vmem>>, vector<16x32xf32>
    tpu.vector_store %arg25[%c16, %c0_47], %98 {strides = array<i32>} : memref<144x32xf32, #tpu.memory_space<vmem>>, vector<16x32xf32>,
    %100 = vector.extract_strided_slice %95 {offsets = [0, 64], sizes = [16, 32], strides = [1, 1]} : vector<16x288xf32> to vector<16x32xf32>
    %c32 = arith.constant 32 : index
    %c0_48 = arith.constant 0 : index
    %101 = vector.load %arg25[%c32, %c0_48] : memref<144x32xf32, #tpu.memory_space<vmem>>, vector<16x32xf32>
    tpu.vector_store %arg25[%c32, %c0_48], %100 {strides = array<i32>} : memref<144x32xf32, #tpu.memory_space<vmem>>, vector<16x32xf32>,
    %102 = vector.extract_strided_slice %95 {offsets = [0, 96], sizes = [16, 32], strides = [1, 1]} : vector<16x288xf32> to vector<16x32xf32>
    %c48 = arith.constant 48 : index
    %c0_49 = arith.constant 0 : index
    %103 = vector.load %arg25[%c48, %c0_49] : memref<144x32xf32, #tpu.memory_space<vmem>>, vector<16x32xf32>
    tpu.vector_store %arg25[%c48, %c0_49], %102 {strides = array<i32>} : memref<144x32xf32, #tpu.memory_space<vmem>>, vector<16x32xf32>,
    %104 = vector.extract_strided_slice %95 {offsets = [0, 128], sizes = [16, 32], strides = [1, 1]} : vector<16x288xf32> to vector<16x32xf32>
    %c64 = arith.constant 64 : index
    %c0_50 = arith.constant 0 : index
    %105 = vector.load %arg25[%c64, %c0_50] : memref<144x32xf32, #tpu.memory_space<vmem>>, vector<16x32xf32>
    tpu.vector_store %arg25[%c64, %c0_50], %104 {strides = array<i32>} : memref<144x32xf32, #tpu.memory_space<vmem>>, vector<16x32xf32>,
    %106 = vector.extract_strided_slice %95 {offsets = [0, 160], sizes = [16, 32], strides = [1, 1]} : vector<16x288xf32> to vector<16x32xf32>
    %c80 = arith.constant 80 : index
    %c0_51 = arith.constant 0 : index
    %107 = vector.load %arg25[%c80, %c0_51] : memref<144x32xf32, #tpu.memory_space<vmem>>, vector<16x32xf32>
    tpu.vector_store %arg25[%c80, %c0_51], %106 {strides = array<i32>} : memref<144x32xf32, #tpu.memory_space<vmem>>, vector<16x32xf32>,
    %108 = vector.extract_strided_slice %95 {offsets = [0, 192], sizes = [16, 32], strides = [1, 1]} : vector<16x288xf32> to vector<16x32xf32>
    %c96 = arith.constant 96 : index
    %c0_52 = arith.constant 0 : index
    %109 = vector.load %arg25[%c96, %c0_52] : memref<144x32xf32, #tpu.memory_space<vmem>>, vector<16x32xf32>
    tpu.vector_store %arg25[%c96, %c0_52], %108 {strides = array<i32>} : memref<144x32xf32, #tpu.memory_space<vmem>>, vector<16x32xf32>,
    %110 = vector.extract_strided_slice %95 {offsets = [0, 224], sizes = [16, 32], strides = [1, 1]} : vector<16x288xf32> to vector<16x32xf32>
    %c112 = arith.constant 112 : index
    %c0_53 = arith.constant 0 : index
    %111 = vector.load %arg25[%c112, %c0_53] : memref<144x32xf32, #tpu.memory_space<vmem>>, vector<16x32xf32>
    tpu.vector_store %arg25[%c112, %c0_53], %110 {strides = array<i32>} : memref<144x32xf32, #tpu.memory_space<vmem>>, vector<16x32xf32>,
    %112 = vector.extract_strided_slice %95 {offsets = [0, 256], sizes = [16, 32], strides = [1, 1]} : vector<16x288xf32> to vector<16x32xf32>
    %c128 = arith.constant 128 : index
    %c0_54 = arith.constant 0 : index
    %113 = vector.load %arg25[%c128, %c0_54] : memref<144x32xf32, #tpu.memory_space<vmem>>, vector<16x32xf32>
    tpu.vector_store %arg25[%c128, %c0_54], %112 {strides = array<i32>} : memref<144x32xf32, #tpu.memory_space<vmem>>, vector<16x32xf32>,
    %c0_55 = arith.constant 0 : index
    %c0_56 = arith.constant 0 : index
    %114 = vector.load %arg25[%c0_55, %c0_56] : memref<144x32xf32, #tpu.memory_space<vmem>>, vector<144x32xf32>
    %cst_57 = arith.constant dense<0.000000e+00> : vector<81x32xf32>
    %115 = tpu.matmul %13, %114, %cst_57 {dimension_numbers = #tpu.dot_dimension_numbers<[1], [0], [0], [1], [0, 0, 1, 1], [], []>} : vector<81x144xf32>, vector<144x32xf32>, vector<81x32xf32> -> vector<81x32xf32>
    %c0_58 = arith.constant 0 : index
    %c0_59 = arith.constant 0 : index
    %116 = vector.load %arg5[%c0_58, %c0_59] : memref<32x16xf32, #tpu.memory_space<vmem>>, vector<32x16xf32>
    %cst_60 = arith.constant dense<0.000000e+00> : vector<81x16xf32>
    %117 = tpu.matmul %115, %116, %cst_60 {dimension_numbers = #tpu.dot_dimension_numbers<[1], [0], [0], [1], [0, 0, 1, 1], [], []>} : vector<81x32xf32>, vector<32x16xf32>, vector<81x16xf32> -> vector<81x16xf32>
    %c0_61 = arith.constant 0 : index
    %c0_62 = arith.constant 0 : index
    %118 = vector.load %arg6[%c0_61, %c0_62] : memref<1x16xf32, #tpu.memory_space<vmem>>, vector<1x16xf32>
    %119 = vector.broadcast %118 : vector<1x16xf32> to vector<81x16xf32>
    %120 = arith.addf %117, %119 : vector<81x16xf32>
    %c0_63 = arith.constant 0 : index
    %c0_64 = arith.constant 0 : index
    %121 = vector.load %arg7[%c0_63, %c0_64] : memref<1x16xf32, #tpu.memory_space<vmem>>, vector<1x16xf32>
    %c0_65 = arith.constant 0 : index
    %c0_66 = arith.constant 0 : index
    %122 = vector.load %arg8[%c0_65, %c0_66] : memref<1x16xf32, #tpu.memory_space<vmem>>, vector<1x16xf32>
    %cst_67 = arith.constant dense<0.000000e+00> : vector<81xf32>
    %123 = vector.multi_reduction <add>, %120, %cst_67 [1] : vector<81x16xf32> to vector<81xf32>
    %124 = vector.shape_cast %123 : vector<81xf32> to vector<81x1xf32>
    %cst_68 = arith.constant 1.600000e+01 : f32
    %125 = vector.broadcast %cst_68 : f32 to vector<81x1xf32>
    %126 = arith.divf %124, %125 : vector<81x1xf32>
    %127 = vector.broadcast %126 : vector<81x1xf32> to vector<81x16xf32>
    %128 = arith.subf %120, %127 : vector<81x16xf32>
    %129 = arith.mulf %128, %128 : vector<81x16xf32>
    %cst_69 = arith.constant dense<0.000000e+00> : vector<81xf32>
    %130 = vector.multi_reduction <add>, %129, %cst_69 [1] : vector<81x16xf32> to vector<81xf32>
    %131 = vector.shape_cast %130 : vector<81xf32> to vector<81x1xf32>
    %cst_70 = arith.constant 1.600000e+01 : f32
    %132 = vector.broadcast %cst_70 : f32 to vector<81x1xf32>
    %133 = arith.divf %131, %132 : vector<81x1xf32>
    %134 = vector.broadcast %126 : vector<81x1xf32> to vector<81x16xf32>
    %135 = arith.subf %120, %134 : vector<81x16xf32>
    %cst_71 = arith.constant 9.99999974E-6 : f32
    %136 = vector.broadcast %cst_71 : f32 to vector<81x1xf32>
    %137 = arith.addf %133, %136 : vector<81x1xf32>
    %138 = math.rsqrt %137 : vector<81x1xf32>
    %139 = vector.broadcast %138 : vector<81x1xf32> to vector<81x16xf32>
    %140 = arith.mulf %135, %139 : vector<81x16xf32>
    %141 = vector.broadcast %121 : vector<1x16xf32> to vector<81x16xf32>
    %142 = arith.mulf %140, %141 : vector<81x16xf32>
    %143 = vector.broadcast %122 : vector<1x16xf32> to vector<81x16xf32>
    %144 = arith.addf %142, %143 : vector<81x16xf32>
    %145 = math.absf %144 : vector<81x16xf32>
    %cst_72 = arith.constant 0.707106769 : f32
    %146 = vector.broadcast %cst_72 : f32 to vector<81x16xf32>
    %147 = arith.mulf %145, %146 : vector<81x16xf32>
    %cst_73 = arith.constant 0.327591091 : f32
    %148 = vector.broadcast %cst_73 : f32 to vector<81x16xf32>
    %149 = arith.mulf %148, %147 : vector<81x16xf32>
    %cst_74 = arith.constant 1.000000e+00 : f32
    %150 = vector.broadcast %cst_74 : f32 to vector<81x16xf32>
    %151 = arith.addf %150, %149 : vector<81x16xf32>
    %152 = tpu.reciprocal %151 {approx = true} : vector<81x16xf32> -> vector<81x16xf32>
    %153 = arith.mulf %151, %152 : vector<81x16xf32>
    %cst_75 = arith.constant 2.000000e+00 : f32
    %154 = vector.broadcast %cst_75 : f32 to vector<81x16xf32>
    %155 = arith.subf %154, %153 : vector<81x16xf32>
    %156 = arith.mulf %152, %155 : vector<81x16xf32>
    %cst_76 = arith.constant 1.06140542 : f32
    %157 = vector.broadcast %cst_76 : f32 to vector<81x16xf32>
    %158 = arith.mulf %157, %156 : vector<81x16xf32>
    %cst_77 = arith.constant -1.45315206 : f32
    %159 = vector.broadcast %cst_77 : f32 to vector<81x16xf32>
    %160 = arith.addf %158, %159 : vector<81x16xf32>
    %161 = arith.mulf %160, %156 : vector<81x16xf32>
    %cst_78 = arith.constant 1.42141378 : f32
    %162 = vector.broadcast %cst_78 : f32 to vector<81x16xf32>
    %163 = arith.addf %161, %162 : vector<81x16xf32>
    %164 = arith.mulf %163, %156 : vector<81x16xf32>
    %cst_79 = arith.constant -0.284496725 : f32
    %165 = vector.broadcast %cst_79 : f32 to vector<81x16xf32>
    %166 = arith.addf %164, %165 : vector<81x16xf32>
    %167 = arith.mulf %166, %156 : vector<81x16xf32>
    %cst_80 = arith.constant 0.254829586 : f32
    %168 = vector.broadcast %cst_80 : f32 to vector<81x16xf32>
    %169 = arith.addf %167, %168 : vector<81x16xf32>
    %170 = arith.mulf %169, %156 : vector<81x16xf32>
    %cst_81 = arith.constant 0.000000e+00 : f32
    %171 = vector.broadcast %cst_81 : f32 to vector<81x16xf32>
    %172 = arith.subf %171, %147 : vector<81x16xf32>
    %173 = arith.mulf %172, %147 : vector<81x16xf32>
    %174 = math.exp %173 : vector<81x16xf32>
    %175 = arith.mulf %170, %174 : vector<81x16xf32>
    %cst_82 = arith.constant 1.000000e+00 : f32
    %176 = vector.broadcast %cst_82 : f32 to vector<81x16xf32>
    %177 = arith.subf %176, %175 : vector<81x16xf32>
    %178 = arith.mulf %145, %177 : vector<81x16xf32>
    %179 = arith.addf %144, %178 : vector<81x16xf32>
    %cst_83 = arith.constant 5.000000e-01 : f32
    %180 = vector.broadcast %cst_83 : f32 to vector<81x16xf32>
    %181 = arith.mulf %180, %179 : vector<81x16xf32>
    %c0_84 = arith.constant 0 : index
    %c0_85 = arith.constant 0 : index
    %182 = vector.load %arg9[%c0_84, %c0_85] : memref<16x32xf32, #tpu.memory_space<vmem>>, vector<16x32xf32>
    %cst_86 = arith.constant dense<0.000000e+00> : vector<81x32xf32>
    %183 = tpu.matmul %181, %182, %cst_86 {dimension_numbers = #tpu.dot_dimension_numbers<[1], [0], [0], [1], [0, 0, 1, 1], [], []>} : vector<81x16xf32>, vector<16x32xf32>, vector<81x32xf32> -> vector<81x32xf32>
    %c0_87 = arith.constant 0 : index
    %c0_88 = arith.constant 0 : index
    %184 = vector.load %arg10[%c0_87, %c0_88] : memref<1x32xf32, #tpu.memory_space<vmem>>, vector<1x32xf32>
    %185 = vector.broadcast %184 : vector<1x32xf32> to vector<81x32xf32>
    %186 = arith.addf %183, %185 : vector<81x32xf32>
    %187 = arith.addf %186, %1 : vector<81x32xf32>
    %c0_89 = arith.constant 0 : index
    %c0_90 = arith.constant 0 : index
    %188 = vector.load %arg11[%c0_89, %c0_90] : memref<1x32xf32, #tpu.memory_space<vmem>>, vector<1x32xf32>
    %c0_91 = arith.constant 0 : index
    %c0_92 = arith.constant 0 : index
    %189 = vector.load %arg12[%c0_91, %c0_92] : memref<1x32xf32, #tpu.memory_space<vmem>>, vector<1x32xf32>
    %cst_93 = arith.constant dense<0.000000e+00> : vector<81xf32>
    %190 = vector.multi_reduction <add>, %187, %cst_93 [1] : vector<81x32xf32> to vector<81xf32>
    %191 = vector.shape_cast %190 : vector<81xf32> to vector<81x1xf32>
    %cst_94 = arith.constant 3.200000e+01 : f32
    %192 = vector.broadcast %cst_94 : f32 to vector<81x1xf32>
    %193 = arith.divf %191, %192 : vector<81x1xf32>
    %194 = vector.broadcast %193 : vector<81x1xf32> to vector<81x32xf32>
    %195 = arith.subf %187, %194 : vector<81x32xf32>
    %196 = arith.mulf %195, %195 : vector<81x32xf32>
    %cst_95 = arith.constant dense<0.000000e+00> : vector<81xf32>
    %197 = vector.multi_reduction <add>, %196, %cst_95 [1] : vector<81x32xf32> to vector<81xf32>
    %198 = vector.shape_cast %197 : vector<81xf32> to vector<81x1xf32>
    %cst_96 = arith.constant 3.200000e+01 : f32
    %199 = vector.broadcast %cst_96 : f32 to vector<81x1xf32>
    %200 = arith.divf %198, %199 : vector<81x1xf32>
    %201 = vector.broadcast %193 : vector<81x1xf32> to vector<81x32xf32>
    %202 = arith.subf %187, %201 : vector<81x32xf32>
    %cst_97 = arith.constant 9.99999974E-6 : f32
    %203 = vector.broadcast %cst_97 : f32 to vector<81x1xf32>
    %204 = arith.addf %200, %203 : vector<81x1xf32>
    %205 = math.rsqrt %204 : vector<81x1xf32>
    %206 = vector.broadcast %205 : vector<81x1xf32> to vector<81x32xf32>
    %207 = arith.mulf %202, %206 : vector<81x32xf32>
    %208 = vector.broadcast %188 : vector<1x32xf32> to vector<81x32xf32>
    %209 = arith.mulf %207, %208 : vector<81x32xf32>
    %210 = vector.broadcast %189 : vector<1x32xf32> to vector<81x32xf32>
    %211 = arith.addf %209, %210 : vector<81x32xf32>
    %c0_98 = arith.constant 0 : index
    %c0_99 = arith.constant 0 : index
    %212 = vector.load %arg13[%c0_98, %c0_99] : memref<32x64xf32, #tpu.memory_space<vmem>>, vector<32x64xf32>
    %cst_100 = arith.constant dense<0.000000e+00> : vector<81x64xf32>
    %213 = tpu.matmul %211, %212, %cst_100 {dimension_numbers = #tpu.dot_dimension_numbers<[1], [0], [0], [1], [0, 0, 1, 1], [], []>} : vector<81x32xf32>, vector<32x64xf32>, vector<81x64xf32> -> vector<81x64xf32>
    %c0_101 = arith.constant 0 : index
    %c0_102 = arith.constant 0 : index
    %214 = vector.load %arg14[%c0_101, %c0_102] : memref<1x64xf32, #tpu.memory_space<vmem>>, vector<1x64xf32>
    %215 = vector.broadcast %214 : vector<1x64xf32> to vector<81x64xf32>
    %216 = arith.addf %213, %215 : vector<81x64xf32>
    %217 = math.absf %216 : vector<81x64xf32>
    %cst_103 = arith.constant 0.707106769 : f32
    %218 = vector.broadcast %cst_103 : f32 to vector<81x64xf32>
    %219 = arith.mulf %217, %218 : vector<81x64xf32>
    %cst_104 = arith.constant 0.327591091 : f32
    %220 = vector.broadcast %cst_104 : f32 to vector<81x64xf32>
    %221 = arith.mulf %220, %219 : vector<81x64xf32>
    %cst_105 = arith.constant 1.000000e+00 : f32
    %222 = vector.broadcast %cst_105 : f32 to vector<81x64xf32>
    %223 = arith.addf %222, %221 : vector<81x64xf32>
    %224 = tpu.reciprocal %223 {approx = true} : vector<81x64xf32> -> vector<81x64xf32>
    %225 = arith.mulf %223, %224 : vector<81x64xf32>
    %cst_106 = arith.constant 2.000000e+00 : f32
    %226 = vector.broadcast %cst_106 : f32 to vector<81x64xf32>
    %227 = arith.subf %226, %225 : vector<81x64xf32>
    %228 = arith.mulf %224, %227 : vector<81x64xf32>
    %cst_107 = arith.constant 1.06140542 : f32
    %229 = vector.broadcast %cst_107 : f32 to vector<81x64xf32>
    %230 = arith.mulf %229, %228 : vector<81x64xf32>
    %cst_108 = arith.constant -1.45315206 : f32
    %231 = vector.broadcast %cst_108 : f32 to vector<81x64xf32>
    %232 = arith.addf %230, %231 : vector<81x64xf32>
    %233 = arith.mulf %232, %228 : vector<81x64xf32>
    %cst_109 = arith.constant 1.42141378 : f32
    %234 = vector.broadcast %cst_109 : f32 to vector<81x64xf32>
    %235 = arith.addf %233, %234 : vector<81x64xf32>
    %236 = arith.mulf %235, %228 : vector<81x64xf32>
    %cst_110 = arith.constant -0.284496725 : f32
    %237 = vector.broadcast %cst_110 : f32 to vector<81x64xf32>
    %238 = arith.addf %236, %237 : vector<81x64xf32>
    %239 = arith.mulf %238, %228 : vector<81x64xf32>
    %cst_111 = arith.constant 0.254829586 : f32
    %240 = vector.broadcast %cst_111 : f32 to vector<81x64xf32>
    %241 = arith.addf %239, %240 : vector<81x64xf32>
    %242 = arith.mulf %241, %228 : vector<81x64xf32>
    %cst_112 = arith.constant 0.000000e+00 : f32
    %243 = vector.broadcast %cst_112 : f32 to vector<81x64xf32>
    %244 = arith.subf %243, %219 : vector<81x64xf32>
    %245 = arith.mulf %244, %219 : vector<81x64xf32>
    %246 = math.exp %245 : vector<81x64xf32>
    %247 = arith.mulf %242, %246 : vector<81x64xf32>
    %cst_113 = arith.constant 1.000000e+00 : f32
    %248 = vector.broadcast %cst_113 : f32 to vector<81x64xf32>
    %249 = arith.subf %248, %247 : vector<81x64xf32>
    %250 = arith.mulf %217, %249 : vector<81x64xf32>
    %251 = arith.addf %216, %250 : vector<81x64xf32>
    %cst_114 = arith.constant 5.000000e-01 : f32
    %252 = vector.broadcast %cst_114 : f32 to vector<81x64xf32>
    %253 = arith.mulf %252, %251 : vector<81x64xf32>
    %c0_115 = arith.constant 0 : index
    %c0_116 = arith.constant 0 : index
    %254 = vector.load %arg15[%c0_115, %c0_116] : memref<64x32xf32, #tpu.memory_space<vmem>>, vector<64x32xf32>
    %cst_117 = arith.constant dense<0.000000e+00> : vector<81x32xf32>
    %255 = tpu.matmul %253, %254, %cst_117 {dimension_numbers = #tpu.dot_dimension_numbers<[1], [0], [0], [1], [0, 0, 1, 1], [], []>} : vector<81x64xf32>, vector<64x32xf32>, vector<81x32xf32> -> vector<81x32xf32>
    %c0_118 = arith.constant 0 : index
    %c0_119 = arith.constant 0 : index
    %256 = vector.load %arg16[%c0_118, %c0_119] : memref<1x32xf32, #tpu.memory_space<vmem>>, vector<1x32xf32>
    %257 = vector.broadcast %256 : vector<1x32xf32> to vector<81x32xf32>
    %258 = arith.addf %255, %257 : vector<81x32xf32>
    %259 = arith.addf %258, %211 : vector<81x32xf32>
    %260 = arith.addf %259, %187 : vector<81x32xf32>
    %c0_120 = arith.constant 0 : index
    %c0_121 = arith.constant 0 : index
    %c0_122 = arith.constant 0 : index
    %261 = vector.load %arg24[%c0_120, %c0_121, %c0_122] : memref<1x81x32xf32, #tpu.memory_space<vmem>>, vector<1x81x32xf32>
    %262 = vector.shape_cast %261 : vector<1x81x32xf32> to vector<81x32xf32>
    %263 = vector.shape_cast %260 : vector<81x32xf32> to vector<1x81x32xf32>
    tpu.vector_store %arg24[%c0_120, %c0_121, %c0_122], %263 {strides = array<i32>} : memref<1x81x32xf32, #tpu.memory_space<vmem>>, vector<1x81x32xf32>,
    return
  }
  func.func @transform_0(%arg0: i32) -> (i32, i32, i32) {
    %c0_i32 = arith.constant 0 : i32
    %c0_i32_0 = arith.constant 0 : i32
    %c0_i32_1 = arith.constant 0 : i32
    return %arg0, %c0_i32, %c0_i32_0 : i32, i32, i32
  }
  func.func @transform_1(%arg0: i32) -> (i32, i32) {
    %c0_i32 = arith.constant 0 : i32
    %c0_i32_0 = arith.constant 0 : i32
    %c0_i32_1 = arith.constant 0 : i32
    return %c0_i32, %c0_i32_0 : i32, i32
  }
  func.func @transform_2(%arg0: i32) -> (i32, i32) {
    %c0_i32 = arith.constant 0 : i32
    %c0_i32_0 = arith.constant 0 : i32
    %c0_i32_1 = arith.constant 0 : i32
    return %c0_i32, %c0_i32_0 : i32, i32
  }
  func.func @transform_3(%arg0: i32) -> (i32, i32) {
    %c0_i32 = arith.constant 0 : i32
    %c0_i32_0 = arith.constant 0 : i32
    %c0_i32_1 = arith.constant 0 : i32
    return %c0_i32, %c0_i32_0 : i32, i32
  }
  func.func @transform_4(%arg0: i32) -> (i32, i32) {
    %c0_i32 = arith.constant 0 : i32
    %c0_i32_0 = arith.constant 0 : i32
    %c0_i32_1 = arith.constant 0 : i32
    return %c0_i32, %c0_i32_0 : i32, i32
  }
  func.func @transform_5(%arg0: i32) -> (i32, i32) {
    %c0_i32 = arith.constant 0 : i32
    %c0_i32_0 = arith.constant 0 : i32
    %c0_i32_1 = arith.constant 0 : i32
    return %c0_i32, %c0_i32_0 : i32, i32
  }
  func.func @transform_6(%arg0: i32) -> (i32, i32) {
    %c0_i32 = arith.constant 0 : i32
    %c0_i32_0 = arith.constant 0 : i32
    %c0_i32_1 = arith.constant 0 : i32
    return %c0_i32, %c0_i32_0 : i32, i32
  }
  func.func @transform_7(%arg0: i32) -> (i32, i32) {
    %c0_i32 = arith.constant 0 : i32
    %c0_i32_0 = arith.constant 0 : i32
    %c0_i32_1 = arith.constant 0 : i32
    return %c0_i32, %c0_i32_0 : i32, i32
  }
  func.func @transform_8(%arg0: i32) -> (i32, i32) {
    %c0_i32 = arith.constant 0 : i32
    %c0_i32_0 = arith.constant 0 : i32
    %c0_i32_1 = arith.constant 0 : i32
    return %c0_i32, %c0_i32_0 : i32, i32
  }
  func.func @transform_9(%arg0: i32) -> (i32, i32) {
    %c0_i32 = arith.constant 0 : i32
    %c0_i32_0 = arith.constant 0 : i32
    %c0_i32_1 = arith.constant 0 : i32
    return %c0_i32, %c0_i32_0 : i32, i32
  }
  func.func @transform_10(%arg0: i32) -> (i32, i32) {
    %c0_i32 = arith.constant 0 : i32
    %c0_i32_0 = arith.constant 0 : i32
    %c0_i32_1 = arith.constant 0 : i32
    return %c0_i32, %c0_i32_0 : i32, i32
  }
  func.func @transform_11(%arg0: i32) -> (i32, i32) {
    %c0_i32 = arith.constant 0 : i32
    %c0_i32_0 = arith.constant 0 : i32
    %c0_i32_1 = arith.constant 0 : i32
    return %c0_i32, %c0_i32_0 : i32, i32
  }
  func.func @transform_12(%arg0: i32) -> (i32, i32) {
    %c0_i32 = arith.constant 0 : i32
    %c0_i32_0 = arith.constant 0 : i32
    %c0_i32_1 = arith.constant 0 : i32
    return %c0_i32, %c0_i32_0 : i32, i32
  }
  func.func @transform_13(%arg0: i32) -> (i32, i32) {
    %c0_i32 = arith.constant 0 : i32
    %c0_i32_0 = arith.constant 0 : i32
    %c0_i32_1 = arith.constant 0 : i32
    return %c0_i32, %c0_i32_0 : i32, i32
  }
  func.func @transform_14(%arg0: i32) -> (i32, i32) {
    %c0_i32 = arith.constant 0 : i32
    %c0_i32_0 = arith.constant 0 : i32
    %c0_i32_1 = arith.constant 0 : i32
    return %c0_i32, %c0_i32_0 : i32, i32
  }
  func.func @transform_15(%arg0: i32) -> (i32, i32) {
    %c0_i32 = arith.constant 0 : i32
    %c0_i32_0 = arith.constant 0 : i32
    %c0_i32_1 = arith.constant 0 : i32
    return %c0_i32, %c0_i32_0 : i32, i32
  }
  func.func @transform_16(%arg0: i32) -> (i32, i32) {
    %c0_i32 = arith.constant 0 : i32
    %c0_i32_0 = arith.constant 0 : i32
    %c0_i32_1 = arith.constant 0 : i32
    return %c0_i32, %c0_i32_0 : i32, i32
  }
  func.func @transform_17(%arg0: i32) -> (i32, i32) {
    %c0_i32 = arith.constant 0 : i32
    %c0_i32_0 = arith.constant 0 : i32
    %c0_i32_1 = arith.constant 0 : i32
    return %c0_i32, %c0_i32_0 : i32, i32
  }
  func.func @transform_18(%arg0: i32) -> (i32, i32, i32) {
    %c0_i32 = arith.constant 0 : i32
    %c0_i32_0 = arith.constant 0 : i32
    %c0_i32_1 = arith.constant 0 : i32
    %c0_i32_2 = arith.constant 0 : i32
    return %c0_i32, %c0_i32_0, %c0_i32_1 : i32, i32, i32
  }
  func.func @transform_19(%arg0: i32) -> (i32, i32) {
    %c0_i32 = arith.constant 0 : i32
    %c0_i32_0 = arith.constant 0 : i32
    %c0_i32_1 = arith.constant 0 : i32
    return %c0_i32, %c0_i32_0 : i32, i32
  }
  func.func @transform_20(%arg0: i32) -> (i32, i32) {
    %c0_i32 = arith.constant 0 : i32
    %c0_i32_0 = arith.constant 0 : i32
    %c0_i32_1 = arith.constant 0 : i32
    return %c0_i32, %c0_i32_0 : i32, i32
  }
  func.func @transform_21(%arg0: i32) -> (i32, i32) {
    %c0_i32 = arith.constant 0 : i32
    %c0_i32_0 = arith.constant 0 : i32
    %c0_i32_1 = arith.constant 0 : i32
    return %c0_i32, %c0_i32_0 : i32, i32
  }
  func.func @transform_22(%arg0: i32) -> (i32, i32) {
    %c0_i32 = arith.constant 0 : i32
    %c0_i32_0 = arith.constant 0 : i32
    %c0_i32_1 = arith.constant 0 : i32
    return %c0_i32, %c0_i32_0 : i32, i32
  }
  func.func @transform_23(%arg0: i32) -> (i32, i32, i32) {
    %c0_i32 = arith.constant 0 : i32
    %c0_i32_0 = arith.constant 0 : i32
    %c0_i32_1 = arith.constant 0 : i32
    return %arg0, %c0_i32, %c0_i32_0 : i32, i32, i32
  }
}

</mosaic_0001>

<bundles_post_ra>
// kernel: _lambda_.1
= control target key start
LH: loop header
LB: loop body
LE: loop exit
PB: predicated region body
PF: predicated region fallthrough
CT: control target
= control target key end

     0   :  { %s12359_s0 = inlined_call_operand.vmem [shape: f32[2,81,32], index: 0, kind: input, shape index: {}]   ;;  %s12360_s1 = inlined_call_operand.vmem [shape: f32[1,32], index: 1, kind: input, shape index: {}, may-alias: {1,10}]   ;;  %s12361_s2 = inlined_call_operand.vmem [shape: f32[1,32], index: 2, kind: input, shape index: {}, may-alias: {2,11}]   ;;  %s12362_s3 = inlined_call_operand.hbm [shape: f32[32,96], index: 3, kind: input, shape index: {}]   ;;  %s12363_s4 = inlined_call_operand.hbm [shape: f32[32,16], index: 4, kind: input, shape index: {}]   ;;  %s12364_s5 = inlined_call_operand.vmem [shape: f32[1,16], index: 5, kind: input, shape index: {}]   ;;  %s12365_s6 = inlined_call_operand.vmem [shape: f32[1,16], index: 6, kind: input, shape index: {}]   ;;  %s12366_s7 = inlined_call_operand.vmem [shape: f32[1,16], index: 7, kind: input, shape index: {}]   ;;  %s12367_s8 = inlined_call_operand.hbm [shape: f32[16,32], index: 8, kind: input, shape index: {}]   ;;  %s12368_s9 = inlined_call_operand.vmem [shape: f32[1,32], index: 9, kind: input, shape index: {}]   ;;  %s12369_s10 = inlined_call_operand.vmem [shape: f32[1,32], index: 10, kind: input, shape index: {}, may-alias: {1,10}]   ;;  %s12370_s11 = inlined_call_operand.vmem [shape: f32[1,32], index: 11, kind: input, shape index: {}, may-alias: {2,11}]   ;;  %s12371_s12 = inlined_call_operand.hbm [shape: f32[32,64], index: 12, kind: input, shape index: {}]   ;;  %s12372_s13 = inlined_call_operand.vmem [shape: f32[1,64], index: 13, kind: input, shape index: {}]   ;;  %s12373_s14 = inlined_call_operand.hbm [shape: f32[64,32], index: 14, kind: input, shape index: {}]   ;;  %s12374_s15 = inlined_call_operand.vmem [shape: f32[1,32], index: 15, kind: input, shape index: {}]   ;;  %s12375_s16 = inlined_call_operand.hbm [shape: bf16[144,81], index: 16, kind: input, shape index: {}]   ;;  %s12376_s17 = inlined_call_operand.vmem [shape: f32[144,144], index: 17, kind: input, shape index: {}]   ;;  %s12377_s18 = inlined_call_operand.hbm [shape: bf16[2,16,288], index: 18, kind: input, shape index: {}]   ;;  %s12378_s19 = inlined_call_operand.hbm [shape: bf16[144,288], index: 19, kind: input, shape index: {}]   ;;  %s12379_s20 = inlined_call_operand.hbm [shape: bf16[16,144], index: 20, kind: input, shape index: {}]   ;;  %s12380_s21 = inlined_call_operand.hbm [shape: bf16[288,288], index: 21, kind: input, shape index: {}]   ;;  %s12381_s22 = inlined_call_operand.vmem [shape: bf16[81,144], index: 22, kind: input, shape index: {}]   ;;  %s12382_s23 = inlined_call_operand.vmem [shape: f32[2,81,32], index: 23, kind: output, shape index: {}]  }
   0x1   :  { %12447 = sst [smem:[#allocation65_spill]] %s12359_s0 }
   0x2   :  { %12448 = sst [smem:[#allocation66_spill]] %s12360_s1 }
   0x3   :  { %12449 = sst [smem:[#allocation67_spill]] %s12361_s2 }
   0x4   :  { %12450 = sst [smem:[#allocation68_spill]] %s12362_s3 }
   0x5   :  { %12451 = sst [smem:[#allocation69_spill]] %s12363_s4 }
   0x6   :  { %12452 = sst [smem:[#allocation70_spill]] %s12364_s5 }
   0x7   :  { %12453 = sst [smem:[#allocation71_spill]] %s12365_s6 }
   0x8   :  { %12454 = sst [smem:[#allocation72_spill]] %s12366_s7 }
   0x9   :  { %12455 = sst [smem:[#allocation73_spill]] %s12371_s12 }
   0xa   :  { %12456 = sst [smem:[#allocation74_spill]] %s12375_s16 }
   0xb   :  { %28 = vsyncpa [#allocation4], 0 }
   0xc   :  { %29 = vsyncpa [#allocation6], 0 }
   0xd   :  { %30 = vsyncpa [#allocation9], 0 }
   0xe   :  { %31 = vsyncpa [#allocation12], 0 }
   0xf   :  { %32 = vsyncpa [#allocation15], 0 }
  0x10   :  { %33 = vsyncpa [#allocation18], 0  ;;  %s8978_s4 = smov 0  }
  0x11 LB: > { %s8984_s30 = sadd.s32 4294967295, %s8832_s4   ;;  %p7082_p0 = scmp.ge.s32.totalorder %s8832_s4, 1  ;;  %s8832_s4 = sphi %s8978_s4, %s39_s4  }
  0x12   : > { %p558_p1 = scmp.lt.s32.totalorder %s8832_s4, 3  ;;  %p8073_p2 = scmp.eq.s32.totalorder %s8984_s30, 0 }
  0x13   : > { %s8834_s25 = smov [#allocation5]   ;;  %s8835_s1 = smov [#allocation8]  }
  0x14   : > { %p8989_p3 = pnand %p7082_p0, %p558_p1  ;;  %s589_s5 = sshll.u32 %s8834_s25, 4  ;;  %s590_s5 = int_to_ptr.vmem [resolvable:$true] %s589_s5 }
  0x15   : > { %s633_s26 = sshll.u32 %s8835_s1, 4  ;;  %s8836_s6 = smov [#allocation11]   ;;  %s8995_s26 = int_to_ptr.vmem [resolvable:$true] %s633_s26 }
  0x16   : > { %p8042_p4 = pneg %p8989_p3  ;;  %s665_s27 = sshll.u32 %s8836_s6, 4  ;;  %s9003_s27 = int_to_ptr.vmem [resolvable:$true] %s665_s27 }
  0x17   : > { %s8553_s28 = scalar_lea.vmem %s590_s5, 512  ;;  %p8561_p10 = scmp.lt.s32.totalorder %s590_s5, %s590_s5 }
  0x18   : > { %p8999_p5 = pnand %p8073_p2, %p8042_p4  ;;  %p8554_p7 = scmp.ne.s32.totalorder %s590_s5, %s8553_s28 }
  0x19   : > { %p8562_p11 = scmp.lt.s32.totalorder %s8553_s28, %s8553_s28 }
  0x1a   : > { %p9007_p6 = pneg %p8999_p5 }
  0x1b   : > { %p8563_p12 = por %p8562_p11, %p8561_p10 }
  0x1c   : > { %p8556_p8 = pnand %p8554_p7, %p9007_p6 }
  0x1e   : > { %p8557_p9 = pneg %p8556_p8 }
  0x20   : > { %p8564_p13 = pnand %p8563_p12, %p8557_p9 }
  0x22   : > { %8567 = shalt.err (!%p8564_p13)
}
  0x23   : > { %s12383_s29 = smov 128   ;;  %s12385_s3 = smov 8  }
  0x24   : > { %s12460_s1 = sld [smem:[#allocation69_spill]]  ;;  %s8579_s6 = scalar_lea.vmem %s8995_s26, 512 }
  0x25   : > { %p8580_p0 = scmp.ne.s32.totalorder %s8995_s26, %s8579_s6  ;;  %p8587_p7 = scmp.lt.s32.totalorder %s8995_s26, %s8995_s26 }
  0x26   : > { %p8588_p8 = scmp.lt.s32.totalorder %s8579_s6, %s8579_s6 }
  0x27   : > { %p8582_p1 = pnand %p8580_p0, %p9007_p6 }
  0x28   : > { %p8589_p9 = por %p8588_p8, %p8587_p7 }
  0x29   : > { %p8583_p4 = pneg %p8582_p1 }
  0x2a   : > { %8048 = dma.hbm_to_vmem [thread:$0]  (!%p8999_p5), %s12460_s1, 512, %s590_s5, [#allocation6], %s12383_s29, %s12383_s29, %s12385_s3  }
  0x2b   : > { %p8590_p10 = pnand %p8589_p9, %p8583_p4 }
  0x2d   : > { %8593 = shalt.err (!%p8590_p10)
}
  0x2e   : > { %s12461_s12 = sld [smem:[#allocation73_spill]]  ;;  %s8605_s5 = scalar_lea.vmem %s9003_s27, 1152 }
  0x2f   : > { %p8606_p11 = scmp.ne.s32.totalorder %s9003_s27, %s8605_s5  ;;  %p8613_p0 = scmp.lt.s32.totalorder %s9003_s27, %s9003_s27 }
  0x30   : > { %p8614_p1 = scmp.lt.s32.totalorder %s8605_s5, %s8605_s5 }
  0x31   : > { %p8608_p12 = pnand %p8606_p11, %p9007_p6 }
  0x32   : > { %p8615_p4 = por %p8614_p1, %p8613_p0 }
  0x33   : > { %p8609_p13 = pneg %p8608_p12 }
  0x34   : > { %8054 = dma.hbm_to_vmem [thread:$0]  (!%p8999_p5), %s12461_s12, 512, %s8995_s26, [#allocation9], %s12383_s29, %s12383_s29, %s12385_s3  }
  0x35   : > { %p8616_p7 = pnand %p8615_p4, %p8609_p13 }
  0x37   : > { %8619 = shalt.err (!%p8616_p7)
}
  0x38   : > { %s8839_s25 = smov 64   ;;  %s8840_s1 = smov 4  }
  0x39   : > { %s12462_s16 = sld [smem:[#allocation74_spill]]  ;;  %s8841_s26 = smov [#allocation14]  }
  0x3a   : > { %s694_s0 = sshll.u32 %s8841_s26, 4  ;;  %s8842_s29 = smov [#allocation3]   ;;  %s695_s0 = int_to_ptr.vmem [resolvable:$true] %s694_s0 }
  0x3b   : > { %s576_s3 = sshll.u32 %s8842_s29, 4  ;;  %s8631_s5 = scalar_lea.vmem %s695_s0, 3456  ;;  %s577_s3 = int_to_ptr.vmem [resolvable:$true] %s576_s3 }
  0x3c   : > { %p8632_p8 = scmp.ne.s32.totalorder %s695_s0, %s8631_s5  ;;  %p8639_p11 = scmp.lt.s32.totalorder %s695_s0, %s695_s0 }
  0x3d   : > { %p8640_p12 = scmp.lt.s32.totalorder %s8631_s5, %s8631_s5 }
  0x3e   : > { %p8634_p9 = pnand %p8632_p8, %p9007_p6 }
  0x3f   : > { %8060 = dma.hbm_to_vmem [thread:$0]  (!%p8999_p5), %s12462_s16, 1152, %s9003_s27, [#allocation12], %s8839_s25, %s8839_s25, %s8840_s1  }
  0x40   : > { %p8635_p10 = pneg %p8634_p9  ;;  %p8641_p13 = por %p8640_p12, %p8639_p11 }
  0x42   : > { %p8642_p0 = pnand %p8641_p13, %p8635_p10 }
  0x44   : > { %8645 = shalt.err (!%p8642_p0)
}
  0x45   : > { %s12387_s12 = smov 192   ;;  %s8844_s27 = smov 12  }
  0x46   : > { %8066 = dma.hbm_to_vmem [thread:$0]  (!%p8999_p5), %s12378_s19, 3456, %s695_s0, [#allocation15], %s12387_s12, %s12387_s12, %s8844_s27  }
  0x47   : > { %s8657_s1 = scalar_lea.vmem %s577_s3, 512  ;;  %p8665_p8 = scmp.lt.s32.totalorder %s577_s3, %s577_s3 }
  0x48   : > { %p8658_p1 = scmp.ne.s32.totalorder %s577_s3, %s8657_s1  ;;  %p8666_p9 = scmp.lt.s32.totalorder %s8657_s1, %s8657_s1 }
  0x4a   : > { %p8660_p4 = pnand %p8658_p1, %p9007_p6  ;;  %p8667_p10 = por %p8666_p9, %p8665_p8 }
  0x4c   : > { %p8661_p7 = pneg %p8660_p4 }
  0x4e   : > { %p8668_p11 = pnand %p8667_p10, %p8661_p7 }
  0x50   : > { %8671 = shalt.err (!%p8668_p11)
}
  0x51   : > { %s12463_s6 = smov 8   ;;  %s12464_s28 = smov 128  }
  0x52   : > { %s12465_s16 = sld [smem:[#allocation68_spill]]  ;;  %s8845_s0 = smov [#allocation7]  }
  0x53   : > { %s611_s29 = sshll.u32 %s8845_s0, 4  ;;  %s8846_s25 = smov [#allocation10]   ;;  %s612_s29 = int_to_ptr.vmem [resolvable:$true] %s611_s29 }
  0x54   : > { %s649_s12 = sshll.u32 %s8846_s25, 4  ;;  %s8683_s1 = scalar_lea.vmem %s612_s29, 256  ;;  %s650_s12 = int_to_ptr.vmem [resolvable:$true] %s649_s12 }
  0x55   : > { %p8684_p12 = scmp.ne.s32.totalorder %s612_s29, %s8683_s1  ;;  %p8691_p1 = scmp.lt.s32.totalorder %s612_s29, %s612_s29 }
  0x56   : > { %p8692_p4 = scmp.lt.s32.totalorder %s8683_s1, %s8683_s1 }
  0x57   : > { %p8686_p13 = pnand %p8684_p12, %p9007_p6 }
  0x58   : > { %8045 = dma.hbm_to_vmem [thread:$0]  (!%p8999_p5), %s12465_s16, 512, %s577_s3, [#allocation4], %s12464_s28, %s12464_s28, %s12463_s6  }
  0x59   : > { %p8687_p0 = pneg %p8686_p13  ;;  %p8693_p7 = por %p8692_p4, %p8691_p1 }
  0x5b   : > { %p8694_p8 = pnand %p8693_p7, %p8687_p0 }
  0x5d   : > { %8697 = shalt.err (!%p8694_p8)
}
  0x5e   : > { %8051 = dma.hbm_to_vmem [thread:$0]  (!%p8999_p5), %s12367_s8, 256, %s612_s29, [#allocation6], %s12464_s28, %s12464_s28, %s12463_s6  }
  0x5f   : > { %s8709_s26 = scalar_lea.vmem %s650_s12, 1024  ;;  %p8717_p12 = scmp.lt.s32.totalorder %s650_s12, %s650_s12 }
  0x60   : > { %p8710_p9 = scmp.ne.s32.totalorder %s650_s12, %s8709_s26  ;;  %p8718_p13 = scmp.lt.s32.totalorder %s8709_s26, %s8709_s26 }
  0x62   : > { %p8712_p10 = pnand %p8710_p9, %p9007_p6  ;;  %p8719_p1 = por %p8718_p13, %p8717_p12 }
  0x64   : > { %p8713_p11 = pneg %p8712_p10 }
  0x66   : > { %p8720_p0 = pnand %p8719_p1, %p8713_p11 }
  0x68   : > { %8723 = shalt.err (!%p8720_p0)
}
  0x69   : > { %8057 = dma.hbm_to_vmem [thread:$0]  (!%p8999_p5), %s12373_s14, 1024, %s650_s12, [#allocation9], %s12464_s28, %s12464_s28, %s12463_s6  }
  0x6a   : > { %s8847_s29 = smov [#allocation13]   ;;  %s8848_s1 = smov [#allocation16]  }
  0x6b   : > { %s681_s25 = sshll.u32 %s8847_s29, 4  ;;  %s707_s16 = sshll.u32 %s8848_s1, 4  ;;  %s682_s25 = int_to_ptr.vmem [resolvable:$true] %s681_s25  ;;  %s708_s16 = int_to_ptr.vmem [resolvable:$true] %s707_s16 }
  0x6c   : > { %s8735_s3 = scalar_lea.vmem %s682_s25, 768  ;;  %p8743_p9 = scmp.lt.s32.totalorder %s682_s25, %s682_s25 }
  0x6d   : > { %p8736_p4 = scmp.ne.s32.totalorder %s682_s25, %s8735_s3  ;;  %p8744_p10 = scmp.lt.s32.totalorder %s8735_s3, %s8735_s3 }
  0x6f   : > { %p8738_p7 = pnand %p8736_p4, %p9007_p6  ;;  %p8745_p11 = por %p8744_p10, %p8743_p9 }
  0x71   : > { %p8739_p8 = pneg %p8738_p7 }
  0x73   : > { %p8746_p12 = pnand %p8745_p11, %p8739_p8 }
  0x75   : > { %8749 = shalt.err (!%p8746_p12)
}
  0x76   : > { %s12466_s12 = smov 192   ;;  %s8761_s0 = scalar_lea.vmem %s708_s16, 256 }
  0x77   : > { %8063 = dma.hbm_to_vmem [thread:$0]  (!%p8999_p5), %s12377_s18, 768, %s682_s25, [#allocation12], %s12466_s12, %s12466_s12, %s8844_s27  }
  0x78   : > { %p8762_p13 = scmp.ne.s32.totalorder %s708_s16, %s8761_s0  ;;  %p8769_p4 = scmp.lt.s32.totalorder %s708_s16, %s708_s16 }
  0x79   : > { %p8770_p7 = scmp.lt.s32.totalorder %s8761_s0, %s8761_s0 }
  0x7a   : > { %p8764_p1 = pnand %p8762_p13, %p9007_p6 }
  0x7b   : > { %p8771_p9 = por %p8770_p7, %p8769_p4 }
  0x7c   : > { %p8765_p0 = pneg %p8764_p1 }
  0x7e   : > { %p8772_p8 = pnand %p8771_p9, %p8765_p0 }
  0x80   : > { %8775 = shalt.err (!%p8772_p8)
}
  0x81   : > { %8069 = dma.hbm_to_vmem [thread:$0]  (!%p8999_p5), %s12379_s20, 256, %s708_s16, [#allocation15], %s12464_s28, %s12464_s28, %s12463_s6  }
  0x82   : > { %s8849_s25 = smov [#allocation17]  }
  0x83   : > { %s720_s3 = sshll.u32 %s8849_s25, 4  ;;  %s721_s3 = int_to_ptr.vmem [resolvable:$true] %s720_s3 }
  0x84   : > { %s8787_s26 = scalar_lea.vmem %s721_s3, 6912  ;;  %p8795_p13 = scmp.lt.s32.totalorder %s721_s3, %s721_s3 }
  0x85   : > { %p8788_p10 = scmp.ne.s32.totalorder %s721_s3, %s8787_s26  ;;  %p8796_p1 = scmp.lt.s32.totalorder %s8787_s26, %s8787_s26 }
  0x87   : > { %p8790_p11 = pnand %p8788_p10, %p9007_p6  ;;  %p8797_p0 = por %p8796_p1, %p8795_p13 }
  0x89   : > { %p8791_p12 = pneg %p8790_p11 }
  0x8b   : > { %p8798_p4 = pnand %p8797_p0, %p8791_p12 }
  0x8d   : > { %8801 = shalt.err (!%p8798_p4)
}
  0x8e   : > { %8072 = dma.hbm_to_vmem [thread:$0]  (!%p8999_p5), %s12380_s21, 6912, %s721_s3, [#allocation18], %s12466_s12, %s12466_s12, %s8844_s27  }
  0x8f   : > { %747 = sbr.rel (%p8989_p3) target bundleno = 5257 (0x1489), region = 112 }
  0x94   : > { %8807 = dma.done.wait (%p8073_p2), [#allocation4], 512  }
  0x95   : > { %8809 = vsyncadd (%p8073_p2), [#allocation4], 4294966784 }
  0x96   : > { %8811 = dma.done.wait (%p8073_p2), [#allocation6], 768  }
  0x97   : > { %8813 = vsyncadd (%p8073_p2), [#allocation6], 4294966528 }
  0x98   : > { %8815 = dma.done.wait (%p8073_p2), [#allocation9], 1536  }
  0x99   : > { %8817 = vsyncadd (%p8073_p2), [#allocation9], 4294965760 }
  0x9a   : > { %8819 = dma.done.wait (%p8073_p2), [#allocation12], 1920  }
  0x9b   : > { %8821 = vsyncadd (%p8073_p2), [#allocation12], 4294965376 }
  0x9c   : > { %8823 = dma.done.wait (%p8073_p2), [#allocation15], 3712  }
  0x9d   : > { %8825 = vsyncadd (%p8073_p2), [#allocation15], 4294963584 }
  0x9e   : > { %8827 = dma.done.wait (%p8073_p2), [#allocation18], 6912  }
  0x9f   : > { %8829 = vsyncadd (%p8073_p2), [#allocation18], 4294960384  ;;  %p847_p3 = scmp.lt.s32.totalorder %s8984_s30, 1  ;;  %vm1302_vm0 = vcmask 253952   ;;  %vm1271_vm1 = vcmask 261120   ;;  %s12467_s27 = sld [smem:[#allocation65_spill]] }
  0xa0   : > { %vm1451_vm2 = vcmask 662528   ;;  %s12468_s0 = sld [smem:[#allocation66_spill]]  ;;  %vm1506_vm3 = vcmask 1040384   ;;  %s8851_s3 = smov 96   ;;  %vm1950_vm4 = vcmask 130048   ;;  %vm8857_vm5 = vmmov 0  }
  0xa1   : > { %s12665_s30 = smov (!%p847_p3, %s8984_s30), 1  ;;  %s12469_s25 = sld [smem:[#allocation67_spill]]  ;;  %vm5488_vm6 = vcmask 122880   ;;  %vm6740_vm7 = vcmask 523264  }
  0xa2   : > { %s8001_s24 = smul.u32 88, %s12665_s30  ;;  %s8852_s26 = smov 64  }
  0xa3   : > { %s8853_s5 = smov 80   ;;  %s8854_s7 = smov 112  }
  0xa4   : > { %s12644_s16 = sld [smem:[#allocation70_spill]] }
  0xa5   : > { %s9154_s28 = scalar_lea.vmem %s12467_s27, %s8001_s24  ;;  %s12646_s29 = sld [smem:[#allocation72_spill]] }
  0xa6   : > { %v867_v0 = vld [vmem:[%s9154_s28 + $0x50] sm:$0x1]  ;;  %v866_v1 = vld [vmem:[%s9154_s28 + $0x48] sm:$0xff]  ;;  %v865_v2 = vld [vmem:[%s9154_s28 + $0x40] sm:$0xff] }
  0xa7   : > { %v1303_v3 = vsel %vm1302_vm0, %v867_v0, 0.0  ;;  %v1296_v4 = vsel %vm1271_vm1, %v865_v2, 0.0  ;;  %v864_v5 = vld [vmem:[%s9154_s28 + $0x38] sm:$0xff]  ;;  %v1299_v6 = vsel %vm1271_vm1, %v866_v1, 0.0  ;;  %v863_v8 = vld [vmem:[%s9154_s28 + $0x30] sm:$0xff]  ;;  %v862_v9 = vld [vmem:[%s9154_s28 + $0x28] sm:$0xff] }
  0xa8   : > { %1304 = vadd.xlane.f32.xlu0 %v1303_v3  ;;  %1297 = vadd.xlane.f32.xlu1 %v1296_v4  ;;  %v1293_v7 = vsel %vm1271_vm1, %v864_v5, 0.0  ;;  %v1290_v10 = vsel %vm1271_vm1, %v863_v8, 0.0  ;;  %v1287_v11 = vsel %vm1271_vm1, %v862_v9, 0.0  ;;  %v861_v12 = vld [vmem:[%s9154_s28 + $0x20] sm:$0xff]  ;;  %v860_v13 = vld [vmem:[%s9154_s28 + $0x18] sm:$0xff]  ;;  %v859_v16 = vld [vmem:[%s9154_s28 + $0x10] sm:$0xff] }
  0xa9   : > { %v1284_v14 = vsel %vm1271_vm1, %v861_v12, 0.0  ;;  %v1281_v15 = vsel %vm1271_vm1, %v860_v13, 0.0  ;;  %v858_v17 = vld [vmem:[%s9154_s28 + $0x8] sm:$0xff]  ;;  %v1278_v18 = vsel %vm1271_vm1, %v859_v16, 0.0  ;;  %v857_v20 = vld [vmem:[%s9154_s28] sm:$0xff] }
  0xaa   : > { %v1275_v19 = vsel %vm1271_vm1, %v858_v17, 0.0  ;;  %v1272_v21 = vsel %vm1271_vm1, %v857_v20, 0.0 }
  0xac   : > { %1300 = vadd.xlane.f32.xlu0 %v1299_v6  ;;  %1294 = vadd.xlane.f32.xlu1 %v1293_v7 }
  0xb0   : > { %1291 = vadd.xlane.f32.xlu0 %v1290_v10  ;;  %1288 = vadd.xlane.f32.xlu1 %v1287_v11 }
  0xb4   : > { %1285 = vadd.xlane.f32.xlu0 %v1284_v14  ;;  %1282 = vadd.xlane.f32.xlu1 %v1281_v15  ;;  %v1668_v15 = vld [vmem:[#allocation3 + $0x18] sm:$0xff] }
  0xb5   : > { %7689 = vmatprep.subr.mxu1 %v1668_v15 }
  0xb6   : > { %7690 = vmatpush3.msra.mxu1 %v1668_v15 }
  0xb8   : > { %1279 = vadd.xlane.f32.xlu0 %v1278_v18  ;;  %1276 = vadd.xlane.f32.xlu1 %v1275_v19 }
  0xbc   : > { %1273 = vadd.xlane.f32.xlu0 %v1272_v21 }
 0x131   : > { %v1305_v22 = vpop.xlane.xlu0 %1304  ;;  %v1298_v23 = vpop.xlane.xlu1 %1297 }
 0x132   : > { %v1317_v24 = vmul.f32 0.03125, %v1305_v22  ;;  %v1315_v25 = vmul.f32 0.03125, %v1298_v23 }
 0x134   : > { %v9178_v26 = vsub.f32 %v867_v0, %v1317_v24  ;;  %v9180_v27 = vsub.f32 %v865_v2, %v1315_v25 }
 0x135   : > { %v1301_v28 = vpop.xlane.xlu0 %1300  ;;  %v1295_v29 = vpop.xlane.xlu1 %1294 }
 0x136   : > { %v1316_v30 = vmul.f32 0.03125, %v1301_v28  ;;  %v1314_v31 = vmul.f32 0.03125, %v1295_v29  ;;  %v1339_v32 = vmul.f32 %v9178_v26, %v9178_v26  ;;  %v1337_v33 = vmul.f32 %v9180_v27, %v9180_v27 }
 0x138   : > { %v9186_v34 = vsub.f32 %v866_v1, %v1316_v30  ;;  %v9188_v35 = vsub.f32 %v864_v5, %v1314_v31  ;;  %v1370_v36 = vsel %vm1302_vm0, %v1339_v32, 0.0  ;;  %v1364_v39 = vsel %vm1271_vm1, %v1337_v33, 0.0 }
 0x139   : > { %v1292_v37 = vpop.xlane.xlu0 %1291  ;;  %1371 = vadd.xlane.f32.xlu1 %v1370_v36  ;;  %v1289_v38 = vpop.xlane.xlu1 %1288 }
 0x13a   : > { %v1313_v40 = vmul.f32 0.03125, %v1292_v37  ;;  %v1312_v41 = vmul.f32 0.03125, %v1289_v38  ;;  %v1338_v42 = vmul.f32 %v9186_v34, %v9186_v34  ;;  %v1336_v43 = vmul.f32 %v9188_v35, %v9188_v35 }
 0x13c   : > { %v9196_v44 = vsub.f32 %v863_v8, %v1313_v40  ;;  %v9198_v45 = vsub.f32 %v862_v9, %v1312_v41  ;;  %v1367_v46 = vsel %vm1271_vm1, %v1338_v42, 0.0  ;;  %v1361_v49 = vsel %vm1271_vm1, %v1336_v43, 0.0 }
 0x13d   : > { %v1286_v47 = vpop.xlane.xlu0 %1285  ;;  %1365 = vadd.xlane.f32.xlu1 %v1364_v39  ;;  %1368 = vadd.xlane.f32.xlu0 %v1367_v46  ;;  %v1283_v48 = vpop.xlane.xlu1 %1282 }
 0x13e   : > { %v1311_v50 = vmul.f32 0.03125, %v1286_v47  ;;  %v1310_v51 = vmul.f32 0.03125, %v1283_v48  ;;  %v1335_v52 = vmul.f32 %v9196_v44, %v9196_v44  ;;  %v1334_v53 = vmul.f32 %v9198_v45, %v9198_v45 }
 0x140   : > { %v9206_v54 = vsub.f32 %v861_v12, %v1311_v50  ;;  %v9208_v55 = vsub.f32 %v860_v13, %v1310_v51  ;;  %v1358_v56 = vsel %vm1271_vm1, %v1335_v52, 0.0  ;;  %v1355_v59 = vsel %vm1271_vm1, %v1334_v53, 0.0  ;;  %v9233_v13 = vld [vmem:[#allocation11] sm:$0xff]  }
 0x141   : > { %v1280_v57 = vpop.xlane.xlu0 %1279  ;;  %1359 = vadd.xlane.f32.xlu1 %v1358_v56  ;;  %1362 = vadd.xlane.f32.xlu0 %v1361_v49  ;;  %v1277_v58 = vpop.xlane.xlu1 %1276  ;;  %v7401_v14 = vunpack.c.l.bf16 %v9233_v13  ;;  %v9240_v49 = vld [vmem:[%s12468_s0] ss:$0 sm:$0xff]  ;;  %s12645_s0 = sld [smem:[#allocation71_spill]] }
 0x142   : > { %v1309_v60 = vmul.f32 0.03125, %v1280_v57  ;;  %v1333_v61 = vmul.f32 %v9206_v54, %v9206_v54  ;;  %v1308_v62 = vmul.f32 0.03125, %v1277_v58  ;;  %v1332_v63 = vmul.f32 %v9208_v55, %v9208_v55  ;;  %v9246_v57 = vld [vmem:[%s12469_s25] ss:$0 sm:$0xff] }
 0x143   : > { %7662 = vmatprep.mubr.msk.f32.mxu0 %vm1451_vm2, %v7401_v14 }
 0x144   : > { %v9216_v0 = vsub.f32 %v859_v16, %v1309_v60  ;;  %v1352_v1 = vsel %vm1271_vm1, %v1333_v61, 0.0  ;;  %v9219_v2 = vsub.f32 %v858_v17, %v1308_v62  ;;  %v1349_v6 = vsel %vm1271_vm1, %v1332_v63, 0.0  ;;  %v1667_v16 = vld [vmem:[#allocation3 + $0x10] sm:$0xff] }
 0x145   : > { %1353 = vadd.xlane.f32.xlu1 %v1352_v1  ;;  %1356 = vadd.xlane.f32.xlu0 %v1355_v59  ;;  %v1274_v3 = vpop.xlane.xlu0 %1273 }
 0x146   : > { %v1307_v4 = vmul.f32 0.03125, %v1274_v3  ;;  %v1331_v5 = vmul.f32 %v9216_v0, %v9216_v0  ;;  %v1330_v7 = vmul.f32 %v9219_v2, %v9219_v2  ;;  %7691 = vmatprep.subr.mxu1 %v1667_v16 }
 0x147   : > { %7692 = vmatpush3.msra.mxu1 %v1667_v16 }
 0x148   : > { %v9226_v8 = vsub.f32 %v857_v20, %v1307_v4  ;;  %v1346_v9 = vsel %vm1271_vm1, %v1331_v5, 0.0  ;;  %v1343_v10 = vsel %vm1271_vm1, %v1330_v7, 0.0 }
 0x149   : > { %1347 = vadd.xlane.f32.xlu1 %v1346_v9  ;;  %1350 = vadd.xlane.f32.xlu0 %v1349_v6 }
 0x14a   : > { %v1329_v11 = vmul.f32 %v9226_v8, %v9226_v8 }
 0x14c   : > { %v1340_v12 = vsel %vm1271_vm1, %v1329_v11, 0.0 }
 0x14d   : > { %1344 = vadd.xlane.f32.xlu0 %v1343_v10  ;;  %1341 = vadd.xlane.f32.xlu1 %v1340_v12 }
 0x1c2   : > { %v1372_v17 = vpop.xlane.xlu1 %1371 }
 0x1c3   : > { %v1383_v18 = vmul.f32 0.03125, %v1372_v17 }
 0x1c5   : > { %v1394_v19 = vadd.f32 1e-05, %v1383_v18 }
 0x1c6   : > { %v1366_v20 = vpop.xlane.xlu1 %1365  ;;  %v1369_v21 = vpop.xlane.xlu0 %1368 }
 0x1c7   : > { %8125 = vrsqrt.f32 %v1394_v19  ;;  %v1381_v22 = vmul.f32 0.03125, %v1366_v20  ;;  %v1382_v23 = vmul.f32 0.03125, %v1369_v21 }
 0x1c9   : > { %v1392_v24 = vadd.f32 1e-05, %v1381_v22  ;;  %v1393_v25 = vadd.f32 1e-05, %v1382_v23 }
 0x1ca   : > { %v1360_v28 = vpop.xlane.xlu1 %1359  ;;  %v1363_v29 = vpop.xlane.xlu0 %1362 }
 0x1cb   : > { %8127 = vrsqrt.f32 %v1392_v24  ;;  %v1379_v30 = vmul.f32 0.03125, %v1360_v28  ;;  %v1380_v31 = vmul.f32 0.03125, %v1363_v29 }
 0x1cc   : > { %8129 = vrsqrt.f32 %v1393_v25 }
 0x1cd   : > { %v1390_v32 = vadd.f32 1e-05, %v1379_v30  ;;  %v1391_v33 = vadd.f32 1e-05, %v1380_v31 }
 0x1ce   : > { %v1354_v36 = vpop.xlane.xlu1 %1353  ;;  %v1357_v37 = vpop.xlane.xlu0 %1356 }
 0x1cf   : > { %8131 = vrsqrt.f32 %v1390_v32  ;;  %v1377_v38 = vmul.f32 0.03125, %v1354_v36  ;;  %v1378_v39 = vmul.f32 0.03125, %v1357_v37 }
 0x1d0   : > { %8133 = vrsqrt.f32 %v1391_v33 }
 0x1d1   : > { %v1388_v40 = vadd.f32 1e-05, %v1377_v38  ;;  %v1389_v41 = vadd.f32 1e-05, %v1378_v39  ;;  %v7435_v38 = vld [vmem:[#allocation11 + $0x8] sm:$0xff]   ;;  %v7402_v39 = vunpack.c.h.bf16 %v9233_v13 }
 0x1d2   : > { %v1348_v42 = vpop.xlane.xlu1 %1347  ;;  %v1351_v43 = vpop.xlane.xlu0 %1350 }
 0x1d3   : > { %8135 = vrsqrt.f32 %v1388_v40  ;;  %v1375_v46 = vmul.f32 0.03125, %v1348_v42  ;;  %v1376_v47 = vmul.f32 0.03125, %v1351_v43  ;;  %v7436_v40 = vld [vmem:[#allocation11 + $0x10] sm:$0xff]   ;;  %v7437_v43 = vld [vmem:[#allocation11 + $0x18] sm:$0xff]  }
 0x1d4   : > { %v8126_v48 = vpop.eup %8125  ;;  %8137 = vrsqrt.f32 %v1389_v41  ;;  %v7406_v41 = vunpack.c.h.bf16 %v7435_v38  ;;  %v7409_v42 = vunpack.c.l.bf16 %v7436_v40  ;;  %v7414_v13 = vunpack.c.h.bf16 %v7437_v43 }
 0x1d5   : > { %v1386_v50 = vadd.f32 1e-05, %v1375_v46  ;;  %v1387_v51 = vadd.f32 1e-05, %v1376_v47  ;;  %v1416_v52 = vmul.f32 %v8126_v48, %v9178_v26  ;;  %v7410_v46 = vunpack.c.h.bf16 %v7436_v40  ;;  %v7438_v48 = vld [vmem:[#allocation11 + $0x20] sm:$0xff]  }
 0x1d6   : > { %v1342_v53 = vpop.xlane.xlu1 %1341  ;;  %v1345_v56 = vpop.xlane.xlu0 %1344  ;;  %v7413_v47 = vunpack.c.l.bf16 %v7437_v43 }
 0x1d7   : > { %8139 = vrsqrt.f32 %v1386_v50  ;;  %v1373_v58 = vmul.f32 0.03125, %v1342_v53  ;;  %v1374_v59 = vmul.f32 0.03125, %v1345_v56  ;;  %v1433_v60 = vmul.f32 %v9240_v49, %v1416_v52  ;;  %v7439_v50 = vld [vmem:[#allocation11 + $0x28] sm:$0xff]   ;;  %v7440_v53 = vld [vmem:[#allocation11 + $0x30] sm:$0xff]  }
 0x1d8   : > { %v8128_v61 = vpop.eup %8127  ;;  %8141 = vrsqrt.f32 %v1387_v51  ;;  %v7418_v51 = vunpack.c.h.bf16 %v7438_v48  ;;  %v7421_v52 = vunpack.c.l.bf16 %v7439_v50  ;;  %v7422_v56 = vunpack.c.h.bf16 %v7439_v50 }
 0x1d9   : > { %v8130_v62 = vpop.eup %8129  ;;  %v1384_v63 = vadd.f32 1e-05, %v1373_v58  ;;  %v1385_v1 = vadd.f32 1e-05, %v1374_v59  ;;  %v1450_v26 = vadd.f32 %v9246_v57, %v1433_v60  ;;  %v1414_v3 = vmul.f32 %v8128_v61, %v9180_v27  ;;  %v7441_v58 = vld [vmem:[#allocation11 + $0x38] sm:$0xff]   ;;  %v7442_v61 = vld [vmem:[#allocation11 + $0x40] sm:$0xff]  }
 0x1da   : > { %v1415_v4 = vmul.f32 %v8130_v62, %v9186_v34  ;;  %v7426_v59 = vunpack.c.h.bf16 %v7440_v53  ;;  %v7429_v60 = vunpack.c.l.bf16 %v7441_v58  ;;  %v7430_v62 = vunpack.c.h.bf16 %v7441_v58 }
 0x1db   : > { %8143 = vrsqrt.f32 %v1384_v63  ;;  %7640 = vmatprep.subr.msk.mxu0 %vm1506_vm3, %v1450_v26  ;;  %v1431_v7 = vmul.f32 %v9240_v49, %v1414_v3  ;;  %v7433_v63 = vunpack.c.l.bf16 %v7442_v61  ;;  %v1665_v3 = vld [vmem:[#allocation3] sm:$0xff] }
 0x1dc   : > { %v8132_v5 = vpop.eup %8131  ;;  %8145 = vrsqrt.f32 %v1385_v1  ;;  %7641 = vmatpush3.msk.msra.mxu0 %vm1506_vm3, %v1450_v26  ;;  %v1432_v6 = vmul.f32 %v9240_v49, %v1415_v4  ;;  %v7434_v1 = vunpack.c.h.bf16 %v7442_v61  ;;  %v1666_v26 = vld [vmem:[#allocation3 + $0x8] sm:$0xff] }
 0x1dd   : > { %v8134_v9 = vpop.eup %8133  ;;  %v1412_v10 = vmul.f32 %v8132_v5, %v9196_v44  ;;  %v1448_v27 = vadd.f32 %v9246_v57, %v1431_v7  ;;  %7693 = vmatprep.subr.mxu1 %v1666_v26 }
 0x1de   : > { %v1449_v11 = vadd.f32 %v9246_v57, %v1432_v6  ;;  %v1413_v12 = vmul.f32 %v8134_v9, %v9188_v35  ;;  %7694 = vmatpush3.msra.mxu1 %v1666_v26 }
 0x1df   : > { %v1429_v15 = vmul.f32 %v9240_v49, %v1412_v10  ;;  %7695 = vmatprep.subr.mxu1 %v1665_v3 }
 0x1e0   : > { %v8136_v14 = vpop.eup %8135  ;;  %7642 = vmatprep.subr.mxu0 %v1449_v11  ;;  %v1430_v34 = vmul.f32 %v9240_v49, %v1413_v12  ;;  %7696 = vmatpush3.msra.mxu1 %v1665_v3 }
 0x1e1   : > { %v8138_v16 = vpop.eup %8137  ;;  %7643 = vmatpush3.msra.mxu0 %v1449_v11  ;;  %v1410_v17 = vmul.f32 %v8136_v14, %v9206_v54  ;;  %v1446_v35 = vadd.f32 %v9246_v57, %v1429_v15 }
 0x1e2   : > { %7644 = vmatprep.subr.mxu0 %v1448_v27  ;;  %v1447_v18 = vadd.f32 %v9246_v57, %v1430_v34  ;;  %v1411_v44 = vmul.f32 %v8138_v16, %v9198_v45 }
 0x1e3   : > { %7645 = vmatpush3.msra.mxu0 %v1448_v27  ;;  %v1427_v21 = vmul.f32 %v9240_v49, %v1410_v17 }
 0x1e4   : > { %v8140_v19 = vpop.eup %8139  ;;  %7646 = vmatprep.subr.mxu0 %v1447_v18  ;;  %v1428_v20 = vmul.f32 %v9240_v49, %v1411_v44 }
 0x1e5   : > { %v8142_v22 = vpop.eup %8141  ;;  %7647 = vmatpush3.msra.mxu0 %v1447_v18  ;;  %v1408_v23 = vmul.f32 %v8140_v19, %v9216_v0  ;;  %v1444_v25 = vadd.f32 %v9246_v57, %v1427_v21 }
 0x1e6   : > { %7648 = vmatprep.subr.mxu0 %v1446_v35  ;;  %v1445_v54 = vadd.f32 %v9246_v57, %v1428_v20  ;;  %v1409_v24 = vmul.f32 %v8142_v22, %v9208_v55  ;;  %v12389_v20 = vmov 0.0  }
 0x1e7   : > { %7649 = vmatpush3.msra.mxu0 %v1446_v35  ;;  %v1425_v29 = vmul.f32 %v9240_v49, %v1408_v23  ;;  %2041 = vmatprep.subr.mxu1 %v12389_v20 }
 0x1e8   : > { %v8144_v45 = vpop.eup %8143  ;;  %7650 = vmatprep.subr.mxu0 %v1445_v54  ;;  %v1426_v28 = vmul.f32 %v9240_v49, %v1409_v24 }
 0x1e9   : > { %v8146_v30 = vpop.eup %8145  ;;  %7651 = vmatpush3.msra.mxu0 %v1445_v54  ;;  %v1406_v31 = vmul.f32 %v8144_v45, %v9226_v8  ;;  %v1442_v55 = vadd.f32 %v9246_v57, %v1425_v29 }
 0x1ea   : > { %7652 = vmatprep.subr.mxu0 %v1444_v25  ;;  %v1443_v0 = vadd.f32 %v9246_v57, %v1426_v28  ;;  %v1407_v32 = vmul.f32 %v8146_v30, %v9219_v2  ;;  %v7405_v2 = vunpack.c.l.bf16 %v7435_v38 }
 0x1eb   : > { %7653 = vmatpush3.msra.mxu0 %v1444_v25  ;;  %v1423_v36 = vmul.f32 %v9240_v49, %v1406_v31 }
 0x1ec   : > { %7654 = vmatprep.subr.mxu0 %v1443_v0  ;;  %v1424_v33 = vmul.f32 %v9240_v49, %v1407_v32  ;;  %v7417_v49 = vunpack.c.l.bf16 %v7438_v48 }
 0x1ed   : > { %7655 = vmatpush3.msra.mxu0 %v1443_v0  ;;  %v1440_v8 = vadd.f32 %v9246_v57, %v1423_v36 }
 0x1ee   : > { %7656 = vmatprep.subr.mxu0 %v1442_v55  ;;  %v1441_v37 = vadd.f32 %v9246_v57, %v1424_v33  ;;  %v7425_v57 = vunpack.c.l.bf16 %v7440_v53 }
 0x1ef   : > { %7657 = vmatpush3.msra.mxu0 %v1442_v55 }
 0x1f0   : > { %7658 = vmatprep.subr.mxu0 %v1441_v37 }
 0x1f1   : > { %7659 = vmatpush3.msra.mxu0 %v1441_v37 }
 0x1f2   : > { %7660 = vmatprep.subr.mxu0 %v1440_v8 }
 0x1f3   : > { %7661 = vmatpush3.msra.mxu0 %v1440_v8 }
 0x1f4   : > { %7663 = vmatmul.mubr.msk.f32.vlgmr.msra.gmra.mxu0 %vm1451_vm2, %v7402_v39  ;;  %2682 = vmatprep.subr.mxu0 %v12389_v20 }
 0x1f5   : > { %7665 = vmatprep.mubr.msk.f32.mxu0 %vm1451_vm2, %v7405_v2 }
 0x1f8   : > { %7666 = vmatmul.mubr.msk.f32.gmra.mxu0 %vm1451_vm2, %v7406_v41 }
 0x1f9   : > { %7668 = vmatprep.mubr.msk.f32.mxu0 %vm1451_vm2, %v7409_v42 }
 0x1fc   : > { %7669 = vmatmul.mubr.msk.f32.gmra.mxu0 %vm1451_vm2, %v7410_v46 }
 0x1fd   : > { %7671 = vmatprep.mubr.msk.f32.mxu0 %vm1451_vm2, %v7413_v47 }
 0x200   : > { %7672 = vmatmul.mubr.msk.f32.gmra.mxu0 %vm1451_vm2, %v7414_v13 }
 0x201   : > { %7674 = vmatprep.mubr.msk.f32.mxu0 %vm1451_vm2, %v7417_v49 }
 0x204   : > { %7675 = vmatmul.mubr.msk.f32.gmra.mxu0 %vm1451_vm2, %v7418_v51 }
 0x205   : > { %7677 = vmatprep.mubr.msk.f32.mxu0 %vm1451_vm2, %v7421_v52 }
 0x208   : > { %7678 = vmatmul.mubr.msk.f32.gmra.mxu0 %vm1451_vm2, %v7422_v56 }
 0x209   : > { %7680 = vmatprep.mubr.msk.f32.mxu0 %vm1451_vm2, %v7425_v57 }
 0x20c   : > { %7681 = vmatmul.mubr.msk.f32.gmra.mxu0 %vm1451_vm2, %v7426_v59 }
 0x20d   : > { %7683 = vmatprep.mubr.msk.f32.mxu0 %vm1451_vm2, %v7429_v60 }
 0x210   : > { %7684 = vmatmul.mubr.msk.f32.gmra.mxu0 %vm1451_vm2, %v7430_v62 }
 0x211   : > { %7686 = vmatprep.mubr.msk.f32.mxu0 %vm1451_vm2, %v7433_v63 }
 0x214   : > { %7687 = vmatmul.mubr.msk.f32.gmra.mxu0 %vm1451_vm2, %v7434_v1 }
 0x2b4   : > { %v7664_v4 = vpop.f32.mrf.mxu0 }
 0x2b6   : > { %v1576_v5 = vpop.f32.mrf.mxu0 }
 0x2b7   : > { %7697 = vmatprep.mubr.msk.f32.mxu1 %vm1271_vm1, %v1576_v5 }
 0x2b8   : > { %v7667_v6 = vpop.f32.mrf.mxu0  ;;  %7698 = vmatmul.mubr.msk.f32.vlgmr.msra.gmra.mxu1 %vm1271_vm1, %v7664_v4 }
 0x2ba   : > { %v1586_v7 = vpop.f32.mrf.mxu0 }
 0x2bb   : > { %7700 = vmatprep.mubr.msk.f32.mxu1 %vm1271_vm1, %v1586_v7 }
 0x2bc   : > { %v7670_v9 = vpop.f32.mrf.mxu0  ;;  %7701 = vmatmul.mubr.msk.f32.gmra.mxu1 %vm1271_vm1, %v7667_v6 }
 0x2be   : > { %v1596_v10 = vpop.f32.mrf.mxu0 }
 0x2bf   : > { %7703 = vmatprep.mubr.msk.f32.mxu1 %vm1271_vm1, %v1596_v10 }
 0x2c0   : > { %v7673_v11 = vpop.f32.mrf.mxu0  ;;  %7704 = vmatmul.mubr.msk.f32.gmra.mxu1 %vm1271_vm1, %v7670_v9 }
 0x2c2   : > { %v1606_v12 = vpop.f32.mrf.mxu0 }
 0x2c3   : > { %7706 = vmatprep.mubr.msk.f32.mxu1 %vm1271_vm1, %v1606_v12 }
 0x2c4   : > { %v7676_v14 = vpop.f32.mrf.mxu0  ;;  %7707 = vmatmul.mubr.msk.f32.gmra.mxu1 %vm1271_vm1, %v7673_v11 }
 0x2c6   : > { %v1616_v27 = vpop.f32.mrf.mxu0 }
 0x2c7   : > { %7709 = vmatprep.mubr.msk.f32.mxu1 %vm1271_vm1, %v1616_v27 }
 0x2c8   : > { %v7679_v34 = vpop.f32.mrf.mxu0  ;;  %7710 = vmatmul.mubr.msk.f32.gmra.mxu1 %vm1271_vm1, %v7676_v14 }
 0x2ca   : > { %v1626_v15 = vpop.f32.mrf.mxu0 }
 0x2cb   : > { %7712 = vmatprep.mubr.msk.f32.mxu1 %vm1271_vm1, %v1626_v15 }
 0x2cc   : > { %v7682_v16 = vpop.f32.mrf.mxu0  ;;  %7713 = vmatmul.mubr.msk.f32.gmra.mxu1 %vm1271_vm1, %v7679_v34 }
 0x2ce   : > { %v1636_v17 = vpop.f32.mrf.mxu0 }
 0x2cf   : > { %7715 = vmatprep.mubr.msk.f32.mxu1 %vm1271_vm1, %v1636_v17 }
 0x2d0   : > { %v7685_v18 = vpop.f32.mrf.mxu0  ;;  %7716 = vmatmul.mubr.msk.f32.gmra.mxu1 %vm1271_vm1, %v7682_v16 }
 0x2d2   : > { %v1646_v44 = vpop.f32.mrf.mxu0 }
 0x2d3   : > { %7718 = vmatprep.mubr.msk.f32.mxu1 %vm1271_vm1, %v1646_v44 }
 0x2d4   : > { %7719 = vmatmul.mubr.msk.f32.gmra.mxu1 %vm1271_vm1, %v7685_v18  ;;  %v7688_v19 = vpop.f32.mrf.mxu0 }
 0x2d6   : > { %v1656_v35 = vpop.f32.mrf.mxu0 }
 0x2d7   : > { %7721 = vmatprep.mubr.msk.f32.mxu1 %vm1271_vm1, %v1656_v35 }
 0x2d8   : > { %7722 = vmatmul.mubr.msk.f32.gmra.mxu1 %vm1271_vm1, %v7688_v19 }
 0x2d9   : > { %2105 = vmatprep.mubr.f32.mxu1 %v12389_v20 }
 0x378   : > { %v9319_v21 = vpop.f32.mrf.mxu1 }
 0x379   : > { %v9498_v34 = vmul.f32 0.25, %v9319_v21 }
 0x37a   : > { %v9321_v22 = vpop.f32.mrf.mxu1 }
 0x37b   : > { %v9486_v12 = vmul.f32 0.25, %v9321_v22  ;;  %12482 = vst [vmem:[#allocation37_spill] sm:$0xff] %v9498_v34 }
 0x37c   : > { %v9323_v23 = vpop.f32.mrf.mxu1 }
 0x37d   : > { %v9513_v18 = vmul.f32 0.25, %v9323_v23 }
 0x37e   : > { %v9325_v54 = vpop.f32.mrf.mxu1 }
 0x37f   : > { %v9507_v16 = vmul.f32 0.25, %v9325_v54  ;;  %12484 = vst [vmem:[#allocation39_spill] sm:$0xff] %v9513_v18 }
 0x380   : > { %v9327_v24 = vpop.f32.mrf.mxu1 }
 0x381   : > { %12470 = vst [vmem:[#allocation25_spill] sm:$0xff] %v9327_v24  ;;  %v9526_v19 = vmul.f32 0.25, %v9327_v24 }
 0x382   : > { %v9329_v45 = vpop.f32.mrf.mxu1 }
 0x383   : > { %v9520_v44 = vmul.f32 0.25, %v9329_v45  ;;  %12485 = vst [vmem:[#allocation40_spill] sm:$0xff] %v9526_v19 }
 0x384   : > { %v9331_v25 = vpop.f32.mrf.mxu1 }
 0x386   : > { %v9333_v28 = vpop.f32.mrf.mxu1 }
 0x387   : > { %12471 = vst [vmem:[#allocation26_spill] sm:$0xff] %v9333_v28  ;;  %v9532_v35 = vmul.f32 0.25, %v9333_v28 }
 0x388   : > { %v9335_v29 = vpop.f32.mrf.mxu1 }
 0x389   : > { %12472 = vst [vmem:[#allocation27_spill] sm:$0xff] %v9335_v29 }
 0x38a   : > { %v9337_v30 = vpop.f32.mrf.mxu1 }
 0x38c   : > { %v9339_v31 = vpop.f32.mrf.mxu1 }
 0x38d   : > { %12473 = vst [vmem:[#allocation28_spill] sm:$0xff] %v9339_v31 }
 0x38e   : > { %v9341_v0 = vpop.f32.mrf.mxu1 }
 0x38f   : > { %12474 = vst [vmem:[#allocation29_spill] sm:$0xff] %v9341_v0 }
 0x390   : > { %v9343_v32 = vpop.f32.mrf.mxu1 }
 0x391   : > { %12475 = vst [vmem:[#allocation30_spill] sm:$0xff] %v9343_v32 }
 0x392   : > { %v9345_v55 = vpop.f32.mrf.mxu1 }
 0x393   : > { %12476 = vst [vmem:[#allocation31_spill] sm:$0xff] %v9345_v55 }
 0x394   : > { %v9347_v33 = vpop.f32.mrf.mxu1 }
 0x395   : > { %12477 = vst [vmem:[#allocation32_spill] sm:$0xff] %v9347_v33  ;;  %1944 = vrot.lane.b32.xlu0 %v9347_v33, %s8851_s3 }
 0x396   : > { %v9351_v36 = vpop.f32.mrf.mxu1 }
 0x397   : > { %12478 = vst [vmem:[#allocation33_spill] sm:$0xff] %v9351_v36  ;;  %1942 = vrot.lane.b32.xlu1 %v9351_v36, %s8851_s3 }
 0x398   : > { %v9377_v37 = vpop.f32.mrf.mxu1 }
 0x399   : > { %1936 = vrot.lane.b32.xlu0 %v9339_v31, %s8851_s3  ;;  %12479 = vst [vmem:[#allocation34_spill] sm:$0xff] %v9377_v37 }
 0x39a   : > { %v9389_v38 = vpop.f32.mrf.mxu1 }
 0x39b   : > { %1940 = vrot.lane.b32.xlu1 %v9343_v32, %s8851_s3  ;;  %12480 = vst [vmem:[#allocation35_spill] sm:$0xff] %v9389_v38 }
 0x39d   : > { %1932 = vrot.lane.b32.xlu0 %v9335_v29, %s8851_s3 }
 0x39f   : > { %1938 = vrot.lane.b32.xlu1 %v9345_v55, %s8851_s3 }
 0x3a1   : > { %1928 = vrot.lane.b32.xlu0 %v9331_v25, %s8851_s3 }
 0x3a3   : > { %1934 = vrot.lane.b32.xlu1 %v9341_v0, %s8851_s3 }
 0x3a5   : > { %1924 = vrot.lane.b32.xlu0 %v9327_v24, %s8851_s3 }
 0x3a7   : > { %1930 = vrot.lane.b32.xlu1 %v9337_v30, %s8851_s3 }
 0x3a9   : > { %1920 = vrot.lane.b32.xlu0 %v9323_v23, %s8851_s3 }
 0x3ab   : > { %1926 = vrot.lane.b32.xlu1 %v9333_v28, %s8851_s3 }
 0x3ad   : > { %1916 = vrot.lane.b32.xlu0 %v9319_v21, %s8851_s3 }
 0x3af   : > { %1922 = vrot.lane.b32.xlu1 %v9329_v45, %s8851_s3 }
 0x3b1   : > { %1948 = vrot.lane.b32.xlu0 %v9377_v37, %s8851_s3 }
 0x3b3   : > { %1918 = vrot.lane.b32.xlu1 %v9325_v54, %s8851_s3 }
 0x3b5   : > { %2602 = vrot.lane.b32.xlu0 %v9351_v36, %s8852_s26 }
 0x3b7   : > { %1914 = vrot.lane.b32.xlu1 %v9321_v22, %s8851_s3 }
 0x3b9   : > { %2600 = vrot.lane.b32.xlu0 %v9343_v32, %s8852_s26 }
 0x3bb   : > { %1946 = vrot.lane.b32.xlu1 %v9389_v38, %s8851_s3 }
 0x3bd   : > { %2598 = vrot.lane.b32.xlu0 %v9345_v55, %s8852_s26 }
 0x3bf   : > { %2604 = vrot.lane.b32.xlu1 %v9347_v33, %s8852_s26 }
 0x3c1   : > { %2594 = vrot.lane.b32.xlu0 %v9341_v0, %s8852_s26 }
 0x3c3   : > { %2596 = vrot.lane.b32.xlu1 %v9339_v31, %s8852_s26 }
 0x3c5   : > { %2592 = vrot.lane.b32.xlu0 %v9335_v29, %s8852_s26 }
 0x3c7   : > { %2588 = vrot.lane.b32.xlu1 %v9331_v25, %s8852_s26 }
 0x3c9   : > { %2590 = vrot.lane.b32.xlu0 %v9337_v30, %s8852_s26 }
 0x3cb   : > { %2586 = vrot.lane.b32.xlu1 %v9333_v28, %s8852_s26 }
 0x3cd   : > { %2582 = vrot.lane.b32.xlu0 %v9329_v45, %s8852_s26 }
 0x3cf   : > { %2584 = vrot.lane.b32.xlu1 %v9327_v24, %s8852_s26 }
 0x3d1   : > { %2580 = vrot.lane.b32.xlu0 %v9323_v23, %s8852_s26 }
 0x3d3   : > { %2576 = vrot.lane.b32.xlu1 %v9319_v21, %s8852_s26 }
 0x3d5   : > { %2578 = vrot.lane.b32.xlu0 %v9325_v54, %s8852_s26 }
 0x3d7   : > { %2574 = vrot.lane.b32.xlu1 %v9321_v22, %s8852_s26 }
 0x3d9   : > { %2608 = vrot.lane.b32.xlu0 %v9377_v37, %s8852_s26 }
 0x3db   : > { %2903 = vrot.lane.b32.xlu1 %v9347_v33, %s8853_s5 }
 0x3dd   : > { %2901 = vrot.lane.b32.xlu0 %v9351_v36, %s8853_s5 }
 0x3df   : > { %2899 = vrot.lane.b32.xlu1 %v9343_v32, %s8853_s5 }
 0x3e1   : > { %2897 = vrot.lane.b32.xlu0 %v9345_v55, %s8853_s5 }
 0x3e3   : > { %2895 = vrot.lane.b32.xlu1 %v9339_v31, %s8853_s5 }
 0x3e5   : > { %2606 = vrot.lane.b32.xlu0 %v9389_v38, %s8852_s26 }
 0x407   : > { %v1945_v8 = vpop.permute.xlu0 %1944 }
 0x408   : > { %7146 = vmatpush1.xpose.msk.msra.mxu1 %vm1950_vm4, %v1945_v8  ;;  %v9538_v8 = vmul.f32 0.25, %v9331_v25 }
 0x409   : > { %v1943_v39 = vpop.permute.xlu1 %1942  ;;  %2043 = vmatprep.subr.mxu1 %v12389_v20 }
 0x40a   : > { %12486 = vst [vmem:[#allocation41_spill] sm:$0xff] %v9538_v8 }
 0x40b   : > { %v1937_v2 = vpop.permute.xlu0 %1936 }
 0x40c   : > { %7147 = vmatpush1.xpose.msk.msra.mxu1 %vm1950_vm4, %v1943_v39  ;;  %v9544_v39 = vmul.f32 0.25, %v9337_v30 }
 0x40d   : > { %v1941_v40 = vpop.permute.xlu1 %1940  ;;  %2045 = vmatprep.subr.mxu1 %v12389_v20 }
 0x40e   : > { %12487 = vst [vmem:[#allocation42_spill] sm:$0xff] %v9544_v39 }
 0x40f   : > { %v1933_v41 = vpop.permute.xlu0 %1932 }
 0x410   : > { %7148 = vmatpush1.xpose.msk.msra.mxu1 %vm1950_vm4, %v1941_v40  ;;  %v9556_v40 = vmul.f32 0.25, %v9341_v0 }
 0x411   : > { %v1939_v42 = vpop.permute.xlu1 %1938  ;;  %2047 = vmatprep.subr.mxu1 %v12389_v20 }
 0x412   : > { %12489 = vst [vmem:[#allocation44_spill] sm:$0xff] %v9556_v40 }
 0x413   : > { %v1929_v43 = vpop.permute.xlu0 %1928 }
 0x414   : > { %7149 = vmatpush1.xpose.msk.msra.mxu1 %vm1950_vm4, %v1939_v42  ;;  %v9568_v42 = vmul.f32 0.25, %v9345_v55 }
 0x415   : > { %v1935_v46 = vpop.permute.xlu1 %1934  ;;  %2049 = vmatprep.subr.mxu1 %v12389_v20 }
 0x416   : > { %12491 = vst [vmem:[#allocation46_spill] sm:$0xff] %v9568_v42 }
 0x417   : > { %v1925_v47 = vpop.permute.xlu0 %1924 }
 0x418   : > { %7150 = vmatpush1.xpose.msk.msra.mxu1 %vm1950_vm4, %v1937_v2  ;;  %v9550_v2 = vmul.f32 0.25, %v9335_v29 }
 0x419   : > { %v1931_v48 = vpop.permute.xlu1 %1930  ;;  %2051 = vmatprep.subr.mxu1 %v12389_v20 }
 0x41a   : > { %12488 = vst [vmem:[#allocation43_spill] sm:$0xff] %v9550_v2 }
 0x41b   : > { %v1921_v13 = vpop.permute.xlu0 %1920 }
 0x41c   : > { %7151 = vmatpush1.xpose.msk.msra.mxu1 %vm1950_vm4, %v1935_v46  ;;  %v9580_v46 = vmul.f32 0.25, %v9351_v36 }
 0x41d   : > { %v1927_v49 = vpop.permute.xlu1 %1926  ;;  %2053 = vmatprep.subr.mxu1 %v12389_v20 }
 0x41e   : > { %12493 = vst [vmem:[#allocation48_spill] sm:$0xff] %v9580_v46 }
 0x41f   : > { %v1917_v50 = vpop.permute.xlu0 %1916 }
 0x420   : > { %7152 = vmatpush1.xpose.msk.msra.mxu1 %vm1950_vm4, %v1933_v41  ;;  %v9562_v41 = vmul.f32 0.25, %v9339_v31 }
 0x421   : > { %v1923_v51 = vpop.permute.xlu1 %1922  ;;  %2055 = vmatprep.subr.mxu1 %v12389_v20 }
 0x422   : > { %12490 = vst [vmem:[#allocation45_spill] sm:$0xff] %v9562_v41 }
 0x423   : > { %v1949_v52 = vpop.permute.xlu0 %1948 }
 0x424   : > { %7153 = vmatpush1.xpose.msk.msra.mxu1 %vm1950_vm4, %v1931_v48  ;;  %v9592_v48 = vmul.f32 0.25, %v9389_v38 }
 0x425   : > { %v1919_v53 = vpop.permute.xlu1 %1918  ;;  %2057 = vmatprep.subr.mxu1 %v12389_v20 }
 0x426   : > { %12495 = vst [vmem:[#allocation50_spill] sm:$0xff] %v9592_v48 }
 0x427   : > { %v2603_v56 = vpop.permute.xlu0 %2602 }
 0x428   : > { %7154 = vmatpush1.xpose.msk.msra.mxu1 %vm1950_vm4, %v1929_v43  ;;  %v9574_v43 = vmul.f32 0.25, %v9343_v32  ;;  %v1254_v32 = vld [vmem:[%s12376_s17 + $0xa8] sm:$0xff] }
 0x429   : > { %v1915_v57 = vpop.permute.xlu1 %1914  ;;  %2059 = vmatprep.subr.mxu1 %v12389_v20 }
 0x42a   : > { %12492 = vst [vmem:[#allocation47_spill] sm:$0xff] %v9574_v43 }
 0x42b   : > { %v2601_v58 = vpop.permute.xlu0 %2600 }
 0x42c   : > { %7155 = vmatpush1.xpose.msk.msra.mxu1 %vm1950_vm4, %v1927_v49 }
 0x42d   : > { %v1947_v59 = vpop.permute.xlu1 %1946  ;;  %2061 = vmatprep.subr.mxu1 %v12389_v20 }
 0x42f   : > { %v2599_v60 = vpop.permute.xlu0 %2598 }
 0x430   : > { %7156 = vmatpush1.xpose.msk.msra.mxu1 %vm1950_vm4, %v1925_v47  ;;  %v9586_v47 = vmul.f32 0.25, %v9347_v33 }
 0x431   : > { %v2605_v61 = vpop.permute.xlu1 %2604  ;;  %2063 = vmatprep.subr.mxu1 %v12389_v20 }
 0x432   : > { %2683 = vmatpush1.msra.mxu0 %v2605_v61  ;;  %12494 = vst [vmem:[#allocation49_spill] sm:$0xff] %v9586_v47 }
 0x433   : > { %v2595_v62 = vpop.permute.xlu0 %2594  ;;  %2684 = vmatprep.subr.mxu0 %v12389_v20 }
 0x434   : > { %7157 = vmatpush1.xpose.msk.msra.mxu1 %vm1950_vm4, %v1923_v51  ;;  %2685 = vmatpush1.msra.mxu0 %v2603_v56  ;;  %v1233_v51 = vld [vmem:[%s12376_s17] sm:$0xff] }
 0x435   : > { %2686 = vmatprep.subr.mxu0 %v12389_v20  ;;  %v2597_v63 = vpop.permute.xlu1 %2596  ;;  %2065 = vmatprep.subr.mxu1 %v12389_v20 }
 0x436   : > { %2687 = vmatpush1.msra.mxu0 %v2601_v58  ;;  %v1236_v58 = vld [vmem:[%s12376_s17 + $0x18] sm:$0xff] }
 0x437   : > { %v2593_v1 = vpop.permute.xlu0 %2592  ;;  %2688 = vmatprep.subr.mxu0 %v12389_v20 }
 0x438   : > { %7158 = vmatpush1.xpose.msk.msra.mxu1 %vm1950_vm4, %v1921_v13  ;;  %2689 = vmatpush1.msra.mxu0 %v2599_v60  ;;  %v9598_v13 = vmul.f32 0.25, %v9377_v37 }
 0x439   : > { %2690 = vmatprep.subr.mxu0 %v12389_v20  ;;  %v2589_v26 = vpop.permute.xlu1 %2588  ;;  %2067 = vmatprep.subr.mxu1 %v12389_v20 }
 0x43a   : > { %2691 = vmatpush1.msra.mxu0 %v2597_v63  ;;  %12496 = vst [vmem:[#allocation51_spill] sm:$0xff] %v9598_v13 }
 0x43b   : > { %v2591_v3 = vpop.permute.xlu0 %2590  ;;  %2692 = vmatprep.subr.mxu0 %v12389_v20 }
 0x43c   : > { %7159 = vmatpush1.xpose.msk.msra.mxu1 %vm1950_vm4, %v1919_v53  ;;  %2693 = vmatpush1.msra.mxu0 %v2595_v62 }
 0x43d   : > { %2694 = vmatprep.subr.mxu0 %v12389_v20  ;;  %v2587_v4 = vpop.permute.xlu1 %2586  ;;  %2069 = vmatprep.subr.mxu1 %v12389_v20 }
 0x43e   : > { %2695 = vmatpush1.msra.mxu0 %v2593_v1 }
 0x43f   : > { %v2583_v5 = vpop.permute.xlu0 %2582  ;;  %2696 = vmatprep.subr.mxu0 %v12389_v20 }
 0x440   : > { %7160 = vmatpush1.xpose.msk.msra.mxu1 %vm1950_vm4, %v1917_v50  ;;  %2697 = vmatpush1.msra.mxu0 %v2591_v3  ;;  %v1234_v50 = vld [vmem:[%s12376_s17 + $0x8] sm:$0xff] }
 0x441   : > { %2698 = vmatprep.subr.mxu0 %v12389_v20  ;;  %2071 = vmatprep.subr.mxu1 %v12389_v20  ;;  %v2585_v6 = vpop.permute.xlu1 %2584  ;;  %v1238_v3 = vld [vmem:[%s12376_s17 + $0x28] sm:$0xff] }
 0x442   : > { %2699 = vmatpush1.msra.mxu0 %v2589_v26 }
 0x443   : > { %v2581_v7 = vpop.permute.xlu0 %2580  ;;  %2700 = vmatprep.subr.mxu0 %v12389_v20 }
 0x444   : > { %7161 = vmatpush1.xpose.msk.msra.mxu1 %vm1950_vm4, %v1915_v57  ;;  %2701 = vmatpush1.msra.mxu0 %v2587_v4  ;;  %v1237_v4 = vld [vmem:[%s12376_s17 + $0x20] sm:$0xff] }
 0x445   : > { %2702 = vmatprep.subr.mxu0 %v12389_v20  ;;  %2101 = vmatprep.subr.mxu1 %v12389_v20  ;;  %v2577_v10 = vpop.permute.xlu1 %2576 }
 0x446   : > { %2703 = vmatpush1.msra.mxu0 %v2585_v6 }
 0x447   : > { %v2579_v9 = vpop.permute.xlu0 %2578  ;;  %2704 = vmatprep.subr.mxu0 %v12389_v20 }
 0x448   : > { %7162 = vmatpush2.xpose.msk.msra.mxu1 %vm1950_vm4, %v1949_v52  ;;  %2705 = vmatpush1.msra.mxu0 %v2583_v5 }
 0x449   : > { %2706 = vmatprep.subr.mxu0 %v12389_v20  ;;  %2103 = vmatprep.subr.mxu1 %v12389_v20  ;;  %v2575_v14 = vpop.permute.xlu1 %2574 }
 0x44a   : > { %2707 = vmatpush1.msra.mxu0 %v2581_v7 }
 0x44b   : > { %v2609_v11 = vpop.permute.xlu0 %2608  ;;  %2708 = vmatprep.subr.mxu0 %v12389_v20 }
 0x44c   : > { %7163 = vmatpush2.xpose.msk.msra.mxu1 %vm1950_vm4, %v1947_v59  ;;  %2709 = vmatpush1.msra.mxu0 %v2579_v9  ;;  %v1235_v59 = vld [vmem:[%s12376_s17 + $0x10] sm:$0xff] }
 0x44d   : > { %2710 = vmatprep.subr.mxu0 %v12389_v20  ;;  %7965 = vmatprep.subr.mxu1 %v12389_v20 }
 0x44e   : > { %2711 = vmatpush1.msra.mxu0 %v2577_v10 }
 0x44f   : > { %v9490_v27 = vpop.permute.xlu0 %2901  ;;  %7164 = vmatmul.mubr.msk.f32.vlgmr.msra.gmra.mxu1 %vm1950_vm4, %v9486_v12  ;;  %2712 = vmatprep.subr.mxu0 %v12389_v20 }
 0x450   : > { %12481 = vst [vmem:[#allocation36_spill] sm:$0xff] %v9490_v27  ;;  %2713 = vmatpush1.msra.mxu0 %v2575_v14  ;;  %2111 = vmatprep.mubr.f32.mxu1 %v12389_v20  ;;  %v1240_v14 = vld [vmem:[%s12376_s17 + $0x38] sm:$0xff] }
 0x451   : > { %2742 = vmatprep.subr.mxu0 %v12389_v20 }
 0x452   : > { %2743 = vmatpush2.msra.mxu0 %v2609_v11 }
 0x453   : > { %v9500_v15 = vpop.permute.xlu0 %2897  ;;  %7165 = vmatmul.mubr.msk.f32.gmra.mxu1 %vm1950_vm4, %v9498_v34  ;;  %2744 = vmatprep.subr.mxu0 %v12389_v20 }
 0x454   : > { %12483 = vst [vmem:[#allocation38_spill] sm:$0xff] %v9500_v15  ;;  %2117 = vmatprep.mubr.f32.mxu1 %v12389_v20 }
 0x457   : > { %v2607_v17 = vpop.permute.xlu0 %2606  ;;  %7166 = vmatmul.mubr.msk.f32.gmra.mxu1 %vm1950_vm4, %v9507_v16 }
 0x458   : > { %2745 = vmatpush2.msra.mxu0 %v2607_v17  ;;  %2123 = vmatprep.mubr.f32.mxu1 %v12389_v20  ;;  %v1239_v17 = vld [vmem:[%s12376_s17 + $0x30] sm:$0xff] }
 0x459   : > { %2981 = vmatprep.subr.mxu0 %v12389_v20 }
 0x45b   : > { %7167 = vmatmul.mubr.msk.f32.gmra.mxu1 %vm1950_vm4, %v9513_v18 }
 0x45c   : > { %2129 = vmatprep.mubr.f32.mxu1 %v12389_v20 }
 0x45f   : > { %7168 = vmatmul.mubr.msk.f32.gmra.mxu1 %vm1950_vm4, %v9520_v44 }
 0x460   : > { %2135 = vmatprep.mubr.f32.mxu1 %v12389_v20 }
 0x463   : > { %7169 = vmatmul.mubr.msk.f32.gmra.mxu1 %vm1950_vm4, %v9526_v19 }
 0x464   : > { %2141 = vmatprep.mubr.f32.mxu1 %v12389_v20 }
 0x467   : > { %7170 = vmatmul.mubr.msk.f32.gmra.mxu1 %vm1950_vm4, %v9532_v35 }
 0x468   : > { %2147 = vmatprep.mubr.f32.mxu1 %v12389_v20 }
 0x46b   : > { %7171 = vmatmul.mubr.msk.f32.gmra.mxu1 %vm1950_vm4, %v9538_v8  ;;  %v1260_v8 = vld [vmem:[%s12376_s17 + $0xd8] sm:$0xff] }
 0x46c   : > { %2153 = vmatprep.mubr.f32.mxu1 %v12389_v20 }
 0x46f   : > { %7172 = vmatmul.mubr.msk.f32.gmra.mxu1 %vm1950_vm4, %v9544_v39 }
 0x470   : > { %2159 = vmatprep.mubr.f32.mxu1 %v12389_v20 }
 0x473   : > { %7173 = vmatmul.mubr.msk.f32.gmra.mxu1 %vm1950_vm4, %v9550_v2 }
 0x474   : > { %2165 = vmatprep.mubr.f32.mxu1 %v12389_v20 }
 0x477   : > { %7174 = vmatmul.mubr.msk.f32.gmra.mxu1 %vm1950_vm4, %v9556_v40  ;;  %v1262_v40 = vld [vmem:[%s12376_s17 + $0xe8] sm:$0xff] }
 0x478   : > { %2171 = vmatprep.mubr.f32.mxu1 %v12389_v20 }
 0x47b   : > { %7175 = vmatmul.mubr.msk.f32.gmra.mxu1 %vm1950_vm4, %v9562_v41 }
 0x47c   : > { %2177 = vmatprep.mubr.f32.mxu1 %v12389_v20 }
 0x47f   : > { %7176 = vmatmul.mubr.msk.f32.gmra.mxu1 %vm1950_vm4, %v9568_v42 }
 0x480   : > { %2183 = vmatprep.mubr.f32.mxu1 %v12389_v20 }
 0x483   : > { %7177 = vmatmul.mubr.msk.f32.gmra.mxu1 %vm1950_vm4, %v9574_v43 }
 0x484   : > { %2189 = vmatprep.mubr.f32.mxu1 %v12389_v20 }
 0x487   : > { %7178 = vmatmul.mubr.msk.f32.gmra.mxu1 %vm1950_vm4, %v9580_v46 }
 0x488   : > { %2195 = vmatprep.mubr.f32.mxu1 %v12389_v20 }
 0x48b   : > { %7179 = vmatmul.mubr.msk.f32.gmra.mxu1 %vm1950_vm4, %v9586_v47 }
 0x48c   : > { %2201 = vmatprep.mubr.f32.mxu1 %v12389_v20 }
 0x48f   : > { %7180 = vmatmul.mubr.msk.f32.gmra.mxu1 %vm1950_vm4, %v9592_v48  ;;  %v1258_v48 = vld [vmem:[%s12376_s17 + $0xc8] sm:$0xff] }
 0x490   : > { %2207 = vmatprep.mubr.f32.mxu1 %v12389_v20 }
 0x493   : > { %7181 = vmatmul.mubr.msk.f32.gmra.mxu1 %vm1950_vm4, %v9598_v13 }
 0x50f   : > { %v2107_v49 = vpop.f32.mrf.mxu1 }
 0x510   : > { %v9610_v56 = vadd.f32 %v2107_v49, %v1233_v51 }
 0x511   : > { %v2109_v52 = vpop.f32.mrf.mxu1 }
 0x512   : > { %v9608_v53 = vadd.f32 %v2109_v52, %v1234_v50 }
 0x513   : > { %v2113_v57 = vpop.f32.mrf.mxu1 }
 0x514   : > { %v2214_v60 = vsel %vm1950_vm4, %v9608_v53, -inf  ;;  %v9623_v1 = vadd.f32 %v2113_v57, %v1235_v59  ;;  %v1242_v59 = vld [vmem:[%s12376_s17 + $0x48] sm:$0xff] }
 0x515   : > { %v2115_v61 = vpop.f32.mrf.mxu1  ;;  %v2215_v62 = vmax.f32 %v9610_v56, %v2214_v60  ;;  %v1241_v60 = vld [vmem:[%s12376_s17 + $0x40] sm:$0xff] }
 0x516   : > { %v9621_v63 = vadd.f32 %v2115_v61, %v1236_v58 }
 0x517   : > { %v2119_v26 = vpop.f32.mrf.mxu1  ;;  %2216 = vmax.xlane.f32.xlu0 %v2215_v62 }
 0x518   : > { %v2218_v5 = vsel %vm1950_vm4, %v9621_v63, -inf  ;;  %v9636_v10 = vadd.f32 %v2119_v26, %v1237_v4 }
 0x519   : > { %v2121_v6 = vpop.f32.mrf.mxu1  ;;  %v2219_v7 = vmax.f32 %v9623_v1, %v2218_v5 }
 0x51a   : > { %v9634_v9 = vadd.f32 %v2121_v6, %v1238_v3  ;;  %v1244_v6 = vld [vmem:[%s12376_s17 + $0x58] sm:$0xff] }
 0x51b   : > { %v2125_v11 = vpop.f32.mrf.mxu1  ;;  %2220 = vmax.xlane.f32.xlu1 %v2219_v7  ;;  %v1243_v7 = vld [vmem:[%s12376_s17 + $0x50] sm:$0xff] }
 0x51c   : > { %v2222_v49 = vsel %vm1950_vm4, %v9634_v9, -inf  ;;  %v9649_v57 = vadd.f32 %v2125_v11, %v1239_v17 }
 0x51d   : > { %v2127_v50 = vpop.f32.mrf.mxu1  ;;  %v2223_v51 = vmax.f32 %v9636_v10, %v2222_v49 }
 0x51e   : > { %v9647_v52 = vadd.f32 %v2127_v50, %v1240_v14 }
 0x51f   : > { %v2131_v58 = vpop.f32.mrf.mxu1  ;;  %2224 = vmax.xlane.f32.xlu0 %v2223_v51 }
 0x520   : > { %v2226_v61 = vsel %vm1950_vm4, %v9647_v52, -inf  ;;  %v9662_v4 = vadd.f32 %v2131_v58, %v1241_v60  ;;  %v1246_v58 = vld [vmem:[%s12376_s17 + $0x68] sm:$0xff] }
 0x521   : > { %v2133_v62 = vpop.f32.mrf.mxu1  ;;  %v2227_v26 = vmax.f32 %v9649_v57, %v2226_v61 }
 0x522   : > { %v9660_v3 = vadd.f32 %v2133_v62, %v1242_v59  ;;  %v1245_v59 = vld [vmem:[%s12376_s17 + $0x60] sm:$0xff] }
 0x523   : > { %v2137_v5 = vpop.f32.mrf.mxu1  ;;  %2228 = vmax.xlane.f32.xlu0 %v2227_v26 }
 0x524   : > { %v2230_v11 = vsel %vm1950_vm4, %v9660_v3, -inf  ;;  %v9675_v50 = vadd.f32 %v2137_v5, %v1243_v7  ;;  %v1248_v7 = vld [vmem:[%s12376_s17 + $0x78] sm:$0xff] }
 0x525   : > { %v2139_v14 = vpop.f32.mrf.mxu1  ;;  %v2231_v17 = vmax.f32 %v9662_v4, %v2230_v11  ;;  %v1247_v11 = vld [vmem:[%s12376_s17 + $0x70] sm:$0xff] }
 0x526   : > { %v9673_v49 = vadd.f32 %v2139_v14, %v1244_v6 }
 0x527   : > { %v2143_v51 = vpop.f32.mrf.mxu1  ;;  %2232 = vmax.xlane.f32.xlu0 %v2231_v17 }
 0x528   : > { %v2234_v60 = vsel %vm1950_vm4, %v9673_v49, -inf  ;;  %v9688_v5 = vadd.f32 %v2143_v51, %v1245_v59 }
 0x529   : > { %v2145_v61 = vpop.f32.mrf.mxu1  ;;  %v2235_v62 = vmax.f32 %v9675_v50, %v2234_v60 }
 0x52a   : > { %v9686_v26 = vadd.f32 %v2145_v61, %v1246_v58  ;;  %v1250_v61 = vld [vmem:[%s12376_s17 + $0x88] sm:$0xff] }
 0x52b   : > { %v2149_v6 = vpop.f32.mrf.mxu1  ;;  %2236 = vmax.xlane.f32.xlu1 %v2235_v62  ;;  %v1249_v62 = vld [vmem:[%s12376_s17 + $0x80] sm:$0xff] }
 0x52c   : > { %v2238_v14 = vsel %vm1950_vm4, %v9686_v26, -inf  ;;  %v9701_v51 = vadd.f32 %v2149_v6, %v1247_v11 }
 0x52d   : > { %v2151_v17 = vpop.f32.mrf.mxu1  ;;  %v2239_v60 = vmax.f32 %v9688_v5, %v2238_v14 }
 0x52e   : > { %v9699_v58 = vadd.f32 %v2151_v17, %v1248_v7 }
 0x52f   : > { %v2155_v59 = vpop.f32.mrf.mxu1  ;;  %2240 = vmax.xlane.f32.xlu0 %v2239_v60 }
 0x530   : > { %v2242_v20 = vsel %vm1950_vm4, %v9699_v58, -inf  ;;  %v9714_v6 = vadd.f32 %v2155_v59, %v1249_v62 }
 0x531   : > { %v2157_v31 = vpop.f32.mrf.mxu1  ;;  %v2243_v14 = vmax.f32 %v9701_v51, %v2242_v20 }
 0x532   : > { %v9712_v7 = vadd.f32 %v2157_v31, %v1250_v61 }
 0x533   : > { %v2161_v11 = vpop.f32.mrf.mxu1  ;;  %2244 = vmax.xlane.f32.xlu1 %v2243_v14 }
 0x534   : > { %v2246_v17 = vsel %vm1950_vm4, %v9712_v7, -inf }
 0x535   : > { %v2163_v60 = vpop.f32.mrf.mxu1  ;;  %v2247_v33 = vmax.f32 %v9714_v6, %v2246_v17 }
 0x537   : > { %v2167_v13 = vpop.f32.mrf.mxu1  ;;  %2248 = vmax.xlane.f32.xlu0 %v2247_v33  ;;  %v1252_v33 = vld [vmem:[%s12376_s17 + $0x98] sm:$0xff] }
 0x538   : > { %v9726_v17 = vadd.f32 %v2163_v60, %v1252_v33 }
 0x539   : > { %v2169_v15 = vpop.f32.mrf.mxu1 }
 0x53a   : > { %v9737_v36 = vadd.f32 %v2169_v15, %v1254_v32  ;;  %v2250_v60 = vsel %vm1950_vm4, %v9726_v17, -inf  ;;  %v1253_v32 = vld [vmem:[%s12376_s17 + $0xa0] sm:$0xff] }
 0x53b   : > { %v2173_v47 = vpop.f32.mrf.mxu1  ;;  %v9766_v42 = vadd.f32 %v2167_v13, %v1253_v32  ;;  %v1259_v13 = vld [vmem:[%s12376_s17 + $0xd0] sm:$0xff] }
 0x53c   : > { %v2254_v19 = vsel %vm1950_vm4, %v9737_v36, -inf }
 0x53d   : > { %v2175_v55 = vpop.f32.mrf.mxu1 }
 0x53f   : > { %v2179_v43 = vpop.f32.mrf.mxu1 }
 0x541   : > { %v2181_v27 = vpop.f32.mrf.mxu1 }
 0x543   : > { %v2185_v20 = vpop.f32.mrf.mxu1 }
 0x544   : > { %2891 = vrot.lane.b32.xlu1 %v9335_v29, %s8853_s5  ;;  %v1256_v29 = vld [vmem:[%s12376_s17 + $0xb8] sm:$0xff]  ;;  %v9794_v39 = vadd.f32 %v2185_v20, %v1259_v13 }
 0x545   : > { %v2187_v31 = vpop.f32.mrf.mxu1  ;;  %v9739_v2 = vadd.f32 %v2175_v55, %v1256_v29  ;;  %v1255_v29 = vld [vmem:[%s12376_s17 + $0xb0] sm:$0xff]  ;;  %v9758_v55 = vadd.f32 %v2181_v27, %v1258_v48  ;;  %v1264_v27 = vld [vmem:[%s12376_s17 + $0xf8] sm:$0xff]  ;;  %v1257_v48 = vld [vmem:[%s12376_s17 + $0xc0] sm:$0xff] }
 0x546   : > { %v9760_v15 = vadd.f32 %v2187_v31, %v1260_v8  ;;  %v9768_v18 = vadd.f32 %v2173_v47, %v1255_v29  ;;  %v2255_v31 = vmax.f32 %v9766_v42, %v2254_v19  ;;  %v9792_v34 = vadd.f32 %v2179_v43, %v1257_v48  ;;  %v1268_v19 = vld [vmem:[%s12376_s17 + $0x118] sm:$0xff]  ;;  %v1263_v43 = vld [vmem:[%s12376_s17 + $0xf0] sm:$0xff] }
 0x547   : > { %v2191_v59 = vpop.f32.mrf.mxu1 }
 0x548   : > { %v2266_v29 = vsel %vm1950_vm4, %v9760_v15, -inf }
 0x549   : > { %v2193_v61 = vpop.f32.mrf.mxu1  ;;  %v2267_v20 = vmax.f32 %v9794_v39, %v2266_v29  ;;  %v1265_v29 = vld [vmem:[%s12376_s17 + $0x100] sm:$0xff] }
 0x54b   : > { %v2197_v62 = vpop.f32.mrf.mxu1 }
 0x54c   : > { %v9820_v38 = vadd.f32 %v2197_v62, %v1263_v43 }
 0x54d   : > { %2893 = vrot.lane.b32.xlu0 %v9341_v0, %s8853_s5  ;;  %v2199_v14 = vpop.f32.mrf.mxu1  ;;  %v1251_v0 = vld [vmem:[%s12376_s17 + $0x90] sm:$0xff] }
 0x54e   : > { %v9743_v33 = vadd.f32 %v2161_v11, %v1251_v0  ;;  %v2258_v11 = vsel %vm1950_vm4, %v9739_v2, -inf  ;;  %v9786_v32 = vadd.f32 %v2199_v14, %v1264_v27 }
 0x54f   : > { %v2203_v41 = vpop.f32.mrf.mxu1  ;;  %v2259_v47 = vmax.f32 %v9768_v18, %v2258_v11  ;;  %v1266_v11 = vld [vmem:[%s12376_s17 + $0x108] sm:$0xff] }
 0x550   : > { %v2251_v0 = vmax.f32 %v9743_v33, %v2250_v60  ;;  %v9784_v60 = vadd.f32 %v2193_v61, %v1262_v40  ;;  %v1261_v61 = vld [vmem:[%s12376_s17 + $0xe0] sm:$0xff]  ;;  %v2274_v13 = vsel %vm1950_vm4, %v9786_v32, -inf }
 0x551   : > { %v2205_v46 = vpop.f32.mrf.mxu1 }
 0x552   : > { %v9810_v27 = vadd.f32 %v2205_v46, %v1266_v11  ;;  %v1267_v46 = vld [vmem:[%s12376_s17 + $0x110] sm:$0xff] }
 0x553   : > { %v2209_v8 = vpop.f32.mrf.mxu1 }
 0x554   : > { %v2278_v62 = vsel %vm1950_vm4, %v9810_v27, -inf }
 0x555   : > { %v2211_v40 = vpop.f32.mrf.mxu1 }
 0x556   : > { %v9812_v48 = vadd.f32 %v2211_v40, %v1268_v19  ;;  %v9834_v19 = vadd.f32 %v2203_v41, %v1265_v29  ;;  %v9836_v40 = vadd.f32 %v2209_v8, %v1267_v46 }
 0x558   : > { %v2279_v43 = vmax.f32 %v9834_v19, %v2278_v62 }
 0x568   : > { %2252 = vmax.xlane.f32.xlu1 %v2251_v0  ;;  %v2262_v0 = vsel %vm1950_vm4, %v9758_v55, -inf }
 0x569   : > { %v2263_v14 = vmax.f32 %v9792_v34, %v2262_v0  ;;  %v2275_v0 = vmax.f32 %v9820_v38, %v2274_v13 }
 0x56c   : > { %2260 = vmax.xlane.f32.xlu1 %v2259_v47  ;;  %2256 = vmax.xlane.f32.xlu0 %v2255_v31  ;;  %v2270_v47 = vsel %vm1950_vm4, %v9784_v60, -inf  ;;  %v9818_v31 = vadd.f32 %v2191_v59, %v1261_v61  ;;  %v2282_v59 = vsel %vm1950_vm4, %v9812_v48, -inf }
 0x56d   : > { %v2283_v61 = vmax.f32 %v9836_v40, %v2282_v59 }
 0x56e   : > { %v2271_v11 = vmax.f32 %v9818_v31, %v2270_v47 }
 0x570   : > { %2268 = vmax.xlane.f32.xlu1 %v2267_v20  ;;  %2264 = vmax.xlane.f32.xlu0 %v2263_v14  ;;  %v9840_v20 = vpop.permute.xlu1 %2903 }
 0x574   : > { %2276 = vmax.xlane.f32.xlu1 %v2275_v0  ;;  %2272 = vmax.xlane.f32.xlu0 %v2271_v11  ;;  %v9842_v14 = vpop.permute.xlu1 %2899 }
 0x575   : > { %12497 = vst [vmem:[#allocation52_spill] sm:$0xff] %v9842_v14 }
 0x578   : > { %2284 = vmax.xlane.f32.xlu1 %v2283_v61  ;;  %2280 = vmax.xlane.f32.xlu0 %v2279_v43  ;;  %v9844_v13 = vpop.permute.xlu1 %2895 }
 0x579   : > { %12498 = vst [vmem:[#allocation53_spill] sm:$0xff] %v9844_v13 }
 0x5a0   : > { %v2217_v47 = vpop.xlane.xlu0 %2216 }
 0x5a1   : > { %v2286_v41 = vsub.f32 %v9610_v56, %v2217_v47  ;;  %v2287_v8 = vsub.f32 %v9608_v53, %v2217_v47 }
 0x5a3   : > { %v2322_v29 = vmul.f32 1.442695, %v2286_v41  ;;  %v2324_v46 = vmul.f32 1.442695, %v2287_v8 }
 0x5a4   : > { %v2221_v0 = vpop.xlane.xlu1 %2220 }
 0x5a5   : > { %8147 = vpow2.f32 %v2322_v29  ;;  %v2288_v11 = vsub.f32 %v9623_v1, %v2221_v0  ;;  %v2289_v59 = vsub.f32 %v9621_v63, %v2221_v0 }
 0x5a6   : > { %8149 = vpow2.f32 %v2324_v46 }
 0x5a7   : > { %v2326_v62 = vmul.f32 1.442695, %v2288_v11  ;;  %v2328_v61 = vmul.f32 1.442695, %v2289_v59 }
 0x5a8   : > { %v2225_v43 = vpop.xlane.xlu0 %2224 }
 0x5a9   : > { %8151 = vpow2.f32 %v2326_v62  ;;  %v2290_v13 = vsub.f32 %v9636_v10, %v2225_v43  ;;  %v2291_v14 = vsub.f32 %v9634_v9, %v2225_v43 }
 0x5aa   : > { %8153 = vpow2.f32 %v2328_v61 }
 0x5ab   : > { %v2330_v56 = vmul.f32 1.442695, %v2290_v13  ;;  %v2332_v53 = vmul.f32 1.442695, %v2291_v14 }
 0x5ac   : > { %v2229_v47 = vpop.xlane.xlu0 %2228 }
 0x5ad   : > { %8155 = vpow2.f32 %v2330_v56  ;;  %v2292_v41 = vsub.f32 %v9649_v57, %v2229_v47  ;;  %v2293_v1 = vsub.f32 %v9647_v52, %v2229_v47 }
 0x5ae   : > { %8157 = vpow2.f32 %v2332_v53 }
 0x5af   : > { %v2334_v63 = vmul.f32 1.442695, %v2292_v41  ;;  %v2336_v8 = vmul.f32 1.442695, %v2293_v1 }
 0x5b0   : > { %v2233_v29 = vpop.xlane.xlu0 %2232 }
 0x5b1   : > { %8159 = vpow2.f32 %v2334_v63  ;;  %v2294_v46 = vsub.f32 %v9662_v4, %v2233_v29  ;;  %v2295_v10 = vsub.f32 %v9660_v3, %v2233_v29 }
 0x5b2   : > { %v9856_v0 = vpop.eup %8147  ;;  %8161 = vpow2.f32 %v2336_v8 }
 0x5b3   : > { %v9858_v9 = vpop.eup %8149  ;;  %v2338_v14 = vmul.f32 1.442695, %v2294_v46  ;;  %v2340_v13 = vmul.f32 1.442695, %v2295_v10 }
 0x5b4   : > { %v2237_v11 = vpop.xlane.xlu1 %2236  ;;  %v2394_v52 = vsel %vm1950_vm4, %v9858_v9, 0.0 }
 0x5b5   : > { %8163 = vpow2.f32 %v2338_v14  ;;  %v2296_v57 = vsub.f32 %v9675_v50, %v2237_v11  ;;  %v2297_v59 = vsub.f32 %v9673_v49, %v2237_v11  ;;  %v2395_v4 = vadd.f32 %v9856_v0, %v2394_v52 }
 0x5b6   : > { %v9865_v62 = vpop.eup %8151  ;;  %8165 = vpow2.f32 %v2340_v13 }
 0x5b7   : > { %v9867_v3 = vpop.eup %8153  ;;  %v2342_v61 = vmul.f32 1.442695, %v2296_v57  ;;  %v2344_v43 = vmul.f32 1.442695, %v2297_v59  ;;  %2396 = vadd.xlane.f32.xlu0 %v2395_v4 }
 0x5b8   : > { %v2241_v56 = vpop.xlane.xlu0 %2240  ;;  %v2398_v53 = vsel %vm1950_vm4, %v9867_v3, 0.0 }
 0x5b9   : > { %8167 = vpow2.f32 %v2342_v61  ;;  %v2298_v47 = vsub.f32 %v9688_v5, %v2241_v56  ;;  %v2299_v50 = vsub.f32 %v9686_v26, %v2241_v56  ;;  %v2399_v49 = vadd.f32 %v9865_v62, %v2398_v53 }
 0x5ba   : > { %v9874_v41 = vpop.eup %8155  ;;  %8169 = vpow2.f32 %v2344_v43 }
 0x5bb   : > { %v9876_v1 = vpop.eup %8157  ;;  %v2346_v63 = vmul.f32 1.442695, %v2298_v47  ;;  %v2348_v8 = vmul.f32 1.442695, %v2299_v50  ;;  %2400 = vadd.xlane.f32.xlu1 %v2399_v49 }
 0x5bc   : > { %v2245_v29 = vpop.xlane.xlu1 %2244  ;;  %v2402_v46 = vsel %vm1950_vm4, %v9876_v1, 0.0 }
 0x5bd   : > { %8171 = vpow2.f32 %v2346_v63  ;;  %v2300_v10 = vsub.f32 %v9701_v51, %v2245_v29  ;;  %v2301_v5 = vsub.f32 %v9699_v58, %v2245_v29  ;;  %v2403_v26 = vadd.f32 %v9874_v41, %v2402_v46 }
 0x5be   : > { %v9883_v14 = vpop.eup %8159  ;;  %8173 = vpow2.f32 %v2348_v8 }
 0x5bf   : > { %v9885_v13 = vpop.eup %8161  ;;  %v2350_v11 = vmul.f32 1.442695, %v2300_v10  ;;  %v2352_v52 = vmul.f32 1.442695, %v2301_v5  ;;  %2404 = vadd.xlane.f32.xlu0 %v2403_v26 }
 0x5c0   : > { %v2406_v57 = vsel %vm1950_vm4, %v9885_v13, 0.0  ;;  %v2249_v26 = vpop.xlane.xlu0 %2248 }
 0x5c1   : > { %8175 = vpow2.f32 %v2350_v11  ;;  %v2407_v59 = vadd.f32 %v9883_v14, %v2406_v57  ;;  %v2303_v11 = vsub.f32 %v9712_v7, %v2249_v26  ;;  %v2302_v57 = vsub.f32 %v9714_v6, %v2249_v26 }
 0x5c2   : > { %v9890_v4 = vpop.eup %8163  ;;  %8177 = vpow2.f32 %v2352_v52  ;;  %v9927_v52 = vpop.permute.xlu1 %2891 }
 0x5c3   : > { %v9892_v58 = vpop.eup %8165  ;;  %2408 = vadd.xlane.f32.xlu1 %v2407_v59  ;;  %v2356_v59 = vmul.f32 1.442695, %v2303_v11 }
 0x5c4   : > { %v2410_v51 = vsel %vm1950_vm4, %v9892_v58, 0.0 }
 0x5c5   : > { %v2411_v61 = vadd.f32 %v9890_v4, %v2410_v51  ;;  %v9930_v51 = vpop.permute.xlu0 %2893  ;;  %8179 = vpow2.f32 %v2356_v59 }
 0x5c6   : > { %v9897_v43 = vpop.eup %8167 }
 0x5c7   : > { %v9899_v56 = vpop.eup %8169  ;;  %2412 = vadd.xlane.f32.xlu0 %v2411_v61 }
 0x5c8   : > { %v2414_v53 = vsel %vm1950_vm4, %v9899_v56, 0.0 }
 0x5c9   : > { %v2415_v47 = vadd.f32 %v9897_v43, %v2414_v53 }
 0x5ca   : > { %v9904_v50 = vpop.eup %8171 }
 0x5cb   : > { %v9906_v49 = vpop.eup %8173  ;;  %2416 = vadd.xlane.f32.xlu0 %v2415_v47 }
 0x5cc   : > { %v2418_v63 = vsel %vm1950_vm4, %v9906_v49, 0.0 }
 0x5cd   : > { %v2419_v8 = vadd.f32 %v9904_v50, %v2418_v63 }
 0x5ce   : > { %v9911_v29 = vpop.eup %8175 }
 0x5cf   : > { %12499 = vst [vmem:[#allocation54_spill] sm:$0xff] %v9911_v29  ;;  %v9913_v46 = vpop.eup %8177  ;;  %2420 = vadd.xlane.f32.xlu1 %v2419_v8 }
 0x5d0   : > { %v2422_v10 = vsel %vm1950_vm4, %v9913_v46, 0.0 }
 0x5d1   : > { %v2423_v5 = vadd.f32 %v9911_v29, %v2422_v10  ;;  %v2354_v10 = vmul.f32 1.442695, %v2302_v57 }
 0x5d3   : > { %2424 = vadd.xlane.f32.xlu0 %v2423_v5 }
 0x5e0   : > { %2887 = vrot.lane.b32.xlu1 %v9331_v25, %s8853_s5 }
 0x5e4   : > { %2885 = vrot.lane.b32.xlu1 %v9333_v28, %s8853_s5 }
 0x5e8   : > { %2883 = vrot.lane.b32.xlu1 %v9327_v24, %s8853_s5 }
 0x5e9   : > { %2889 = vrot.lane.b32.xlu0 %v9337_v30, %s8853_s5 }
 0x5f1   : > { %v2253_v61 = vpop.xlane.xlu1 %2252 }
 0x5f2   : > { %v2304_v53 = vsub.f32 %v9743_v33, %v2253_v61  ;;  %v2305_v47 = vsub.f32 %v9726_v17, %v2253_v61 }
 0x5f4   : > { %v2358_v63 = vmul.f32 1.442695, %v2304_v53  ;;  %v2360_v8 = vmul.f32 1.442695, %v2305_v47 }
 0x5f5   : > { %v2257_v5 = vpop.xlane.xlu0 %2256  ;;  %v2261_v24 = vpop.xlane.xlu1 %2260 }
 0x5f6   : > { %8181 = vpow2.f32 %v2358_v63  ;;  %v2306_v7 = vsub.f32 %v9766_v42, %v2257_v5  ;;  %v2307_v28 = vsub.f32 %v9737_v36, %v2257_v5  ;;  %v2308_v6 = vsub.f32 %v9768_v18, %v2261_v24 }
 0x5f7   : > { %8183 = vpow2.f32 %v2360_v8  ;;  %v2309_v26 = vsub.f32 %v9739_v2, %v2261_v24 }
 0x5f8   : > { %v2362_v11 = vmul.f32 1.442695, %v2306_v7  ;;  %v2364_v33 = vmul.f32 1.442695, %v2307_v28  ;;  %v2366_v29 = vmul.f32 1.442695, %v2308_v6  ;;  %8185 = vpow2.f32 %v2354_v10 }
 0x5f9   : > { %v2368_v17 = vmul.f32 1.442695, %v2309_v26  ;;  %v2265_v61 = vpop.xlane.xlu0 %2264  ;;  %v2269_v57 = vpop.xlane.xlu1 %2268 }
 0x5fa   : > { %8187 = vpow2.f32 %v2362_v11  ;;  %v2310_v59 = vsub.f32 %v9792_v34, %v2265_v61  ;;  %v2311_v53 = vsub.f32 %v9758_v55, %v2265_v61  ;;  %v2312_v42 = vsub.f32 %v9794_v39, %v2269_v57  ;;  %v9946_v26 = vpop.eup %8179 }
 0x5fb   : > { %8189 = vpow2.f32 %v2364_v33  ;;  %v2313_v36 = vsub.f32 %v9760_v15, %v2269_v57 }
 0x5fc   : > { %8191 = vpow2.f32 %v2366_v29  ;;  %v2370_v18 = vmul.f32 1.442695, %v2310_v59  ;;  %v2372_v24 = vmul.f32 1.442695, %v2311_v53  ;;  %v2374_v2 = vmul.f32 1.442695, %v2312_v42 }
 0x5fd   : > { %8193 = vpow2.f32 %v2368_v17  ;;  %v2376_v28 = vmul.f32 1.442695, %v2313_v36  ;;  %v2273_v47 = vpop.xlane.xlu0 %2272  ;;  %v2277_v63 = vpop.xlane.xlu1 %2276 }
 0x5fe   : > { %8195 = vpow2.f32 %v2370_v18  ;;  %v2314_v8 = vsub.f32 %v9818_v31, %v2273_v47  ;;  %v2315_v34 = vsub.f32 %v9784_v60, %v2273_v47  ;;  %v2316_v55 = vsub.f32 %v9820_v38, %v2277_v63 }
 0x5ff   : > { %8197 = vpow2.f32 %v2372_v24  ;;  %v2317_v39 = vsub.f32 %v9786_v32, %v2277_v63 }
 0x600   : > { %8199 = vpow2.f32 %v2374_v2  ;;  %v2378_v15 = vmul.f32 1.442695, %v2314_v8  ;;  %v2380_v29 = vmul.f32 1.442695, %v2315_v34  ;;  %v2382_v10 = vmul.f32 1.442695, %v2316_v55 }
 0x601   : > { %8201 = vpow2.f32 %v2376_v28  ;;  %v2384_v5 = vmul.f32 1.442695, %v2317_v39  ;;  %v2285_v7 = vpop.xlane.xlu1 %2284  ;;  %v2281_v6 = vpop.xlane.xlu0 %2280 }
 0x602   : > { %8203 = vpow2.f32 %v2378_v15  ;;  %v2320_v31 = vsub.f32 %v9836_v40, %v2285_v7  ;;  %v2321_v60 = vsub.f32 %v9812_v48, %v2285_v7  ;;  %v2318_v38 = vsub.f32 %v9834_v19, %v2281_v6 }
 0x603   : > { %v9951_v11 = vpop.eup %8181  ;;  %8205 = vpow2.f32 %v2380_v29  ;;  %v2319_v32 = vsub.f32 %v9810_v27, %v2281_v6  ;;  %v2426_v27 = vsel %vm1950_vm4, %v9946_v26, 0.0 }
 0x604   : > { %v9954_v33 = vpop.eup %8183  ;;  %8207 = vpow2.f32 %v2382_v10  ;;  %v2390_v17 = vmul.f32 1.442695, %v2320_v31  ;;  %v2392_v61 = vmul.f32 1.442695, %v2321_v60  ;;  %v2386_v48 = vmul.f32 1.442695, %v2318_v38 }
 0x605   : > { %8209 = vpow2.f32 %v2384_v5  ;;  %v2388_v57 = vmul.f32 1.442695, %v2319_v32  ;;  %v2430_v59 = vsel %vm1950_vm4, %v9954_v33, 0.0  ;;  %v9958_v40 = vpop.eup %8185 }
 0x606   : > { %8211 = vpow2.f32 %v2390_v17  ;;  %v2431_v19 = vadd.f32 %v9951_v11, %v2430_v59  ;;  %v2427_v24 = vadd.f32 %v9958_v40, %v2426_v27 }
 0x607   : > { %v9961_v53 = vpop.eup %8187  ;;  %8213 = vpow2.f32 %v2392_v61 }
 0x608   : > { %v9965_v42 = vpop.eup %8189  ;;  %2432 = vadd.xlane.f32.xlu0 %v2431_v19  ;;  %8215 = vpow2.f32 %v2388_v57 }
 0x609   : > { %v9967_v36 = vpop.eup %8191  ;;  %8217 = vpow2.f32 %v2386_v48  ;;  %v2434_v47 = vsel %vm1950_vm4, %v9965_v42, 0.0 }
 0x60a   : > { %v9969_v18 = vpop.eup %8193  ;;  %v2435_v39 = vadd.f32 %v9961_v53, %v2434_v47 }
 0x60b   : > { %v9972_v2 = vpop.eup %8195  ;;  %v2438_v28 = vsel %vm1950_vm4, %v9969_v18, 0.0 }
 0x60c   : > { %v9978_v63 = vpop.eup %8197  ;;  %2428 = vadd.xlane.f32.xlu1 %v2427_v24  ;;  %v2439_v8 = vadd.f32 %v9967_v36, %v2438_v28 }
 0x60d   : > { %v9981_v34 = vpop.eup %8199  ;;  %v2442_v10 = vsel %vm1950_vm4, %v9978_v63, 0.0 }
 0x60e   : > { %v9983_v55 = vpop.eup %8201  ;;  %2440 = vadd.xlane.f32.xlu0 %v2439_v8  ;;  %v2443_v60 = vadd.f32 %v9972_v2, %v2442_v10 }
 0x60f   : > { %v9986_v15 = vpop.eup %8203  ;;  %v2446_v29 = vsel %vm1950_vm4, %v9983_v55, 0.0 }
 0x610   : > { %v9992_v5 = vpop.eup %8205  ;;  %2436 = vadd.xlane.f32.xlu1 %v2435_v39  ;;  %v2447_v7 = vadd.f32 %v9981_v34, %v2446_v29  ;;  %v12501_v39 = vld [vmem:[#allocation42_spill] sm:$0xff]  ;;  %v12502_v29 = vld [vmem:[#allocation37_spill] sm:$0xff] }
 0x611   : > { %v9995_v6 = vpop.eup %8207  ;;  %v2450_v17 = vsel %vm1950_vm4, %v9992_v5, 0.0 }
 0x612   : > { %v9997_v31 = vpop.eup %8209  ;;  %2448 = vadd.xlane.f32.xlu0 %v2447_v7  ;;  %v2451_v19 = vadd.f32 %v9986_v15, %v2450_v17  ;;  %v12505_v7 = vld [vmem:[#allocation46_spill] sm:$0xff] }
 0x613   : > { %v10000_v38 = vpop.eup %8211  ;;  %v2454_v32 = vsel %vm1950_vm4, %v9997_v31, 0.0 }
 0x614   : > { %v10006_v61 = vpop.eup %8213  ;;  %2444 = vadd.xlane.f32.xlu1 %v2443_v60  ;;  %v2455_v57 = vadd.f32 %v9995_v6, %v2454_v32  ;;  %v12506_v32 = vld [vmem:[#allocation40_spill] sm:$0xff] }
 0x615   : > { %v2462_v59 = vsel %vm1950_vm4, %v10006_v61, 0.0  ;;  %v10011_v48 = vpop.eup %8215 }
 0x616   : > { %2456 = vadd.xlane.f32.xlu0 %v2455_v57  ;;  %v2463_v27 = vadd.f32 %v10000_v38, %v2462_v59  ;;  %v10015_v24 = vpop.eup %8217  ;;  %v2458_v28 = vsel %vm1950_vm4, %v10011_v48, 0.0  ;;  %v12507_v59 = vld [vmem:[#allocation48_spill] sm:$0xff] }
 0x617   : > { %v2459_v47 = vadd.f32 %v10015_v24, %v2458_v28  ;;  %v12508_v28 = vld [vmem:[#allocation41_spill] sm:$0xff] }
 0x618   : > { %2452 = vadd.xlane.f32.xlu1 %v2451_v19 }
 0x61a   : > { %2464 = vadd.xlane.f32.xlu0 %v2463_v27 }
 0x61c   : > { %2460 = vadd.xlane.f32.xlu1 %v2459_v47 }
 0x62d   : > { %2879 = vrot.lane.b32.xlu1 %v9323_v23, %s8853_s5 }
 0x630   : > { %2881 = vrot.lane.b32.xlu0 %v9329_v45, %s8853_s5 }
 0x631   : > { %2877 = vrot.lane.b32.xlu1 %v9325_v54, %s8853_s5 }
 0x634   : > { %2837 = vrot.lane.b32.xlu0 %v9486_v12, %s8854_s7  ;;  %v12500_v12 = vld [vmem:[#allocation35_spill] sm:$0xff] }
 0x635   : > { %2875 = vrot.lane.b32.xlu1 %v9319_v21, %s8853_s5 }
 0x638   : > { %2841 = vrot.lane.b32.xlu0 %v9507_v16, %s8854_s7 }
 0x639   : > { %2873 = vrot.lane.b32.xlu1 %v9321_v22, %s8853_s5 }
 0x63c   : > { %2845 = vrot.lane.b32.xlu0 %v9520_v44, %s8854_s7  ;;  %v12503_v44 = vld [vmem:[#allocation44_spill] sm:$0xff] }
 0x63d   : > { %2907 = vrot.lane.b32.xlu1 %v9377_v37, %s8853_s5 }
 0x640   : > { %2849 = vrot.lane.b32.xlu0 %v9532_v35, %s8854_s7  ;;  %v2397_v8 = vpop.xlane.xlu0 %2396  ;;  %v12504_v35 = vld [vmem:[#allocation39_spill] sm:$0xff] }
 0x641   : > { %8219 = vrcp.f32 %v2397_v8  ;;  %2905 = vrot.lane.b32.xlu1 %v12500_v12, %s8853_s5  ;;  %s8855_s5 = smov 48  }
 0x644   : > { %2853 = vrot.lane.b32.xlu0 %v12501_v39, %s8854_s7  ;;  %v2401_v16 = vpop.xlane.xlu1 %2400 }
 0x645   : > { %8221 = vrcp.f32 %v2401_v16  ;;  %2839 = vrot.lane.b32.xlu1 %v12502_v29, %s8854_s7 }
 0x648   : > { %2857 = vrot.lane.b32.xlu0 %v12503_v44, %s8854_s7  ;;  %v2405_v10 = vpop.xlane.xlu0 %2404  ;;  %v12509_v44 = vld [vmem:[#allocation50_spill] sm:$0xff] }
 0x649   : > { %8223 = vrcp.f32 %v2405_v10  ;;  %2843 = vrot.lane.b32.xlu1 %v12504_v35, %s8854_s7 }
 0x64c   : > { %2861 = vrot.lane.b32.xlu0 %v12505_v7, %s8854_s7  ;;  %v2409_v60 = vpop.xlane.xlu1 %2408 }
 0x64d   : > { %8225 = vrcp.f32 %v2409_v60  ;;  %2847 = vrot.lane.b32.xlu1 %v12506_v32, %s8854_s7 }
 0x64e   : > { %v8220_v17 = vpop.eup %8219 }
 0x64f   : > { %v2484_v57 = vmul.f32 %v8220_v17, %v2397_v8  ;;  %v12510_v8 = vld [vmem:[#allocation43_spill] sm:$0xff] }
 0x650   : > { %2865 = vrot.lane.b32.xlu0 %v12507_v59, %s8854_s7  ;;  %v2413_v19 = vpop.xlane.xlu0 %2412 }
 0x651   : > { %v2502_v27 = vsub.f32 2.0, %v2484_v57  ;;  %8227 = vrcp.f32 %v2413_v19  ;;  %2851 = vrot.lane.b32.xlu1 %v12508_v28, %s8854_s7 }
 0x652   : > { %v8222_v47 = vpop.eup %8221 }
 0x653   : > { %v2520_v39 = vmul.f32 %v8220_v17, %v2502_v27  ;;  %v2485_v29 = vmul.f32 %v8222_v47, %v2401_v16  ;;  %v12511_v16 = vld [vmem:[#allocation33_spill] sm:$0xff] }
 0x654   : > { %2869 = vrot.lane.b32.xlu0 %v12509_v44, %s8854_s7  ;;  %v2417_v35 = vpop.xlane.xlu0 %2416 }
 0x655   : > { %v2538_v7 = vmul.f32 %v9856_v0, %v2520_v39  ;;  %v2503_v32 = vsub.f32 2.0, %v2485_v29  ;;  %8229 = vrcp.f32 %v2417_v35  ;;  %2855 = vrot.lane.b32.xlu1 %v12510_v8, %s8854_s7  ;;  %v2539_v57 = vmul.f32 %v9858_v9, %v2520_v39  ;;  %v12512_v0 = vld [vmem:[#allocation45_spill] sm:$0xff] }
 0x656   : > { %v8224_v59 = vpop.eup %8223 }
 0x657   : > { %v2521_v12 = vmul.f32 %v8222_v47, %v2503_v32  ;;  %v2486_v37 = vmul.f32 %v8224_v59, %v2405_v10  ;;  %7182 = vmatprep.mubr.msk.f32.mxu0 %vm1950_vm4, %v2539_v57  ;;  %v12513_v47 = vmov 0.0   ;;  %v12517_v57 = vld [vmem:[#allocation31_spill] sm:$0xff] }
 0x658   : > { %3542 = vrot.lane.b32.xlu0 %v12511_v16, %s8855_s5  ;;  %v2421_v17 = vpop.xlane.xlu1 %2420  ;;  %2747 = vmatmul.mubr.f32.vlgmr.msra.gmra.mxu0 %v2538_v7  ;;  %v12515_v7 = vld [vmem:[#allocation36_spill] sm:$0xff] }
 0x659   : > { %v2504_v27 = vsub.f32 2.0, %v2486_v37  ;;  %8231 = vrcp.f32 %v2421_v17  ;;  %7200 = vmatpush1.xpose.msk.msra.mxu0 %vm1950_vm4, %v9840_v20  ;;  %2859 = vrot.lane.b32.xlu1 %v12512_v0, %s8854_s7  ;;  %v2541_v9 = vmul.f32 %v9867_v3, %v2521_v12  ;;  %v2540_v10 = vmul.f32 %v9865_v62, %v2521_v12  ;;  %v12514_v37 = vld [vmem:[#allocation30_spill] sm:$0xff]  ;;  %v12516_v3 = vld [vmem:[#allocation47_spill] sm:$0xff]  ;;  %v12518_v16 = vld [vmem:[#allocation52_spill] sm:$0xff] }
 0x65a   : > { %v8226_v28 = vpop.eup %8225  ;;  %2983 = vmatprep.subr.mxu0 %v12513_v47 }
 0x65b   : > { %v2522_v39 = vmul.f32 %v8224_v59, %v2504_v27  ;;  %v2487_v29 = vmul.f32 %v8226_v28, %v2409_v60  ;;  %7183 = vmatprep.mubr.msk.f32.mxu0 %vm1950_vm4, %v2541_v9  ;;  %v12519_v27 = vld [vmem:[#allocation49_spill] sm:$0xff] }
 0x65c   : > { %3540 = vrot.lane.b32.xlu0 %v12514_v37, %s8855_s5  ;;  %2752 = vmatmul.mubr.f32.gmra.mxu0 %v2540_v10  ;;  %v2425_v44 = vpop.xlane.xlu0 %2424  ;;  %v12520_v10 = vld [vmem:[#allocation29_spill] sm:$0xff] }
 0x65d   : > { %v2505_v20 = vsub.f32 2.0, %v2487_v29  ;;  %7201 = vmatpush1.xpose.msk.msra.mxu0 %vm1950_vm4, %v12515_v7  ;;  %8233 = vrcp.f32 %v2425_v44  ;;  %2863 = vrot.lane.b32.xlu1 %v12516_v3, %s8854_s7  ;;  %v2543_v62 = vmul.f32 %v9876_v1, %v2522_v39  ;;  %v2542_v12 = vmul.f32 %v9874_v41, %v2522_v39  ;;  %v12521_v39 = vld [vmem:[#allocation38_spill] sm:$0xff]  ;;  %v12522_v29 = vld [vmem:[#allocation51_spill] sm:$0xff] }
 0x65e   : > { %v8228_v60 = vpop.eup %8227  ;;  %2985 = vmatprep.subr.mxu0 %v12513_v47  ;;  %v12523_v7 = vld [vmem:[#allocation27_spill] sm:$0xff] }
 0x65f   : > { %v2523_v32 = vmul.f32 %v8226_v28, %v2505_v20  ;;  %v2488_v8 = vmul.f32 %v8228_v60, %v2413_v19  ;;  %7184 = vmatprep.mubr.msk.f32.mxu0 %vm1950_vm4, %v2543_v62  ;;  %v12524_v62 = vld [vmem:[#allocation53_spill] sm:$0xff] }
 0x660   : > { %3538 = vrot.lane.b32.xlu0 %v12517_v57, %s8855_s5  ;;  %2757 = vmatmul.mubr.f32.gmra.mxu0 %v2542_v12  ;;  %v12525_v12 = vld [vmem:[#allocation32_spill] sm:$0xff] }
 0x661   : > { %v2506_v59 = vsub.f32 2.0, %v2488_v8  ;;  %7202 = vmatpush1.xpose.msk.msra.mxu0 %vm1950_vm4, %v12518_v16  ;;  %2867 = vrot.lane.b32.xlu1 %v12519_v27, %s8854_s7  ;;  %v2545_v41 = vmul.f32 %v9885_v13, %v2523_v32  ;;  %v2544_v1 = vmul.f32 %v9883_v14, %v2523_v32  ;;  %v12526_v57 = vld [vmem:[#allocation28_spill] sm:$0xff] }
 0x662   : > { %v8230_v0 = vpop.eup %8229  ;;  %2987 = vmatprep.subr.mxu0 %v12513_v47 }
 0x663   : > { %v2524_v19 = vmul.f32 %v8228_v60, %v2506_v59  ;;  %v2489_v9 = vmul.f32 %v8230_v0, %v2417_v35  ;;  %7185 = vmatprep.mubr.msk.f32.mxu0 %vm1950_vm4, %v2545_v41  ;;  %v2890_v59 = vpop.permute.xlu0 %2889 }
 0x664   : > { %3534 = vrot.lane.b32.xlu0 %v12520_v10, %s8855_s5  ;;  %2762 = vmatmul.mubr.f32.gmra.mxu0 %v2544_v1 }
 0x665   : > { %v2507_v28 = vsub.f32 2.0, %v2489_v9  ;;  %7203 = vmatpush1.xpose.msk.msra.mxu0 %vm1950_vm4, %v12521_v39  ;;  %2871 = vrot.lane.b32.xlu1 %v12522_v29, %s8854_s7  ;;  %v2547_v14 = vmul.f32 %v9892_v58, %v2524_v19  ;;  %v2546_v13 = vmul.f32 %v9890_v4, %v2524_v19 }
 0x666   : > { %v8232_v37 = vpop.eup %8231  ;;  %2989 = vmatprep.subr.mxu0 %v12513_v47 }
 0x667   : > { %v2525_v35 = vmul.f32 %v8230_v0, %v2507_v28  ;;  %v2490_v20 = vmul.f32 %v8232_v37, %v2421_v17  ;;  %7186 = vmatprep.mubr.msk.f32.mxu0 %vm1950_vm4, %v2547_v14 }
 0x668   : > { %3532 = vrot.lane.b32.xlu0 %v12523_v7, %s8855_s5  ;;  %2767 = vmatmul.mubr.f32.gmra.mxu0 %v2546_v13 }
 0x669   : > { %v2508_v3 = vsub.f32 2.0, %v2490_v20  ;;  %7204 = vmatpush1.xpose.msk.msra.mxu0 %vm1950_vm4, %v12524_v62  ;;  %3544 = vrot.lane.b32.xlu1 %v12525_v12, %s8855_s5  ;;  %v2549_v4 = vmul.f32 %v9899_v56, %v2525_v35  ;;  %v2548_v58 = vmul.f32 %v9897_v43, %v2525_v35 }
 0x66a   : > { %v8234_v60 = vpop.eup %8233  ;;  %2991 = vmatprep.subr.mxu0 %v12513_v47 }
 0x66b   : > { %v2526_v17 = vmul.f32 %v8232_v37, %v2508_v3  ;;  %v2491_v32 = vmul.f32 %v8234_v60, %v2425_v44  ;;  %7187 = vmatprep.mubr.msk.f32.mxu0 %vm1950_vm4, %v2549_v4 }
 0x66c   : > { %3530 = vrot.lane.b32.xlu0 %v9337_v30, %s8855_s5  ;;  %2772 = vmatmul.mubr.f32.gmra.mxu0 %v2548_v58 }
 0x66d   : > { %v2509_v8 = vsub.f32 2.0, %v2491_v32  ;;  %7205 = vmatpush1.xpose.msk.msra.mxu0 %vm1950_vm4, %v9930_v51  ;;  %3536 = vrot.lane.b32.xlu1 %v12526_v57, %s8855_s5  ;;  %v2551_v43 = vmul.f32 %v9906_v49, %v2526_v17  ;;  %v2550_v56 = vmul.f32 %v9904_v50, %v2526_v17  ;;  %v12527_v49 = vld [vmem:[#allocation54_spill] sm:$0xff]  ;;  %v2888_v50 = vpop.permute.xlu1 %2887 }
 0x66e   : > { %2993 = vmatprep.subr.mxu0 %v12513_v47 }
 0x66f   : > { %v2527_v44 = vmul.f32 %v8234_v60, %v2509_v8  ;;  %7188 = vmatprep.mubr.msk.f32.mxu0 %vm1950_vm4, %v2551_v43 }
 0x670   : > { %3522 = vrot.lane.b32.xlu0 %v9329_v45, %s8855_s5  ;;  %2777 = vmatmul.mubr.f32.gmra.mxu0 %v2550_v56  ;;  %v12528_v45 = vld [vmem:[#allocation26_spill] sm:$0xff] }
 0x671   : > { %7206 = vmatpush1.xpose.msk.msra.mxu0 %vm1950_vm4, %v9927_v52  ;;  %3528 = vrot.lane.b32.xlu1 %v9331_v25, %s8855_s5  ;;  %v2553_v30 = vmul.f32 %v9913_v46, %v2527_v44  ;;  %v2552_v51 = vmul.f32 %v12527_v49, %v2527_v44  ;;  %v12529_v25 = vld [vmem:[#allocation25_spill] sm:$0xff]  ;;  %v2886_v46 = vpop.permute.xlu1 %2885 }
 0x672   : > { %2995 = vmatprep.subr.mxu0 %v12513_v47 }
 0x673   : > { %7189 = vmatprep.mubr.msk.f32.mxu0 %vm1950_vm4, %v2553_v30 }
 0x674   : > { %2782 = vmatmul.mubr.f32.gmra.mxu0 %v2552_v51 }
 0x675   : > { %7207 = vmatpush1.xpose.msk.msra.mxu0 %vm1950_vm4, %v2890_v59  ;;  %3526 = vrot.lane.b32.xlu1 %v12528_v45, %s8855_s5  ;;  %v2884_v52 = vpop.permute.xlu1 %2883 }
 0x676   : > { %2997 = vmatprep.subr.mxu0 %v12513_v47 }
 0x679   : > { %7208 = vmatpush1.xpose.msk.msra.mxu0 %vm1950_vm4, %v2888_v50  ;;  %3524 = vrot.lane.b32.xlu1 %v12529_v25, %s8855_s5 }
 0x67a   : > { %2999 = vmatprep.subr.mxu0 %v12513_v47 }
 0x67d   : > { %7209 = vmatpush1.xpose.msk.msra.mxu0 %vm1950_vm4, %v2886_v46 }
 0x67e   : > { %3001 = vmatprep.subr.mxu0 %v12513_v47 }
 0x681   : > { %7210 = vmatpush1.xpose.msk.msra.mxu0 %vm1950_vm4, %v2884_v52 }
 0x682   : > { %3003 = vmatprep.subr.mxu0 %v12513_v47 }
 0x691   : > { %v2433_v16 = vpop.xlane.xlu0 %2432 }
 0x692   : > { %8235 = vrcp.f32 %v2433_v16 }
 0x695   : > { %v2429_v27 = vpop.xlane.xlu1 %2428 }
 0x696   : > { %8237 = vrcp.f32 %v2429_v27 }
 0x697   : > { %v2441_v41 = vpop.xlane.xlu0 %2440 }
 0x698   : > { %8239 = vrcp.f32 %v2441_v41 }
 0x699   : > { %v2437_v1 = vpop.xlane.xlu1 %2436 }
 0x69a   : > { %8241 = vrcp.f32 %v2437_v1 }
 0x69b   : > { %v2449_v0 = vpop.xlane.xlu0 %2448 }
 0x69d   : > { %v2445_v19 = vpop.xlane.xlu1 %2444 }
 0x69e   : > { %8243 = vrcp.f32 %v2445_v19 }
 0x69f   : > { %v8236_v9 = vpop.eup %8235  ;;  %v10147_v10 = vpop.xlane.xlu0 %2456  ;;  %8245 = vrcp.f32 %v2449_v0 }
 0x6a0   : > { %v2493_v28 = vmul.f32 %v8236_v9, %v2433_v16 }
 0x6a1   : > { %v2453_v39 = vpop.xlane.xlu1 %2452 }
 0x6a2   : > { %v2511_v13 = vsub.f32 2.0, %v2493_v28  ;;  %8247 = vrcp.f32 %v2453_v39 }
 0x6a3   : > { %v8238_v29 = vpop.eup %8237  ;;  %v10149_v14 = vpop.xlane.xlu0 %2464  ;;  %8249 = vrcp.f32 %v10147_v10 }
 0x6a4   : > { %v2492_v37 = vmul.f32 %v8238_v29, %v2429_v27  ;;  %v2529_v12 = vmul.f32 %v8236_v9, %v2511_v13 }
 0x6a5   : > { %v8240_v35 = vpop.eup %8239  ;;  %v10151_v20 = vpop.xlane.xlu1 %2460 }
 0x6a6   : > { %v2510_v7 = vsub.f32 2.0, %v2492_v37  ;;  %v2495_v58 = vmul.f32 %v8240_v35, %v2441_v41  ;;  %8251 = vrcp.f32 %v10151_v20  ;;  %v2557_v51 = vmul.f32 %v9954_v33, %v2529_v12 }
 0x6a7   : > { %v8242_v3 = vpop.eup %8241  ;;  %v2882_v62 = vpop.permute.xlu0 %2881  ;;  %8253 = vrcp.f32 %v10149_v14 }
 0x6a8   : > { %v2528_v4 = vmul.f32 %v8238_v29, %v2510_v7  ;;  %v2494_v60 = vmul.f32 %v8242_v3, %v2437_v1  ;;  %7211 = vmatpush1.xpose.msk.msra.mxu0 %vm1950_vm4, %v2882_v62  ;;  %v2513_v44 = vsub.f32 2.0, %v2495_v58 }
 0x6a9   : > { %v2880_v17 = vpop.permute.xlu1 %2879  ;;  %3005 = vmatprep.subr.mxu0 %v12513_v47 }
 0x6aa   : > { %v2512_v32 = vsub.f32 2.0, %v2494_v60  ;;  %v2555_v8 = vmul.f32 %v9946_v26, %v2528_v4  ;;  %v2554_v56 = vmul.f32 %v9958_v40, %v2528_v4  ;;  %v2556_v40 = vmul.f32 %v9951_v11, %v2529_v12 }
 0x6ab   : > { %v8244_v57 = vpop.eup %8243  ;;  %v10158_v43 = vpop.permute.xlu0 %2837  ;;  %v2531_v45 = vmul.f32 %v8240_v35, %v2513_v44 }
 0x6ac   : > { %v2530_v30 = vmul.f32 %v8242_v3, %v2512_v32  ;;  %v2496_v49 = vmul.f32 %v8244_v57, %v2445_v19  ;;  %7212 = vmatpush1.xpose.msk.msra.mxu0 %vm1950_vm4, %v2880_v17  ;;  %7190 = vmatprep.mubr.msk.f32.mxu0 %vm1950_vm4, %v2555_v8  ;;  %v8246_v50 = vpop.eup %8245 }
 0x6ad   : > { %v2878_v59 = vpop.permute.xlu1 %2877  ;;  %2787 = vmatmul.mubr.f32.gmra.mxu0 %v2554_v56  ;;  %3007 = vmatprep.subr.mxu0 %v12513_v47  ;;  %v2497_v25 = vmul.f32 %v8246_v50, %v2449_v0  ;;  %v2561_v9 = vmul.f32 %v9969_v18, %v2531_v45  ;;  %v2560_v29 = vmul.f32 %v9967_v36, %v2531_v45 }
 0x6ae   : > { %7191 = vmatprep.mubr.msk.f32.mxu0 %vm1950_vm4, %v2557_v51  ;;  %v2514_v46 = vsub.f32 2.0, %v2496_v49  ;;  %v2559_v33 = vmul.f32 %v9965_v42, %v2530_v30  ;;  %v2558_v41 = vmul.f32 %v9961_v53, %v2530_v30 }
 0x6af   : > { %v10167_v26 = vpop.permute.xlu0 %2841  ;;  %v8248_v52 = vpop.eup %8247  ;;  %v2515_v11 = vsub.f32 2.0, %v2497_v25 }
 0x6b0   : > { %7213 = vmatpush1.xpose.msk.msra.mxu0 %vm1950_vm4, %v2878_v59  ;;  %v8250_v1 = vpop.eup %8249  ;;  %v2532_v19 = vmul.f32 %v8244_v57, %v2514_v46  ;;  %v2498_v0 = vmul.f32 %v8248_v52, %v2453_v39 }
 0x6b1   : > { %v2876_v16 = vpop.permute.xlu1 %2875  ;;  %2792 = vmatmul.mubr.f32.gmra.mxu0 %v2556_v40  ;;  %3009 = vmatprep.subr.mxu0 %v12513_v47  ;;  %v2533_v53 = vmul.f32 %v8246_v50, %v2515_v11  ;;  %v2499_v37 = vmul.f32 %v8250_v1, %v10147_v10 }
 0x6b2   : > { %7192 = vmatprep.mubr.msk.f32.mxu0 %vm1950_vm4, %v2559_v33  ;;  %v2516_v35 = vsub.f32 2.0, %v2498_v0  ;;  %v2563_v39 = vmul.f32 %v9978_v63, %v2532_v19  ;;  %v2562_v3 = vmul.f32 %v9972_v2, %v2532_v19 }
 0x6b3   : > { %v10174_v27 = vpop.permute.xlu0 %2845  ;;  %v8252_v13 = vpop.eup %8251  ;;  %v2517_v62 = vsub.f32 2.0, %v2499_v37  ;;  %v2565_v4 = vmul.f32 %v9983_v55, %v2533_v53  ;;  %v2564_v58 = vmul.f32 %v9981_v34, %v2533_v53 }
 0x6b4   : > { %7214 = vmatpush1.xpose.msk.msra.mxu0 %vm1950_vm4, %v2876_v16  ;;  %v8254_v36 = vpop.eup %8253  ;;  %v2534_v12 = vmul.f32 %v8248_v52, %v2516_v35  ;;  %v2500_v10 = vmul.f32 %v8252_v13, %v10151_v20 }
 0x6b5   : > { %v2874_v42 = vpop.permute.xlu1 %2873  ;;  %2797 = vmatmul.mubr.f32.gmra.mxu0 %v2558_v41  ;;  %3011 = vmatprep.subr.mxu0 %v12513_v47  ;;  %v2535_v60 = vmul.f32 %v8250_v1, %v2517_v62  ;;  %v2501_v2 = vmul.f32 %v8254_v36, %v10149_v14 }
 0x6b6   : > { %7193 = vmatprep.mubr.msk.f32.mxu0 %vm1950_vm4, %v2561_v9  ;;  %v2518_v17 = vsub.f32 2.0, %v2500_v10  ;;  %v2567_v20 = vmul.f32 %v9992_v5, %v2534_v12  ;;  %v2566_v55 = vmul.f32 %v9986_v15, %v2534_v12 }
 0x6b7   : > { %v10181_v28 = vpop.permute.xlu0 %2849  ;;  %v2519_v57 = vsub.f32 2.0, %v2501_v2  ;;  %v2569_v56 = vmul.f32 %v9997_v31, %v2535_v60  ;;  %v2568_v5 = vmul.f32 %v9995_v6, %v2535_v60 }
 0x6b8   : > { %7215 = vmatpush1.xpose.msk.msra.mxu0 %vm1950_vm4, %v2874_v42  ;;  %v2536_v34 = vmul.f32 %v8252_v13, %v2518_v17 }
 0x6b9   : > { %v2908_v18 = vpop.permute.xlu1 %2907  ;;  %2802 = vmatmul.mubr.f32.gmra.mxu0 %v2560_v29  ;;  %3041 = vmatprep.subr.mxu0 %v12513_v47  ;;  %v2537_v30 = vmul.f32 %v8254_v36, %v2519_v57 }
 0x6ba   : > { %7194 = vmatprep.mubr.msk.f32.mxu0 %vm1950_vm4, %v2563_v39  ;;  %v2571_v49 = vmul.f32 %v10011_v48, %v2536_v34  ;;  %v2570_v15 = vmul.f32 %v10015_v24, %v2536_v34 }
 0x6bb   : > { %v10189_v7 = vpop.permute.xlu0 %2853  ;;  %v2573_v31 = vmul.f32 %v10006_v61, %v2537_v30  ;;  %v2572_v40 = vmul.f32 %v10000_v38, %v2537_v30 }
 0x6bc   : > { %7216 = vmatpush2.xpose.msk.msra.mxu0 %vm1950_vm4, %v2908_v18 }
 0x6bd   : > { %v2906_v63 = vpop.permute.xlu1 %2905  ;;  %2807 = vmatmul.mubr.f32.gmra.mxu0 %v2562_v3  ;;  %3043 = vmatprep.subr.mxu0 %v12513_v47 }
 0x6be   : > { %7195 = vmatprep.mubr.msk.f32.mxu0 %vm1950_vm4, %v2565_v4 }
 0x6bf   : > { %v10199_v32 = vpop.permute.xlu0 %2857 }
 0x6c0   : > { %7217 = vmatpush2.xpose.msk.msra.mxu0 %vm1950_vm4, %v2906_v63 }
 0x6c1   : > { %v2840_v8 = vpop.permute.xlu1 %2839  ;;  %2812 = vmatmul.mubr.f32.gmra.mxu0 %v2564_v58  ;;  %3622 = vmatprep.subr.mxu0 %v12513_v47 }
 0x6c2   : > { %7196 = vmatprep.mubr.msk.f32.mxu0 %vm1950_vm4, %v2567_v20 }
 0x6c3   : > { %v10207_v44 = vpop.permute.xlu0 %2861 }
 0x6c5   : > { %v2844_v14 = vpop.permute.xlu1 %2843  ;;  %2817 = vmatmul.mubr.f32.gmra.mxu0 %v2566_v55 }
 0x6c6   : > { %7197 = vmatprep.mubr.msk.f32.mxu0 %vm1950_vm4, %v2569_v56 }
 0x6c7   : > { %v10214_v50 = vpop.permute.xlu0 %2865 }
 0x6c9   : > { %v2848_v51 = vpop.permute.xlu1 %2847  ;;  %2822 = vmatmul.mubr.f32.gmra.mxu0 %v2568_v5 }
 0x6ca   : > { %7198 = vmatprep.mubr.msk.f32.mxu0 %vm1950_vm4, %v2571_v49 }
 0x6cb   : > { %v10221_v48 = vpop.permute.xlu0 %2869 }
 0x6cd   : > { %v2852_v59 = vpop.permute.xlu1 %2851  ;;  %2827 = vmatmul.mubr.f32.gmra.mxu0 %v2570_v15 }
 0x6ce   : > { %7199 = vmatprep.mubr.msk.f32.mxu0 %vm1950_vm4, %v2573_v31  ;;  %v8495_v31 = vld [vmem:[%s12376_s17 + $0x8] sm:$0xff] }
 0x6cf   : > { %v3543_v61 = vpop.permute.xlu0 %3542 }
 0x6d1   : > { %v10219_v6 = vpop.permute.xlu1 %2855  ;;  %2832 = vmatmul.mubr.f32.gmra.mxu0 %v2572_v40  ;;  %v8496_v40 = vld [vmem:[%s12376_s17] sm:$0xff] }
 0x6d2   : > { %3045 = vmatprep.mubr.f32.mxu0 %v12513_v47 }
 0x6d3   : > { %v3541_v25 = vpop.permute.xlu0 %3540 }
 0x6d5   : > { %v10224_v45 = vpop.permute.xlu1 %2859  ;;  %7218 = vmatmul.mubr.msk.f32.vlgmr.msra.gmra.mxu0 %vm1950_vm4, %v10158_v43 }
 0x6d6   : > { %3051 = vmatprep.mubr.f32.mxu0 %v12513_v47 }
 0x6d7   : > { %v3539_v43 = vpop.permute.xlu0 %3538 }
 0x6d9   : > { %v10229_v24 = vpop.permute.xlu1 %2863  ;;  %7219 = vmatmul.mubr.msk.f32.gmra.mxu0 %vm1950_vm4, %v2840_v8 }
 0x6da   : > { %3057 = vmatprep.mubr.f32.mxu0 %v12513_v47 }
 0x6dd   : > { %v10233_v38 = vpop.permute.xlu1 %2867  ;;  %7220 = vmatmul.mubr.msk.f32.gmra.mxu0 %vm1950_vm4, %v10167_v26  ;;  %v3535_v26 = vpop.permute.xlu0 %3534 }
 0x6de   : > { %3063 = vmatprep.mubr.f32.mxu0 %v12513_v47 }
 0x6e1   : > { %v10238_v46 = vpop.permute.xlu1 %2871  ;;  %7221 = vmatmul.mubr.msk.f32.gmra.mxu0 %vm1950_vm4, %v2844_v14  ;;  %v3533_v16 = vpop.permute.xlu0 %3532 }
 0x6e2   : > { %3069 = vmatprep.mubr.f32.mxu0 %v12513_v47 }
 0x6e5   : > { %v3545_v33 = vpop.permute.xlu1 %3544  ;;  %7222 = vmatmul.mubr.msk.f32.gmra.mxu0 %vm1950_vm4, %v10174_v27  ;;  %v3531_v41 = vpop.permute.xlu0 %3530 }
 0x6e6   : > { %3623 = vmatpush1.msra.mxu0 %v3545_v33  ;;  %7983 = vmatpush1.msra.mxu1 %v3545_v33 }
 0x6e7   : > { %3624 = vmatprep.subr.mxu0 %v12513_v47  ;;  %7966 = vmatprep.subr.mxu1 %v12513_v47 }
 0x6e8   : > { %3075 = vmatprep.mubr.f32.mxu0 %v12513_v47  ;;  %3625 = vmatpush1.msra.mxu0 %v3543_v61 }
 0x6e9   : > { %7984 = vmatpush1.msra.mxu1 %v3543_v61  ;;  %7223 = vmatmul.mubr.msk.f32.gmra.mxu0 %vm1950_vm4, %v2848_v51  ;;  %v3537_v52 = vpop.permute.xlu1 %3536  ;;  %v3523_v19 = vpop.permute.xlu0 %3522 }
 0x6ea   : > { %3626 = vmatprep.subr.mxu0 %v12513_v47  ;;  %7967 = vmatprep.subr.mxu1 %v12513_v47 }
 0x6eb   : > { %3627 = vmatpush1.msra.mxu0 %v3541_v25  ;;  %7985 = vmatpush1.msra.mxu1 %v3541_v25 }
 0x6ec   : > { %3628 = vmatprep.subr.mxu0 %v12513_v47  ;;  %7968 = vmatprep.subr.mxu1 %v12513_v47 }
 0x6ed   : > { %3081 = vmatprep.mubr.f32.mxu0 %v12513_v47  ;;  %3629 = vmatpush1.msra.mxu0 %v3539_v43  ;;  %v3529_v27 = vpop.permute.xlu1 %3528 }
 0x6ee   : > { %7986 = vmatpush1.msra.mxu1 %v3539_v43  ;;  %7224 = vmatmul.mubr.msk.f32.gmra.mxu0 %vm1950_vm4, %v10181_v28 }
 0x6ef   : > { %3630 = vmatprep.subr.mxu0 %v12513_v47  ;;  %7969 = vmatprep.subr.mxu1 %v12513_v47 }
 0x6f0   : > { %3631 = vmatpush1.msra.mxu0 %v3537_v52  ;;  %7987 = vmatpush1.msra.mxu1 %v3537_v52 }
 0x6f1   : > { %3632 = vmatprep.subr.mxu0 %v12513_v47  ;;  %7970 = vmatprep.subr.mxu1 %v12513_v47  ;;  %v3527_v1 = vpop.permute.xlu1 %3526 }
 0x6f2   : > { %3087 = vmatprep.mubr.f32.mxu0 %v12513_v47  ;;  %3633 = vmatpush1.msra.mxu0 %v3535_v26 }
 0x6f3   : > { %7988 = vmatpush1.msra.mxu1 %v3535_v26  ;;  %7225 = vmatmul.mubr.msk.f32.gmra.mxu0 %vm1950_vm4, %v2852_v59 }
 0x6f4   : > { %3634 = vmatprep.subr.mxu0 %v12513_v47  ;;  %7971 = vmatprep.subr.mxu1 %v12513_v47 }
 0x6f5   : > { %3635 = vmatpush1.msra.mxu0 %v3533_v16  ;;  %7989 = vmatpush1.msra.mxu1 %v3533_v16  ;;  %v3525_v11 = vpop.permute.xlu1 %3524 }
 0x6f6   : > { %3636 = vmatprep.subr.mxu0 %v12513_v47  ;;  %7972 = vmatprep.subr.mxu1 %v12513_v47 }
 0x6f7   : > { %3093 = vmatprep.mubr.f32.mxu0 %v12513_v47  ;;  %3637 = vmatpush1.msra.mxu0 %v3531_v41 }
 0x6f8   : > { %7990 = vmatpush1.msra.mxu1 %v3531_v41  ;;  %7226 = vmatmul.mubr.msk.f32.gmra.mxu0 %vm1950_vm4, %v10189_v7 }
 0x6f9   : > { %3638 = vmatprep.subr.mxu0 %v12513_v47  ;;  %7973 = vmatprep.subr.mxu1 %v12513_v47 }
 0x6fa   : > { %3639 = vmatpush1.msra.mxu0 %v3529_v27  ;;  %7991 = vmatpush1.msra.mxu1 %v3529_v27  ;;  %v8499_v27 = vld [vmem:[%s12376_s17 + $0x28] sm:$0xff] }
 0x6fb   : > { %3640 = vmatprep.subr.mxu0 %v12513_v47  ;;  %7974 = vmatprep.subr.mxu1 %v12513_v47 }
 0x6fc   : > { %3099 = vmatprep.mubr.f32.mxu0 %v12513_v47  ;;  %3641 = vmatpush1.msra.mxu0 %v3527_v1 }
 0x6fd   : > { %7992 = vmatpush1.msra.mxu1 %v3527_v1  ;;  %7227 = vmatmul.mubr.msk.f32.gmra.mxu0 %vm1950_vm4, %v10219_v6  ;;  %v8500_v1 = vld [vmem:[%s12376_s17 + $0x20] sm:$0xff] }
 0x6fe   : > { %3642 = vmatprep.subr.mxu0 %v12513_v47  ;;  %7975 = vmatprep.subr.mxu1 %v12513_v47 }
 0x6ff   : > { %3643 = vmatpush1.msra.mxu0 %v3525_v11  ;;  %7993 = vmatpush1.msra.mxu1 %v3525_v11 }
 0x700   : > { %3644 = vmatprep.subr.mxu0 %v12513_v47  ;;  %7976 = vmatprep.subr.mxu1 %v12513_v47 }
 0x701   : > { %3105 = vmatprep.mubr.f32.mxu0 %v12513_v47  ;;  %3645 = vmatpush1.msra.mxu0 %v3523_v19 }
 0x702   : > { %7994 = vmatpush1.msra.mxu1 %v3523_v19  ;;  %7228 = vmatmul.mubr.msk.f32.gmra.mxu0 %vm1950_vm4, %v10199_v32 }
 0x703   : > { %3111 = vmatprep.mubr.f32.mxu0 %v12513_v47  ;;  %3646 = vmatprep.subr.mxu0 %v12513_v47 }
 0x704   : > { %7977 = vmatprep.subr.mxu1 %v12513_v47 }
 0x706   : > { %7229 = vmatmul.mubr.msk.f32.gmra.mxu0 %vm1950_vm4, %v10224_v45 }
 0x707   : > { %3117 = vmatprep.mubr.f32.mxu0 %v12513_v47 }
 0x70a   : > { %7230 = vmatmul.mubr.msk.f32.gmra.mxu0 %vm1950_vm4, %v10207_v44 }
 0x70b   : > { %3123 = vmatprep.mubr.f32.mxu0 %v12513_v47 }
 0x70e   : > { %7231 = vmatmul.mubr.msk.f32.gmra.mxu0 %vm1950_vm4, %v10229_v24 }
 0x70f   : > { %3129 = vmatprep.mubr.f32.mxu0 %v12513_v47 }
 0x712   : > { %7232 = vmatmul.mubr.msk.f32.gmra.mxu0 %vm1950_vm4, %v10214_v50 }
 0x713   : > { %3135 = vmatprep.mubr.f32.mxu0 %v12513_v47 }
 0x716   : > { %7233 = vmatmul.mubr.msk.f32.gmra.mxu0 %vm1950_vm4, %v10233_v38  ;;  %v8497_v38 = vld [vmem:[%s12376_s17 + $0x18] sm:$0xff] }
 0x717   : > { %3141 = vmatprep.mubr.f32.mxu0 %v12513_v47 }
 0x718   : > { %v10300_v0 = vpop.f32.mrf.mxu0 }
 0x71a   : > { %7234 = vmatmul.mubr.msk.f32.gmra.mxu0 %vm1950_vm4, %v10221_v48  ;;  %v2750_v9 = vpop.f32.mrf.mxu0 }
 0x71b   : > { %3147 = vmatprep.mubr.f32.mxu0 %v12513_v47 }
 0x71c   : > { %v10305_v42 = vpop.f32.mrf.mxu0 }
 0x71e   : > { %7235 = vmatmul.mubr.msk.f32.gmra.mxu0 %vm1950_vm4, %v10238_v46  ;;  %v2755_v28 = vpop.f32.mrf.mxu0  ;;  %v8498_v46 = vld [vmem:[%s12376_s17 + $0x10] sm:$0xff] }
 0x720   : > { %v10309_v29 = vpop.f32.mrf.mxu0 }
 0x721   : > { %12530 = vst [vmem:[#allocation42_spill] sm:$0xff] %v10309_v29 }
 0x722   : > { %v2760_v13 = vpop.f32.mrf.mxu0 }
 0x724   : > { %v10311_v53 = vpop.f32.mrf.mxu0 }
 0x725   : > { %12531 = vst [vmem:[#allocation37_spill] sm:$0xff] %v10311_v53 }
 0x726   : > { %v2765_v37 = vpop.f32.mrf.mxu0 }
 0x727   : > { %v8501_v37 = vld [vmem:[%s12376_s17 + $0x38] sm:$0xff] }
 0x728   : > { %v10313_v35 = vpop.f32.mrf.mxu0 }
 0x729   : > { %12532 = vst [vmem:[#allocation44_spill] sm:$0xff] %v10313_v35 }
 0x72a   : > { %v2770_v39 = vpop.f32.mrf.mxu0 }
 0x72c   : > { %v10315_v18 = vpop.f32.mrf.mxu0 }
 0x72d   : > { %12533 = vst [vmem:[#allocation39_spill] sm:$0xff] %v10315_v18 }
 0x72e   : > { %v2775_v7 = vpop.f32.mrf.mxu0 }
 0x72f   : > { %v8502_v7 = vld [vmem:[%s12376_s17 + $0x30] sm:$0xff] }
 0x730   : > { %v10317_v3 = vpop.f32.mrf.mxu0 }
 0x731   : > { %12534 = vst [vmem:[#allocation46_spill] sm:$0xff] %v10317_v3 }
 0x732   : > { %v2780_v36 = vpop.f32.mrf.mxu0 }
 0x734   : > { %v10319_v62 = vpop.f32.mrf.mxu0 }
 0x735   : > { %12535 = vst [vmem:[#allocation40_spill] sm:$0xff] %v10319_v62 }
 0x736   : > { %v2785_v12 = vpop.f32.mrf.mxu0 }
 0x76d   : > { %v10321_v10 = vpop.f32.mrf.mxu0 }
 0x76e   : > { %12536 = vst [vmem:[#allocation48_spill] sm:$0xff] %v10321_v10 }
 0x76f   : > { %v2790_v4 = vpop.f32.mrf.mxu0 }
 0x771   : > { %v10323_v63 = vpop.f32.mrf.mxu0 }
 0x772   : > { %12537 = vst [vmem:[#allocation41_spill] sm:$0xff] %v10323_v63 }
 0x773   : > { %v2795_v58 = vpop.f32.mrf.mxu0 }
 0x775   : > { %v10325_v60 = vpop.f32.mrf.mxu0 }
 0x776   : > { %12538 = vst [vmem:[#allocation50_spill] sm:$0xff] %v10325_v60 }
 0x777   : > { %v2800_v2 = vpop.f32.mrf.mxu0 }
 0x779   : > { %v10327_v17 = vpop.f32.mrf.mxu0 }
 0x77a   : > { %12539 = vst [vmem:[#allocation43_spill] sm:$0xff] %v10327_v17 }
 0x77b   : > { %v2805_v32 = vpop.f32.mrf.mxu0 }
 0x77c   : > { %v8503_v32 = vld [vmem:[%s12376_s17 + $0x48] sm:$0xff] }
 0x77d   : > { %v10329_v20 = vpop.f32.mrf.mxu0 }
 0x77e   : > { %12540 = vst [vmem:[#allocation33_spill] sm:$0xff] %v10329_v20 }
 0x77f   : > { %v2810_v8 = vpop.f32.mrf.mxu0 }
 0x781   : > { %v10331_v55 = vpop.f32.mrf.mxu0 }
 0x782   : > { %12541 = vst [vmem:[#allocation45_spill] sm:$0xff] %v10331_v55 }
 0x783   : > { %v2815_v57 = vpop.f32.mrf.mxu0 }
 0x784   : > { %v8504_v57 = vld [vmem:[%s12376_s17 + $0x40] sm:$0xff] }
 0x785   : > { %v10333_v34 = vpop.f32.mrf.mxu0 }
 0x786   : > { %12542 = vst [vmem:[#allocation30_spill] sm:$0xff] %v10333_v34 }
 0x787   : > { %v2820_v56 = vpop.f32.mrf.mxu0 }
 0x789   : > { %v10335_v14 = vpop.f32.mrf.mxu0 }
 0x78a   : > { %12543 = vst [vmem:[#allocation36_spill] sm:$0xff] %v10335_v14 }
 0x78b   : > { %v2825_v44 = vpop.f32.mrf.mxu0 }
 0x78d   : > { %v10337_v5 = vpop.f32.mrf.mxu0 }
 0x78e   : > { %12544 = vst [vmem:[#allocation47_spill] sm:$0xff] %v10337_v5 }
 0x78f   : > { %v2830_v30 = vpop.f32.mrf.mxu0 }
 0x791   : > { %v10339_v49 = vpop.f32.mrf.mxu0 }
 0x792   : > { %12545 = vst [vmem:[#allocation31_spill] sm:$0xff] %v10339_v49 }
 0x793   : > { %v2835_v51 = vpop.f32.mrf.mxu0 }
 0x795   : > { %v3047_v15 = vpop.f32.mrf.mxu0 }
 0x796   : > { %v10349_v6 = vadd.f32 %v8496_v40, %v3047_v15  ;;  %v8506_v40 = vld [vmem:[%s12376_s17 + $0x50] sm:$0xff] }
 0x797   : > { %v3049_v50 = vpop.f32.mrf.mxu0 }
 0x798   : > { %v10344_v59 = vadd.f32 %v8495_v31, %v3049_v50  ;;  %v8505_v50 = vld [vmem:[%s12376_s17 + $0x58] sm:$0xff] }
 0x799   : > { %v3053_v48 = vpop.f32.mrf.mxu0 }
 0x79a   : > { %v3154_v45 = vsel %vm1950_vm4, %v10344_v59, -inf  ;;  %v10362_v43 = vadd.f32 %v8498_v46, %v3053_v48  ;;  %v8507_v46 = vld [vmem:[%s12376_s17 + $0x68] sm:$0xff] }
 0x79b   : > { %v3055_v61 = vpop.f32.mrf.mxu0  ;;  %v3155_v24 = vmax.f32 %v10349_v6, %v3154_v45 }
 0x79c   : > { %v10357_v25 = vadd.f32 %v8497_v38, %v3055_v61 }
 0x79d   : > { %3156 = vmax.xlane.f32.xlu0 %v3155_v24  ;;  %v3059_v33 = vpop.f32.mrf.mxu0 }
 0x79e   : > { %v3158_v26 = vsel %vm1950_vm4, %v10357_v25, -inf  ;;  %v10375_v11 = vadd.f32 %v8500_v1, %v3059_v33 }
 0x79f   : > { %v3061_v52 = vpop.f32.mrf.mxu0  ;;  %v3159_v16 = vmax.f32 %v10362_v43, %v3158_v26  ;;  %v8508_v26 = vld [vmem:[%s12376_s17 + $0x60] sm:$0xff] }
 0x7a0   : > { %v10370_v41 = vadd.f32 %v8499_v27, %v3061_v52 }
 0x7a1   : > { %3160 = vmax.xlane.f32.xlu0 %v3159_v16  ;;  %v3065_v19 = vpop.f32.mrf.mxu0 }
 0x7a2   : > { %v3162_v9 = vsel %vm1950_vm4, %v10370_v41, -inf  ;;  %v10388_v36 = vadd.f32 %v8502_v7, %v3065_v19 }
 0x7a3   : > { %v3067_v28 = vpop.f32.mrf.mxu0  ;;  %v3163_v13 = vmax.f32 %v10375_v11, %v3162_v9  ;;  %v8509_v9 = vld [vmem:[%s12376_s17 + $0x78] sm:$0xff] }
 0x7a4   : > { %v10383_v39 = vadd.f32 %v8501_v37, %v3067_v28 }
 0x7a5   : > { %3164 = vmax.xlane.f32.xlu0 %v3163_v13  ;;  %v3071_v12 = vpop.f32.mrf.mxu0  ;;  %v8510_v13 = vld [vmem:[%s12376_s17 + $0x70] sm:$0xff] }
 0x7a6   : > { %v3166_v4 = vsel %vm1950_vm4, %v10383_v39, -inf  ;;  %v10401_v56 = vadd.f32 %v8504_v57, %v3071_v12  ;;  %v8512_v57 = vld [vmem:[%s12376_s17 + $0x80] sm:$0xff] }
 0x7a7   : > { %v3073_v58 = vpop.f32.mrf.mxu0  ;;  %v3167_v2 = vmax.f32 %v10388_v36, %v3166_v4 }
 0x7a8   : > { %v10396_v8 = vadd.f32 %v8503_v32, %v3073_v58 }
 0x7a9   : > { %3168 = vmax.xlane.f32.xlu1 %v3167_v2  ;;  %v3077_v44 = vpop.f32.mrf.mxu0  ;;  %v8511_v2 = vld [vmem:[%s12376_s17 + $0x88] sm:$0xff] }
 0x7aa   : > { %v3170_v30 = vsel %vm1950_vm4, %v10396_v8, -inf  ;;  %v10414_v48 = vadd.f32 %v8506_v40, %v3077_v44  ;;  %v8513_v40 = vld [vmem:[%s12376_s17 + $0x98] sm:$0xff] }
 0x7ab   : > { %v3079_v51 = vpop.f32.mrf.mxu0  ;;  %v3171_v15 = vmax.f32 %v10401_v56, %v3170_v30 }
 0x7ac   : > { %v10409_v31 = vadd.f32 %v8505_v50, %v3079_v51 }
 0x7ad   : > { %3172 = vmax.xlane.f32.xlu0 %v3171_v15 }
 0x7ae   : > { %v3174_v45 = vsel %vm1950_vm4, %v10409_v31, -inf  ;;  %v3083_v61 = vpop.f32.mrf.mxu0 }
 0x7af   : > { %v3175_v24 = vmax.f32 %v10414_v48, %v3174_v45  ;;  %v10427_v52 = vadd.f32 %v8508_v26, %v3083_v61  ;;  %v8514_v61 = vld [vmem:[%s12376_s17 + $0x90] sm:$0xff] }
 0x7b0   : > { %v3085_v38 = vpop.f32.mrf.mxu0 }
 0x7b1   : > { %v10422_v33 = vadd.f32 %v8507_v46, %v3085_v38  ;;  %3176 = vmax.xlane.f32.xlu0 %v3175_v24 }
 0x7b3   : > { %v3178_v16 = vsel %vm1950_vm4, %v10422_v33, -inf  ;;  %v3089_v27 = vpop.f32.mrf.mxu0 }
 0x7b4   : > { %v3179_v1 = vmax.f32 %v10427_v52, %v3178_v16  ;;  %v10440_v37 = vadd.f32 %v8510_v13, %v3089_v27  ;;  %v8515_v27 = vld [vmem:[%s12376_s17 + $0xa8] sm:$0xff] }
 0x7b5   : > { %v3091_v19 = vpop.f32.mrf.mxu0 }
 0x7b6   : > { %v10435_v28 = vadd.f32 %v8509_v9, %v3091_v19  ;;  %3180 = vmax.xlane.f32.xlu0 %v3179_v1  ;;  %v8516_v19 = vld [vmem:[%s12376_s17 + $0xa0] sm:$0xff] }
 0x7b8   : > { %v3182_v7 = vsel %vm1950_vm4, %v10435_v28, -inf  ;;  %v3095_v12 = vpop.f32.mrf.mxu0 }
 0x7b9   : > { %v3183_v4 = vmax.f32 %v10440_v37, %v3182_v7  ;;  %v10453_v44 = vadd.f32 %v8512_v57, %v3095_v12  ;;  %v8518_v57 = vld [vmem:[%s12376_s17 + $0xb0] sm:$0xff] }
 0x7ba   : > { %v3097_v58 = vpop.f32.mrf.mxu0 }
 0x7bb   : > { %v10448_v32 = vadd.f32 %v8511_v2, %v3097_v58  ;;  %3184 = vmax.xlane.f32.xlu1 %v3183_v4  ;;  %v8517_v58 = vld [vmem:[%s12376_s17 + $0xb8] sm:$0xff] }
 0x7bd   : > { %v3186_v30 = vsel %vm1950_vm4, %v10448_v32, -inf  ;;  %v3101_v51 = vpop.f32.mrf.mxu0 }
 0x7be   : > { %v3187_v15 = vmax.f32 %v10453_v44, %v3186_v30  ;;  %v10466_v24 = vadd.f32 %v8514_v61, %v3101_v51  ;;  %v8519_v61 = vld [vmem:[%s12376_s17 + $0xc8] sm:$0xff] }
 0x7bf   : > { %v3103_v50 = vpop.f32.mrf.mxu0 }
 0x7c0   : > { %v10461_v45 = vadd.f32 %v8513_v40, %v3103_v50  ;;  %3188 = vmax.xlane.f32.xlu1 %v3187_v15 }
 0x7c2   : > { %v3190_v38 = vsel %vm1950_vm4, %v10461_v45, -inf  ;;  %v3107_v46 = vpop.f32.mrf.mxu0 }
 0x7c3   : > { %v3191_v26 = vmax.f32 %v10466_v24, %v3190_v38  ;;  %v10479_v9 = vadd.f32 %v8516_v19, %v3107_v46  ;;  %v8520_v46 = vld [vmem:[%s12376_s17 + $0xc0] sm:$0xff] }
 0x7c4   : > { %v3109_v16 = vpop.f32.mrf.mxu0 }
 0x7c5   : > { %v10474_v1 = vadd.f32 %v8515_v27, %v3109_v16  ;;  %3192 = vmax.xlane.f32.xlu1 %v3191_v26 }
 0x7c6   : > { %v3113_v13 = vpop.f32.mrf.mxu0 }
 0x7c7   : > { %v3194_v7 = vsel %vm1950_vm4, %v10474_v1, -inf  ;;  %v10492_v30 = vadd.f32 %v8518_v57, %v3113_v13 }
 0x7c8   : > { %v3115_v12 = vpop.f32.mrf.mxu0  ;;  %v3195_v4 = vmax.f32 %v10479_v9, %v3194_v7  ;;  %v8521_v7 = vld [vmem:[%s12376_s17 + $0xd8] sm:$0xff] }
 0x7c9   : > { %v10487_v2 = vadd.f32 %v8517_v58, %v3115_v12 }
 0x7ca   : > { %3196 = vmax.xlane.f32.xlu0 %v3195_v4  ;;  %v3119_v51 = vpop.f32.mrf.mxu0  ;;  %v8522_v4 = vld [vmem:[%s12376_s17 + $0xd0] sm:$0xff] }
 0x7cb   : > { %v3198_v15 = vsel %vm1950_vm4, %v10487_v2, -inf  ;;  %v10505_v26 = vadd.f32 %v8520_v46, %v3119_v51 }
 0x7cc   : > { %v3121_v50 = vpop.f32.mrf.mxu0  ;;  %v3199_v40 = vmax.f32 %v10492_v30, %v3198_v15 }
 0x7cd   : > { %v10500_v38 = vadd.f32 %v8519_v61, %v3121_v50 }
 0x7ce   : > { %3200 = vmax.xlane.f32.xlu1 %v3199_v40  ;;  %v3125_v16 = vpop.f32.mrf.mxu0 }
 0x7cf   : > { %v3202_v27 = vsel %vm1950_vm4, %v10500_v38, -inf  ;;  %v10518_v58 = vadd.f32 %v8522_v4, %v3125_v16  ;;  %v8525_v4 = vld [vmem:[%s12376_s17 + $0x108] sm:$0xff] }
 0x7d0   : > { %v3127_v19 = vpop.f32.mrf.mxu0  ;;  %v3203_v13 = vmax.f32 %v10505_v26, %v3202_v27  ;;  %v8523_v27 = vld [vmem:[%s12376_s17 + $0xe8] sm:$0xff] }
 0x7d1   : > { %v10513_v12 = vadd.f32 %v8521_v7, %v3127_v19 }
 0x7d2   : > { %3204 = vmax.xlane.f32.xlu0 %v3203_v13  ;;  %v3131_v15 = vpop.f32.mrf.mxu0 }
 0x7d3   : > { %v3206_v57 = vsel %vm1950_vm4, %v10513_v12, -inf }
 0x7d4   : > { %v3207_v51 = vmax.f32 %v10518_v58, %v3206_v57  ;;  %v3133_v50 = vpop.f32.mrf.mxu0 }
 0x7d5   : > { %v10530_v19 = vadd.f32 %v8523_v27, %v3133_v50 }
 0x7d6   : > { %3208 = vmax.xlane.f32.xlu1 %v3207_v51  ;;  %v3137_v40 = vpop.f32.mrf.mxu0  ;;  %v8526_v51 = vld [vmem:[%s12376_s17 + $0xe0] sm:$0xff] }
 0x7d7   : > { %v3210_v7 = vsel %vm1950_vm4, %v10530_v19, -inf  ;;  %v10547_v50 = vadd.f32 %v8526_v51, %v3131_v15  ;;  %v8528_v15 = vld [vmem:[%s12376_s17 + $0xf0] sm:$0xff] }
 0x7d8   : > { %v3139_v61 = vpop.f32.mrf.mxu0 }
 0x7d9   : > { %v3211_v49 = vmax.f32 %v10547_v50, %v3210_v7  ;;  %v8529_v7 = vld [vmem:[%s12376_s17 + $0x100] sm:$0xff] }
 0x7da   : > { %v3143_v46 = vpop.f32.mrf.mxu0 }
 0x7db   : > { %v10567_v51 = vadd.f32 %v8529_v7, %v3143_v46 }
 0x7dc   : > { %v3145_v16 = vpop.f32.mrf.mxu0 }
 0x7dd   : > { %v10542_v57 = vadd.f32 %v8525_v4, %v3145_v16  ;;  %v8527_v16 = vld [vmem:[%s12376_s17 + $0x118] sm:$0xff]  ;;  %v10562_v4 = vadd.f32 %v8528_v15, %v3137_v40 }
 0x7de   : > { %v3149_v13 = vpop.f32.mrf.mxu0 }
 0x7e0   : > { %v3151_v27 = vpop.f32.mrf.mxu0 }
 0x7e7   : > { %3520 = vrot.lane.b32.xlu1 %v9323_v23, %s8855_s5  ;;  %v8524_v23 = vld [vmem:[%s12376_s17 + $0xf8] sm:$0xff] }
 0x7e8   : > { %3518 = vrot.lane.b32.xlu0 %v9325_v54, %s8855_s5  ;;  %v10537_v54 = vadd.f32 %v8524_v23, %v3139_v61  ;;  %v3218_v61 = vsel %vm1950_vm4, %v10542_v57, -inf  ;;  %v10557_v23 = vadd.f32 %v8527_v16, %v3151_v27  ;;  %v8530_v16 = vld [vmem:[%s12376_s17 + $0x110] sm:$0xff] }
 0x7e9   : > { %v3219_v34 = vmax.f32 %v10567_v51, %v3218_v61  ;;  %v10576_v40 = vadd.f32 %v8530_v16, %v3149_v13 }
 0x7ea   : > { %v3214_v5 = vsel %vm1950_vm4, %v10537_v54, -inf  ;;  %v3222_v27 = vsel %vm1950_vm4, %v10557_v23, -inf }
 0x7eb   : > { %v3215_v14 = vmax.f32 %v10562_v4, %v3214_v5  ;;  %v3223_v15 = vmax.f32 %v10576_v40, %v3222_v27 }
 0x807   : > { %3212 = vmax.xlane.f32.xlu0 %v3211_v49 }
 0x80b   : > { %3216 = vmax.xlane.f32.xlu1 %v3215_v14  ;;  %3220 = vmax.xlane.f32.xlu0 %v3219_v34 }
 0x80f   : > { %3224 = vmax.xlane.f32.xlu1 %v3223_v15 }
 0x826   : > { %v3157_v46 = vpop.xlane.xlu0 %3156 }
 0x827   : > { %v3226_v49 = vsub.f32 %v10349_v6, %v3157_v46  ;;  %v3227_v5 = vsub.f32 %v10344_v59, %v3157_v46 }
 0x829   : > { %v3262_v61 = vmul.f32 1.442695, %v3226_v49  ;;  %v3264_v7 = vmul.f32 1.442695, %v3227_v5 }
 0x82a   : > { %v3161_v55 = vpop.xlane.xlu0 %3160 }
 0x82b   : > { %8255 = vpow2.f32 %v3262_v61  ;;  %v3228_v20 = vsub.f32 %v10362_v43, %v3161_v55  ;;  %v3229_v17 = vsub.f32 %v10357_v25, %v3161_v55 }
 0x82c   : > { %8257 = vpow2.f32 %v3264_v7 }
 0x82d   : > { %v3266_v13 = vmul.f32 1.442695, %v3228_v20  ;;  %v3268_v14 = vmul.f32 1.442695, %v3229_v17 }
 0x82e   : > { %v3165_v34 = vpop.xlane.xlu0 %3164 }
 0x82f   : > { %8259 = vpow2.f32 %v3266_v13  ;;  %v3230_v27 = vsub.f32 %v10375_v11, %v3165_v34  ;;  %v3231_v16 = vsub.f32 %v10370_v41, %v3165_v34 }
 0x830   : > { %8261 = vpow2.f32 %v3268_v14 }
 0x831   : > { %v3270_v6 = vmul.f32 1.442695, %v3230_v27  ;;  %v3272_v59 = vmul.f32 1.442695, %v3231_v16 }
 0x832   : > { %v3169_v15 = vpop.xlane.xlu1 %3168 }
 0x833   : > { %8263 = vpow2.f32 %v3270_v6  ;;  %v3232_v46 = vsub.f32 %v10388_v36, %v3169_v15  ;;  %v3233_v43 = vsub.f32 %v10383_v39, %v3169_v15 }
 0x834   : > { %8265 = vpow2.f32 %v3272_v59 }
 0x835   : > { %v3274_v55 = vmul.f32 1.442695, %v3232_v46  ;;  %v3276_v25 = vmul.f32 1.442695, %v3233_v43 }
 0x836   : > { %v3173_v20 = vpop.xlane.xlu0 %3172 }
 0x837   : > { %8267 = vpow2.f32 %v3274_v55  ;;  %v3234_v17 = vsub.f32 %v10401_v56, %v3173_v20  ;;  %v3235_v11 = vsub.f32 %v10396_v8, %v3173_v20 }
 0x838   : > { %v10589_v49 = vpop.eup %8255  ;;  %8269 = vpow2.f32 %v3276_v25 }
 0x839   : > { %v10591_v41 = vpop.eup %8257  ;;  %v3278_v5 = vmul.f32 1.442695, %v3234_v17  ;;  %v3280_v61 = vmul.f32 1.442695, %v3235_v11 }
 0x83a   : > { %v3177_v7 = vpop.xlane.xlu0 %3176  ;;  %v3334_v39 = vsel %vm1950_vm4, %v10591_v41, 0.0 }
 0x83b   : > { %8271 = vpow2.f32 %v3278_v5  ;;  %v3236_v36 = vsub.f32 %v10414_v48, %v3177_v7  ;;  %v3237_v13 = vsub.f32 %v10409_v31, %v3177_v7  ;;  %v3335_v56 = vadd.f32 %v10589_v49, %v3334_v39 }
 0x83c   : > { %v10598_v14 = vpop.eup %8259  ;;  %8273 = vpow2.f32 %v3280_v61 }
 0x83d   : > { %v10600_v8 = vpop.eup %8261  ;;  %v3282_v34 = vmul.f32 1.442695, %v3236_v36  ;;  %v3284_v27 = vmul.f32 1.442695, %v3237_v13  ;;  %3336 = vadd.xlane.f32.xlu1 %v3335_v56 }
 0x83e   : > { %v3338_v16 = vsel %vm1950_vm4, %v10600_v8, 0.0 }
 0x83f   : > { %8275 = vpow2.f32 %v3282_v34  ;;  %v3339_v6 = vadd.f32 %v10598_v14, %v3338_v16  ;;  %v3181_v34 = vpop.xlane.xlu0 %3180 }
 0x840   : > { %v10605_v59 = vpop.eup %8263  ;;  %8277 = vpow2.f32 %v3284_v27 }
 0x841   : > { %v10607_v31 = vpop.eup %8265  ;;  %3340 = vadd.xlane.f32.xlu1 %v3339_v6 }
 0x842   : > { %v3342_v48 = vsel %vm1950_vm4, %v10607_v31, 0.0 }
 0x843   : > { %v3343_v15 = vadd.f32 %v10605_v59, %v3342_v48 }
 0x844   : > { %v10612_v46 = vpop.eup %8267  ;;  %v3185_v5 = vpop.xlane.xlu1 %3184 }
 0x845   : > { %v10614_v43 = vpop.eup %8269  ;;  %3344 = vadd.xlane.f32.xlu0 %v3343_v15 }
 0x846   : > { %v3346_v55 = vsel %vm1950_vm4, %v10614_v43, 0.0 }
 0x847   : > { %v3347_v25 = vadd.f32 %v10612_v46, %v3346_v55 }
 0x848   : > { %v10619_v20 = vpop.eup %8271 }
 0x849   : > { %v10621_v17 = vpop.eup %8273  ;;  %3348 = vadd.xlane.f32.xlu1 %v3347_v25  ;;  %v3189_v56 = vpop.xlane.xlu1 %3188  ;;  %v3239_v25 = vsub.f32 %v10422_v33, %v3181_v34  ;;  %v3240_v33 = vsub.f32 %v10440_v37, %v3185_v5 }
 0x84a   : > { %v3350_v11 = vsel %vm1950_vm4, %v10621_v17, 0.0  ;;  %v3242_v10 = vsub.f32 %v10453_v44, %v3189_v56 }
 0x84b   : > { %v3351_v61 = vadd.f32 %v10619_v20, %v3350_v11 }
 0x84c   : > { %v10626_v7 = vpop.eup %8275 }
 0x84d   : > { %v10628_v39 = vpop.eup %8277  ;;  %3352 = vadd.xlane.f32.xlu0 %v3351_v61  ;;  %v3238_v61 = vsub.f32 %v10427_v52, %v3181_v34  ;;  %v3290_v34 = vmul.f32 1.442695, %v3240_v33 }
 0x84e   : > { %v3354_v36 = vsel %vm1950_vm4, %v10628_v39, 0.0  ;;  %v3193_v27 = vpop.xlane.xlu1 %3192 }
 0x84f   : > { %v3355_v13 = vadd.f32 %v10626_v7, %v3354_v36 }
 0x851   : > { %3356 = vadd.xlane.f32.xlu1 %v3355_v13  ;;  %v3286_v13 = vmul.f32 1.442695, %v3238_v61 }
 0x853   : > { %v3197_v16 = vpop.xlane.xlu0 %3196 }
 0x854   : > { %v3247_v36 = vsub.f32 %v10474_v1, %v3197_v16  ;;  %v3246_v63 = vsub.f32 %v10479_v9, %v3197_v16  ;;  %v3294_v9 = vmul.f32 1.442695, %v3242_v10 }
 0x856   : > { %v3302_v1 = vmul.f32 1.442695, %v3246_v63 }
 0x857   : > { %v10633_v6 = vpop.xlane.xlu1 %3200 }
 0x85b   : > { %v3205_v48 = vpop.xlane.xlu0 %3204 }
 0x85c   : > { %v3251_v52 = vsub.f32 %v10500_v38, %v3205_v48  ;;  %v3250_v37 = vsub.f32 %v10505_v26, %v3205_v48  ;;  %v3244_v38 = vsub.f32 %v10466_v24, %v3193_v27 }
 0x85e   : > { %v3310_v44 = vmul.f32 1.442695, %v3250_v37  ;;  %v3298_v63 = vmul.f32 1.442695, %v3244_v38 }
 0x85f   : > { %v3209_v15 = vpop.xlane.xlu1 %3208  ;;  %v3519_v11 = vpop.permute.xlu0 %3518 }
 0x862   : > { %3516 = vrot.lane.b32.xlu1 %v9319_v21, %s8855_s5  ;;  %v3241_v21 = vsub.f32 %v10435_v28, %v3185_v5  ;;  %v3253_v5 = vsub.f32 %v10513_v12, %v3209_v15 }
 0x863   : > { %v3521_v55 = vpop.permute.xlu1 %3520  ;;  %3514 = vrot.lane.b32.xlu0 %v9321_v22, %s8855_s5  ;;  %v3288_v22 = vmul.f32 1.442695, %v3239_v25  ;;  %v3245_v25 = vsub.f32 %v10461_v45, %v3193_v27 }
 0x864   : > { %3647 = vmatpush1.msra.mxu0 %v3521_v55  ;;  %7995 = vmatpush1.msra.mxu1 %v3521_v55  ;;  %v3243_v55 = vsub.f32 %v10448_v32, %v3189_v56  ;;  %v3292_v60 = vmul.f32 1.442695, %v3241_v21  ;;  %v3312_v32 = vmul.f32 1.442695, %v3251_v52  ;;  %v3252_v56 = vsub.f32 %v10518_v58, %v3209_v15 }
 0x865   : > { %3648 = vmatprep.subr.mxu0 %v12513_v47  ;;  %7978 = vmatprep.subr.mxu1 %v12513_v47  ;;  %8279 = vpow2.f32 %v3288_v22  ;;  %v3300_v16 = vmul.f32 1.442695, %v3245_v25  ;;  %v3316_v45 = vmul.f32 1.442695, %v3253_v5 }
 0x866   : > { %3649 = vmatpush1.msra.mxu0 %v3519_v11  ;;  %7996 = vmatpush1.msra.mxu1 %v3519_v11  ;;  %v3304_v11 = vmul.f32 1.442695, %v3247_v36  ;;  %8281 = vpow2.f32 %v3286_v13  ;;  %v3296_v28 = vmul.f32 1.442695, %v3243_v55 }
 0x867   : > { %3650 = vmatprep.subr.mxu0 %v12513_v47  ;;  %7979 = vmatprep.subr.mxu1 %v12513_v47  ;;  %8283 = vpow2.f32 %v3292_v60  ;;  %v3314_v60 = vmul.f32 1.442695, %v3252_v56 }
 0x868   : > { %8285 = vpow2.f32 %v3304_v11 }
 0x869   : > { %8287 = vpow2.f32 %v3290_v34 }
 0x86a   : > { %8289 = vpow2.f32 %v3296_v28 }
 0x86b   : > { %8291 = vpow2.f32 %v3302_v1 }
 0x86c   : > { %8293 = vpow2.f32 %v3312_v32 }
 0x86d   : > { %8295 = vpow2.f32 %v3294_v9 }
 0x86e   : > { %8297 = vpow2.f32 %v3300_v16 }
 0x86f   : > { %8299 = vpow2.f32 %v3310_v44 }
 0x870   : > { %8301 = vpow2.f32 %v3316_v45 }
 0x871   : > { %8303 = vpow2.f32 %v3298_v63 }
 0x872   : > { %v10657_v26 = vpop.eup %8279  ;;  %8305 = vpow2.f32 %v3314_v60 }
 0x873   : > { %v10659_v10 = vpop.eup %8281  ;;  %v3358_v12 = vsel %vm1950_vm4, %v10657_v26, 0.0 }
 0x874   : > { %v10661_v24 = vpop.eup %8283  ;;  %v3359_v15 = vadd.f32 %v10659_v10, %v3358_v12 }
 0x875   : > { %v10665_v58 = vpop.eup %8285  ;;  %v3362_v21 = vsel %vm1950_vm4, %v10661_v24, 0.0 }
 0x876   : > { %v10667_v27 = vpop.eup %8287  ;;  %v3374_v22 = vsel %vm1950_vm4, %v10665_v58, 0.0 }
 0x877   : > { %v10669_v48 = vpop.eup %8289  ;;  %v3363_v55 = vadd.f32 %v10667_v27, %v3362_v21 }
 0x878   : > { %v10672_v61 = vpop.eup %8291  ;;  %v3366_v34 = vsel %vm1950_vm4, %v10669_v48, 0.0 }
 0x879   : > { %v10678_v36 = vpop.eup %8293  ;;  %v3375_v11 = vadd.f32 %v10672_v61, %v3374_v22 }
 0x87a   : > { %v10680_v33 = vpop.eup %8295  ;;  %v3382_v28 = vsel %vm1950_vm4, %v10678_v36, 0.0 }
 0x87b   : > { %v10682_v13 = vpop.eup %8297  ;;  %v3367_v37 = vadd.f32 %v10680_v33, %v3366_v34 }
 0x87c   : > { %v10686_v52 = vpop.eup %8299  ;;  %v3370_v9 = vsel %vm1950_vm4, %v10682_v13, 0.0 }
 0x87d   : > { %v10692_v25 = vpop.eup %8301  ;;  %v3383_v32 = vadd.f32 %v10686_v52, %v3382_v28 }
 0x87e   : > { %v10694_v1 = vpop.eup %8303  ;;  %v3386_v38 = vsel %vm1950_vm4, %v10692_v25, 0.0 }
 0x87f   : > { %v10698_v5 = vpop.eup %8305  ;;  %v3371_v16 = vadd.f32 %v10694_v1, %v3370_v9 }
 0x880   : > { %v3387_v44 = vadd.f32 %v10698_v5, %v3386_v38 }
 0x882   : > { %3360 = vadd.xlane.f32.xlu0 %v3359_v15 }
 0x886   : > { %3364 = vadd.xlane.f32.xlu0 %v3363_v55  ;;  %3376 = vadd.xlane.f32.xlu1 %v3375_v11 }
 0x88a   : > { %3368 = vadd.xlane.f32.xlu0 %v3367_v37  ;;  %3384 = vadd.xlane.f32.xlu1 %v3383_v32 }
 0x88e   : > { %3372 = vadd.xlane.f32.xlu0 %v3371_v16  ;;  %3388 = vadd.xlane.f32.xlu1 %v3387_v44  ;;  %v12546_v44 = vld [vmem:[#allocation34_spill] sm:$0xff] }
 0x890   : > { %v3213_v56 = vpop.xlane.xlu0 %3212 }
 0x891   : > { %v3254_v45 = vsub.f32 %v10547_v50, %v3213_v56  ;;  %v3255_v63 = vsub.f32 %v10530_v19, %v3213_v56 }
 0x893   : > { %v3318_v60 = vmul.f32 1.442695, %v3254_v45  ;;  %v3320_v12 = vmul.f32 1.442695, %v3255_v63  ;;  %v12547_v63 = vld [vmem:[#allocation35_spill] sm:$0xff] }
 0x894   : > { %v3217_v15 = vpop.xlane.xlu1 %3216  ;;  %v3221_v21 = vpop.xlane.xlu0 %3220 }
 0x895   : > { %8307 = vpow2.f32 %v3318_v60  ;;  %v3256_v22 = vsub.f32 %v10562_v4, %v3217_v15  ;;  %v3257_v55 = vsub.f32 %v10537_v54, %v3217_v15  ;;  %v3258_v11 = vsub.f32 %v10567_v51, %v3221_v21 }
 0x896   : > { %8309 = vpow2.f32 %v3320_v12  ;;  %v3259_v34 = vsub.f32 %v10542_v57, %v3221_v21  ;;  %v3249_v21 = vsub.f32 %v10487_v2, %v10633_v6 }
 0x897   : > { %v3322_v28 = vmul.f32 1.442695, %v3256_v22  ;;  %v3324_v37 = vmul.f32 1.442695, %v3257_v55  ;;  %v3326_v19 = vmul.f32 1.442695, %v3258_v11  ;;  %v3248_v11 = vsub.f32 %v10492_v30, %v10633_v6 }
 0x898   : > { %v3328_v32 = vmul.f32 1.442695, %v3259_v34  ;;  %v3225_v50 = vpop.xlane.xlu1 %3224 }
 0x899   : > { %8311 = vpow2.f32 %v3322_v28  ;;  %v3260_v9 = vsub.f32 %v10576_v40, %v3225_v50  ;;  %v3261_v38 = vsub.f32 %v10557_v23, %v3225_v50  ;;  %v3306_v50 = vmul.f32 1.442695, %v3248_v11 }
 0x89a   : > { %8313 = vpow2.f32 %v3324_v37  ;;  %v3308_v37 = vmul.f32 1.442695, %v3249_v21 }
 0x89b   : > { %v3332_v16 = vmul.f32 1.442695, %v3261_v38  ;;  %8315 = vpow2.f32 %v3328_v32  ;;  %v3330_v54 = vmul.f32 1.442695, %v3260_v9 }
 0x89c   : > { %8317 = vpow2.f32 %v3326_v19 }
 0x89d   : > { %8319 = vpow2.f32 %v3332_v16 }
 0x89e   : > { %8321 = vpow2.f32 %v3330_v54 }
 0x89f   : > { %8323 = vpow2.f32 %v3308_v37 }
 0x8a0   : > { %8325 = vpow2.f32 %v3306_v50 }
 0x8a2   : > { %v10714_v4 = vpop.eup %8307 }
 0x8a3   : > { %v10716_v57 = vpop.eup %8309 }
 0x8a4   : > { %v3390_v51 = vsel %vm1950_vm4, %v10716_v57, 0.0  ;;  %3548 = vrot.lane.b32.xlu0 %v12546_v44, %s8855_s5 }
 0x8a5   : > { %v3391_v40 = vadd.f32 %v10714_v4, %v3390_v51 }
 0x8a6   : > { %v10723_v23 = vpop.eup %8311 }
 0x8a7   : > { %v10725_v56 = vpop.eup %8313  ;;  %3392 = vadd.xlane.f32.xlu1 %v3391_v40 }
 0x8a8   : > { %v3394_v45 = vsel %vm1950_vm4, %v10725_v56, 0.0  ;;  %3546 = vrot.lane.b32.xlu0 %v12547_v63, %s8855_s5  ;;  %v10731_v60 = vpop.eup %8315  ;;  %s8856_s5 = smov 32  }
 0x8a9   : > { %v3395_v12 = vadd.f32 %v10723_v23, %v3394_v45  ;;  %v10734_v15 = vpop.eup %8317  ;;  %v3398_v22 = vsel %vm1950_vm4, %v10731_v60, 0.0 }
 0x8aa   : > { %v10740_v55 = vpop.eup %8319  ;;  %v3399_v34 = vadd.f32 %v10734_v15, %v3398_v22 }
 0x8ab   : > { %3396 = vadd.xlane.f32.xlu1 %v3395_v12  ;;  %v10745_v28 = vpop.eup %8321  ;;  %v3402_v32 = vsel %vm1950_vm4, %v10740_v55, 0.0 }
 0x8ac   : > { %v3403_v2 = vadd.f32 %v10745_v28, %v3402_v32  ;;  %v10750_v19 = vpop.eup %8323 }
 0x8ad   : > { %v10752_v9 = vpop.eup %8325  ;;  %v3378_v30 = vsel %vm1950_vm4, %v10750_v19, 0.0 }
 0x8ae   : > { %v3379_v6 = vadd.f32 %v10752_v9, %v3378_v30 }
 0x8af   : > { %3400 = vadd.xlane.f32.xlu1 %v3399_v34 }
 0x8b3   : > { %3404 = vadd.xlane.f32.xlu1 %v3403_v2 }
 0x8c6   : > { %v3337_v38 = vpop.xlane.xlu1 %3336 }
 0x8c7   : > { %8327 = vrcp.f32 %v3337_v38  ;;  %3380 = vadd.xlane.f32.xlu0 %v3379_v6 }
 0x8ca   : > { %v3341_v54 = vpop.xlane.xlu1 %3340 }
 0x8ce   : > { %v3345_v16 = vpop.xlane.xlu0 %3344 }
 0x8cf   : > { %8329 = vrcp.f32 %v3345_v16 }
 0x8d0   : > { %8331 = vrcp.f32 %v3341_v54 }
 0x8d2   : > { %v3349_v40 = vpop.xlane.xlu1 %3348 }
 0x8d3   : > { %8333 = vrcp.f32 %v3349_v40 }
 0x8d4   : > { %v8328_v51 = vpop.eup %8327 }
 0x8d5   : > { %v3424_v44 = vmul.f32 %v8328_v51, %v3337_v38 }
 0x8d6   : > { %v3353_v12 = vpop.xlane.xlu0 %3352 }
 0x8d7   : > { %v3442_v45 = vsub.f32 2.0, %v3424_v44  ;;  %8335 = vrcp.f32 %v3353_v12 }
 0x8d9   : > { %v3460_v63 = vmul.f32 %v8328_v51, %v3442_v45 }
 0x8da   : > { %v3357_v21 = vpop.xlane.xlu1 %3356  ;;  %v3515_v50 = vpop.permute.xlu0 %3514 }
 0x8db   : > { %v3479_v22 = vmul.f32 %v10591_v41, %v3460_v63  ;;  %8337 = vrcp.f32 %v3357_v21 }
 0x8dc   : > { %v8330_v11 = vpop.eup %8329 }
 0x8dd   : > { %v3426_v34 = vmul.f32 %v8330_v11, %v3345_v16  ;;  %7236 = vmatprep.mubr.msk.f32.mxu0 %vm1950_vm4, %v3479_v22  ;;  %v8332_v6 = vpop.eup %8331 }
 0x8de   : > { %v3517_v37 = vpop.permute.xlu1 %3516  ;;  %v3425_v51 = vmul.f32 %v8332_v6, %v3341_v54  ;;  %v910_v54 = vld [vmem:[#allocation13 + $0x24] sm:$0xff] }
 0x8df   : > { %v3444_v32 = vsub.f32 2.0, %v3426_v34  ;;  %3651 = vmatpush1.msra.mxu0 %v3517_v37  ;;  %7997 = vmatpush1.msra.mxu1 %v3517_v37  ;;  %v921_v53 = vunpack.c.l.bf16 %v910_v54 }
 0x8e0   : > { %3652 = vmatprep.subr.mxu0 %v12513_v47  ;;  %7980 = vmatprep.subr.mxu1 %v12513_v47  ;;  %v8334_v16 = vpop.eup %8333 }
 0x8e1   : > { %v3462_v2 = vmul.f32 %v8330_v11, %v3444_v32  ;;  %3653 = vmatpush1.msra.mxu0 %v3515_v50  ;;  %7998 = vmatpush1.msra.mxu1 %v3515_v50  ;;  %v3427_v44 = vmul.f32 %v8334_v16, %v3349_v40  ;;  %v3443_v11 = vsub.f32 2.0, %v3425_v51 }
 0x8e2   : > { %3682 = vmatprep.subr.mxu0 %v12513_v47  ;;  %7981 = vmatprep.subr.mxu1 %v12513_v47 }
 0x8e3   : > { %v3483_v41 = vmul.f32 %v10607_v31, %v3462_v2  ;;  %v3445_v34 = vsub.f32 2.0, %v3427_v44  ;;  %v3461_v50 = vmul.f32 %v8332_v6, %v3443_v11  ;;  %v3482_v6 = vmul.f32 %v10605_v59, %v3462_v2 }
 0x8e4   : > { %v8336_v22 = vpop.eup %8335  ;;  %v922_v11 = vunpack.c.h.bf16 %v910_v54 }
 0x8e5   : > { %7238 = vmatprep.mubr.msk.f32.mxu1 %vm1950_vm4, %v3483_v41  ;;  %v3428_v37 = vmul.f32 %v8336_v22, %v3353_v12  ;;  %v3463_v41 = vmul.f32 %v8334_v16, %v3445_v34  ;;  %v3478_v12 = vmul.f32 %v10589_v49, %v3460_v63  ;;  %v3481_v51 = vmul.f32 %v10600_v8, %v3461_v50  ;;  %v908_v34 = vld [vmem:[#allocation13 + $0x18] sm:$0xff] }
 0x8e6   : > { %v919_v49 = vunpack.c.h.bf16 %v908_v34  ;;  %v3480_v8 = vmul.f32 %v10598_v14, %v3461_v50  ;;  %v918_v59 = vunpack.c.l.bf16 %v908_v34 }
 0x8e7   : > { %v3446_v62 = vsub.f32 2.0, %v3428_v37  ;;  %v3485_v16 = vmul.f32 %v10614_v43, %v3463_v41 }
 0x8e8   : > { %v8338_v32 = vpop.eup %8337 }
 0x8e9   : > { %v3429_v18 = vmul.f32 %v8338_v32, %v3357_v21  ;;  %v3464_v21 = vmul.f32 %v8336_v22, %v3446_v62  ;;  %v3484_v62 = vmul.f32 %v10612_v46, %v3463_v41 }
 0x8eb   : > { %v3486_v22 = vmul.f32 %v10619_v20, %v3464_v21 }
 0x90b   : > { %v3361_v30 = vpop.xlane.xlu0 %3360 }
 0x90c   : > { %8339 = vrcp.f32 %v3361_v30 }
 0x90f   : > { %v3365_v38 = vpop.xlane.xlu0 %3364  ;;  %v3377_v35 = vpop.xlane.xlu1 %3376 }
 0x910   : > { %8341 = vrcp.f32 %v3365_v38 }
 0x913   : > { %v3369_v45 = vpop.xlane.xlu0 %3368 }
 0x914   : > { %8343 = vrcp.f32 %v3369_v45 }
 0x917   : > { %v10765_v31 = vpop.xlane.xlu0 %3372 }
 0x918   : > { %8345 = vrcp.f32 %v10765_v31 }
 0x919   : > { %v8340_v40 = vpop.eup %8339  ;;  %8347 = vrcp.f32 %v3377_v35 }
 0x91a   : > { %v3430_v37 = vmul.f32 %v8340_v40, %v3361_v30 }
 0x91b   : > { %v3549_v3 = vpop.permute.xlu0 %3548 }
 0x91c   : > { %3683 = vmatpush2.msra.mxu0 %v3549_v3  ;;  %7999 = vmatpush2.msra.mxu1 %v3549_v3  ;;  %v3447_v3 = vsub.f32 2.0, %v3429_v18  ;;  %v3487_v18 = vmul.f32 %v10621_v17, %v3464_v21  ;;  %v3448_v63 = vsub.f32 2.0, %v3430_v37 }
 0x91d   : > { %3684 = vmatprep.subr.mxu0 %v12513_v47  ;;  %7982 = vmatprep.subr.mxu1 %v12513_v47  ;;  %v8342_v29 = vpop.eup %8341 }
 0x91e   : > { %v3465_v43 = vmul.f32 %v8338_v32, %v3447_v3  ;;  %v3431_v2 = vmul.f32 %v8342_v29, %v3365_v38  ;;  %v3466_v46 = vmul.f32 %v8340_v40, %v3448_v63 }
 0x91f   : > { %v3547_v44 = vpop.permute.xlu0 %3546 }
 0x920   : > { %3685 = vmatpush2.msra.mxu0 %v3547_v44  ;;  %8000 = vmatpush2.msra.mxu1 %v3547_v44  ;;  %v3489_v14 = vmul.f32 %v10628_v39, %v3465_v43  ;;  %v3449_v50 = vsub.f32 2.0, %v3431_v2  ;;  %v3491_v38 = vmul.f32 %v10657_v26, %v3466_v46  ;;  %v3490_v39 = vmul.f32 %v10659_v10, %v3466_v46 }
 0x921   : > { %3687 = vmatmul.mubr.f32.vlgmr.msra.gmra.mxu0 %v3478_v12  ;;  %3697 = vmatmul.mubr.f32.vlgmr.msra.gmra.mxu1 %v3482_v6  ;;  %v8344_v30 = vpop.eup %8343 }
 0x922   : > { %7237 = vmatprep.mubr.msk.f32.mxu0 %vm1950_vm4, %v3481_v51  ;;  %7239 = vmatprep.mubr.msk.f32.mxu1 %vm1950_vm4, %v3485_v16  ;;  %v3432_v17 = vmul.f32 %v8344_v30, %v3369_v45  ;;  %v3467_v41 = vmul.f32 %v8342_v29, %v3449_v50 }
 0x923   : > { %3859 = vmatprep.subr.mxu0 %v922_v11 }
 0x924   : > { %3860 = vmatpush1.msra.mxu0 %v921_v53  ;;  %v3488_v53 = vmul.f32 %v10626_v7, %v3465_v43  ;;  %v3450_v54 = vsub.f32 2.0, %v3432_v17  ;;  %v3493_v45 = vmul.f32 %v10661_v24, %v3467_v41  ;;  %v3492_v7 = vmul.f32 %v10667_v27, %v3467_v41  ;;  %v911_v43 = vld [vmem:[#allocation13 + $0x20] ss:$12 sps:$4 sm:$0xff]  }
 0x925   : > { %3692 = vmatmul.mubr.f32.gmra.mxu0 %v3480_v8  ;;  %3702 = vmatmul.mubr.f32.gmra.mxu1 %v3484_v62  ;;  %v8346_v32 = vpop.eup %8345  ;;  %v923_v2 = vunpack.c.h.bf16 %v911_v43  ;;  %v920_v46 = vunpack.c.l.bf16 %v911_v43 }
 0x926   : > { %7240 = vmatprep.mubr.msk.f32.mxu1 %vm1950_vm4, %v3487_v18  ;;  %3861 = vmatprep.subr.mxu0 %v919_v49  ;;  %v3433_v20 = vmul.f32 %v8346_v32, %v10765_v31  ;;  %v8348_v12 = vpop.eup %8347  ;;  %v3468_v51 = vmul.f32 %v8344_v30, %v3450_v54 }
 0x927   : > { %3862 = vmatpush1.msra.mxu0 %v918_v59  ;;  %3895 = vmatprep.mubr.f32.mxu0 %v12513_v47  ;;  %v3434_v40 = vmul.f32 %v8348_v12, %v3377_v35 }
 0x928   : > { %v3451_v6 = vsub.f32 2.0, %v3433_v20  ;;  %v3495_v26 = vmul.f32 %v10669_v48, %v3468_v51  ;;  %v3494_v16 = vmul.f32 %v10680_v33, %v3468_v51  ;;  %v3385_v48 = vpop.xlane.xlu1 %3384  ;;  %7724 = vmatprep.subr.mxu1 %v923_v2 }
 0x929   : > { %3707 = vmatmul.mubr.f32.gmra.mxu1 %v3486_v22  ;;  %v3452_v29 = vsub.f32 2.0, %v3434_v40  ;;  %8349 = vrcp.f32 %v3385_v48 }
 0x92a   : > { %7241 = vmatprep.mubr.msk.f32.mxu1 %vm1950_vm4, %v3489_v14  ;;  %v3469_v31 = vmul.f32 %v8346_v32, %v3451_v6  ;;  %7725 = vmatpush3.msra.mxu1 %v923_v2 }
 0x92b   : > { %v3470_v10 = vmul.f32 %v8348_v12, %v3452_v29  ;;  %7726 = vmatprep.subr.mxu1 %v920_v46 }
 0x92c   : > { %v3497_v35 = vmul.f32 %v10682_v13, %v3469_v31  ;;  %v3496_v24 = vmul.f32 %v10694_v1, %v3469_v31  ;;  %v3389_v44 = vpop.xlane.xlu1 %3388  ;;  %7727 = vmatpush3.msra.mxu1 %v920_v46 }
 0x92d   : > { %3712 = vmatmul.mubr.f32.gmra.mxu1 %v3488_v53  ;;  %v3499_v21 = vmul.f32 %v10665_v58, %v3470_v10  ;;  %v3498_v27 = vmul.f32 %v10672_v61, %v3470_v10  ;;  %8351 = vrcp.f32 %v3389_v44 }
 0x92e   : > { %7242 = vmatprep.mubr.msk.f32.mxu1 %vm1950_vm4, %v3491_v38 }
 0x930   : > { %v3393_v33 = vpop.xlane.xlu1 %3392 }
 0x931   : > { %3717 = vmatmul.mubr.f32.gmra.mxu1 %v3490_v39 }
 0x932   : > { %7243 = vmatprep.mubr.msk.f32.mxu1 %vm1950_vm4, %v3493_v45 }
 0x934   : > { %v3397_v11 = vpop.xlane.xlu1 %3396 }
 0x935   : > { %3722 = vmatmul.mubr.f32.gmra.mxu1 %v3492_v7 }
 0x936   : > { %7244 = vmatprep.mubr.msk.f32.mxu1 %vm1950_vm4, %v3495_v26  ;;  %v8350_v3 = vpop.eup %8349 }
 0x937   : > { %v3436_v1 = vmul.f32 %v8350_v3, %v3385_v48 }
 0x938   : > { %v3401_v34 = vpop.xlane.xlu1 %3400 }
 0x939   : > { %3727 = vmatmul.mubr.f32.gmra.mxu1 %v3494_v16  ;;  %v3454_v8 = vsub.f32 2.0, %v3436_v1 }
 0x93a   : > { %7245 = vmatprep.mubr.msk.f32.mxu1 %vm1950_vm4, %v3497_v35  ;;  %v8352_v58 = vpop.eup %8351 }
 0x93b   : > { %v3437_v61 = vmul.f32 %v8352_v58, %v3389_v44  ;;  %v3472_v63 = vmul.f32 %v8350_v3, %v3454_v8 }
 0x93c   : > { %v3405_v37 = vpop.xlane.xlu1 %3404 }
 0x93d   : > { %3732 = vmatmul.mubr.f32.gmra.mxu1 %v3496_v24  ;;  %v3455_v30 = vsub.f32 2.0, %v3437_v61  ;;  %v3503_v53 = vmul.f32 %v10678_v36, %v3472_v63  ;;  %v3502_v12 = vmul.f32 %v10686_v52, %v3472_v63  ;;  %v907_v24 = vld [vmem:[#allocation13 + $0x8] ss:$12 sps:$4 sm:$0xff]  }
 0x93e   : > { %7246 = vmatprep.mubr.msk.f32.mxu1 %vm1950_vm4, %v3499_v21 }
 0x93f   : > { %v3473_v38 = vmul.f32 %v8352_v58, %v3455_v30 }
 0x941   : > { %3737 = vmatmul.mubr.f32.gmra.mxu1 %v3498_v27  ;;  %v3504_v36 = vmul.f32 %v10698_v5, %v3473_v38 }
 0x950   : > { %v3381_v13 = vpop.xlane.xlu0 %3380 }
 0x951   : > { %8353 = vrcp.f32 %v3381_v13 }
 0x952   : > { %8355 = vrcp.f32 %v3393_v33 }
 0x953   : > { %8357 = vrcp.f32 %v3397_v11 }
 0x954   : > { %8359 = vrcp.f32 %v3401_v34 }
 0x955   : > { %8361 = vrcp.f32 %v3405_v37 }
 0x95e   : > { %v8354_v49 = vpop.eup %8353 }
 0x95f   : > { %v3435_v62 = vmul.f32 %v8354_v49, %v3381_v13  ;;  %v8356_v59 = vpop.eup %8355 }
 0x960   : > { %v3438_v22 = vmul.f32 %v8356_v59, %v3393_v33  ;;  %v8358_v50 = vpop.eup %8357 }
 0x961   : > { %v3453_v18 = vsub.f32 2.0, %v3435_v62  ;;  %v3439_v54 = vmul.f32 %v8358_v50, %v3397_v11  ;;  %v8360_v20 = vpop.eup %8359 }
 0x962   : > { %v3456_v41 = vsub.f32 2.0, %v3438_v22  ;;  %v3440_v40 = vmul.f32 %v8360_v20, %v3401_v34  ;;  %v8362_v45 = vpop.eup %8361 }
 0x963   : > { %v3471_v14 = vmul.f32 %v8354_v49, %v3453_v18  ;;  %v3441_v29 = vmul.f32 %v8362_v45, %v3405_v37 }
 0x964   : > { %v3474_v39 = vmul.f32 %v8356_v59, %v3456_v41  ;;  %v3458_v7 = vsub.f32 2.0, %v3440_v40 }
 0x965   : > { %v3501_v17 = vmul.f32 %v10750_v19, %v3471_v14  ;;  %v3500_v32 = vmul.f32 %v10752_v9, %v3471_v14  ;;  %v3505_v19 = vmul.f32 %v10692_v25, %v3473_v38  ;;  %v3457_v9 = vsub.f32 2.0, %v3439_v54 }
 0x966   : > { %v3507_v51 = vmul.f32 %v10716_v57, %v3474_v39  ;;  %v3506_v52 = vmul.f32 %v10714_v4, %v3474_v39  ;;  %v3476_v26 = vmul.f32 %v8360_v20, %v3458_v7  ;;  %v3459_v31 = vsub.f32 2.0, %v3441_v29  ;;  %v12554_v7 = vld [vmem:[#allocation48_spill] sm:$0xff]  ;;  %v12555_v29 = vld [vmem:[#allocation41_spill] sm:$0xff] }
 0x967   : > { %7247 = vmatprep.mubr.msk.f32.mxu1 %vm1950_vm4, %v3501_v17  ;;  %v3475_v6 = vmul.f32 %v8358_v50, %v3457_v9 }
 0x968   : > { %3742 = vmatmul.mubr.f32.gmra.mxu1 %v3500_v32  ;;  %v3511_v5 = vmul.f32 %v10731_v60, %v3476_v26  ;;  %v3477_v57 = vmul.f32 %v8362_v45, %v3459_v31  ;;  %v3510_v10 = vmul.f32 %v10734_v15, %v3476_v26  ;;  %v914_v60 = vunpack.c.l.bf16 %v907_v24  ;;  %v904_v15 = vld [vmem:[#allocation13] sm:$0xff]  ;;  %v12548_v45 = vld [vmem:[#allocation42_spill] sm:$0xff]  ;;  %v12558_v26 = vld [vmem:[#allocation33_spill] sm:$0xff] }
 0x969   : > { %7248 = vmatprep.mubr.msk.f32.mxu1 %vm1950_vm4, %v3503_v53  ;;  %v3509_v25 = vmul.f32 %v10725_v56, %v3475_v6  ;;  %v3508_v16 = vmul.f32 %v10723_v23, %v3475_v6  ;;  %v906_v56 = vld [vmem:[#allocation13 + $0xc] sm:$0xff]  ;;  %v917_v23 = vunpack.c.h.bf16 %v907_v24  ;;  %v913_v13 = vunpack.c.h.bf16 %v904_v15 }
 0x96a   : > { %v3513_v35 = vmul.f32 %v10740_v55, %v3477_v57  ;;  %v3512_v4 = vmul.f32 %v10745_v28, %v3477_v57  ;;  %v916_v21 = vunpack.c.h.bf16 %v906_v56  ;;  %v915_v28 = vunpack.c.l.bf16 %v906_v56  ;;  %v12552_v6 = vld [vmem:[#allocation46_spill] sm:$0xff]  ;;  %v12559_v31 = vld [vmem:[#allocation45_spill] sm:$0xff]  ;;  %v12562_v57 = vld [vmem:[#allocation47_spill] sm:$0xff] }
 0x96b   : > { %7755 = vmatprep.subr.mxu0 %v917_v23  ;;  %v912_v1 = vunpack.c.l.bf16 %v904_v15 }
 0x96c   : > { %3747 = vmatmul.mubr.f32.gmra.mxu1 %v3502_v12  ;;  %4241 = vmatprep.subr.mxu1 %v916_v21 }
 0x96d   : > { %7249 = vmatprep.mubr.msk.f32.mxu1 %vm1950_vm4, %v3505_v19 }
 0x970   : > { %3752 = vmatmul.mubr.f32.gmra.mxu1 %v3504_v36  ;;  %v12549_v36 = vld [vmem:[#allocation37_spill] sm:$0xff] }
 0x971   : > { %7250 = vmatprep.mubr.msk.f32.mxu1 %vm1950_vm4, %v3507_v51  ;;  %v12550_v51 = vld [vmem:[#allocation44_spill] sm:$0xff] }
 0x974   : > { %3757 = vmatmul.mubr.f32.gmra.mxu1 %v3506_v52  ;;  %v12556_v52 = vld [vmem:[#allocation50_spill] sm:$0xff] }
 0x975   : > { %7251 = vmatprep.mubr.msk.f32.mxu1 %vm1950_vm4, %v3509_v25  ;;  %v12557_v25 = vld [vmem:[#allocation43_spill] sm:$0xff] }
 0x978   : > { %3762 = vmatmul.mubr.f32.gmra.mxu1 %v3508_v16  ;;  %v12560_v16 = vld [vmem:[#allocation30_spill] sm:$0xff] }
 0x979   : > { %7252 = vmatprep.mubr.msk.f32.mxu1 %vm1950_vm4, %v3511_v5  ;;  %v12561_v5 = vld [vmem:[#allocation36_spill] sm:$0xff] }
 0x97c   : > { %3767 = vmatmul.mubr.f32.gmra.mxu1 %v3510_v10  ;;  %v12563_v10 = vld [vmem:[#allocation31_spill] sm:$0xff] }
 0x97d   : > { %7253 = vmatprep.mubr.msk.f32.mxu1 %vm1950_vm4, %v3513_v35 }
 0x980   : > { %3772 = vmatmul.mubr.f32.gmra.mxu1 %v3512_v4 }
 0x9e1   : > { %v3688_v27 = vpop.f32.mrf.mxu0  ;;  %v3698_v48 = vpop.f32.mrf.mxu1 }
 0x9e2   : > { %7254 = vmatmul.mubr.msk.f32.vlgmr.msra.gmra.mxu0 %vm1950_vm4, %v3688_v27  ;;  %7728 = vmatprep.mubr.msk.f32.mxu1 %vm1950_vm4, %v3688_v27 }
 0x9e3   : > { %v3690_v55 = vpop.f32.mrf.mxu0  ;;  %v3700_v44 = vpop.f32.mrf.mxu1  ;;  %3901 = vmatprep.mubr.f32.mxu0 %v12513_v47  ;;  %7756 = vmatpush3.msra.mxu0 %v917_v23 }
 0x9e4   : > { %7757 = vmatprep.subr.mxu0 %v914_v60 }
 0x9e5   : > { %v3693_v33 = vpop.f32.mrf.mxu0  ;;  %v3703_v11 = vpop.f32.mrf.mxu1  ;;  %7758 = vmatpush3.msra.mxu0 %v914_v60 }
 0x9e6   : > { %7255 = vmatmul.mubr.msk.f32.gmra.mxu0 %vm1950_vm4, %v3693_v33  ;;  %7729 = vmatmul.mubr.msk.f32.vlgmr.msra.gmra.mxu1 %vm1950_vm4, %v3693_v33 }
 0x9e7   : > { %v3695_v34 = vpop.f32.mrf.mxu0  ;;  %v3705_v3 = vpop.f32.mrf.mxu1  ;;  %7731 = vmatprep.mubr.msk.f32.mxu1 %vm1950_vm4, %v3698_v48  ;;  %3907 = vmatprep.mubr.f32.mxu0 %v12513_v47 }
 0x9e8   : > { %4242 = vmatpush1.msra.mxu1 %v915_v28  ;;  %v11000_v3 = vld [vmem:[#allocation16] sm:$0xff] }
 0x9e9   : > { %v3708_v58 = vpop.f32.mrf.mxu1  ;;  %4243 = vmatprep.subr.mxu1 %v913_v13 }
 0x9ea   : > { %7256 = vmatmul.mubr.msk.f32.gmra.mxu0 %vm1950_vm4, %v3698_v48  ;;  %7732 = vmatmul.mubr.msk.f32.gmra.mxu1 %vm1950_vm4, %v3703_v11 }
 0x9eb   : > { %v3710_v37 = vpop.f32.mrf.mxu1  ;;  %7734 = vmatprep.mubr.msk.f32.mxu1 %vm1950_vm4, %v3708_v58  ;;  %3913 = vmatprep.mubr.f32.mxu0 %v12513_v47 }
 0x9ec   : > { %4244 = vmatpush1.msra.mxu1 %v912_v1  ;;  %v1017_v1 = vunpack.c.h.bf16 %v11000_v3 }
 0x9ed   : > { %v3713_v49 = vpop.f32.mrf.mxu1  ;;  %4678 = vmatprep.subr.mxu1 %v12513_v47 }
 0x9ee   : > { %7257 = vmatmul.mubr.msk.f32.gmra.mxu0 %vm1950_vm4, %v3703_v11  ;;  %7735 = vmatmul.mubr.msk.f32.gmra.mxu1 %vm1950_vm4, %v3713_v49 }
 0x9ef   : > { %v3715_v8 = vpop.f32.mrf.mxu1  ;;  %3919 = vmatprep.mubr.f32.mxu0 %v12513_v47 }
 0x9f1   : > { %v3718_v61 = vpop.f32.mrf.mxu1 }
 0x9f2   : > { %7258 = vmatmul.mubr.msk.f32.gmra.mxu0 %vm1950_vm4, %v3708_v58  ;;  %7737 = vmatprep.mubr.msk.f32.mxu1 %vm1950_vm4, %v3718_v61 }
 0x9f3   : > { %v3720_v62 = vpop.f32.mrf.mxu1  ;;  %3925 = vmatprep.mubr.f32.mxu0 %v12513_v47 }
 0x9f5   : > { %v3723_v59 = vpop.f32.mrf.mxu1 }
 0x9f6   : > { %7259 = vmatmul.mubr.msk.f32.gmra.mxu0 %vm1950_vm4, %v3713_v49  ;;  %7738 = vmatmul.mubr.msk.f32.gmra.mxu1 %vm1950_vm4, %v3723_v59 }
 0x9f7   : > { %v3725_v18 = vpop.f32.mrf.mxu1  ;;  %3931 = vmatprep.mubr.f32.mxu0 %v12513_v47 }
 0x9f9   : > { %v3728_v43 = vpop.f32.mrf.mxu1 }
 0x9fa   : > { %7260 = vmatmul.mubr.msk.f32.gmra.mxu0 %vm1950_vm4, %v3718_v61  ;;  %7740 = vmatprep.mubr.msk.f32.mxu1 %vm1950_vm4, %v3728_v43 }
 0x9fb   : > { %v3730_v63 = vpop.f32.mrf.mxu1  ;;  %3937 = vmatprep.mubr.f32.mxu0 %v12513_v47 }
 0x9fd   : > { %v3733_v2 = vpop.f32.mrf.mxu1 }
 0x9fe   : > { %7261 = vmatmul.mubr.msk.f32.gmra.mxu0 %vm1950_vm4, %v3723_v59  ;;  %7741 = vmatmul.mubr.msk.f32.gmra.mxu1 %vm1950_vm4, %v3733_v2 }
 0x9ff   : > { %v3735_v30 = vpop.f32.mrf.mxu1  ;;  %3943 = vmatprep.mubr.f32.mxu0 %v12513_v47 }
 0xa01   : > { %v3738_v22 = vpop.f32.mrf.mxu1 }
 0xa02   : > { %7262 = vmatmul.mubr.msk.f32.gmra.mxu0 %vm1950_vm4, %v3728_v43  ;;  %7743 = vmatprep.mubr.msk.f32.mxu1 %vm1950_vm4, %v3738_v22 }
 0xa03   : > { %v3740_v14 = vpop.f32.mrf.mxu1  ;;  %3949 = vmatprep.mubr.f32.mxu0 %v12513_v47 }
 0xa06   : > { %7263 = vmatmul.mubr.msk.f32.gmra.mxu0 %vm1950_vm4, %v3733_v2 }
 0xa07   : > { %3955 = vmatprep.mubr.f32.mxu0 %v12513_v47 }
 0xa0a   : > { %7264 = vmatmul.mubr.msk.f32.gmra.mxu0 %vm1950_vm4, %v3738_v22 }
 0xa0b   : > { %3961 = vmatprep.mubr.f32.mxu0 %v12513_v47 }
 0xa28   : > { %v3743_v46 = vpop.f32.mrf.mxu1 }
 0xa29   : > { %7265 = vmatmul.mubr.msk.f32.gmra.mxu0 %vm1950_vm4, %v3743_v46  ;;  %7744 = vmatmul.mubr.msk.f32.gmra.mxu1 %vm1950_vm4, %v3743_v46 }
 0xa2a   : > { %v3745_v50 = vpop.f32.mrf.mxu1  ;;  %3967 = vmatprep.mubr.f32.mxu0 %v12513_v47 }
 0xa2c   : > { %v3748_v17 = vpop.f32.mrf.mxu1 }
 0xa2d   : > { %7266 = vmatmul.mubr.msk.f32.gmra.mxu0 %vm1950_vm4, %v3748_v17  ;;  %7746 = vmatprep.mubr.msk.f32.mxu1 %vm1950_vm4, %v3748_v17 }
 0xa2e   : > { %v3750_v32 = vpop.f32.mrf.mxu1  ;;  %3973 = vmatprep.mubr.f32.mxu0 %v12513_v47 }
 0xa30   : > { %v3753_v53 = vpop.f32.mrf.mxu1 }
 0xa31   : > { %7267 = vmatmul.mubr.msk.f32.gmra.mxu0 %vm1950_vm4, %v3753_v53  ;;  %7747 = vmatmul.mubr.msk.f32.gmra.mxu1 %vm1950_vm4, %v3753_v53 }
 0xa32   : > { %v3755_v38 = vpop.f32.mrf.mxu1  ;;  %3979 = vmatprep.mubr.f32.mxu0 %v12513_v47 }
 0xa34   : > { %v3758_v41 = vpop.f32.mrf.mxu1 }
 0xa35   : > { %7268 = vmatmul.mubr.msk.f32.gmra.mxu0 %vm1950_vm4, %v3758_v41  ;;  %7749 = vmatprep.mubr.msk.f32.mxu1 %vm1950_vm4, %v3758_v41 }
 0xa36   : > { %v3760_v54 = vpop.f32.mrf.mxu1  ;;  %3985 = vmatprep.mubr.f32.mxu0 %v12513_v47 }
 0xa38   : > { %v3763_v20 = vpop.f32.mrf.mxu1 }
 0xa39   : > { %7269 = vmatmul.mubr.msk.f32.gmra.mxu0 %vm1950_vm4, %v3763_v20  ;;  %7750 = vmatmul.mubr.msk.f32.gmra.mxu1 %vm1950_vm4, %v3763_v20 }
 0xa3a   : > { %v3765_v12 = vpop.f32.mrf.mxu1  ;;  %3991 = vmatprep.mubr.f32.mxu0 %v12513_v47 }
 0xa3c   : > { %v3768_v19 = vpop.f32.mrf.mxu1 }
 0xa3d   : > { %7270 = vmatmul.mubr.msk.f32.gmra.mxu0 %vm1950_vm4, %v3768_v19  ;;  %7752 = vmatprep.mubr.msk.f32.mxu1 %vm1950_vm4, %v3768_v19 }
 0xa3e   : > { %v3770_v39 = vpop.f32.mrf.mxu1  ;;  %3997 = vmatprep.mubr.f32.mxu0 %v12513_v47 }
 0xa40   : > { %v3773_v9 = vpop.f32.mrf.mxu1 }
 0xa41   : > { %7271 = vmatmul.mubr.msk.f32.gmra.mxu0 %vm1950_vm4, %v3773_v9  ;;  %7753 = vmatmul.mubr.msk.f32.gmra.mxu1 %vm1950_vm4, %v3773_v9 }
 0xa42   : > { %v3775_v40 = vpop.f32.mrf.mxu1  ;;  %7759 = vmatprep.mubr.msk.f32.mxu0 %vm1950_vm4, %v10300_v0  ;;  %4277 = vmatprep.mubr.f32.mxu1 %v12513_v47 }
 0xa45   : > { %7290 = vmatmul.mubr.msk.f32.vlgmr.msra.gmra.mxu1 %vm1950_vm4, %v10300_v0  ;;  %7760 = vmatmul.mubr.msk.f32.vlgmr.msra.gmra.mxu0 %vm1950_vm4, %v10305_v42  ;;  %v12551_v0 = vld [vmem:[#allocation39_spill] sm:$0xff] }
 0xa46   : > { %7762 = vmatprep.mubr.msk.f32.mxu0 %vm1950_vm4, %v12548_v45  ;;  %4283 = vmatprep.mubr.f32.mxu1 %v12513_v47 }
 0xa49   : > { %7291 = vmatmul.mubr.msk.f32.gmra.mxu1 %vm1950_vm4, %v10305_v42  ;;  %7763 = vmatmul.mubr.msk.f32.gmra.mxu0 %vm1950_vm4, %v12549_v36  ;;  %v12553_v42 = vld [vmem:[#allocation40_spill] sm:$0xff] }
 0xa4a   : > { %7765 = vmatprep.mubr.msk.f32.mxu0 %vm1950_vm4, %v12550_v51  ;;  %4289 = vmatprep.mubr.f32.mxu1 %v12513_v47 }
 0xa4d   : > { %7292 = vmatmul.mubr.msk.f32.gmra.mxu1 %vm1950_vm4, %v12548_v45  ;;  %7766 = vmatmul.mubr.msk.f32.gmra.mxu0 %vm1950_vm4, %v12551_v0 }
 0xa4e   : > { %7768 = vmatprep.mubr.msk.f32.mxu0 %vm1950_vm4, %v12552_v6  ;;  %4295 = vmatprep.mubr.f32.mxu1 %v12513_v47 }
 0xa51   : > { %7293 = vmatmul.mubr.msk.f32.gmra.mxu1 %vm1950_vm4, %v12549_v36  ;;  %7769 = vmatmul.mubr.msk.f32.gmra.mxu0 %vm1950_vm4, %v12553_v42 }
 0xa52   : > { %7771 = vmatprep.mubr.msk.f32.mxu0 %vm1950_vm4, %v12554_v7  ;;  %4301 = vmatprep.mubr.f32.mxu1 %v12513_v47 }
 0xa55   : > { %7294 = vmatmul.mubr.msk.f32.gmra.mxu1 %vm1950_vm4, %v12550_v51  ;;  %7772 = vmatmul.mubr.msk.f32.gmra.mxu0 %vm1950_vm4, %v12555_v29 }
 0xa56   : > { %7774 = vmatprep.mubr.msk.f32.mxu0 %vm1950_vm4, %v12556_v52  ;;  %4307 = vmatprep.mubr.f32.mxu1 %v12513_v47 }
 0xa59   : > { %7295 = vmatmul.mubr.msk.f32.gmra.mxu1 %vm1950_vm4, %v12551_v0  ;;  %7775 = vmatmul.mubr.msk.f32.gmra.mxu0 %vm1950_vm4, %v12557_v25 }
 0xa5a   : > { %7777 = vmatprep.mubr.msk.f32.mxu0 %vm1950_vm4, %v12558_v26  ;;  %4313 = vmatprep.mubr.f32.mxu1 %v12513_v47 }
 0xa5d   : > { %7296 = vmatmul.mubr.msk.f32.gmra.mxu1 %vm1950_vm4, %v12552_v6  ;;  %7778 = vmatmul.mubr.msk.f32.gmra.mxu0 %vm1950_vm4, %v12559_v31 }
 0xa5e   : > { %7780 = vmatprep.mubr.msk.f32.mxu0 %vm1950_vm4, %v12560_v16  ;;  %4319 = vmatprep.mubr.f32.mxu1 %v12513_v47 }
 0xa61   : > { %7297 = vmatmul.mubr.msk.f32.gmra.mxu1 %vm1950_vm4, %v12553_v42  ;;  %7781 = vmatmul.mubr.msk.f32.gmra.mxu0 %vm1950_vm4, %v12561_v5 }
 0xa62   : > { %7783 = vmatprep.mubr.msk.f32.mxu0 %vm1950_vm4, %v12562_v57  ;;  %4325 = vmatprep.mubr.f32.mxu1 %v12513_v47 }
 0xa65   : > { %7298 = vmatmul.mubr.msk.f32.gmra.mxu1 %vm1950_vm4, %v12554_v7  ;;  %7784 = vmatmul.mubr.msk.f32.gmra.mxu0 %vm1950_vm4, %v12563_v10 }
 0xa66   : > { %4331 = vmatprep.mubr.f32.mxu1 %v12513_v47  ;;  %7326 = vmatprep.mubr.msk.f32.mxu0 %vm1950_vm4, %v1017_v1 }
 0xa69   : > { %7299 = vmatmul.mubr.msk.f32.gmra.mxu1 %vm1950_vm4, %v12555_v29 }
 0xa6a   : > { %4337 = vmatprep.mubr.f32.mxu1 %v12513_v47 }
 0xa6d   : > { %7300 = vmatmul.mubr.msk.f32.gmra.mxu1 %vm1950_vm4, %v12556_v52 }
 0xa6e   : > { %4343 = vmatprep.mubr.f32.mxu1 %v12513_v47 }
 0xa71   : > { %7301 = vmatmul.mubr.msk.f32.gmra.mxu1 %vm1950_vm4, %v12557_v25 }
 0xa72   : > { %4349 = vmatprep.mubr.f32.mxu1 %v12513_v47 }
 0xa75   : > { %7302 = vmatmul.mubr.msk.f32.gmra.mxu1 %vm1950_vm4, %v12558_v26 }
 0xa76   : > { %4355 = vmatprep.mubr.f32.mxu1 %v12513_v47 }
 0xa79   : > { %7303 = vmatmul.mubr.msk.f32.gmra.mxu1 %vm1950_vm4, %v12559_v31 }
 0xa7a   : > { %4361 = vmatprep.mubr.f32.mxu1 %v12513_v47 }
 0xa7d   : > { %7304 = vmatmul.mubr.msk.f32.gmra.mxu1 %vm1950_vm4, %v12560_v16 }
 0xa7e   : > { %4367 = vmatprep.mubr.f32.mxu1 %v12513_v47 }
 0xa81   : > { %7305 = vmatmul.mubr.msk.f32.gmra.mxu1 %vm1950_vm4, %v12561_v5 }
 0xa82   : > { %4373 = vmatprep.mubr.f32.mxu1 %v12513_v47 }
 0xa85   : > { %7306 = vmatmul.mubr.msk.f32.gmra.mxu1 %vm1950_vm4, %v12562_v57 }
 0xa86   : > { %4379 = vmatprep.mubr.f32.mxu1 %v12513_v47 }
 0xa89   : > { %7307 = vmatmul.mubr.msk.f32.gmra.mxu1 %vm1950_vm4, %v12563_v10 }
 0xa8a   : > { %7328 = vmatprep.mubr.msk.f32.mxu1 %vm1950_vm4, %v1017_v1 }
 0xaa2   : > { %v10966_v35 = vpop.f32.mrf.mxu0 }
 0xaa3   : > { %12564 = vst [vmem:[#allocation52_spill] sm:$0xff] %v10966_v35 }
 0xaa4   : > { %v10968_v4 = vpop.f32.mrf.mxu0 }
 0xaa5   : > { %12565 = vst [vmem:[#allocation49_spill] sm:$0xff] %v10968_v4 }
 0xaa6   : > { %v10970_v56 = vpop.f32.mrf.mxu0  ;;  %v10996_v13 = vpop.f32.mrf.mxu1 }
 0xaa7   : > { %12566 = vst [vmem:[#allocation29_spill] sm:$0xff] %v10970_v56 }
 0xaa8   : > { %v10972_v24 = vpop.f32.mrf.mxu0  ;;  %v11003_v58 = vpop.f32.mrf.mxu1 }
 0xaa9   : > { %12567 = vst [vmem:[#allocation38_spill] sm:$0xff] %v10972_v24 }
 0xaaa   : > { %v10974_v21 = vpop.f32.mrf.mxu0  ;;  %v11009_v49 = vpop.f32.mrf.mxu1 }
 0xaab   : > { %12568 = vst [vmem:[#allocation51_spill] sm:$0xff] %v10974_v21 }
 0xaac   : > { %v10976_v23 = vpop.f32.mrf.mxu0  ;;  %v11013_v61 = vpop.f32.mrf.mxu1 }
 0xaad   : > { %12569 = vst [vmem:[#allocation27_spill] sm:$0xff] %v10976_v23 }
 0xaae   : > { %v10978_v60 = vpop.f32.mrf.mxu0  ;;  %v11017_v59 = vpop.f32.mrf.mxu1 }
 0xaaf   : > { %12570 = vst [vmem:[#allocation53_spill] sm:$0xff] %v10978_v60 }
 0xab0   : > { %v10980_v27 = vpop.f32.mrf.mxu0  ;;  %v11021_v43 = vpop.f32.mrf.mxu1 }
 0xab1   : > { %12571 = vst [vmem:[#allocation32_spill] sm:$0xff] %v10980_v27  ;;  %v955_v27 = vld [vmem:[#allocation14 + $0xb0] ss:$12 sps:$4 sm:$0xff]  }
 0xab2   : > { %v10982_v48 = vpop.f32.mrf.mxu0 }
 0xab3   : > { %12572 = vst [vmem:[#allocation28_spill] sm:$0xff] %v10982_v48 }
 0xab4   : > { %v10984_v15 = vpop.f32.mrf.mxu0 }
 0xab5   : > { %12573 = vst [vmem:[#allocation54_spill] sm:$0xff] %v10984_v15  ;;  %v1007_v15 = vunpack.c.h.bf16 %v955_v27 }
 0xab6   : > { %v10986_v55 = vpop.f32.mrf.mxu0  ;;  %v11023_v63 = vpop.f32.mrf.mxu1 }
 0xab7   : > { %12574 = vst [vmem:[#allocation26_spill] sm:$0xff] %v10986_v55  ;;  %v951_v55 = vld [vmem:[#allocation14 + $0x98] ss:$12 sps:$4 sm:$0xff]  }
 0xab8   : > { %v10988_v44 = vpop.f32.mrf.mxu0  ;;  %v11027_v30 = vpop.f32.mrf.mxu1 }
 0xab9   : > { %12575 = vst [vmem:[#allocation25_spill] sm:$0xff] %v10988_v44 }
 0xaba   : > { %v10990_v28 = vpop.f32.mrf.mxu0 }
 0xabb   : > { %12576 = vst [vmem:[#allocation34_spill] sm:$0xff] %v10990_v28  ;;  %v1004_v28 = vunpack.c.l.bf16 %v955_v27 }
 0xabc   : > { %v10992_v33 = vpop.f32.mrf.mxu0 }
 0xabd   : > { %12577 = vst [vmem:[#allocation35_spill] sm:$0xff] %v10992_v33 }
 0xabe   : > { %v10994_v11 = vpop.f32.mrf.mxu0  ;;  %v11031_v14 = vpop.f32.mrf.mxu1 }
 0xabf   : > { %12578 = vst [vmem:[#allocation42_spill] sm:$0xff] %v10994_v11  ;;  %v1001_v11 = vunpack.c.h.bf16 %v951_v55 }
 0xac0   : > { %v10998_v34 = vpop.f32.mrf.mxu0  ;;  %v11037_v17 = vpop.f32.mrf.mxu1 }
 0xac1   : > { %12579 = vst [vmem:[#allocation37_spill] sm:$0xff] %v10998_v34 }
 0xac2   : > { %v11007_v37 = vpop.f32.mrf.mxu0 }
 0xac3   : > { %12580 = vst [vmem:[#allocation44_spill] sm:$0xff] %v11007_v37 }
 0xac4   : > { %v11011_v8 = vpop.f32.mrf.mxu0 }
 0xac5   : > { %12581 = vst [vmem:[#allocation39_spill] sm:$0xff] %v11011_v8 }
 0xac6   : > { %v11015_v62 = vpop.f32.mrf.mxu0 }
 0xac7   : > { %12582 = vst [vmem:[#allocation46_spill] sm:$0xff] %v11015_v62  ;;  %v998_v62 = vunpack.c.l.bf16 %v951_v55 }
 0xac8   : > { %v11019_v18 = vpop.f32.mrf.mxu0 }
 0xac9   : > { %12583 = vst [vmem:[#allocation40_spill] sm:$0xff] %v11019_v18 }
 0xaca   : > { %v11025_v2 = vpop.f32.mrf.mxu0 }
 0xacb   : > { %12584 = vst [vmem:[#allocation48_spill] sm:$0xff] %v11025_v2 }
 0xacc   : > { %v11029_v22 = vpop.f32.mrf.mxu0 }
 0xae9   : > { %v11033_v46 = vpop.f32.mrf.mxu0  ;;  %v11041_v53 = vpop.f32.mrf.mxu1 }
 0xaeb   : > { %v11035_v50 = vpop.f32.mrf.mxu0  ;;  %v11047_v54 = vpop.f32.mrf.mxu1 }
 0xaed   : > { %v11039_v32 = vpop.f32.mrf.mxu0 }
 0xaef   : > { %v11043_v38 = vpop.f32.mrf.mxu0 }
 0xaf1   : > { %v11045_v41 = vpop.f32.mrf.mxu0  ;;  %v7748_v12 = vpop.f32.mrf.mxu1 }
 0xaf3   : > { %v11049_v20 = vpop.f32.mrf.mxu0  ;;  %v4130_v9 = vpop.f32.mrf.mxu1 }
 0xaf5   : > { %v11051_v19 = vpop.f32.mrf.mxu0 }
 0xaf7   : > { %v11053_v39 = vpop.f32.mrf.mxu0 }
 0xaf9   : > { %v11055_v40 = vpop.f32.mrf.mxu0  ;;  %v7751_v45 = vpop.f32.mrf.mxu1 }
 0xafb   : > { %v11057_v36 = vpop.f32.mrf.mxu0  ;;  %v4140_v0 = vpop.f32.mrf.mxu1 }
 0xafd   : > { %v11059_v51 = vpop.f32.mrf.mxu0 }
 0xafe   : > { %12585 = vst [vmem:[#allocation41_spill] sm:$0xff] %v11059_v51 }
 0xaff   : > { %v11061_v6 = vpop.f32.mrf.mxu0 }
 0xb00   : > { %12586 = vst [vmem:[#allocation50_spill] sm:$0xff] %v11061_v6 }
 0xb01   : > { %v11063_v42 = vpop.f32.mrf.mxu0  ;;  %v11065_v7 = vpop.f32.mrf.mxu1 }
 0xb02   : > { %12587 = vst [vmem:[#allocation43_spill] sm:$0xff] %v11063_v42 }
 0xb03   : > { %v11067_v29 = vpop.f32.mrf.mxu0  ;;  %v11069_v52 = vpop.f32.mrf.mxu1 }
 0xb04   : > { %12588 = vst [vmem:[#allocation33_spill] sm:$0xff] %v11067_v29 }
 0xb05   : > { %v11071_v25 = vpop.f32.mrf.mxu1  ;;  %v11073_v26 = vpop.f32.mrf.mxu0 }
 0xb06   : > { %12589 = vst [vmem:[#allocation45_spill] sm:$0xff] %v11071_v25 }
 0xb07   : > { %v11075_v31 = vpop.f32.mrf.mxu1  ;;  %v11077_v16 = vpop.f32.mrf.mxu0 }
 0xb08   : > { %12590 = vst [vmem:[#allocation30_spill] sm:$0xff] %v11075_v31 }
 0xb09   : > { %v11079_v5 = vpop.f32.mrf.mxu1  ;;  %v11081_v57 = vpop.f32.mrf.mxu0 }
 0xb0a   : > { %12591 = vst [vmem:[#allocation36_spill] sm:$0xff] %v11079_v5 }
 0xb0b   : > { %v11083_v10 = vpop.f32.mrf.mxu1  ;;  %v11085_v1 = vpop.f32.mrf.mxu0 }
 0xb0c   : > { %12592 = vst [vmem:[#allocation47_spill] sm:$0xff] %v11083_v10 }
 0xb0d   : > { %v11087_v51 = vpop.f32.mrf.mxu1  ;;  %v11089_v6 = vpop.f32.mrf.mxu0 }
 0xb0e   : > { %12593 = vst [vmem:[#allocation31_spill] sm:$0xff] %v11087_v51 }
 0xb0f   : > { %v11091_v42 = vpop.f32.mrf.mxu1  ;;  %v11093_v29 = vpop.f32.mrf.mxu0 }
 0xb10   : > { %12594 = vst [vmem:[#allocation55_spill] sm:$0xff] %v11091_v42 }
 0xb11   : > { %v11095_v25 = vpop.f32.mrf.mxu1  ;;  %v11097_v35 = vpop.f32.mrf.mxu0 }
 0xb12   : > { %12595 = vst [vmem:[#allocation56_spill] sm:$0xff] %v11095_v25 }
 0xb13   : > { %v11099_v31 = vpop.f32.mrf.mxu1  ;;  %v11101_v4 = vpop.f32.mrf.mxu0 }
 0xb14   : > { %12596 = vst [vmem:[#allocation57_spill] sm:$0xff] %v11099_v31 }
 0xb15   : > { %v11103_v5 = vpop.f32.mrf.mxu1  ;;  %v7773_v56 = vpop.f32.mrf.mxu0 }
 0xb16   : > { %12597 = vst [vmem:[#allocation58_spill] sm:$0xff] %v11103_v5 }
 0xb17   : > { %v11105_v10 = vpop.f32.mrf.mxu1  ;;  %v4492_v24 = vpop.f32.mrf.mxu0 }
 0xb18   : > { %12598 = vst [vmem:[#allocation59_spill] sm:$0xff] %v11105_v10 }
 0xb19   : > { %v11107_v51 = vpop.f32.mrf.mxu1  ;;  %v7776_v21 = vpop.f32.mrf.mxu0 }
 0xb1a   : > { %12599 = vst [vmem:[#allocation60_spill] sm:$0xff] %v11107_v51  ;;  %v4508_v27 = vadd.f32 %v7776_v21, %v11041_v53 }
 0xb1b   : > { %v11109_v42 = vpop.f32.mrf.mxu1  ;;  %v4502_v23 = vpop.f32.mrf.mxu0 }
 0xb1c   : > { %12600 = vst [vmem:[#allocation61_spill] sm:$0xff] %v11109_v42  ;;  %v4503_v55 = vadd.f32 %v4502_v23, %v11047_v54  ;;  %v935_v54 = vld [vmem:[#allocation14 + $0x38] ss:$12 sps:$4 sm:$0xff]  }
 0xb1d   : > { %v11111_v60 = vpop.f32.mrf.mxu1  ;;  %v7779_v25 = vpop.f32.mrf.mxu0 }
 0xb1e   : > { %12601 = vst [vmem:[#allocation62_spill] sm:$0xff] %v11111_v60  ;;  %v4518_v42 = vadd.f32 %v7779_v25, %v7748_v12  ;;  %v947_v60 = vld [vmem:[#allocation14 + $0x80] ss:$12 sps:$4 sm:$0xff]   ;;  %v977_v25 = vunpack.c.h.bf16 %v935_v54 }
 0xb1f   : > { %v11113_v48 = vpop.f32.mrf.mxu1  ;;  %v4512_v31 = vpop.f32.mrf.mxu0 }
 0xb20   : > { %12602 = vst [vmem:[#allocation63_spill] sm:$0xff] %v11113_v48  ;;  %v4513_v48 = vadd.f32 %v4512_v31, %v4130_v9  ;;  %v931_v31 = vld [vmem:[#allocation14 + $0x20] ss:$12 sps:$4 sm:$0xff]  }
 0xb21   : > { %v11115_v5 = vpop.f32.mrf.mxu1  ;;  %v7782_v44 = vpop.f32.mrf.mxu0 }
 0xb22   : > { %12603 = vst [vmem:[#allocation64_spill] sm:$0xff] %v11115_v5  ;;  %v4528_v10 = vadd.f32 %v7782_v44, %v7751_v45  ;;  %v995_v44 = vunpack.c.h.bf16 %v947_v60  ;;  %v4582_v45 = vmul.f32 %v4518_v42, %v1001_v11  ;;  %v943_v5 = vld [vmem:[#allocation14 + $0x68] ss:$12 sps:$4 sm:$0xff]   ;;  %v4579_v9 = vmul.f32 %v4513_v48, %v998_v62  ;;  %v939_v11 = vld [vmem:[#allocation14 + $0x50] ss:$12 sps:$4 sm:$0xff]  }
 0xb23   : > { %v11117_v33 = vpop.f32.mrf.mxu1  ;;  %v4522_v51 = vpop.f32.mrf.mxu0  ;;  %v986_v53 = vunpack.c.l.bf16 %v943_v5  ;;  %v983_v62 = vunpack.c.h.bf16 %v939_v11 }
 0xb24   : > { %v4588_v34 = vmul.f32 %v4528_v10, %v1007_v15  ;;  %v4523_v37 = vadd.f32 %v4522_v51, %v4140_v0  ;;  %v992_v15 = vunpack.c.l.bf16 %v947_v60  ;;  %v4576_v21 = vmul.f32 %v4508_v27, %v995_v44 }
 0xb25   : > { %v11119_v8 = vpop.f32.mrf.mxu1  ;;  %v4493_v60 = vadd.f32 %v4492_v24, %v11037_v17  ;;  %v980_v0 = vunpack.c.l.bf16 %v939_v11  ;;  %v4483_v24 = vadd.f32 %v11101_v4, %v11027_v30  ;;  %v974_v10 = vunpack.c.l.bf16 %v935_v54 }
 0xb26   : > { %v4585_v18 = vmul.f32 %v4523_v37, %v1004_v28  ;;  %4679 = vmatpush1.msra.mxu1 %v4588_v34  ;;  %v989_v34 = vunpack.c.h.bf16 %v943_v5  ;;  %v4498_v37 = vadd.f32 %v7773_v56, %v11031_v14  ;;  %v4573_v23 = vmul.f32 %v4503_v55, %v992_v15 }
 0xb27   : > { %v11121_v2 = vpop.f32.mrf.mxu1  ;;  %4680 = vmatprep.subr.mxu1 %v12513_v47  ;;  %v4488_v56 = vadd.f32 %v11097_v35, %v11023_v63  ;;  %v4567_v17 = vmul.f32 %v4493_v60, %v986_v53  ;;  %v4478_v35 = vadd.f32 %v11089_v6, %v11017_v59  ;;  %v4473_v4 = vadd.f32 %v11093_v29, %v11021_v43 }
 0xb28   : > { %4681 = vmatpush1.msra.mxu1 %v4585_v18  ;;  %v4570_v14 = vmul.f32 %v4498_v37, %v989_v34  ;;  %v4561_v30 = vmul.f32 %v4483_v24, %v980_v0  ;;  %v971_v27 = vunpack.c.h.bf16 %v931_v31  ;;  %v4468_v59 = vadd.f32 %v11081_v57, %v11009_v49 }
 0xb29   : > { %v11125_v12 = vpop.f32.mrf.mxu1  ;;  %4682 = vmatprep.subr.mxu1 %v12513_v47  ;;  %v4564_v63 = vmul.f32 %v4488_v56, %v983_v62  ;;  %v4558_v6 = vmul.f32 %v4478_v35, %v977_v25  ;;  %v968_v55 = vunpack.c.l.bf16 %v931_v31  ;;  %v4463_v43 = vadd.f32 %v11085_v1, %v11013_v61  ;;  %v950_v31 = vld [vmem:[#allocation14 + $0x9c] sm:$0xff] }
 0xb2a   : > { %4683 = vmatpush1.msra.mxu1 %v4582_v45  ;;  %v927_v45 = vld [vmem:[#allocation14 + $0x8] ss:$12 sps:$4 sm:$0xff]   ;;  %v4555_v29 = vmul.f32 %v4473_v4, %v974_v10  ;;  %v4458_v49 = vadd.f32 %v11073_v26, %v10996_v13  ;;  %v4552_v57 = vmul.f32 %v4468_v59, %v971_v27  ;;  %v4453_v61 = vadd.f32 %v11077_v16, %v11003_v58 }
 0xb2b   : > { %v11129_v28 = vpop.f32.mrf.mxu1  ;;  %4684 = vmatprep.subr.mxu1 %v12513_v47  ;;  %v965_v37 = vunpack.c.h.bf16 %v927_v45  ;;  %v962_v53 = vunpack.c.l.bf16 %v927_v45  ;;  %v4549_v1 = vmul.f32 %v4463_v43, %v968_v55  ;;  %v954_v26 = vld [vmem:[#allocation14 + $0xb4] sm:$0xff]  ;;  %v952_v58 = vld [vmem:[#allocation14 + $0xa8] sm:$0xff]  ;;  %v1000_v27 = vunpack.c.h.bf16 %v950_v31 }
 0xb2c   : > { %4685 = vmatpush1.msra.mxu1 %v4579_v9  ;;  %v7785_v9 = vpop.f32.mrf.mxu0  ;;  %v1006_v16 = vunpack.c.h.bf16 %v954_v26  ;;  %v1003_v10 = vunpack.c.h.bf16 %v952_v58  ;;  %v1002_v59 = vunpack.c.l.bf16 %v952_v58  ;;  %v948_v55 = vld [vmem:[#allocation14 + $0x90] sm:$0xff] }
 0xb2d   : > { %v11133_v18 = vpop.f32.mrf.mxu1  ;;  %4686 = vmatprep.subr.mxu1 %v12513_v47  ;;  %v4546_v62 = vmul.f32 %v4458_v49, %v965_v37  ;;  %v4538_v13 = vadd.f32 %v7785_v9, %v11065_v7  ;;  %v4543_v54 = vmul.f32 %v4453_v61, %v962_v53  ;;  %v999_v9 = vunpack.c.l.bf16 %v950_v31  ;;  %v12604_v58 = vld [vmem:[#allocation48_spill] sm:$0xff] }
 0xb2e   : > { %4687 = vmatpush1.msra.mxu1 %v4576_v21  ;;  %v959_v21 = vld [vmem:[#allocation14 + $0xc8] ss:$12 sps:$4 sm:$0xff]   ;;  %v4532_v60 = vpop.f32.mrf.mxu0 }
 0xb2f   : > { %v11137_v48 = vpop.f32.mrf.mxu1  ;;  %4688 = vmatprep.subr.mxu1 %v12513_v47  ;;  %v1013_v56 = vunpack.c.h.bf16 %v959_v21  ;;  %v1010_v0 = vunpack.c.l.bf16 %v959_v21  ;;  %v4533_v24 = vadd.f32 %v4532_v60, %v11069_v52  ;;  %v1090_v52 = vld [vmem:[#allocation17 + $0x1a4] sm:$0xff]  ;;  %v997_v21 = vunpack.c.h.bf16 %v948_v55  ;;  %v944_v60 = vld [vmem:[#allocation14 + $0x78] sm:$0xff] }
 0xb30   : > { %4689 = vmatpush1.msra.mxu1 %v4573_v23  ;;  %v1198_v49 = vunpack.c.h.bf16 %v1090_v52 }
 0xb31   : > { %v11142_v51 = vpop.f32.mrf.mxu1  ;;  %4690 = vmatprep.subr.mxu1 %v12513_v47  ;;  %v4594_v7 = vmul.f32 %v4538_v13, %v1013_v56  ;;  %v4591_v45 = vmul.f32 %v4533_v24, %v1010_v0  ;;  %v990_v24 = vunpack.c.l.bf16 %v944_v60 }
 0xb32   : > { %4691 = vmatpush1.msra.mxu1 %v4570_v14 }
 0xb33   : > { %v11147_v42 = vpop.f32.mrf.mxu1  ;;  %4692 = vmatprep.subr.mxu1 %v12513_v47 }
 0xb34   : > { %4693 = vmatpush1.msra.mxu1 %v4567_v17  ;;  %v1005_v17 = vunpack.c.l.bf16 %v954_v26  ;;  %v1084_v26 = vld [vmem:[#allocation17 + $0x180] sm:$0xff] }
 0xb35   : > { %v11152_v5 = vpop.f32.mrf.mxu1  ;;  %4694 = vmatprep.subr.mxu1 %v12513_v47 }
 0xb36   : > { %4695 = vmatpush1.msra.mxu1 %v4564_v63  ;;  %v11177_v63 = vld [vmem:[#allocation16 + $0x8] sm:$0xff]  ;;  %v4352_v61 = vadd.f32 %v11152_v5, %v11039_v32 }
 0xb37   : > { %v11157_v44 = vpop.f32.mrf.mxu1  ;;  %4696 = vmatprep.subr.mxu1 %v12513_v47 }
 0xb38   : > { %4697 = vmatpush1.msra.mxu1 %v4561_v30 }
 0xb39   : > { %v4357_v15 = vpop.f32.mrf.mxu1  ;;  %4698 = vmatprep.subr.mxu1 %v12513_v47 }
 0xb3a   : > { %4699 = vmatpush1.msra.mxu1 %v4558_v6 }
 0xb3b   : > { %v4359_v34 = vpop.f32.mrf.mxu1  ;;  %4700 = vmatprep.subr.mxu1 %v12513_v47 }
 0xb3c   : > { %4701 = vmatpush1.msra.mxu1 %v4555_v29  ;;  %v4360_v43 = vadd.f32 %v4359_v34, %v11049_v20  ;;  %v1197_v20 = vunpack.c.l.bf16 %v1090_v52  ;;  %v996_v34 = vunpack.c.l.bf16 %v948_v55  ;;  %v938_v52 = vld [vmem:[#allocation14 + $0x54] sm:$0xff] }
 0xb3d   : > { %v4363_v11 = vpop.f32.mrf.mxu1  ;;  %4702 = vmatprep.subr.mxu1 %v12513_v47  ;;  %v12608_v55 = vld [vmem:[#allocation44_spill] sm:$0xff] }
 0xb3e   : > { %4703 = vmatpush1.msra.mxu1 %v4552_v57  ;;  %v4364_v6 = vadd.f32 %v4363_v11, %v11051_v19  ;;  %v1088_v19 = vld [vmem:[#allocation17 + $0x198] sm:$0xff]  ;;  %v4354_v11 = vadd.f32 %v11157_v44, %v11043_v38  ;;  %v4348_v38 = vadd.f32 %v11147_v42, %v11035_v50  ;;  %v4581_v44 = vmul.f32 %v4360_v43, %v1000_v27 }
 0xb3f   : > { %v4365_v23 = vpop.f32.mrf.mxu1  ;;  %4704 = vmatprep.subr.mxu1 %v12513_v47  ;;  %v946_v57 = vld [vmem:[#allocation14 + $0x84] sm:$0xff]  ;;  %v1195_v32 = vunpack.c.h.bf16 %v1088_v19  ;;  %v1194_v13 = vunpack.c.l.bf16 %v1088_v19  ;;  %v4342_v50 = vadd.f32 %v11137_v48, %v11029_v22  ;;  %v1189_v48 = vunpack.c.h.bf16 %v1084_v26 }
 0xb40   : > { %4705 = vmatpush1.msra.mxu1 %v4549_v1  ;;  %v4366_v4 = vadd.f32 %v4365_v23, %v11053_v39  ;;  %v1019_v39 = vunpack.c.h.bf16 %v11177_v63  ;;  %v4583_v1 = vmul.f32 %v4364_v6, %v1002_v59  ;;  %v994_v23 = vunpack.c.h.bf16 %v946_v57  ;;  %v12607_v59 = vld [vmem:[#allocation39_spill] sm:$0xff] }
 0xb41   : > { %v4369_v14 = vpop.f32.mrf.mxu1  ;;  %4706 = vmatprep.subr.mxu1 %v12513_v47  ;;  %v993_v5 = vunpack.c.l.bf16 %v946_v57  ;;  %v4578_v42 = vmul.f32 %v4354_v11, %v997_v21  ;;  %v4330_v6 = vadd.f32 %v11121_v2, %v12607_v59  ;;  %v4328_v43 = vadd.f32 %v11119_v8, %v12608_v55  ;;  %v12610_v2 = vld [vmem:[#allocation42_spill] sm:$0xff]  ;;  %v12611_v57 = vld [vmem:[#allocation64_spill] sm:$0xff] }
 0xb42   : > { %4707 = vmatpush1.msra.mxu1 %v4546_v62  ;;  %v4370_v25 = vadd.f32 %v4369_v14, %v11055_v40  ;;  %v1016_v40 = vunpack.c.l.bf16 %v11000_v3  ;;  %v4584_v53 = vmul.f32 %v4366_v4, %v1003_v10  ;;  %v4346_v62 = vadd.f32 %v11142_v51, %v11033_v46  ;;  %v942_v14 = vld [vmem:[#allocation14 + $0x6c] sm:$0xff]  ;;  %v940_v51 = vld [vmem:[#allocation14 + $0x60] sm:$0xff] }
 0xb43   : > { %v4371_v35 = vpop.f32.mrf.mxu1  ;;  %4708 = vmatprep.subr.mxu1 %v12513_v47  ;;  %v4575_v22 = vmul.f32 %v4348_v38, %v994_v23  ;;  %v987_v31 = vunpack.c.l.bf16 %v942_v14  ;;  %v12606_v10 = vld [vmem:[#allocation46_spill] sm:$0xff]  ;;  %v985_v27 = vunpack.c.h.bf16 %v940_v51  ;;  %v981_v19 = vunpack.c.l.bf16 %v938_v52 }
 0xb44   : > { %v4372_v30 = vadd.f32 %v4371_v35, %v11057_v36  ;;  %4709 = vmatpush1.msra.mxu1 %v4543_v54  ;;  %v4358_v36 = vadd.f32 %v4357_v15, %v11045_v41  ;;  %v4586_v37 = vmul.f32 %v4370_v25, %v1005_v17  ;;  %v1018_v41 = vunpack.c.l.bf16 %v11177_v63  ;;  %v1086_v15 = vld [vmem:[#allocation17 + $0x18c] sm:$0xff]  ;;  %v934_v8 = vld [vmem:[#allocation14 + $0x3c] sm:$0xff] }
 0xb45   : > { %4738 = vmatprep.subr.mxu1 %v12513_v47  ;;  %v991_v54 = vunpack.c.h.bf16 %v944_v60  ;;  %v1192_v0 = vunpack.c.h.bf16 %v1086_v15  ;;  %v4577_v17 = vmul.f32 %v4352_v61, %v996_v34  ;;  %v1191_v46 = vunpack.c.l.bf16 %v1086_v15  ;;  %v12605_v35 = vld [vmem:[#allocation40_spill] sm:$0xff]  ;;  %v12612_v34 = vld [vmem:[#allocation35_spill] sm:$0xff]  ;;  %v12614_v60 = vld [vmem:[#allocation34_spill] sm:$0xff] }
 0xb46   : > { %v4587_v29 = vmul.f32 %v4372_v30, %v1006_v16  ;;  %4739 = vmatpush2.msra.mxu1 %v4594_v7  ;;  %v4580_v56 = vmul.f32 %v4358_v36, %v999_v9  ;;  %v4340_v16 = vadd.f32 %v11133_v18, %v12604_v58  ;;  %v988_v25 = vunpack.c.h.bf16 %v942_v14  ;;  %v12609_v36 = vld [vmem:[#allocation37_spill] sm:$0xff]  ;;  %v12613_v61 = vld [vmem:[#allocation63_spill] sm:$0xff]  ;;  %v12615_v23 = vld [vmem:[#allocation62_spill] sm:$0xff] }
 0xb47   : > { %4740 = vmatprep.subr.mxu1 %v12513_v47  ;;  %v4336_v7 = vadd.f32 %v11129_v28, %v12605_v35  ;;  %v4334_v4 = vadd.f32 %v11125_v12, %v12606_v10  ;;  %v4574_v18 = vmul.f32 %v4346_v62, %v993_v5  ;;  %v1188_v30 = vunpack.c.l.bf16 %v1084_v26  ;;  %v936_v12 = vld [vmem:[#allocation14 + $0x48] sm:$0xff]  ;;  %v12616_v62 = vld [vmem:[#allocation25_spill] sm:$0xff] }
 0xb48   : > { %4601 = vmatprep.subr.mxu0 %v4587_v29  ;;  %4741 = vmatpush2.msra.mxu1 %v4591_v45  ;;  %v4572_v45 = vmul.f32 %v4342_v50, %v991_v54  ;;  %v984_v28 = vunpack.c.l.bf16 %v940_v51  ;;  %v4571_v29 = vmul.f32 %v4340_v16, %v990_v24  ;;  %v982_v9 = vunpack.c.h.bf16 %v938_v52  ;;  %v12618_v54 = vld [vmem:[#allocation26_spill] sm:$0xff]  ;;  %v12619_v50 = vld [vmem:[#allocation60_spill] sm:$0xff]  ;;  %v928_v10 = vld [vmem:[#allocation14 + $0x18] sm:$0xff] }
 0xb49   : > { %4602 = vmatpush1.msra.mxu0 %v4586_v37  ;;  %4743 = vmatmul.mubr.f32.vlgmr.msra.gmra.mxu1 %v1016_v40  ;;  %v4324_v37 = vadd.f32 %v11117_v33, %v12609_v36  ;;  %v4322_v21 = vadd.f32 %v12611_v57, %v12610_v2  ;;  %v4568_v11 = vmul.f32 %v4334_v4, %v987_v31  ;;  %v978_v33 = vunpack.c.l.bf16 %v936_v12  ;;  %v930_v58 = vld [vmem:[#allocation14 + $0x24] sm:$0xff] }
 0xb4a   : > { %4603 = vmatprep.subr.mxu0 %v4584_v53  ;;  %7329 = vmatprep.mubr.msk.f32.mxu1 %vm1950_vm4, %v1019_v39  ;;  %v11220_v53 = vpop.f32.mrf.mxu1  ;;  %v4566_v15 = vmul.f32 %v4330_v6, %v985_v27  ;;  %v4316_v38 = vadd.f32 %v12615_v23, %v12614_v60  ;;  %v976_v5 = vunpack.c.h.bf16 %v934_v8  ;;  %v975_v14 = vunpack.c.l.bf16 %v934_v8  ;;  %v12626_v6 = vld [vmem:[#allocation53_spill] sm:$0xff]  ;;  %v12629_v36 = vld [vmem:[#allocation55_spill] sm:$0xff]  ;;  %v924_v8 = vld [vmem:[#allocation14] sm:$0xff] }
 0xb4b   : > { %4604 = vmatpush1.msra.mxu0 %v4583_v1  ;;  %4860 = vmatprep.subr.mxu1 %v1198_v49  ;;  %v4569_v49 = vmul.f32 %v4336_v7, %v988_v25  ;;  %v4318_v1 = vadd.f32 %v12613_v61, %v12612_v34  ;;  %v4563_v26 = vmul.f32 %v4324_v37, %v982_v9  ;;  %v12622_v7 = vld [vmem:[#allocation28_spill] sm:$0xff]  ;;  %v970_v4 = vunpack.c.h.bf16 %v930_v58  ;;  %v12628_v9 = vld [vmem:[#allocation27_spill] sm:$0xff]  ;;  %v12632_v34 = vld [vmem:[#allocation38_spill] sm:$0xff] }
 0xb4c   : > { %4605 = vmatprep.subr.mxu0 %v4581_v44  ;;  %4861 = vmatpush1.msra.mxu1 %v1197_v20  ;;  %v979_v20 = vunpack.c.h.bf16 %v936_v12  ;;  %v4565_v44 = vmul.f32 %v4328_v43, %v984_v28  ;;  %v4377_v24 = vpop.f32.mrf.mxu1  ;;  %v4559_v31 = vmul.f32 %v4316_v38, %v978_v33  ;;  %v969_v59 = vunpack.c.l.bf16 %v930_v58  ;;  %v12630_v2 = vld [vmem:[#allocation51_spill] sm:$0xff]  ;;  %v12634_v60 = vld [vmem:[#allocation29_spill] sm:$0xff]  ;;  %v12635_v23 = vld [vmem:[#allocation36_spill] sm:$0xff] }
 0xb4d   : > { %4606 = vmatpush1.msra.mxu0 %v4580_v56  ;;  %4748 = vmatmul.mubr.f32.gmra.mxu1 %v1018_v41  ;;  %v12617_v56 = vld [vmem:[#allocation61_spill] sm:$0xff]  ;;  %v967_v12 = vunpack.c.h.bf16 %v928_v10  ;;  %v4294_v37 = vadd.f32 %v12629_v36, %v12628_v9  ;;  %v12631_v57 = vld [vmem:[#allocation31_spill] sm:$0xff]  ;;  %v4286_v38 = vadd.f32 %v12635_v23, %v12634_v60 }
 0xb4e   : > { %4607 = vmatprep.subr.mxu0 %v4578_v42  ;;  %4862 = vmatprep.subr.mxu1 %v1195_v32  ;;  %v932_v32 = vld [vmem:[#allocation14 + $0x30] sm:$0xff]  ;;  %v4310_v42 = vadd.f32 %v12619_v50, %v12618_v54  ;;  %v4560_v25 = vmul.f32 %v4318_v1, %v979_v20  ;;  %v4381_v43 = vpop.f32.mrf.mxu1  ;;  %v12633_v61 = vld [vmem:[#allocation47_spill] sm:$0xff]  ;;  %v960_v54 = vunpack.c.l.bf16 %v924_v8 }
 0xb4f   : > { %4608 = vmatpush1.msra.mxu0 %v4577_v17  ;;  %4863 = vmatpush1.msra.mxu1 %v1194_v13  ;;  %v4312_v13 = vadd.f32 %v12617_v56, %v12616_v62  ;;  %v973_v16 = vunpack.c.h.bf16 %v932_v32  ;;  %v12620_v17 = vld [vmem:[#allocation54_spill] sm:$0xff]  ;;  %v972_v35 = vunpack.c.l.bf16 %v932_v32  ;;  %v4288_v1 = vadd.f32 %v12633_v61, %v12632_v34  ;;  %v12636_v62 = vld [vmem:[#allocation49_spill] sm:$0xff]  ;;  %v12638_v50 = vld [vmem:[#allocation52_spill] sm:$0xff] }
 0xb50   : > { %4609 = vmatprep.subr.mxu0 %v4575_v22  ;;  %4864 = vmatprep.subr.mxu1 %v1192_v0  ;;  %v4562_v0 = vmul.f32 %v4322_v21, %v981_v19  ;;  %v12623_v22 = vld [vmem:[#allocation58_spill] sm:$0xff]  ;;  %v4556_v55 = vmul.f32 %v4310_v42, %v975_v14  ;;  %v966_v19 = vunpack.c.l.bf16 %v928_v10  ;;  %v4292_v21 = vadd.f32 %v12631_v57, %v12630_v2  ;;  %v4383_v32 = vpop.f32.mrf.mxu1  ;;  %v958_v14 = vld [vmem:[#allocation14 + $0xcc] sm:$0xff]  ;;  %v12639_v42 = vld [vmem:[#allocation45_spill] sm:$0xff] }
 0xb51   : > { %4610 = vmatpush1.msra.mxu0 %v4574_v18  ;;  %4865 = vmatpush1.msra.mxu1 %v1191_v46  ;;  %v12621_v46 = vld [vmem:[#allocation59_spill] sm:$0xff]  ;;  %v12624_v18 = vld [vmem:[#allocation32_spill] sm:$0xff]  ;;  %v4557_v27 = vmul.f32 %v4312_v13, %v976_v5  ;;  %v961_v5 = vunpack.c.h.bf16 %v924_v8  ;;  %v12637_v56 = vld [vmem:[#allocation30_spill] sm:$0xff] }
 0xb52   : > { %4611 = vmatprep.subr.mxu0 %v4572_v45  ;;  %4866 = vmatprep.subr.mxu1 %v1189_v48  ;;  %v4306_v51 = vadd.f32 %v12621_v46, %v12620_v17  ;;  %v4304_v48 = vadd.f32 %v12623_v22, %v12622_v7  ;;  %v12627_v45 = vld [vmem:[#allocation56_spill] sm:$0xff]  ;;  %v4282_v13 = vadd.f32 %v12637_v56, %v12636_v62  ;;  %v956_v17 = vld [vmem:[#allocation14 + $0xc0] sm:$0xff]  ;;  %v1012_v46 = vunpack.c.h.bf16 %v958_v14  ;;  %v12641_v22 = vld [vmem:[#allocation43_spill] sm:$0xff] }
 0xb53   : > { %4612 = vmatpush1.msra.mxu0 %v4571_v29  ;;  %4867 = vmatpush1.msra.mxu1 %v1188_v30  ;;  %v12625_v30 = vld [vmem:[#allocation57_spill] sm:$0xff]  ;;  %v4298_v28 = vadd.f32 %v12627_v45, %v12626_v6  ;;  %v926_v29 = vld [vmem:[#allocation14 + $0xc] sm:$0xff]  ;;  %v4547_v58 = vmul.f32 %v4292_v21, %v966_v19  ;;  %v1011_v7 = vunpack.c.l.bf16 %v958_v14  ;;  %v1009_v10 = vunpack.c.h.bf16 %v956_v17 }
 0xb54   : > { %4613 = vmatprep.subr.mxu0 %v4569_v49  ;;  %4900 = vmatprep.mubr.f32.mxu1 %v12513_v47  ;;  %v4300_v52 = vadd.f32 %v12625_v30, %v12624_v18  ;;  %v4554_v49 = vmul.f32 %v4306_v51, %v973_v16  ;;  %v964_v20 = vunpack.c.h.bf16 %v926_v29  ;;  %v963_v33 = vunpack.c.l.bf16 %v926_v29  ;;  %v12640_v51 = vld [vmem:[#allocation33_spill] sm:$0xff]  ;;  %v1042_v2 = vld [vmem:[#allocation17 + $0x84] sm:$0xff] }
 0xb55   : > { %4614 = vmatpush1.msra.mxu0 %v4568_v11  ;;  %v4553_v11 = vmul.f32 %v4304_v48, %v972_v35  ;;  %v4382_v48 = vadd.f32 %v4381_v43, %v12641_v22  ;;  %v1050_v6 = vld [vmem:[#allocation17 + $0xb4] sm:$0xff]  ;;  %v1126_v3 = vunpack.c.h.bf16 %v1042_v2  ;;  %v1038_v8 = vld [vmem:[#allocation17 + $0x6c] sm:$0xff]  ;;  %v1036_v34 = vld [vmem:[#allocation17 + $0x60] sm:$0xff] }
 0xb56   : > { %4615 = vmatprep.subr.mxu0 %v4566_v15  ;;  %v4551_v15 = vmul.f32 %v4300_v52, %v970_v4  ;;  %v4545_v16 = vmul.f32 %v4288_v1, %v964_v20  ;;  %v4544_v35 = vmul.f32 %v4286_v38, %v963_v33  ;;  %v12642_v4 = vld [vmem:[#allocation50_spill] sm:$0xff]  ;;  %v1008_v52 = vunpack.c.l.bf16 %v956_v17  ;;  %v1020_v17 = vld [vmem:[#allocation17] sm:$0xff] }
 0xb57   : > { %4616 = vmatpush1.msra.mxu0 %v4565_v44  ;;  %v4550_v44 = vmul.f32 %v4298_v28, %v969_v59  ;;  %v4378_v18 = vadd.f32 %v4377_v24, %v12642_v4  ;;  %v4592_v28 = vmul.f32 %v4382_v48, %v1011_v7  ;;  %v1138_v43 = vunpack.c.h.bf16 %v1050_v6  ;;  %v1046_v24 = vld [vmem:[#allocation17 + $0x9c] sm:$0xff]  ;;  %v1082_v7 = vld [vmem:[#allocation17 + $0x174] sm:$0xff]  ;;  %v1080_v4 = vld [vmem:[#allocation17 + $0x168] sm:$0xff] }
 0xb58   : > { %4617 = vmatprep.subr.mxu0 %v4563_v26  ;;  %v4548_v26 = vmul.f32 %v4294_v37, %v967_v12  ;;  %v1137_v9 = vunpack.c.l.bf16 %v1050_v6  ;;  %v1131_v19 = vunpack.c.l.bf16 %v1046_v24  ;;  %v1120_v61 = vunpack.c.h.bf16 %v1038_v8  ;;  %v1030_v38 = vld [vmem:[#allocation17 + $0x3c] sm:$0xff]  ;;  %v1076_v6 = vld [vmem:[#allocation17 + $0x150] sm:$0xff] }
 0xb59   : > { %4618 = vmatpush1.msra.mxu0 %v4562_v0  ;;  %v4280_v0 = vadd.f32 %v12639_v42, %v12638_v50  ;;  %v4590_v29 = vmul.f32 %v4378_v18, %v1009_v10  ;;  %v1119_v1 = vunpack.c.l.bf16 %v1038_v8  ;;  %v1117_v33 = vunpack.c.h.bf16 %v1036_v34  ;;  %v11263_v22 = vld [vmem:[#allocation17 + $0x170] ss:$12 sps:$4 sm:$0xff]  }
 0xb5a   : > { %4619 = vmatprep.subr.mxu0 %v4560_v25  ;;  %v4384_v25 = vadd.f32 %v4383_v32, %v12640_v51  ;;  %v1116_v63 = vunpack.c.l.bf16 %v1036_v34  ;;  %v1108_v62 = vunpack.c.h.bf16 %v1030_v38  ;;  %v1107_v56 = vunpack.c.l.bf16 %v1030_v38 }
 0xb5b   : > { %4620 = vmatpush1.msra.mxu0 %v4559_v31  ;;  %v4542_v31 = vmul.f32 %v4282_v13, %v961_v5  ;;  %v4541_v30 = vmul.f32 %v4280_v0, %v960_v54  ;;  %v1028_v5 = vld [vmem:[#allocation17 + $0x30] sm:$0xff]  ;;  %v1026_v13 = vld [vmem:[#allocation17 + $0x24] sm:$0xff]  ;;  %v1024_v54 = vld [vmem:[#allocation17 + $0x18] sm:$0xff]  ;;  %v1185_v48 = vunpack.c.l.bf16 %v1082_v7  ;;  %v1187_v10 = vunpack.c.h.bf16 %v11263_v22 }
 0xb5c   : > { %4621 = vmatprep.subr.mxu0 %v4557_v27  ;;  %v12643_v27 = vld [vmem:[#allocation41_spill] sm:$0xff]  ;;  %v4593_v45 = vmul.f32 %v4384_v25, %v1012_v46  ;;  %v1104_v14 = vunpack.c.l.bf16 %v1028_v5  ;;  %v1102_v50 = vunpack.c.h.bf16 %v1026_v13  ;;  %v1101_v42 = vunpack.c.l.bf16 %v1026_v13 }
 0xb5d   : > { %4622 = vmatpush1.msra.mxu0 %v4556_v55  ;;  %v4376_v59 = vadd.f32 %v11220_v53, %v12643_v27  ;;  %v1048_v55 = vld [vmem:[#allocation17 + $0xa8] sm:$0xff]  ;;  %v1132_v53 = vunpack.c.h.bf16 %v1046_v24  ;;  %v1093_v25 = vunpack.c.h.bf16 %v1020_v17  ;;  %7534 = vmatprep.subr.mxu1 %v1187_v10  ;;  %v1182_v18 = vunpack.c.l.bf16 %v1080_v4 }
 0xb5e   : > { %4623 = vmatprep.subr.mxu0 %v4554_v49  ;;  %v1135_v36 = vunpack.c.h.bf16 %v1048_v55  ;;  %v1134_v37 = vunpack.c.l.bf16 %v1048_v55  ;;  %v1044_v49 = vld [vmem:[#allocation17 + $0x90] sm:$0xff]  ;;  %v1074_v55 = vld [vmem:[#allocation17 + $0x144] sm:$0xff] }
 0xb5f   : > { %4624 = vmatpush1.msra.mxu0 %v4553_v11  ;;  %v4589_v12 = vmul.f32 %v4376_v59, %v1008_v52  ;;  %v1129_v57 = vunpack.c.h.bf16 %v1044_v49  ;;  %v1128_v21 = vunpack.c.l.bf16 %v1044_v49  ;;  %v1040_v11 = vld [vmem:[#allocation17 + $0x78] sm:$0xff]  ;;  %v1022_v0 = vld [vmem:[#allocation17 + $0xc] sm:$0xff]  ;;  %v1071_v10 = vld [vmem:[#allocation17 + $0x128] ss:$12 sps:$4 sm:$0xff]  }
 0xb60   : > { %4625 = vmatprep.subr.mxu0 %v4551_v15  ;;  %v1123_v20 = vunpack.c.h.bf16 %v1040_v11  ;;  %v1034_v15 = vld [vmem:[#allocation17 + $0x54] sm:$0xff]  ;;  %v1096_v46 = vunpack.c.h.bf16 %v1022_v0  ;;  %v1095_v51 = vunpack.c.l.bf16 %v1022_v0  ;;  %v1078_v52 = vld [vmem:[#allocation17 + $0x15c] sm:$0xff] }
 0xb61   : > { %4626 = vmatpush1.msra.mxu0 %v4550_v44  ;;  %v1114_v60 = vunpack.c.h.bf16 %v1034_v15  ;;  %v1113_v23 = vunpack.c.l.bf16 %v1034_v15  ;;  %v1179_v27 = vunpack.c.l.bf16 %v1078_v52  ;;  %v1180_v59 = vunpack.c.h.bf16 %v1078_v52 }
 0xb62   : > { %4627 = vmatprep.subr.mxu0 %v4548_v26  ;;  %v1105_v26 = vunpack.c.h.bf16 %v1028_v5 }
 0xb63   : > { %4628 = vmatpush1.msra.mxu0 %v4547_v58  ;;  %v1099_v58 = vunpack.c.h.bf16 %v1024_v54 }
 0xb64   : > { %4629 = vmatprep.subr.mxu0 %v4545_v16  ;;  %v1098_v16 = vunpack.c.l.bf16 %v1024_v54  ;;  %v1079_v54 = vld [vmem:[#allocation17 + $0x158] ss:$12 sps:$4 sm:$0xff]  }
 0xb65   : > { %4630 = vmatpush1.msra.mxu0 %v4544_v35  ;;  %v1092_v35 = vunpack.c.l.bf16 %v1020_v17 }
 0xb66   : > { %4631 = vmatprep.subr.mxu0 %v4542_v31  ;;  %v1186_v31 = vunpack.c.h.bf16 %v1082_v7 }
 0xb67   : > { %4632 = vmatpush1.msra.mxu0 %v4541_v30  ;;  %v1183_v30 = vunpack.c.h.bf16 %v1080_v4 }
 0xb68   : > { %4661 = vmatprep.subr.mxu0 %v4593_v45  ;;  %v1176_v45 = vunpack.c.l.bf16 %v1076_v6 }
 0xb69   : > { %4662 = vmatpush2.msra.mxu0 %v4592_v28  ;;  %v1177_v28 = vunpack.c.h.bf16 %v1076_v6  ;;  %v1067_v6 = vld [vmem:[#allocation17 + $0x110] ss:$12 sps:$4 sm:$0xff]  }
 0xb6a   : > { %4663 = vmatprep.subr.mxu0 %v4590_v29  ;;  %v1173_v29 = vunpack.c.l.bf16 %v1074_v55 }
 0xb6b   : > { %4664 = vmatpush2.msra.mxu0 %v4589_v12  ;;  %v1072_v12 = vld [vmem:[#allocation17 + $0x138] sm:$0xff] }
 0xb6c   : > { %4666 = vmatmul.mubr.f32.vlgmr.msra.gmra.mxu0 %v1016_v40  ;;  %4759 = vmatprep.subr.mxu0 %v1138_v43  ;;  %v1125_v40 = vunpack.c.l.bf16 %v1042_v2  ;;  %v1174_v43 = vunpack.c.h.bf16 %v1074_v55  ;;  %v1171_v24 = vunpack.c.h.bf16 %v1072_v12 }
 0xb6d   : > { %7327 = vmatprep.mubr.msk.f32.mxu0 %vm1950_vm4, %v1019_v39  ;;  %4760 = vmatpush1.msra.mxu0 %v1137_v9  ;;  %v1122_v39 = vunpack.c.l.bf16 %v1040_v11  ;;  %v1170_v9 = vunpack.c.l.bf16 %v1072_v12  ;;  %v1063_v12 = vld [vmem:[#allocation17 + $0xf8] ss:$12 sps:$4 sm:$0xff]  }
 0xb6e   : > { %4761 = vmatprep.subr.mxu0 %v1135_v36  ;;  %v1070_v36 = vld [vmem:[#allocation17 + $0x12c] sm:$0xff] }
 0xb6f   : > { %4762 = vmatpush1.msra.mxu0 %v1134_v37  ;;  %v1167_v37 = vunpack.c.l.bf16 %v1070_v36  ;;  %v1168_v49 = vunpack.c.h.bf16 %v1070_v36 }
 0xb70   : > { %4672 = vmatmul.mubr.f32.gmra.mxu0 %v1018_v41  ;;  %4763 = vmatprep.subr.mxu0 %v1132_v53  ;;  %v1032_v41 = vld [vmem:[#allocation17 + $0x48] sm:$0xff]  ;;  %v1068_v53 = vld [vmem:[#allocation17 + $0x120] sm:$0xff] }
 0xb71   : > { %4764 = vmatpush1.msra.mxu0 %v1131_v19  ;;  %v1111_v44 = vunpack.c.h.bf16 %v1032_v41  ;;  %v1110_v32 = vunpack.c.l.bf16 %v1032_v41  ;;  %v1164_v19 = vunpack.c.l.bf16 %v1068_v53  ;;  %v1165_v2 = vunpack.c.h.bf16 %v1068_v53  ;;  %v1059_v53 = vld [vmem:[#allocation17 + $0xe0] ss:$12 sps:$4 sm:$0xff]  }
 0xb72   : > { %4765 = vmatprep.subr.mxu0 %v1129_v57  ;;  %v1066_v57 = vld [vmem:[#allocation17 + $0x114] sm:$0xff] }
 0xb73   : > { %4766 = vmatpush1.msra.mxu0 %v1128_v21  ;;  %v1161_v21 = vunpack.c.l.bf16 %v1066_v57  ;;  %v1162_v11 = vunpack.c.h.bf16 %v1066_v57 }
 0xb74   : > { %4767 = vmatprep.subr.mxu0 %v1126_v3  ;;  %v1064_v3 = vld [vmem:[#allocation17 + $0x108] sm:$0xff] }
 0xb75   : > { %4768 = vmatpush1.msra.mxu0 %v1125_v40  ;;  %v1158_v40 = vunpack.c.l.bf16 %v1064_v3  ;;  %v1159_v8 = vunpack.c.h.bf16 %v1064_v3  ;;  %v1055_v3 = vld [vmem:[#allocation17 + $0xc8] ss:$12 sps:$4 sm:$0xff]  }
 0xb76   : > { %4769 = vmatprep.subr.mxu0 %v1123_v20  ;;  %v1062_v20 = vld [vmem:[#allocation17 + $0xfc] sm:$0xff] }
 0xb77   : > { %4770 = vmatpush1.msra.mxu0 %v1122_v39  ;;  %v1155_v39 = vunpack.c.l.bf16 %v1062_v20  ;;  %v1156_v34 = vunpack.c.h.bf16 %v1062_v20 }
 0xb78   : > { %4771 = vmatprep.subr.mxu0 %v1120_v61  ;;  %v1060_v61 = vld [vmem:[#allocation17 + $0xf0] sm:$0xff] }
 0xb79   : > { %4772 = vmatpush1.msra.mxu0 %v1119_v1  ;;  %v1152_v1 = vunpack.c.l.bf16 %v1060_v61  ;;  %v1153_v15 = vunpack.c.h.bf16 %v1060_v61  ;;  %v1091_v61 = vld [vmem:[#allocation17 + $0x1a0] ss:$12 sps:$4 sm:$0xff]  }
 0xb7a   : > { %4773 = vmatprep.subr.mxu0 %v1117_v33  ;;  %v1058_v33 = vld [vmem:[#allocation17 + $0xe4] sm:$0xff] }
 0xb7b   : > { %4774 = vmatpush1.msra.mxu0 %v1116_v63  ;;  %v1149_v63 = vunpack.c.l.bf16 %v1058_v33  ;;  %v1150_v41 = vunpack.c.h.bf16 %v1058_v33  ;;  %v1199_v33 = vunpack.c.h.bf16 %v1091_v61 }
 0xb7c   : > { %4775 = vmatprep.subr.mxu0 %v1114_v60  ;;  %v1056_v60 = vld [vmem:[#allocation17 + $0xd8] sm:$0xff] }
 0xb7d   : > { %4776 = vmatpush1.msra.mxu0 %v1113_v23  ;;  %v1146_v23 = vunpack.c.l.bf16 %v1056_v60  ;;  %v1147_v38 = vunpack.c.h.bf16 %v1056_v60  ;;  %v1196_v60 = vunpack.c.l.bf16 %v1091_v61 }
 0xb7e   : > { %4777 = vmatprep.subr.mxu0 %v1111_v44  ;;  %v1054_v44 = vld [vmem:[#allocation17 + $0xcc] sm:$0xff] }
 0xb7f   : > { %4778 = vmatpush1.msra.mxu0 %v1110_v32  ;;  %v1143_v32 = vunpack.c.l.bf16 %v1054_v44  ;;  %v1144_v5 = vunpack.c.h.bf16 %v1054_v44 }
 0xb80   : > { %4779 = vmatprep.subr.mxu0 %v1108_v62  ;;  %v1052_v62 = vld [vmem:[#allocation17 + $0xc0] sm:$0xff] }
 0xb81   : > { %4780 = vmatpush1.msra.mxu0 %v1107_v56  ;;  %v1140_v56 = vunpack.c.l.bf16 %v1052_v62  ;;  %v1141_v13 = vunpack.c.h.bf16 %v1052_v62 }
 0xb82   : > { %4781 = vmatprep.subr.mxu0 %v1105_v26  ;;  %v1051_v26 = vld [vmem:[#allocation17 + $0xb0] ss:$12 sps:$4 sm:$0xff]  }
 0xb83   : > { %4782 = vmatpush1.msra.mxu0 %v1104_v14  ;;  %v1139_v14 = vunpack.c.h.bf16 %v1051_v26 }
 0xb84   : > { %4783 = vmatprep.subr.mxu0 %v1102_v50  ;;  %v1184_v50 = vunpack.c.l.bf16 %v11263_v22 }
 0xb85   : > { %4784 = vmatpush1.msra.mxu0 %v1101_v42  ;;  %v1047_v42 = vld [vmem:[#allocation17 + $0x98] ss:$12 sps:$4 sm:$0xff]  }
 0xb86   : > { %4785 = vmatprep.subr.mxu0 %v1099_v58  ;;  %v1136_v58 = vunpack.c.l.bf16 %v1051_v26  ;;  %v1133_v17 = vunpack.c.h.bf16 %v1047_v42  ;;  %v1130_v7 = vunpack.c.l.bf16 %v1047_v42 }
 0xb87   : > { %4786 = vmatpush1.msra.mxu0 %v1098_v16  ;;  %v1181_v16 = vunpack.c.h.bf16 %v1079_v54 }
 0xb88   : > { %4787 = vmatprep.subr.mxu0 %v1096_v46  ;;  %v1075_v46 = vld [vmem:[#allocation17 + $0x140] ss:$12 sps:$4 sm:$0xff]  }
 0xb89   : > { %4788 = vmatpush1.msra.mxu0 %v1095_v51 }
 0xb8a   : > { %4789 = vmatprep.subr.mxu0 %v1093_v25  ;;  %v1178_v25 = vunpack.c.l.bf16 %v1079_v54 }
 0xb8b   : > { %4790 = vmatpush1.msra.mxu0 %v1092_v35  ;;  %v1043_v35 = vld [vmem:[#allocation17 + $0x80] ss:$12 sps:$4 sm:$0xff]  }
 0xb8c   : > { %4791 = vmatprep.subr.mxu0 %v1186_v31  ;;  %v1127_v31 = vunpack.c.h.bf16 %v1043_v35  ;;  %v1124_v52 = vunpack.c.l.bf16 %v1043_v35 }
 0xb8d   : > { %4792 = vmatpush2.msra.mxu0 %v1185_v48  ;;  %v1175_v48 = vunpack.c.h.bf16 %v1075_v46 }
 0xb8e   : > { %4793 = vmatprep.subr.mxu0 %v1183_v30  ;;  %v1039_v30 = vld [vmem:[#allocation17 + $0x68] ss:$12 sps:$4 sm:$0xff]  }
 0xb8f   : > { %4794 = vmatpush2.msra.mxu0 %v1182_v18  ;;  %v1172_v18 = vunpack.c.l.bf16 %v1075_v46  ;;  %v1118_v55 = vunpack.c.l.bf16 %v1039_v30 }
 0xb90   : > { %4795 = vmatprep.subr.mxu0 %v1180_v59  ;;  %v1121_v59 = vunpack.c.h.bf16 %v1039_v30 }
 0xb91   : > { %4796 = vmatpush2.msra.mxu0 %v1179_v27  ;;  %v1169_v27 = vunpack.c.h.bf16 %v1071_v10 }
 0xb92   : > { %4797 = vmatprep.subr.mxu0 %v1177_v28  ;;  %v1035_v28 = vld [vmem:[#allocation17 + $0x50] ss:$12 sps:$4 sm:$0xff]  }
 0xb93   : > { %4798 = vmatpush2.msra.mxu0 %v1176_v45  ;;  %v1166_v45 = vunpack.c.l.bf16 %v1071_v10  ;;  %v1112_v36 = vunpack.c.l.bf16 %v1035_v28 }
 0xb94   : > { %4799 = vmatprep.subr.mxu0 %v1174_v43  ;;  %v1115_v43 = vunpack.c.h.bf16 %v1035_v28 }
 0xb95   : > { %4800 = vmatpush2.msra.mxu0 %v1173_v29  ;;  %v1163_v29 = vunpack.c.h.bf16 %v1067_v6 }
 0xb96   : > { %4801 = vmatprep.subr.mxu0 %v1171_v24  ;;  %v1031_v24 = vld [vmem:[#allocation17 + $0x38] ss:$12 sps:$4 sm:$0xff]  }
 0xb97   : > { %4802 = vmatpush2.msra.mxu0 %v1170_v9  ;;  %v1160_v9 = vunpack.c.l.bf16 %v1067_v6  ;;  %v1106_v57 = vunpack.c.l.bf16 %v1031_v24 }
 0xb98   : > { %4803 = vmatprep.subr.mxu0 %v1168_v49  ;;  %v1109_v49 = vunpack.c.h.bf16 %v1031_v24 }
 0xb99   : > { %4804 = vmatpush2.msra.mxu0 %v1167_v37  ;;  %v1157_v37 = vunpack.c.h.bf16 %v1063_v12 }
 0xb9a   : > { %4805 = vmatprep.subr.mxu0 %v1165_v2  ;;  %v1027_v2 = vld [vmem:[#allocation17 + $0x20] ss:$12 sps:$4 sm:$0xff]  }
 0xb9b   : > { %4806 = vmatpush2.msra.mxu0 %v1164_v19  ;;  %v1154_v19 = vunpack.c.l.bf16 %v1063_v12  ;;  %v1100_v20 = vunpack.c.l.bf16 %v1027_v2 }
 0xb9c   : > { %4807 = vmatprep.subr.mxu0 %v1162_v11  ;;  %v1103_v11 = vunpack.c.h.bf16 %v1027_v2 }
 0xb9d   : > { %4808 = vmatpush2.msra.mxu0 %v1161_v21  ;;  %v1151_v21 = vunpack.c.h.bf16 %v1059_v53 }
 0xb9e   : > { %4809 = vmatprep.subr.mxu0 %v1159_v8  ;;  %v1023_v8 = vld [vmem:[#allocation17 + $0x8] ss:$12 sps:$4 sm:$0xff]  }
 0xb9f   : > { %4810 = vmatpush2.msra.mxu0 %v1158_v40  ;;  %v1148_v40 = vunpack.c.l.bf16 %v1059_v53 }
 0xba0   : > { %4811 = vmatprep.subr.mxu0 %v1156_v34  ;;  %v1097_v34 = vunpack.c.h.bf16 %v1023_v8 }
 0xba1   : > { %4812 = vmatpush2.msra.mxu0 %v1155_v39  ;;  %v1145_v39 = vunpack.c.h.bf16 %v1055_v3 }
 0xba2   : > { %4813 = vmatprep.subr.mxu0 %v1153_v15  ;;  %v1094_v15 = vunpack.c.l.bf16 %v1023_v8 }
 0xba3   : > { %4814 = vmatpush2.msra.mxu0 %v1152_v1  ;;  %v1142_v1 = vunpack.c.l.bf16 %v1055_v3 }
 0xba4   : > { %4815 = vmatprep.subr.mxu0 %v1150_v41 }
 0xba5   : > { %4816 = vmatpush2.msra.mxu0 %v1149_v63 }
 0xba6   : > { %4817 = vmatprep.subr.mxu0 %v1147_v38 }
 0xba7   : > { %4818 = vmatpush2.msra.mxu0 %v1146_v23  ;;  %v1087_v23 = vld [vmem:[#allocation17 + $0x188] ss:$12 sps:$4 sm:$0xff]  }
 0xba8   : > { %4819 = vmatprep.subr.mxu0 %v1144_v5  ;;  %v1193_v44 = vunpack.c.h.bf16 %v1087_v23  ;;  %v1190_v5 = vunpack.c.l.bf16 %v1087_v23 }
 0xba9   : > { %4820 = vmatpush2.msra.mxu0 %v1143_v32 }
 0xbaa   : > { %4821 = vmatprep.subr.mxu0 %v1141_v13 }
 0xbab   : > { %4822 = vmatpush2.msra.mxu0 %v1140_v56 }
 0xbac   : > { %5172 = vmatprep.subr.mxu0 %v12513_v47 }
 0xc09   : > { %v11268_v0 = vpop.f32.mrf.mxu1 }
 0xc0a   : > { %7330 = vmatmul.mubr.msk.f32.vlgmr.msra.gmra.mxu1 %vm1271_vm1, %v11268_v0 }
 0xc0b   : > { %7535 = vmatpush3.msra.mxu1 %v1139_v14  ;;  %v4746_v51 = vpop.f32.mrf.mxu1  ;;  %4906 = vmatprep.mubr.f32.mxu1 %v12513_v47 }
 0xc0c   : > { %7536 = vmatprep.subr.mxu1 %v1184_v50 }
 0xc0d   : > { %7537 = vmatpush3.msra.mxu1 %v1136_v58  ;;  %v11273_v22 = vpop.f32.mrf.mxu1 }
 0xc0e   : > { %7538 = vmatprep.subr.mxu1 %v1181_v16  ;;  %7331 = vmatmul.mubr.msk.f32.gmra.mxu1 %vm1271_vm1, %v11273_v22 }
 0xc0f   : > { %7539 = vmatpush3.msra.mxu1 %v1133_v17  ;;  %v4751_v4 = vpop.f32.mrf.mxu1 }
 0xc10   : > { %7540 = vmatprep.subr.mxu1 %v1178_v25 }
 0xc11   : > { %7541 = vmatpush3.msra.mxu1 %v1130_v7 }
 0xc12   : > { %7542 = vmatprep.subr.mxu1 %v1175_v48 }
 0xc13   : > { %7543 = vmatpush3.msra.mxu1 %v1127_v31 }
 0xc14   : > { %7544 = vmatprep.subr.mxu1 %v1172_v18  ;;  %v11299_v18 = vld [vmem:[%s12381_s22] sm:$0xff] }
 0xc15   : > { %7545 = vmatpush3.msra.mxu1 %v1124_v52  ;;  %v1212_v30 = vunpack.c.h.bf16 %v11299_v18  ;;  %v5295_v52 = vld [vmem:[#allocation5 + $0x18] sm:$0xff] }
 0xc16   : > { %7546 = vmatprep.subr.mxu1 %v1169_v27  ;;  %v5294_v27 = vld [vmem:[#allocation5 + $0x10] sm:$0xff] }
 0xc17   : > { %7547 = vmatpush3.msra.mxu1 %v1121_v59  ;;  %v5293_v59 = vld [vmem:[#allocation5 + $0x8] sm:$0xff] }
 0xc18   : > { %7548 = vmatprep.subr.mxu1 %v1166_v45 }
 0xc19   : > { %7549 = vmatpush3.msra.mxu1 %v1118_v55 }
 0xc1a   : > { %7550 = vmatprep.subr.mxu1 %v1163_v29 }
 0xc1b   : > { %7551 = vmatpush3.msra.mxu1 %v1115_v43 }
 0xc1c   : > { %7552 = vmatprep.subr.mxu1 %v1160_v9 }
 0xc1d   : > { %7553 = vmatpush3.msra.mxu1 %v1112_v36 }
 0xc1e   : > { %7554 = vmatprep.subr.mxu1 %v1157_v37 }
 0xc1f   : > { %7555 = vmatpush3.msra.mxu1 %v1109_v49 }
 0xc20   : > { %7556 = vmatprep.subr.mxu1 %v1154_v19 }
 0xc21   : > { %7557 = vmatpush3.msra.mxu1 %v1106_v57 }
 0xc22   : > { %7558 = vmatprep.subr.mxu1 %v1151_v21 }
 0xc23   : > { %7559 = vmatpush3.msra.mxu1 %v1103_v11 }
 0xc24   : > { %7560 = vmatprep.subr.mxu1 %v1148_v40 }
 0xc25   : > { %7561 = vmatpush3.msra.mxu1 %v1100_v20 }
 0xc26   : > { %7562 = vmatprep.subr.mxu1 %v1145_v39 }
 0xc27   : > { %7563 = vmatpush3.msra.mxu1 %v1097_v34 }
 0xc28   : > { %7564 = vmatprep.subr.mxu1 %v1142_v1 }
 0xc29   : > { %7565 = vmatpush3.msra.mxu1 %v1094_v15 }
 0xc2a   : > { %7786 = vmatprep.subr.mxu1 %v1199_v33 }
 0xc2c   : > { %v4667_v63 = vpop.f32.mrf.mxu0 }
 0xc2e   : > { %v4669_v41 = vpop.f32.mrf.mxu0 }
 0xc2f   : > { %4823 = vmatprep.mubr.f32.mxu0 %v4669_v41  ;;  %4977 = vmatprep.mubr.f32.mxu1 %v4669_v41 }
 0xc30   : > { %v4673_v38 = vpop.f32.mrf.mxu0  ;;  %4824 = vmatmul.mubr.f32.vlgmr.msra.gmra.mxu0 %v4667_v63  ;;  %4978 = vmatmul.mubr.f32.vlgmr.msra.gmra.mxu1 %v4667_v63  ;;  %v1201_v63 = vld [vmem:[%s12381_s22 + $0x8] sm:$0xff] }
 0xc31   : > { %7787 = vmatpush3.msra.mxu1 %v1199_v33  ;;  %v1214_v23 = vunpack.c.h.bf16 %v1201_v63 }
 0xc32   : > { %v4675_v32 = vpop.f32.mrf.mxu0  ;;  %7788 = vmatprep.subr.mxu1 %v1196_v60 }
 0xc33   : > { %4829 = vmatprep.mubr.f32.mxu0 %v4675_v32  ;;  %4982 = vmatprep.mubr.f32.mxu1 %v4675_v32  ;;  %v1213_v32 = vunpack.c.l.bf16 %v1201_v63 }
 0xc34   : > { %7789 = vmatpush3.msra.mxu1 %v1196_v60  ;;  %4830 = vmatmul.mubr.f32.gmra.mxu0 %v4673_v38  ;;  %v1211_v60 = vunpack.c.l.bf16 %v11299_v18 }
 0xc35   : > { %4983 = vmatmul.mubr.f32.gmra.mxu1 %v4673_v38  ;;  %7790 = vmatprep.subr.mxu1 %v1193_v44 }
 0xc36   : > { %7791 = vmatpush3.msra.mxu1 %v1193_v44  ;;  %7794 = vmatprep.mubr.msk.f32.mxu1 %vm1271_vm1, %v11268_v0  ;;  %v1202_v44 = vld [vmem:[%s12381_s22 + $0x10] sm:$0xff] }
 0xc37   : > { %7792 = vmatprep.subr.mxu1 %v1190_v5  ;;  %7334 = vmatprep.mubr.msk.f32.mxu0 %vm1950_vm4, %v1212_v30 }
 0xc38   : > { %7793 = vmatpush3.msra.mxu1 %v1190_v5  ;;  %v1216_v5 = vunpack.c.h.bf16 %v1202_v44 }
 0xc39   : > { %7795 = vmatmul.mubr.msk.f32.vlgmr.msra.gmra.mxu1 %vm1271_vm1, %v11273_v22  ;;  %7797 = vmatprep.subr.mxu1 %v12513_v47 }
 0xc3a   : > { %7798 = vmatpush3.msra.mxu1 %v5295_v52  ;;  %7805 = vmatprep.mubr.msk.f32.mxu1 %vm8857_vm5, %v12513_v47 }
 0xc3b   : > { %7799 = vmatprep.subr.mxu1 %v12513_v47 }
 0xc3c   : > { %7800 = vmatpush3.msra.mxu1 %v5294_v27  ;;  %v5292_v27 = vld [vmem:[#allocation5] sm:$0xff] }
 0xc3d   : > { %7801 = vmatprep.subr.mxu1 %v12513_v47 }
 0xc3e   : > { %7802 = vmatpush3.msra.mxu1 %v5293_v59 }
 0xc3f   : > { %7803 = vmatprep.subr.mxu1 %v12513_v47 }
 0xc40   : > { %7804 = vmatpush3.msra.mxu1 %v5292_v27 }
 0xc41   : > { %7838 = vmatprep.subr.mxu1 %v12513_v47 }
 0xcca   : > { %v4902_v62 = vpop.f32.mrf.mxu1 }
 0xccc   : > { %v4904_v56 = vpop.f32.mrf.mxu1 }
 0xcce   : > { %v4908_v13 = vpop.f32.mrf.mxu1 }
 0xcd0   : > { %v4910_v26 = vpop.f32.mrf.mxu1 }
 0xcf0   : > { %v4825_v14 = vpop.f32.mrf.mxu0  ;;  %v7566_v54 = vpop.f32.mrf.mxu1 }
 0xcf1   : > { %v4903_v50 = vadd.f32 %v4902_v62, %v4825_v14  ;;  %v1203_v62 = vld [vmem:[%s12381_s22 + $0x18] sm:$0xff] }
 0xcf2   : > { %v4827_v42 = vpop.f32.mrf.mxu0  ;;  %v7567_v58 = vpop.f32.mrf.mxu1  ;;  %v1217_v14 = vunpack.c.l.bf16 %v1203_v62 }
 0xcf3   : > { %5063 = vst.msk [vmem:[#allocation2] sm:$0xff] %vm1271_vm1, %v4903_v50  ;;  %v4905_v16 = vadd.f32 %v4904_v56, %v4827_v42  ;;  %v7568_v48 = vadd.f32 %v7567_v58, %v7566_v54  ;;  %v1215_v56 = vunpack.c.l.bf16 %v1202_v44 }
 0xcf4   : > { %v4831_v0 = vpop.f32.mrf.mxu0 }
 0xcf5   : > { %5091 = vst.msk [vmem:[#allocation2 + $0x40] sm:$0xff] %vm1271_vm1, %v4905_v16  ;;  %v4909_v17 = vadd.f32 %v4908_v13, %v4831_v0  ;;  %v7569_v46 = vpop.f32.mrf.mxu1  ;;  %5111 = vrot.lane.b32.xlu1 %v4905_v16, %s8856_s5  ;;  %v1218_v13 = vunpack.c.h.bf16 %v1203_v62 }
 0xcf6   : > { %v4833_v51 = vpop.f32.mrf.mxu0 }
 0xcf7   : > { %5064 = vst.msk [vmem:[#allocation2 + $0x8] sm:$0xff] %vm1271_vm1, %v4909_v17  ;;  %v4911_v25 = vadd.f32 %v4910_v26, %v4833_v51  ;;  %v7570_v35 = vpop.f32.mrf.mxu1  ;;  %v1204_v26 = vld [vmem:[%s12381_s22 + $0x20] sm:$0xff] }
 0xcf8   : > { %v7571_v7 = vadd.f32 %v7570_v35, %v7569_v46  ;;  %v1220_v54 = vunpack.c.h.bf16 %v1204_v26  ;;  %v1219_v42 = vunpack.c.l.bf16 %v1204_v26  ;;  %v1207_v46 = vld [vmem:[%s12381_s22 + $0x38] sm:$0xff]  ;;  %v1208_v35 = vld [vmem:[%s12381_s22 + $0x40] sm:$0xff] }
 0xcf9   : > { %5092 = vst.msk [vmem:[#allocation2 + $0x48] sm:$0xff] %vm1271_vm1, %v4911_v25  ;;  %v7796_v22 = vpop.f32.mrf.mxu1  ;;  %5105 = vrot.lane.b32.xlu1 %v4911_v25, %s8852_s26  ;;  %5113 = vrot.lane.b32.xlu0 %v4911_v25, %s8856_s5 }
 0xcfa   : > { %v5060_v31 = vadd.f32 %v7796_v22, %v7571_v7  ;;  %v5121_v33 = vld [vmem:[#allocation2] sm:$0xff]  ;;  %v1225_v7 = vunpack.c.l.bf16 %v1207_v46  ;;  %v1228_v22 = vunpack.c.h.bf16 %v1208_v35 }
 0xcfb   : > { %v5054_v10 = vpop.f32.mrf.mxu1 }
 0xcfc   : > { %5120 = vst.msk [vmem:[#allocation2 + $0x88] sm:$0xff] %vm1271_vm1, %v5060_v31  ;;  %v5055_v4 = vadd.f32 %v7568_v48, %v5054_v10  ;;  %v5129_v40 = vld [vmem:[#allocation2 + $0x40] sm:$0xff]  ;;  %v1209_v48 = vld [vmem:[%s12381_s22 + $0x48] sm:$0xff]  ;;  %v1227_v31 = vunpack.c.l.bf16 %v1208_v35 }
 0xcfd   : > { %5103 = vrot.lane.b32.xlu1 %v4905_v16, %s8852_s26  ;;  %5097 = vrot.lane.b32.xlu0 %v4911_v25, %s8851_s3  ;;  %v1226_v25 = vunpack.c.h.bf16 %v1207_v46  ;;  %v1230_v10 = vunpack.c.h.bf16 %v1209_v48  ;;  %v1229_v18 = vunpack.c.l.bf16 %v1209_v48 }
 0xcfe   : > { %5119 = vst.msk [vmem:[#allocation2 + $0x80] sm:$0xff] %vm1271_vm1, %v5055_v4  ;;  %v5122_v15 = vld [vmem:[#allocation2 + $0x8] sm:$0xff]  ;;  %v1210_v4 = vld [vmem:[%s12381_s22 + $0x50] sm:$0x11] }
 0xcff   : > { %v1232_v30 = vunpack.c.h.bf16 %v1210_v4  ;;  %v1231_v52 = vunpack.c.l.bf16 %v1210_v4 }
 0xd00   : > { %v5130_v3 = vld [vmem:[#allocation2 + $0x48] sm:$0xff] }
 0xd01   : > { %5095 = vrot.lane.b32.xlu1 %v4905_v16, %s8851_s3  ;;  %5085 = vrot.lane.b32.xlu0 %v4909_v17, %s8856_s5  ;;  %v1206_v16 = vld [vmem:[%s12381_s22 + $0x30] sm:$0xff] }
 0xd02   : > { %v1223_v51 = vunpack.c.l.bf16 %v1206_v16 }
 0xd03   : > { %v5138_v41 = vld [vmem:[#allocation2 + $0x88] sm:$0xff] }
 0xd05   : > { %5083 = vrot.lane.b32.xlu1 %v4903_v50, %s8856_s5  ;;  %5077 = vrot.lane.b32.xlu0 %v4909_v17, %s8852_s26  ;;  %v5137_v38 = vld [vmem:[#allocation2 + $0x80] sm:$0xff] }
 0xd09   : > { %5075 = vrot.lane.b32.xlu1 %v4903_v50, %s8852_s26  ;;  %5069 = vrot.lane.b32.xlu0 %v4909_v17, %s8851_s3  ;;  %v1224_v17 = vunpack.c.h.bf16 %v1206_v16  ;;  %s12301_s26 = scalar_lea.vmem %s12382_s23, %s8001_s24 }
 0xd0d   : > { %5067 = vrot.lane.b32.xlu1 %v4903_v50, %s8851_s3  ;;  %v1205_v50 = vld [vmem:[%s12381_s22 + $0x28] sm:$0xff] }
 0xd0e   : > { %v1222_v58 = vunpack.c.h.bf16 %v1205_v50  ;;  %v1221_v0 = vunpack.c.l.bf16 %v1205_v50 }
 0xd67   : > { %v5112_v6 = vpop.permute.xlu1 %5111 }
 0xd68   : > { %5117 = vst.msk [vmem:[#allocation2 + $0x70] sm:$0xff] %vm1271_vm1, %v5112_v6 }
 0xd6b   : > { %v5106_v45 = vpop.permute.xlu1 %5105  ;;  %v5114_v28 = vpop.permute.xlu0 %5113 }
 0xd6c   : > { %5110 = vst.msk [vmem:[#allocation2 + $0x68] sm:$0xff] %vm1271_vm1, %v5106_v45  ;;  %5118 = vst.msk [vmem:[#allocation2 + $0x78] sm:$0xff] %vm1271_vm1, %v5114_v28 }
 0xd6f   : > { %v5104_v55 = vpop.permute.xlu1 %5103  ;;  %v5098_v29 = vpop.permute.xlu0 %5097  ;;  %v5135_v24 = vld [vmem:[#allocation2 + $0x70] sm:$0xff] }
 0xd70   : > { %5109 = vst.msk [vmem:[#allocation2 + $0x60] sm:$0xff] %vm1271_vm1, %v5104_v55  ;;  %5102 = vst.msk [vmem:[#allocation2 + $0x58] sm:$0xff] %vm1271_vm1, %v5098_v29 }
 0xd73   : > { %v5096_v43 = vpop.permute.xlu1 %5095  ;;  %v5086_v12 = vpop.permute.xlu0 %5085  ;;  %v5136_v9 = vld [vmem:[#allocation2 + $0x78] sm:$0xff]  ;;  %v5134_v49 = vld [vmem:[#allocation2 + $0x68] sm:$0xff] }
 0xd74   : > { %5101 = vst.msk [vmem:[#allocation2 + $0x50] sm:$0xff] %vm1271_vm1, %v5096_v43  ;;  %5090 = vst.msk [vmem:[#allocation2 + $0x38] sm:$0xff] %vm1271_vm1, %v5086_v12  ;;  %5173 = vmatpush1.msra.mxu0 %v5136_v9 }
 0xd75   : > { %5174 = vmatprep.subr.mxu0 %v12513_v47 }
 0xd76   : > { %5175 = vmatpush1.msra.mxu0 %v5135_v24 }
 0xd77   : > { %v5084_v36 = vpop.permute.xlu1 %5083  ;;  %5176 = vmatprep.subr.mxu0 %v12513_v47  ;;  %v5078_v37 = vpop.permute.xlu0 %5077  ;;  %v5133_v53 = vld [vmem:[#allocation2 + $0x60] sm:$0xff]  ;;  %v5132_v57 = vld [vmem:[#allocation2 + $0x58] sm:$0xff] }
 0xd78   : > { %5089 = vst.msk [vmem:[#allocation2 + $0x30] sm:$0xff] %vm1271_vm1, %v5084_v36  ;;  %5082 = vst.msk [vmem:[#allocation2 + $0x28] sm:$0xff] %vm1271_vm1, %v5078_v37  ;;  %5177 = vmatpush1.msra.mxu0 %v5134_v49 }
 0xd79   : > { %5178 = vmatprep.subr.mxu0 %v12513_v47 }
 0xd7a   : > { %5179 = vmatpush1.msra.mxu0 %v5133_v53 }
 0xd7b   : > { %v5076_v19 = vpop.permute.xlu1 %5075  ;;  %5180 = vmatprep.subr.mxu0 %v12513_v47  ;;  %v5070_v2 = vpop.permute.xlu0 %5069  ;;  %v5131_v21 = vld [vmem:[#allocation2 + $0x50] sm:$0xff]  ;;  %v5128_v8 = vld [vmem:[#allocation2 + $0x38] sm:$0xff] }
 0xd7c   : > { %5081 = vst.msk [vmem:[#allocation2 + $0x20] sm:$0xff] %vm1271_vm1, %v5076_v19  ;;  %5074 = vst.msk [vmem:[#allocation2 + $0x18] sm:$0xff] %vm1271_vm1, %v5070_v2  ;;  %5181 = vmatpush1.msra.mxu0 %v5132_v57 }
 0xd7d   : > { %5182 = vmatprep.subr.mxu0 %v12513_v47 }
 0xd7e   : > { %5183 = vmatpush1.msra.mxu0 %v5131_v21 }
 0xd7f   : > { %v5068_v11 = vpop.permute.xlu1 %5067  ;;  %5184 = vmatprep.subr.mxu0 %v12513_v47  ;;  %v5127_v20 = vld [vmem:[#allocation2 + $0x30] sm:$0xff]  ;;  %v5126_v39 = vld [vmem:[#allocation2 + $0x28] sm:$0xff] }
 0xd80   : > { %5073 = vst.msk [vmem:[#allocation2 + $0x10] sm:$0xff] %vm1271_vm1, %v5068_v11  ;;  %5185 = vmatpush1.msra.mxu0 %v5130_v3 }
 0xd81   : > { %5186 = vmatprep.subr.mxu0 %v12513_v47 }
 0xd82   : > { %5187 = vmatpush1.msra.mxu0 %v5129_v40 }
 0xd83   : > { %5188 = vmatprep.subr.mxu0 %v12513_v47  ;;  %v5125_v34 = vld [vmem:[#allocation2 + $0x20] sm:$0xff]  ;;  %v5124_v61 = vld [vmem:[#allocation2 + $0x18] sm:$0xff] }
 0xd84   : > { %5189 = vmatpush1.msra.mxu0 %v5128_v8 }
 0xd85   : > { %5190 = vmatprep.subr.mxu0 %v12513_v47 }
 0xd86   : > { %5191 = vmatpush1.msra.mxu0 %v5127_v20  ;;  %v7345_v20 = vld [vmem:[%s12644_s16] ss:$0 sm:$0xff] }
 0xd87   : > { %5192 = vmatprep.subr.mxu0 %v12513_v47  ;;  %v5123_v1 = vld [vmem:[#allocation2 + $0x10] sm:$0xff] }
 0xd88   : > { %5193 = vmatpush1.msra.mxu0 %v5126_v39 }
 0xd89   : > { %5194 = vmatprep.subr.mxu0 %v12513_v47 }
 0xd8a   : > { %5195 = vmatpush1.msra.mxu0 %v5125_v34 }
 0xd8b   : > { %5196 = vmatprep.subr.mxu0 %v12513_v47 }
 0xd8c   : > { %5197 = vmatpush1.msra.mxu0 %v5124_v61 }
 0xd8d   : > { %5198 = vmatprep.subr.mxu0 %v12513_v47 }
 0xd8e   : > { %5199 = vmatpush1.msra.mxu0 %v5123_v1 }
 0xd8f   : > { %5200 = vmatprep.subr.mxu0 %v12513_v47 }
 0xd90   : > { %5201 = vmatpush1.msra.mxu0 %v5122_v15 }
 0xd91   : > { %5202 = vmatprep.subr.mxu0 %v12513_v47 }
 0xd92   : > { %5203 = vmatpush1.msra.mxu0 %v5121_v33 }
 0xd93   : > { %5232 = vmatprep.subr.mxu0 %v12513_v47 }
 0xd94   : > { %5233 = vmatpush2.msra.mxu0 %v5138_v41 }
 0xd95   : > { %5234 = vmatprep.subr.mxu0 %v12513_v47 }
 0xd96   : > { %5235 = vmatpush2.msra.mxu0 %v5137_v38 }
 0xd97   : > { %5237 = vmatmul.mubr.f32.vlgmr.msra.gmra.mxu0 %v1211_v60  ;;  %7875 = vmatprep.subr.mxu0 %v12513_v47 }
 0xd98   : > { %7335 = vmatprep.mubr.msk.f32.mxu0 %vm1950_vm4, %v1214_v23 }
 0xd9b   : > { %5242 = vmatmul.mubr.f32.gmra.mxu0 %v1213_v32 }
 0xd9c   : > { %7336 = vmatprep.mubr.msk.f32.mxu0 %vm1950_vm4, %v1216_v5 }
 0xd9f   : > { %5247 = vmatmul.mubr.f32.gmra.mxu0 %v1215_v56 }
 0xda0   : > { %7337 = vmatprep.mubr.msk.f32.mxu0 %vm1950_vm4, %v1218_v13 }
 0xda3   : > { %5252 = vmatmul.mubr.f32.gmra.mxu0 %v1217_v14 }
 0xda4   : > { %7338 = vmatprep.mubr.msk.f32.mxu0 %vm1950_vm4, %v1220_v54 }
 0xda7   : > { %5257 = vmatmul.mubr.f32.gmra.mxu0 %v1219_v42 }
 0xda8   : > { %7339 = vmatprep.mubr.msk.f32.mxu0 %vm1950_vm4, %v1222_v58 }
 0xdab   : > { %5262 = vmatmul.mubr.f32.gmra.mxu0 %v1221_v0 }
 0xdac   : > { %7340 = vmatprep.mubr.msk.f32.mxu0 %vm1950_vm4, %v1224_v17 }
 0xdaf   : > { %5267 = vmatmul.mubr.f32.gmra.mxu0 %v1223_v51 }
 0xdb0   : > { %7341 = vmatprep.mubr.msk.f32.mxu0 %vm1950_vm4, %v1226_v25 }
 0xdb3   : > { %5272 = vmatmul.mubr.f32.gmra.mxu0 %v1225_v7 }
 0xdb4   : > { %7342 = vmatprep.mubr.msk.f32.mxu0 %vm1950_vm4, %v1228_v22 }
 0xdb7   : > { %5277 = vmatmul.mubr.f32.gmra.mxu0 %v1227_v31 }
 0xdb8   : > { %7343 = vmatprep.mubr.msk.f32.mxu0 %vm1950_vm4, %v1230_v10 }
 0xdbb   : > { %5282 = vmatmul.mubr.f32.gmra.mxu0 %v1229_v18 }
 0xdbc   : > { %7344 = vmatprep.mubr.msk.f32.mxu0 %vm1950_vm4, %v1232_v30 }
 0xdbf   : > { %5287 = vmatmul.mubr.f32.gmra.mxu0 %v1231_v52 }
 0xdc0   : > { %7883 = vmatprep.mubr.msk.f32.mxu0 %vm8857_vm5, %v12513_v47 }
 0xe57   : > { %v5238_v59 = vpop.f32.mrf.mxu0 }
 0xe58   : > { %7806 = vmatmul.mubr.msk.f32.vlgmr.msra.gmra.mxu1 %vm1271_vm1, %v5238_v59 }
 0xe59   : > { %v5240_v6 = vpop.f32.mrf.mxu0  ;;  %7808 = vmatprep.mubr.msk.f32.mxu1 %vm8857_vm5, %v12513_v47 }
 0xe5b   : > { %v5243_v45 = vpop.f32.mrf.mxu0 }
 0xe5c   : > { %7809 = vmatmul.mubr.msk.f32.gmra.mxu1 %vm1271_vm1, %v5243_v45 }
 0xe5d   : > { %v5245_v28 = vpop.f32.mrf.mxu0  ;;  %7811 = vmatprep.mubr.msk.f32.mxu1 %vm8857_vm5, %v12513_v47 }
 0xe5f   : > { %v5248_v55 = vpop.f32.mrf.mxu0 }
 0xe60   : > { %7812 = vmatmul.mubr.msk.f32.gmra.mxu1 %vm1271_vm1, %v5248_v55 }
 0xe61   : > { %v5250_v29 = vpop.f32.mrf.mxu0  ;;  %7814 = vmatprep.mubr.msk.f32.mxu1 %vm8857_vm5, %v12513_v47 }
 0xe63   : > { %v5253_v43 = vpop.f32.mrf.mxu0 }
 0xe64   : > { %7815 = vmatmul.mubr.msk.f32.gmra.mxu1 %vm1271_vm1, %v5253_v43 }
 0xe65   : > { %v5255_v12 = vpop.f32.mrf.mxu0  ;;  %7817 = vmatprep.mubr.msk.f32.mxu1 %vm8857_vm5, %v12513_v47 }
 0xe67   : > { %v5258_v9 = vpop.f32.mrf.mxu0 }
 0xe68   : > { %7818 = vmatmul.mubr.msk.f32.gmra.mxu1 %vm1271_vm1, %v5258_v9 }
 0xe69   : > { %v5260_v24 = vpop.f32.mrf.mxu0  ;;  %7820 = vmatprep.mubr.msk.f32.mxu1 %vm8857_vm5, %v12513_v47 }
 0xe6b   : > { %v5263_v36 = vpop.f32.mrf.mxu0 }
 0xe6c   : > { %7821 = vmatmul.mubr.msk.f32.gmra.mxu1 %vm1271_vm1, %v5263_v36 }
 0xe6d   : > { %v5265_v37 = vpop.f32.mrf.mxu0  ;;  %7823 = vmatprep.mubr.msk.f32.mxu1 %vm8857_vm5, %v12513_v47 }
 0xe6f   : > { %v5268_v49 = vpop.f32.mrf.mxu0 }
 0xe70   : > { %7824 = vmatmul.mubr.msk.f32.gmra.mxu1 %vm1271_vm1, %v5268_v49 }
 0xe71   : > { %v5270_v53 = vpop.f32.mrf.mxu0  ;;  %7826 = vmatprep.mubr.msk.f32.mxu1 %vm8857_vm5, %v12513_v47 }
 0xe73   : > { %v5273_v19 = vpop.f32.mrf.mxu0 }
 0xe74   : > { %7827 = vmatmul.mubr.msk.f32.gmra.mxu1 %vm1271_vm1, %v5273_v19 }
 0xe75   : > { %v5275_v2 = vpop.f32.mrf.mxu0  ;;  %7829 = vmatprep.mubr.msk.f32.mxu1 %vm8857_vm5, %v12513_v47 }
 0xe77   : > { %v5278_v57 = vpop.f32.mrf.mxu0 }
 0xe78   : > { %7830 = vmatmul.mubr.msk.f32.gmra.mxu1 %vm1271_vm1, %v5278_v57 }
 0xe79   : > { %v5280_v21 = vpop.f32.mrf.mxu0  ;;  %7832 = vmatprep.mubr.msk.f32.mxu1 %vm8857_vm5, %v12513_v47 }
 0xe7b   : > { %v5283_v11 = vpop.f32.mrf.mxu0 }
 0xe7c   : > { %7833 = vmatmul.mubr.msk.f32.gmra.mxu1 %vm1271_vm1, %v5283_v11 }
 0xe7d   : > { %v5285_v3 = vpop.f32.mrf.mxu0  ;;  %7835 = vmatprep.mubr.msk.f32.mxu1 %vm8857_vm5, %v12513_v47 }
 0xe7f   : > { %v5288_v40 = vpop.f32.mrf.mxu0 }
 0xe80   : > { %7836 = vmatmul.mubr.msk.f32.gmra.mxu1 %vm1271_vm1, %v5288_v40 }
 0xe81   : > { %v5290_v8 = vpop.f32.mrf.mxu0  ;;  %7842 = vmatprep.mubr.msk.f32.mxu1 %vm8857_vm5, %v12513_v47 }
 0xf18   : > { %v5402_v39 = vpop.f32.mrf.mxu1 }
 0xf19   : > { %v5403_v34 = vadd.f32 %v7345_v20, %v5402_v39 }
 0xf1a   : > { %v7807_v61 = vpop.f32.mrf.mxu1 }
 0xf1b   : > { %v5458_v1 = vsel %vm1950_vm4, %v5403_v34, 0.0 }
 0xf1c   : > { %5459 = vadd.xlane.f32.xlu0 %v5458_v1  ;;  %v5407_v15 = vpop.f32.mrf.mxu1 }
 0xf1d   : > { %v5408_v33 = vadd.f32 %v7345_v20, %v5407_v15 }
 0xf1e   : > { %v7810_v63 = vpop.f32.mrf.mxu1 }
 0xf1f   : > { %v5461_v41 = vsel %vm1950_vm4, %v5408_v33, 0.0 }
 0xf20   : > { %5462 = vadd.xlane.f32.xlu1 %v5461_v41  ;;  %v5412_v60 = vpop.f32.mrf.mxu1 }
 0xf21   : > { %v5413_v23 = vadd.f32 %v7345_v20, %v5412_v60 }
 0xf22   : > { %v7813_v38 = vpop.f32.mrf.mxu1 }
 0xf23   : > { %v5464_v44 = vsel %vm1950_vm4, %v5413_v23, 0.0 }
 0xf24   : > { %5465 = vadd.xlane.f32.xlu0 %v5464_v44  ;;  %v5417_v32 = vpop.f32.mrf.mxu1 }
 0xf25   : > { %v5418_v5 = vadd.f32 %v7345_v20, %v5417_v32 }
 0xf26   : > { %v7816_v62 = vpop.f32.mrf.mxu1 }
 0xf27   : > { %v5467_v56 = vsel %vm1950_vm4, %v5418_v5, 0.0 }
 0xf28   : > { %5468 = vadd.xlane.f32.xlu0 %v5467_v56  ;;  %v5422_v13 = vpop.f32.mrf.mxu1 }
 0xf29   : > { %v5423_v26 = vadd.f32 %v7345_v20, %v5422_v13 }
 0xf2a   : > { %v7819_v14 = vpop.f32.mrf.mxu1 }
 0xf2b   : > { %v5470_v54 = vsel %vm1950_vm4, %v5423_v26, 0.0 }
 0xf2c   : > { %5471 = vadd.xlane.f32.xlu0 %v5470_v54  ;;  %v5427_v50 = vpop.f32.mrf.mxu1 }
 0xf2d   : > { %v5428_v42 = vadd.f32 %v7345_v20, %v5427_v50 }
 0xf2e   : > { %v7822_v58 = vpop.f32.mrf.mxu1 }
 0xf2f   : > { %v5473_v16 = vsel %vm1950_vm4, %v5428_v42, 0.0 }
 0xf30   : > { %5474 = vadd.xlane.f32.xlu1 %v5473_v16  ;;  %v5432_v0 = vpop.f32.mrf.mxu1 }
 0xf31   : > { %v5433_v17 = vadd.f32 %v7345_v20, %v5432_v0 }
 0xf32   : > { %v7825_v46 = vpop.f32.mrf.mxu1 }
 0xf33   : > { %v5476_v51 = vsel %vm1950_vm4, %v5433_v17, 0.0 }
 0xf34   : > { %5477 = vadd.xlane.f32.xlu0 %v5476_v51  ;;  %v5437_v25 = vpop.f32.mrf.mxu1 }
 0xf35   : > { %v5438_v35 = vadd.f32 %v7345_v20, %v5437_v25 }
 0xf36   : > { %v7828_v7 = vpop.f32.mrf.mxu1 }
 0xf37   : > { %v5479_v22 = vsel %vm1950_vm4, %v5438_v35, 0.0 }
 0xf38   : > { %5480 = vadd.xlane.f32.xlu1 %v5479_v22  ;;  %v5442_v48 = vpop.f32.mrf.mxu1 }
 0xf39   : > { %v11426_v31 = vadd.f32 %v7345_v20, %v5442_v48 }
 0xf3a   : > { %v7831_v10 = vpop.f32.mrf.mxu1 }
 0xf3b   : > { %v5482_v4 = vsel %vm1950_vm4, %v11426_v31, 0.0 }
 0xf3c   : > { %5483 = vadd.xlane.f32.xlu0 %v5482_v4  ;;  %v5447_v18 = vpop.f32.mrf.mxu1 }
 0xf3d   : > { %v11430_v30 = vadd.f32 %v7345_v20, %v5447_v18  ;;  %v5924_v18 = vld [vmem:[#allocation7 + $0x8] sm:$0xff] }
 0xf3e   : > { %v7834_v52 = vpop.f32.mrf.mxu1  ;;  %7839 = vmatpush3.msra.mxu1 %v5924_v18 }
 0xf3f   : > { %v5485_v27 = vsel %vm1950_vm4, %v11430_v30, 0.0  ;;  %7840 = vmatprep.subr.mxu1 %v12513_v47 }
 0xf40   : > { %5486 = vadd.xlane.f32.xlu1 %v5485_v27  ;;  %v5452_v59 = vpop.f32.mrf.mxu1 }
 0xf41   : > { %v11434_v6 = vadd.f32 %v7345_v20, %v5452_v59 }
 0xf42   : > { %v7837_v45 = vpop.f32.mrf.mxu1 }
 0xf43   : > { %v5489_v28 = vsel %vm5488_vm6, %v11434_v6, 0.0 }
 0xf44   : > { %5490 = vadd.xlane.f32.xlu0 %v5489_v28 }
 0xfa5   : > { %v5460_v55 = vpop.xlane.xlu0 %5459 }
 0xfa6   : > { %v5493_v29 = vmul.f32 0.0625, %v5460_v55 }
 0xfa8   : > { %v11438_v43 = vsub.f32 %v5403_v34, %v5493_v29 }
 0xfa9   : > { %v5463_v12 = vpop.xlane.xlu1 %5462 }
 0xfaa   : > { %v5494_v9 = vmul.f32 0.0625, %v5463_v12  ;;  %v5515_v24 = vmul.f32 %v11438_v43, %v11438_v43 }
 0xfac   : > { %v11442_v36 = vsub.f32 %v5408_v33, %v5494_v9  ;;  %v5526_v37 = vsel %vm1950_vm4, %v5515_v24, 0.0 }
 0xfad   : > { %v5466_v49 = vpop.xlane.xlu0 %5465  ;;  %5527 = vadd.xlane.f32.xlu1 %v5526_v37 }
 0xfae   : > { %v5495_v53 = vmul.f32 0.0625, %v5466_v49  ;;  %v5516_v19 = vmul.f32 %v11442_v36, %v11442_v36 }
 0xfb0   : > { %v11447_v2 = vsub.f32 %v5413_v23, %v5495_v53  ;;  %v5529_v57 = vsel %vm1950_vm4, %v5516_v19, 0.0 }
 0xfb1   : > { %v5469_v21 = vpop.xlane.xlu0 %5468  ;;  %5530 = vadd.xlane.f32.xlu0 %v5529_v57  ;;  %v11501_v57 = vld [vmem:[%s12645_s0] ss:$0 sm:$0xff] }
 0xfb2   : > { %v5496_v11 = vmul.f32 0.0625, %v5469_v21  ;;  %v5517_v3 = vmul.f32 %v11447_v2, %v11447_v2 }
 0xfb4   : > { %v11452_v40 = vsub.f32 %v5418_v5, %v5496_v11  ;;  %v5532_v8 = vsel %vm1950_vm4, %v5517_v3, 0.0  ;;  %v11507_v3 = vld [vmem:[%s12646_s29] ss:$0 sm:$0xff] }
 0xfb5   : > { %v5472_v20 = vpop.xlane.xlu0 %5471  ;;  %5533 = vadd.xlane.f32.xlu1 %v5532_v8 }
 0xfb6   : > { %v5497_v39 = vmul.f32 0.0625, %v5472_v20  ;;  %v5518_v34 = vmul.f32 %v11452_v40, %v11452_v40 }
 0xfb8   : > { %v11457_v61 = vsub.f32 %v5423_v26, %v5497_v39  ;;  %v5535_v1 = vsel %vm1950_vm4, %v5518_v34, 0.0 }
 0xfb9   : > { %v5475_v15 = vpop.xlane.xlu1 %5474  ;;  %5536 = vadd.xlane.f32.xlu0 %v5535_v1 }
 0xfba   : > { %v5498_v33 = vmul.f32 0.0625, %v5475_v15  ;;  %v5519_v63 = vmul.f32 %v11457_v61, %v11457_v61 }
 0xfbc   : > { %v11462_v41 = vsub.f32 %v5428_v42, %v5498_v33  ;;  %v5538_v60 = vsel %vm1950_vm4, %v5519_v63, 0.0 }
 0xfbd   : > { %v5478_v23 = vpop.xlane.xlu0 %5477  ;;  %5539 = vadd.xlane.f32.xlu1 %v5538_v60 }
 0xfbe   : > { %v5499_v38 = vmul.f32 0.0625, %v5478_v23  ;;  %v5520_v44 = vmul.f32 %v11462_v41, %v11462_v41 }
 0xfc0   : > { %v11467_v32 = vsub.f32 %v5433_v17, %v5499_v38  ;;  %v5541_v5 = vsel %vm1950_vm4, %v5520_v44, 0.0 }
 0xfc1   : > { %v5481_v62 = vpop.xlane.xlu1 %5480  ;;  %5542 = vadd.xlane.f32.xlu0 %v5541_v5 }
 0xfc2   : > { %v5500_v56 = vmul.f32 0.0625, %v5481_v62  ;;  %v5521_v13 = vmul.f32 %v11467_v32, %v11467_v32 }
 0xfc4   : > { %v11472_v26 = vsub.f32 %v5438_v35, %v5500_v56  ;;  %v5544_v14 = vsel %vm1950_vm4, %v5521_v13, 0.0 }
 0xfc5   : > { %v5484_v54 = vpop.xlane.xlu0 %5483  ;;  %5545 = vadd.xlane.f32.xlu1 %v5544_v14 }
 0xfc6   : > { %v5501_v50 = vmul.f32 0.0625, %v5484_v54  ;;  %v5522_v42 = vmul.f32 %v11472_v26, %v11472_v26 }
 0xfc8   : > { %v11478_v58 = vsub.f32 %v11426_v31, %v5501_v50  ;;  %v5547_v16 = vsel %vm1950_vm4, %v5522_v42, 0.0 }
 0xfc9   : > { %v5487_v0 = vpop.xlane.xlu1 %5486  ;;  %5548 = vadd.xlane.f32.xlu0 %v5547_v16 }
 0xfca   : > { %v5502_v17 = vmul.f32 0.0625, %v5487_v0  ;;  %v5523_v46 = vmul.f32 %v11478_v58, %v11478_v58 }
 0xfcc   : > { %v11484_v51 = vsub.f32 %v11430_v30, %v5502_v17  ;;  %v5550_v25 = vsel %vm1950_vm4, %v5523_v46, 0.0  ;;  %v5923_v30 = vld [vmem:[#allocation7] sm:$0xff] }
 0xfcd   : > { %5551 = vadd.xlane.f32.xlu1 %v5550_v25  ;;  %v5491_v35 = vpop.xlane.xlu0 %5490  ;;  %7841 = vmatpush3.msra.mxu1 %v5923_v30 }
 0xfce   : > { %v5503_v7 = vmul.f32 0.0625, %v5491_v35  ;;  %v5524_v22 = vmul.f32 %v11484_v51, %v11484_v51  ;;  %7916 = vmatprep.subr.mxu1 %v12513_v47 }
 0xfd0   : > { %v11490_v48 = vsub.f32 %v11434_v6, %v5503_v7  ;;  %v5553_v31 = vsel %vm1950_vm4, %v5524_v22, 0.0 }
 0xfd1   : > { %5554 = vadd.xlane.f32.xlu0 %v5553_v31 }
 0xfd2   : > { %v5525_v10 = vmul.f32 %v11490_v48, %v11490_v48 }
 0xfd4   : > { %v5556_v4 = vsel %vm5488_vm6, %v5525_v10, 0.0 }
 0xfd5   : > { %5557 = vadd.xlane.f32.xlu1 %v5556_v4 }
0x1036   : > { %v5528_v52 = vpop.xlane.xlu1 %5527 }
0x1037   : > { %v5559_v27 = vmul.f32 0.0625, %v5528_v52 }
0x1039   : > { %v5570_v59 = vadd.f32 1e-05, %v5559_v27 }
0x103a   : > { %v5531_v6 = vpop.xlane.xlu0 %5530 }
0x103b   : > { %8363 = vrsqrt.f32 %v5570_v59  ;;  %v5560_v45 = vmul.f32 0.0625, %v5531_v6 }
0x103d   : > { %v5571_v28 = vadd.f32 1e-05, %v5560_v45 }
0x103e   : > { %v5534_v55 = vpop.xlane.xlu1 %5533 }
0x103f   : > { %8365 = vrsqrt.f32 %v5571_v28  ;;  %v5561_v29 = vmul.f32 0.0625, %v5534_v55 }
0x1041   : > { %v5572_v12 = vadd.f32 1e-05, %v5561_v29 }
0x1042   : > { %v5537_v9 = vpop.xlane.xlu0 %5536 }
0x1043   : > { %8367 = vrsqrt.f32 %v5572_v12  ;;  %v5562_v24 = vmul.f32 0.0625, %v5537_v9 }
0x1045   : > { %v5573_v37 = vadd.f32 1e-05, %v5562_v24 }
0x1046   : > { %v5540_v49 = vpop.xlane.xlu1 %5539 }
0x1047   : > { %8369 = vrsqrt.f32 %v5573_v37  ;;  %v5563_v53 = vmul.f32 0.0625, %v5540_v49 }
0x1048   : > { %v8364_v19 = vpop.eup %8363 }
0x1049   : > { %v5592_v21 = vmul.f32 %v8364_v19, %v11438_v43  ;;  %v5574_v11 = vadd.f32 1e-05, %v5563_v53 }
0x104a   : > { %v5543_v8 = vpop.xlane.xlu0 %5542 }
0x104b   : > { %v5609_v20 = vmul.f32 %v11501_v57, %v5592_v21  ;;  %8371 = vrsqrt.f32 %v5574_v11  ;;  %v5564_v39 = vmul.f32 0.0625, %v5543_v8 }
0x104c   : > { %v8366_v34 = vpop.eup %8365 }
0x104d   : > { %v11511_v1 = vadd.f32 %v11507_v3, %v5609_v20  ;;  %v5593_v15 = vmul.f32 %v8366_v34, %v11442_v36  ;;  %v5575_v33 = vadd.f32 1e-05, %v5564_v39 }
0x104e   : > { %v5546_v63 = vpop.xlane.xlu1 %5545 }
0x104f   : > { %v5637_v43 = vand.u32 2147483647, %v11511_v1  ;;  %8373 = vrsqrt.f32 %v5575_v33  ;;  %v5565_v60 = vmul.f32 0.0625, %v5546_v63  ;;  %v5610_v23 = vmul.f32 %v11501_v57, %v5593_v15 }
0x1050   : > { %v8368_v38 = vpop.eup %8367 }
0x1051   : > { %v5648_v44 = vmul.f32 0.70710677, %v5637_v43  ;;  %v5594_v5 = vmul.f32 %v8368_v38, %v11447_v2  ;;  %v5576_v62 = vadd.f32 1e-05, %v5565_v60  ;;  %v11520_v56 = vadd.f32 %v11507_v3, %v5610_v23 }
0x1052   : > { %v5549_v13 = vpop.xlane.xlu0 %5548 }
0x1053   : > { %v5659_v36 = vmul.f32 0.3275911, %v5648_v44  ;;  %8375 = vrsqrt.f32 %v5576_v62  ;;  %v5566_v14 = vmul.f32 0.0625, %v5549_v13  ;;  %v5638_v50 = vand.u32 2147483647, %v11520_v56 }
0x1054   : > { %v8370_v54 = vpop.eup %8369  ;;  %v5611_v42 = vmul.f32 %v11501_v57, %v5594_v5  ;;  %v5824_v46 = vsub.f32 0.0, %v5648_v44 }
0x1055   : > { %v5670_v16 = vadd.f32 1.0, %v5659_v36  ;;  %v5595_v0 = vmul.f32 %v8370_v54, %v11452_v40  ;;  %v5577_v17 = vadd.f32 1e-05, %v5566_v14  ;;  %v5649_v2 = vmul.f32 0.70710677, %v5638_v50 }
0x1056   : > { %v5552_v25 = vpop.xlane.xlu1 %5551  ;;  %v11528_v35 = vadd.f32 %v11507_v3, %v5611_v42  ;;  %v5835_v52 = vmul.f32 %v5824_v46, %v5648_v44 }
0x1057   : > { %8377 = vrcp.f32 %v5670_v16  ;;  %v5567_v7 = vmul.f32 0.0625, %v5552_v25  ;;  %v5612_v22 = vmul.f32 %v11501_v57, %v5595_v0  ;;  %v5660_v10 = vmul.f32 0.3275911, %v5649_v2 }
0x1058   : > { %v8372_v31 = vpop.eup %8371  ;;  %8379 = vrsqrt.f32 %v5577_v17  ;;  %v5639_v4 = vand.u32 2147483647, %v11528_v35  ;;  %v5825_v6 = vsub.f32 0.0, %v5649_v2  ;;  %v5846_v53 = vmul.f32 1.442695, %v5835_v52 }
0x1059   : > { %v5596_v40 = vmul.f32 %v8372_v31, %v11457_v61  ;;  %v5578_v18 = vadd.f32 1e-05, %v5567_v7  ;;  %v11534_v30 = vadd.f32 %v11507_v3, %v5612_v22  ;;  %v11536_v59 = vadd.f32 1.0, %v5660_v10 }
0x105a   : > { %v5555_v27 = vpop.xlane.xlu0 %5554  ;;  %v5650_v45 = vmul.f32 0.70710677, %v5639_v4  ;;  %v5836_v21 = vmul.f32 %v5825_v6, %v5649_v2 }
0x105b   : > { %8381 = vrsqrt.f32 %v5578_v18  ;;  %v5568_v28 = vmul.f32 0.0625, %v5555_v27  ;;  %v5640_v55 = vand.u32 2147483647, %v11534_v30  ;;  %v5613_v29 = vmul.f32 %v11501_v57, %v5596_v40 }
0x105c   : > { %v8374_v12 = vpop.eup %8373  ;;  %8383 = vrcp.f32 %v11536_v59  ;;  %v5661_v61 = vmul.f32 0.3275911, %v5650_v45  ;;  %v5826_v8 = vsub.f32 0.0, %v5650_v45  ;;  %v5848_v62 = vmul.f32 1.442695, %v5836_v21 }
0x105d   : > { %v5597_v9 = vmul.f32 %v8374_v12, %v11462_v41  ;;  %v5579_v24 = vadd.f32 1e-05, %v5568_v28  ;;  %v5651_v37 = vmul.f32 0.70710677, %v5640_v55  ;;  %v11547_v49 = vadd.f32 %v11507_v3, %v5613_v29 }
0x105e   : > { %v5558_v19 = vpop.xlane.xlu1 %5557  ;;  %v11549_v11 = vadd.f32 1.0, %v5661_v61  ;;  %v5837_v38 = vmul.f32 %v5826_v8, %v5650_v45 }
0x105f   : > { %8385 = vrsqrt.f32 %v5579_v24  ;;  %v5569_v20 = vmul.f32 0.0625, %v5558_v19  ;;  %v5662_v39 = vmul.f32 0.3275911, %v5651_v37  ;;  %v5827_v34 = vsub.f32 0.0, %v5651_v37 }
0x1060   : > { %v8376_v15 = vpop.eup %8375  ;;  %8387 = vrcp.f32 %v11549_v11  ;;  %v5641_v41 = vand.u32 2147483647, %v11547_v49  ;;  %v5614_v33 = vmul.f32 %v11501_v57, %v5597_v9  ;;  %v5850_v2 = vmul.f32 1.442695, %v5837_v38 }
0x1061   : > { %v5598_v63 = vmul.f32 %v8376_v15, %v11467_v32  ;;  %v5580_v60 = vadd.f32 1e-05, %v5569_v20  ;;  %v11555_v23 = vadd.f32 1.0, %v5662_v39  ;;  %8389 = vpow2.f32 %v5846_v53 }
0x1062   : > { %v5652_v44 = vmul.f32 0.70710677, %v5641_v41  ;;  %v11560_v5 = vadd.f32 %v11507_v3, %v5614_v33  ;;  %v5838_v13 = vmul.f32 %v5827_v34, %v5651_v37 }
0x1063   : > { %v5615_v36 = vmul.f32 %v11501_v57, %v5598_v63  ;;  %8391 = vrcp.f32 %v11555_v23 }
0x1064   : > { %v8378_v14 = vpop.eup %8377  ;;  %v5663_v54 = vmul.f32 0.3275911, %v5652_v44  ;;  %v5828_v32 = vsub.f32 0.0, %v5652_v44  ;;  %v5642_v42 = vand.u32 2147483647, %v11560_v5  ;;  %8393 = vrsqrt.f32 %v5580_v60 }
0x1065   : > { %v8380_v0 = vpop.eup %8379  ;;  %v5692_v17 = vmul.f32 %v8378_v14, %v5670_v16  ;;  %v11566_v46 = vadd.f32 %v11507_v3, %v5615_v36  ;;  %8395 = vpow2.f32 %v5848_v62  ;;  %v5852_v10 = vmul.f32 1.442695, %v5838_v13 }
0x1066   : > { %v5599_v25 = vmul.f32 %v8380_v0, %v11472_v26  ;;  %v11569_v7 = vadd.f32 1.0, %v5663_v54  ;;  %v5653_v22 = vmul.f32 0.70710677, %v5642_v42  ;;  %v5839_v16 = vmul.f32 %v5828_v32, %v5652_v44 }
0x1067   : > { %v5703_v31 = vsub.f32 2.0, %v5692_v17  ;;  %v5643_v40 = vand.u32 2147483647, %v11566_v46 }
0x1068   : > { %v8382_v18 = vpop.eup %8381  ;;  %8397 = vrcp.f32 %v11569_v7  ;;  %v5664_v52 = vmul.f32 0.3275911, %v5653_v22  ;;  %v5829_v27 = vsub.f32 0.0, %v5653_v22  ;;  %v5616_v29 = vmul.f32 %v11501_v57, %v5599_v25 }
0x1069   : > { %v8384_v6 = vpop.eup %8383  ;;  %v11575_v45 = vmul.f32 %v8378_v14, %v5703_v31  ;;  %v5600_v26 = vmul.f32 %v8382_v18, %v11478_v58  ;;  %v5654_v28 = vmul.f32 0.70710677, %v5643_v40  ;;  %8399 = vpow2.f32 %v5850_v2 }
0x106a   : > { %v5693_v12 = vmul.f32 %v8384_v6, %v11536_v59  ;;  %v11582_v61 = vadd.f32 1.0, %v5664_v52  ;;  %v5840_v9 = vmul.f32 %v5829_v27, %v5653_v22  ;;  %v11586_v19 = vadd.f32 %v11507_v3, %v5616_v29 }
0x106b   : > { %v5725_v24 = vmul.f32 1.0614054, %v11575_v45  ;;  %v5665_v37 = vmul.f32 0.3275911, %v5654_v28  ;;  %v5830_v53 = vsub.f32 0.0, %v5654_v28  ;;  %v5617_v20 = vmul.f32 %v11501_v57, %v5600_v26 }
0x106c   : > { %v8386_v21 = vpop.eup %8385  ;;  %v5704_v58 = vsub.f32 2.0, %v5693_v12  ;;  %v5854_v8 = vmul.f32 1.442695, %v5839_v16  ;;  %8401 = vrcp.f32 %v11582_v61  ;;  %v5856_v34 = vmul.f32 1.442695, %v5840_v9 }
0x106d   : > { %v8388_v39 = vpop.eup %8387  ;;  %v5736_v59 = vadd.f32 -1.4531521, %v5725_v24  ;;  %8403 = vpow2.f32 %v5852_v10  ;;  %v11590_v15 = vadd.f32 1.0, %v5665_v37  ;;  %v5601_v33 = vmul.f32 %v8386_v21, %v11484_v51 }
0x106e   : > { %v11593_v63 = vmul.f32 %v8384_v6, %v5704_v58  ;;  %v5694_v60 = vmul.f32 %v8388_v39, %v11549_v11  ;;  %v5644_v38 = vand.u32 2147483647, %v11586_v19  ;;  %v5841_v62 = vmul.f32 %v5830_v53, %v5654_v28  ;;  %v8390_v36 = vpop.eup %8389 }
0x106f   : > { %v5747_v44 = vmul.f32 %v5736_v59, %v11575_v45  ;;  %8405 = vrcp.f32 %v11590_v15  ;;  %v11600_v13 = vadd.f32 %v11507_v3, %v5617_v20  ;;  %v5618_v52 = vmul.f32 %v11501_v57, %v5601_v33 }
0x1070   : > { %v5726_v14 = vmul.f32 1.0614054, %v11593_v63  ;;  %v5705_v54 = vsub.f32 2.0, %v5694_v60  ;;  %8407 = vpow2.f32 %v5854_v8  ;;  %v5655_v51 = vmul.f32 0.70710677, %v5644_v38  ;;  %v8392_v32 = vpop.eup %8391 }
0x1071   : > { %v5758_v11 = vadd.f32 1.4214138, %v5747_v44  ;;  %8409 = vpow2.f32 %v5856_v34  ;;  %v5645_v0 = vand.u32 2147483647, %v11600_v13  ;;  %v8394_v17 = vpop.eup %8393  ;;  %v5695_v22 = vmul.f32 %v8392_v32, %v11555_v23 }
0x1072   : > { %v5737_v25 = vadd.f32 -1.4531521, %v5726_v14  ;;  %v11606_v2 = vmul.f32 %v8388_v39, %v5705_v54  ;;  %v5666_v31 = vmul.f32 0.3275911, %v5655_v51  ;;  %v5858_v18 = vmul.f32 1.442695, %v5841_v62  ;;  %v11613_v27 = vpop.eup %8395 }
0x1073   : > { %v5769_v10 = vmul.f32 %v5758_v11, %v11575_v45  ;;  %v5656_v16 = vmul.f32 0.70710677, %v5645_v0  ;;  %v5706_v28 = vsub.f32 2.0, %v5695_v22  ;;  %v11620_v9 = vmul.f32 %v8394_v17, %v11490_v48 }
0x1074   : > { %v5748_v6 = vmul.f32 %v5737_v25, %v11593_v63  ;;  %v5727_v26 = vmul.f32 1.0614054, %v11606_v2  ;;  %v11617_v29 = vadd.f32 1.0, %v5666_v31  ;;  %v5831_v24 = vsub.f32 0.0, %v5655_v51 }
0x1075   : > { %v8398_v12 = vpop.eup %8397  ;;  %v5780_v23 = vadd.f32 -0.28449672, %v5769_v10  ;;  %v5667_v37 = vmul.f32 0.3275911, %v5656_v16  ;;  %v11622_v58 = vmul.f32 %v8392_v32, %v5706_v28  ;;  %v11632_v34 = vadd.f32 %v11507_v3, %v5618_v52 }
0x1076   : > { %v5759_v53 = vadd.f32 1.4214138, %v5748_v6  ;;  %v5738_v21 = vadd.f32 -1.4531521, %v5727_v26  ;;  %v5696_v8 = vmul.f32 %v8398_v12, %v11569_v7  ;;  %v11625_v20 = vpop.eup %8399  ;;  %8411 = vrcp.f32 %v11617_v29 }
0x1077   : > { %v5791_v39 = vmul.f32 %v5780_v23, %v11575_v45  ;;  %v11629_v59 = vadd.f32 1.0, %v5667_v37  ;;  %v5728_v60 = vmul.f32 1.0614054, %v11622_v58  ;;  %8413 = vpow2.f32 %v5858_v18 }
0x1078   : > { %v5770_v48 = vmul.f32 %v5759_v53, %v11593_v63  ;;  %v5749_v33 = vmul.f32 %v5738_v21, %v11606_v2  ;;  %v5707_v44 = vsub.f32 2.0, %v5696_v8  ;;  %v5842_v14 = vmul.f32 %v5831_v24, %v5655_v51 }
0x1079   : > { %v8402_v62 = vpop.eup %8401  ;;  %v5802_v7 = vadd.f32 0.2548296, %v5791_v39  ;;  %v5832_v54 = vsub.f32 0.0, %v5656_v16  ;;  %v5739_v25 = vadd.f32 -1.4531521, %v5728_v60  ;;  %8415 = vrcp.f32 %v11629_v59 }
0x107a   : > { %v11637_v32 = vpop.eup %8403  ;;  %v5781_v11 = vadd.f32 -0.28449672, %v5770_v48  ;;  %v5760_v17 = vadd.f32 1.4214138, %v5749_v33  ;;  %v11639_v22 = vmul.f32 %v8398_v12, %v5707_v44  ;;  %v5697_v10 = vmul.f32 %v8402_v62, %v11582_v61 }
0x107b   : > { %v5813_v31 = vmul.f32 %v5802_v7, %v11575_v45  ;;  %v5646_v52 = vand.u32 2147483647, %v11632_v34  ;;  %v5750_v26 = vmul.f32 %v5739_v25, %v11622_v58  ;;  %v11652_v61 = vmul.f32 1.442695, %v5842_v14 }
0x107c   : > { %v8406_v6 = vpop.eup %8405  ;;  %v5792_v18 = vmul.f32 %v5781_v11, %v11593_v63  ;;  %v5771_v51 = vmul.f32 %v5760_v17, %v11606_v2  ;;  %v5729_v28 = vmul.f32 1.0614054, %v11639_v22  ;;  %v5708_v24 = vsub.f32 2.0, %v5697_v10 }
0x107d   : > { %v11649_v23 = vpop.eup %8407  ;;  %v5868_v12 = vmul.f32 %v8390_v36, %v5813_v31  ;;  %v5698_v45 = vmul.f32 %v8406_v6, %v11590_v15  ;;  %v5761_v8 = vadd.f32 1.4214138, %v5750_v26  ;;  %v11656_v39 = vmul.f32 %v5832_v54, %v5656_v16 }
0x107e   : > { %v11654_v37 = vpop.eup %8409  ;;  %v5803_v53 = vadd.f32 0.2548296, %v5792_v18  ;;  %v5782_v21 = vadd.f32 -0.28449672, %v5771_v51  ;;  %v5740_v33 = vadd.f32 -1.4531521, %v5729_v28  ;;  %v11658_v60 = vmul.f32 %v8402_v62, %v5708_v24 }
0x107f   : > { %v5879_v48 = vsub.f32 1.0, %v5868_v12  ;;  %v5709_v44 = vsub.f32 2.0, %v5698_v45  ;;  %v5772_v15 = vmul.f32 %v5761_v8, %v11622_v58  ;;  %v11665_v14 = vmul.f32 0.70710677, %v5646_v52 }
0x1080   : > { %v5814_v7 = vmul.f32 %v5803_v53, %v11593_v63  ;;  %v5793_v36 = vmul.f32 %v5782_v21, %v11606_v2  ;;  %v5751_v16 = vmul.f32 %v5740_v33, %v11639_v22  ;;  %v5730_v54 = vmul.f32 1.0614054, %v11658_v60 }
0x1081   : > { %v5890_v11 = vmul.f32 %v5879_v48, %v5637_v43  ;;  %v11671_v62 = vmul.f32 %v8406_v6, %v5709_v44  ;;  %v5783_v25 = vadd.f32 -0.28449672, %v5772_v15  ;;  %v5668_v31 = vmul.f32 0.3275911, %v11665_v14 }
0x1082   : > { %v5869_v17 = vmul.f32 %v11613_v27, %v5814_v7  ;;  %v5804_v63 = vadd.f32 0.2548296, %v5793_v36  ;;  %v5762_v18 = vadd.f32 1.4214138, %v5751_v16  ;;  %v5741_v51 = vadd.f32 -1.4531521, %v5730_v54 }
0x1083   : > { %v5901_v10 = vadd.f32 %v5890_v11, %v11511_v1  ;;  %v5731_v26 = vmul.f32 1.0614054, %v11671_v62  ;;  %v8412_v28 = vpop.eup %8411  ;;  %v5794_v24 = vmul.f32 %v5783_v25, %v11622_v58  ;;  %v11679_v6 = vadd.f32 1.0, %v5668_v31 }
0x1084   : > { %v5880_v43 = vsub.f32 1.0, %v5869_v17  ;;  %v5815_v12 = vmul.f32 %v5804_v63, %v11606_v2  ;;  %v5773_v27 = vmul.f32 %v5762_v18, %v11639_v22  ;;  %v5752_v53 = vmul.f32 %v5741_v51, %v11658_v60  ;;  %v11683_v8 = vpop.eup %8413 }
0x1085   : > { %v5912_v45 = vmul.f32 0.5, %v5901_v10  ;;  %v5742_v21 = vadd.f32 -1.4531521, %v5731_v26  ;;  %v5805_v33 = vadd.f32 0.2548296, %v5794_v24  ;;  %v5699_v2 = vmul.f32 %v8412_v28, %v11617_v29 }
0x1086   : > { %v5891_v1 = vmul.f32 %v5880_v43, %v5638_v50  ;;  %v5870_v48 = vmul.f32 %v11625_v20, %v5815_v12  ;;  %v5784_v44 = vadd.f32 -0.28449672, %v5773_v27  ;;  %v5763_v7 = vadd.f32 1.4214138, %v5752_v53  ;;  %v8416_v15 = vpop.eup %8415 }
0x1087   : > { %7843 = vmatmul.mubr.msk.f32.vlgmr.msra.gmra.mxu1 %vm1950_vm4, %v5912_v45  ;;  %v5753_v36 = vmul.f32 %v5742_v21, %v11671_v62  ;;  %8417 = vrcp.f32 %v11679_v6  ;;  %v5816_v20 = vmul.f32 %v5805_v33, %v11622_v58  ;;  %v5710_v16 = vsub.f32 2.0, %v5699_v2 }
0x1088   : > { %7845 = vmatprep.mubr.msk.f32.mxu1 %vm8857_vm5, %v12513_v47  ;;  %v5902_v11 = vadd.f32 %v5891_v1, %v11520_v56  ;;  %v5881_v50 = vsub.f32 1.0, %v5870_v48  ;;  %v5795_v29 = vmul.f32 %v5784_v44, %v11639_v22  ;;  %v5774_v54 = vmul.f32 %v5763_v7, %v11658_v60 }
0x1089   : > { %v5764_v17 = vadd.f32 1.4214138, %v5753_v36  ;;  %v5700_v63 = vmul.f32 %v8416_v15, %v11629_v59  ;;  %v5871_v10 = vmul.f32 %v11637_v32, %v5816_v20  ;;  %v11702_v18 = vmul.f32 %v8412_v28, %v5710_v16 }
0x108a   : > { %v5913_v25 = vmul.f32 0.5, %v5902_v11  ;;  %v5892_v31 = vmul.f32 %v5881_v50, %v5639_v4  ;;  %v5806_v56 = vadd.f32 0.2548296, %v5795_v29  ;;  %v5785_v51 = vadd.f32 -0.28449672, %v5774_v54 }
0x108b   : > { %v5775_v58 = vmul.f32 %v5764_v17, %v11671_v62  ;;  %v5711_v26 = vsub.f32 2.0, %v5700_v63  ;;  %v5882_v12 = vsub.f32 1.0, %v5871_v10  ;;  %v5732_v59 = vmul.f32 1.0614054, %v11702_v18 }
0x108c   : > { %7846 = vmatmul.mubr.msk.f32.gmra.mxu1 %vm1950_vm4, %v5913_v25  ;;  %v5903_v43 = vadd.f32 %v5892_v31, %v11528_v35  ;;  %v5619_v24 = vmul.f32 %v11501_v57, %v11620_v9  ;;  %v5817_v4 = vmul.f32 %v5806_v56, %v11639_v22  ;;  %v5796_v32 = vmul.f32 %v5785_v51, %v11658_v60 }
0x108d   : > { %7848 = vmatprep.mubr.msk.f32.mxu1 %vm8857_vm5, %v12513_v47  ;;  %v5786_v28 = vadd.f32 -0.28449672, %v5775_v58  ;;  %v11714_v45 = vmul.f32 %v8416_v15, %v5711_v26  ;;  %v5893_v35 = vmul.f32 %v5882_v12, %v5640_v55  ;;  %v5743_v53 = vadd.f32 -1.4531521, %v5732_v59 }
0x108e   : > { %v5914_v27 = vmul.f32 0.5, %v5903_v43  ;;  %v5862_v21 = vmul.f32 1.442695, %v11656_v39  ;;  %v5872_v1 = vmul.f32 %v11649_v23, %v5817_v4  ;;  %v5807_v57 = vadd.f32 0.2548296, %v5796_v32 }
0x108f   : > { %v5797_v9 = vmul.f32 %v5786_v28, %v11671_v62  ;;  %v5733_v48 = vmul.f32 1.0614054, %v11714_v45  ;;  %v5904_v22 = vadd.f32 %v5893_v35, %v11534_v30  ;;  %v5754_v33 = vmul.f32 %v5743_v53, %v11702_v18 }
0x1090   : > { %7849 = vmatmul.mubr.msk.f32.gmra.mxu1 %vm1950_vm4, %v5914_v27  ;;  %8419 = vpow2.f32 %v11652_v61  ;;  %v11727_v55 = vadd.f32 %v11507_v3, %v5619_v24  ;;  %v5883_v23 = vsub.f32 1.0, %v5872_v1  ;;  %v5818_v39 = vmul.f32 %v5807_v57, %v11658_v60 }
0x1091   : > { %7851 = vmatprep.mubr.msk.f32.mxu1 %vm8857_vm5, %v12513_v47  ;;  %v5808_v2 = vadd.f32 0.2548296, %v5797_v9  ;;  %v5744_v44 = vadd.f32 -1.4531521, %v5733_v48  ;;  %v5915_v7 = vmul.f32 0.5, %v5904_v22  ;;  %8421 = vpow2.f32 %v5862_v21 }
0x1092   : > { %v5765_v36 = vadd.f32 1.4214138, %v5754_v33  ;;  %v5647_v30 = vand.u32 2147483647, %v11727_v55  ;;  %v5894_v15 = vmul.f32 %v5883_v23, %v5641_v41  ;;  %v5873_v61 = vmul.f32 %v11654_v37, %v5818_v39 }
0x1093   : > { %v5819_v3 = vmul.f32 %v5808_v2, %v11671_v62  ;;  %v5755_v11 = vmul.f32 %v5744_v44, %v11714_v45  ;;  %v5833_v20 = vsub.f32 0.0, %v11665_v14 }
0x1094   : > { %v8418_v50 = vpop.eup %8417  ;;  %7852 = vmatmul.mubr.msk.f32.gmra.mxu1 %vm1950_vm4, %v5915_v7  ;;  %v5776_v60 = vmul.f32 %v5765_v36, %v11702_v18  ;;  %v11743_v16 = vmul.f32 0.70710677, %v5647_v30  ;;  %v5905_v41 = vadd.f32 %v5894_v15, %v11547_v49  ;;  %v5884_v37 = vsub.f32 1.0, %v5873_v61 }
0x1095   : > { %7854 = vmatprep.mubr.msk.f32.mxu1 %vm8857_vm5, %v12513_v47  ;;  %v5874_v62 = vmul.f32 %v11683_v8, %v5819_v3  ;;  %v5766_v29 = vadd.f32 1.4214138, %v5755_v11  ;;  %v5701_v17 = vmul.f32 %v8418_v50, %v11679_v6  ;;  %v5844_v49 = vmul.f32 %v5833_v20, %v11665_v14 }
0x1096   : > { %v5787_v54 = vadd.f32 -0.28449672, %v5776_v60  ;;  %v5669_v63 = vmul.f32 0.3275911, %v11743_v16  ;;  %v5916_v25 = vmul.f32 0.5, %v5905_v41  ;;  %v5895_v31 = vmul.f32 %v5884_v37, %v5642_v42 }
0x1097   : > { %v5885_v10 = vsub.f32 1.0, %v5874_v62  ;;  %v5777_v56 = vmul.f32 %v5766_v29, %v11714_v45  ;;  %v5712_v58 = vsub.f32 2.0, %v5701_v17  ;;  %v5864_v28 = vmul.f32 1.442695, %v5844_v49 }
0x1098   : > { %v5798_v51 = vmul.f32 %v5787_v54, %v11702_v18  ;;  %v5680_v26 = vadd.f32 1.0, %v5669_v63  ;;  %7855 = vmatmul.mubr.msk.f32.gmra.mxu1 %vm1950_vm4, %v5916_v25  ;;  %v5906_v8 = vadd.f32 %v5895_v31, %v11560_v5  ;;  %v5834_v44 = vsub.f32 0.0, %v11743_v16 }
0x1099   : > { %v5896_v6 = vmul.f32 %v5885_v10, %v5643_v40  ;;  %v5788_v43 = vadd.f32 -0.28449672, %v5777_v56  ;;  %7857 = vmatprep.mubr.msk.f32.mxu1 %vm8857_vm5, %v12513_v47  ;;  %v5723_v12 = vmul.f32 %v8418_v50, %v5712_v58 }
0x109a   : > { %v5809_v42 = vadd.f32 0.2548296, %v5798_v51  ;;  %8423 = vrcp.f32 %v5680_v26  ;;  %v5917_v59 = vmul.f32 0.5, %v5906_v8  ;;  %v5845_v11 = vmul.f32 %v5834_v44, %v11743_v16 }
0x109b   : > { %v5907_v24 = vadd.f32 %v5896_v6, %v11566_v46  ;;  %v5799_v14 = vmul.f32 %v5788_v43, %v11714_v45  ;;  %v5734_v32 = vmul.f32 1.0614054, %v5723_v12  ;;  %8425 = vpow2.f32 %v5864_v28  ;;  %v11801_v6 = vld [vmem:[%s12368_s9] ss:$0 sm:$0xff] }
0x109c   : > { %v5820_v4 = vmul.f32 %v5809_v42, %v11702_v18  ;;  %7858 = vmatmul.mubr.msk.f32.gmra.mxu1 %vm1950_vm4, %v5917_v59  ;;  %v5866_v41 = vmul.f32 1.442695, %v5845_v11 }
0x109d   : > { %v8420_v5 = vpop.eup %8419  ;;  %v5918_v40 = vmul.f32 0.5, %v5907_v24  ;;  %v5810_v27 = vadd.f32 0.2548296, %v5799_v14  ;;  %7860 = vmatprep.mubr.msk.f32.mxu1 %vm8857_vm5, %v12513_v47  ;;  %v5745_v53 = vadd.f32 -1.4531521, %v5734_v32  ;;  %v8532_v32 = vld [vmem:[%s9154_s28 + $0x8] sm:$0xff] }
0x109e   : > { %v5875_v35 = vmul.f32 %v8420_v5, %v5820_v4  ;;  %v8422_v21 = vpop.eup %8421  ;;  %8427 = vpow2.f32 %v5866_v41 }
0x109f   : > { %v5821_v1 = vmul.f32 %v5810_v27, %v11714_v45  ;;  %v5756_v57 = vmul.f32 %v5745_v53, %v5723_v12  ;;  %v8533_v53 = vld [vmem:[%s9154_s28 + $0x10] sm:$0xff] }
0x10a0   : > { %v5886_v46 = vsub.f32 1.0, %v5875_v35  ;;  %7861 = vmatmul.mubr.msk.f32.gmra.mxu1 %vm1950_vm4, %v5918_v40 }
0x10a1   : > { %v5876_v18 = vmul.f32 %v8422_v21, %v5821_v1  ;;  %7863 = vmatprep.mubr.msk.f32.mxu1 %vm8857_vm5, %v12513_v47  ;;  %v5767_v48 = vadd.f32 1.4214138, %v5756_v57 }
0x10a2   : > { %v5897_v9 = vmul.f32 %v5886_v46, %v5644_v38 }
0x10a3   : > { %v5887_v22 = vsub.f32 1.0, %v5876_v18  ;;  %v5778_v23 = vmul.f32 %v5767_v48, %v5723_v12 }
0x10a4   : > { %v5908_v33 = vadd.f32 %v5897_v9, %v11586_v19  ;;  %v8534_v9 = vld [vmem:[%s9154_s28 + $0x18] sm:$0xff] }
0x10a5   : > { %v5898_v45 = vmul.f32 %v5887_v22, %v5645_v0  ;;  %v5789_v2 = vadd.f32 -0.28449672, %v5778_v23 }
0x10a6   : > { %v5919_v39 = vmul.f32 0.5, %v5908_v33 }
0x10a7   : > { %v8424_v7 = vpop.eup %8423  ;;  %v5909_v36 = vadd.f32 %v5898_v45, %v11600_v13  ;;  %v5800_v15 = vmul.f32 %v5789_v2, %v5723_v12 }
0x10a8   : > { %7864 = vmatmul.mubr.msk.f32.gmra.mxu1 %vm1950_vm4, %v5919_v39  ;;  %v5702_v61 = vmul.f32 %v8424_v7, %v5680_v26  ;;  %v8426_v60 = vpop.eup %8425  ;;  %v8535_v39 = vld [vmem:[%s9154_s28 + $0x20] sm:$0xff] }
0x10a9   : > { %7866 = vmatprep.mubr.msk.f32.mxu1 %vm8857_vm5, %v12513_v47  ;;  %v5920_v38 = vmul.f32 0.5, %v5909_v36  ;;  %v5811_v19 = vadd.f32 0.2548296, %v5800_v15 }
0x10aa   : > { %v5713_v3 = vsub.f32 2.0, %v5702_v61  ;;  %v8536_v61 = vld [vmem:[%s9154_s28 + $0x28] sm:$0xff] }
0x10ab   : > { %v5822_v0 = vmul.f32 %v5811_v19, %v5723_v12  ;;  %v8428_v58 = vpop.eup %8427 }
0x10ac   : > { %7867 = vmatmul.mubr.msk.f32.gmra.mxu1 %vm1950_vm4, %v5920_v38  ;;  %v5724_v50 = vmul.f32 %v8424_v7, %v5713_v3 }
0x10ad   : > { %7869 = vmatprep.mubr.msk.f32.mxu1 %vm8857_vm5, %v12513_v47  ;;  %v5877_v13 = vmul.f32 %v8426_v60, %v5822_v0 }
0x10ae   : > { %v5735_v20 = vmul.f32 1.0614054, %v5724_v50 }
0x10af   : > { %v5888_v37 = vsub.f32 1.0, %v5877_v13 }
0x10b0   : > { %v5746_v62 = vadd.f32 -1.4531521, %v5735_v20 }
0x10b1   : > { %v5899_v29 = vmul.f32 %v5888_v37, %v5646_v52 }
0x10b2   : > { %v5757_v54 = vmul.f32 %v5746_v62, %v5724_v50  ;;  %v8538_v62 = vld [vmem:[%s9154_s28 + $0x38] sm:$0xff] }
0x10b3   : > { %v5910_v16 = vadd.f32 %v5899_v29, %v11632_v34 }
0x10b4   : > { %v5768_v17 = vadd.f32 1.4214138, %v5757_v54 }
0x10b5   : > { %v5921_v63 = vmul.f32 0.5, %v5910_v16 }
0x10b6   : > { %v5779_v25 = vmul.f32 %v5768_v17, %v5724_v50 }
0x10b7   : > { %7870 = vmatmul.mubr.msk.f32.gmra.mxu1 %vm1950_vm4, %v5921_v63 }
0x10b8   : > { %v5790_v31 = vadd.f32 -0.28449672, %v5779_v25  ;;  %7872 = vmatprep.mubr.msk.f32.mxu1 %vm8857_vm5, %v12513_v47  ;;  %v8539_v25 = vld [vmem:[%s9154_s28 + $0x40] sm:$0xff] }
0x10ba   : > { %v5801_v10 = vmul.f32 %v5790_v31, %v5724_v50 }
0x10bc   : > { %v5812_v56 = vadd.f32 0.2548296, %v5801_v10 }
0x10be   : > { %v5823_v51 = vmul.f32 %v5812_v56, %v5724_v50  ;;  %v8537_v50 = vld [vmem:[%s9154_s28 + $0x30] sm:$0xff] }
0x10c0   : > { %v5878_v49 = vmul.f32 %v8428_v58, %v5823_v51 }
0x10c2   : > { %v5889_v52 = vsub.f32 1.0, %v5878_v49  ;;  %v8540_v49 = vld [vmem:[%s9154_s28 + $0x48] sm:$0xff] }
0x10c4   : > { %v5900_v26 = vmul.f32 %v5889_v52, %v5647_v30  ;;  %v8531_v30 = vld [vmem:[%s9154_s28] sm:$0xff] }
0x10c6   : > { %v5911_v34 = vadd.f32 %v5900_v26, %v11727_v55 }
0x10c8   : > { %v5922_v8 = vmul.f32 0.5, %v5911_v34 }
0x10ca   : > { %7873 = vmatmul.mubr.msk.f32.gmra.mxu1 %vm1950_vm4, %v5922_v8 }
0x10cb   : > { %7932 = vmatprep.mubr.msk.f32.mxu1 %vm8857_vm5, %v12513_v47 }
0x1147   : > { %v6031_v43 = vpop.f32.mrf.mxu1 }
0x1148   : > { %v6032_v42 = vadd.f32 %v11801_v6, %v6031_v43 }
0x1149   : > { %v7844_v12 = vpop.f32.mrf.mxu1 }
0x114a   : > { %v11805_v59 = vadd.f32 %v8531_v30, %v6032_v42  ;;  %v8541_v42 = vld [vmem:[%s9154_s28 + $0x50] sm:$0x1] }
0x114c   : > { %v6036_v55 = vpop.f32.mrf.mxu1  ;;  %v6098_v24 = vsel %vm1271_vm1, %v11805_v59, 0.0 }
0x114d   : > { %v6037_v14 = vadd.f32 %v11801_v6, %v6036_v55  ;;  %6099 = vadd.xlane.f32.xlu0 %v6098_v24  ;;  %v6278_v55 = vld [vmem:[#allocation8 + $0x18] sm:$0xff]  ;;  %v6277_v24 = vld [vmem:[#allocation8 + $0x10] sm:$0xff] }
0x114e   : > { %v7847_v4 = vpop.f32.mrf.mxu1  ;;  %7876 = vmatpush3.msra.mxu0 %v6278_v55 }
0x114f   : > { %v11811_v28 = vadd.f32 %v8532_v32, %v6037_v14  ;;  %7877 = vmatprep.subr.mxu0 %v12513_v47 }
0x1150   : > { %v6041_v5 = vpop.f32.mrf.mxu1  ;;  %7878 = vmatpush3.msra.mxu0 %v6277_v24 }
0x1151   : > { %v6042_v40 = vadd.f32 %v11801_v6, %v6041_v5  ;;  %v6101_v27 = vsel %vm1271_vm1, %v11811_v28, 0.0  ;;  %7879 = vmatprep.subr.mxu0 %v12513_v47 }
0x1152   : > { %6102 = vadd.xlane.f32.xlu1 %v6101_v27  ;;  %v7850_v35 = vpop.f32.mrf.mxu1 }
0x1153   : > { %v11817_v21 = vadd.f32 %v8533_v53, %v6042_v40 }
0x1154   : > { %v6046_v1 = vpop.f32.mrf.mxu1 }
0x1155   : > { %v6047_v46 = vadd.f32 %v11801_v6, %v6046_v1  ;;  %v6104_v57 = vsel %vm1271_vm1, %v11817_v21, 0.0 }
0x1156   : > { %6105 = vadd.xlane.f32.xlu0 %v6104_v57  ;;  %v7853_v18 = vpop.f32.mrf.mxu1 }
0x1157   : > { %v11823_v48 = vadd.f32 %v8534_v9, %v6047_v46 }
0x1158   : > { %v6051_v22 = vpop.f32.mrf.mxu1 }
0x1159   : > { %v6107_v33 = vsel %vm1271_vm1, %v11823_v48, 0.0  ;;  %v6052_v23 = vadd.f32 %v11801_v6, %v6051_v22 }
0x115a   : > { %6108 = vadd.xlane.f32.xlu1 %v6107_v33  ;;  %v7856_v45 = vpop.f32.mrf.mxu1 }
0x115b   : > { %v11829_v2 = vadd.f32 %v8535_v39, %v6052_v23 }
0x115c   : > { %v6056_v44 = vpop.f32.mrf.mxu1 }
0x115d   : > { %v6057_v7 = vadd.f32 %v11801_v6, %v6056_v44  ;;  %v6110_v36 = vsel %vm1271_vm1, %v11829_v2, 0.0 }
0x115e   : > { %6111 = vadd.xlane.f32.xlu0 %v6110_v36  ;;  %v7859_v15 = vpop.f32.mrf.mxu1 }
0x115f   : > { %v11835_v38 = vadd.f32 %v8536_v61, %v6057_v7 }
0x1160   : > { %v6061_v19 = vpop.f32.mrf.mxu1 }
0x1161   : > { %v6062_v3 = vadd.f32 %v11801_v6, %v6061_v19  ;;  %v6113_v11 = vsel %vm1271_vm1, %v11835_v38, 0.0 }
0x1162   : > { %6114 = vadd.xlane.f32.xlu1 %v6113_v11  ;;  %v7862_v0 = vpop.f32.mrf.mxu1 }
0x1163   : > { %v11841_v60 = vadd.f32 %v8537_v50, %v6062_v3 }
0x1165   : > { %v6116_v13 = vsel %vm1271_vm1, %v11841_v60, 0.0 }
0x1166   : > { %6117 = vadd.xlane.f32.xlu0 %v6116_v13 }
0x1168   : > { %v6066_v20 = vpop.f32.mrf.mxu1 }
0x1169   : > { %v6067_v41 = vadd.f32 %v11801_v6, %v6066_v20 }
0x116a   : > { %v7865_v37 = vpop.f32.mrf.mxu1 }
0x116b   : > { %v11847_v29 = vadd.f32 %v8538_v62, %v6067_v41 }
0x116c   : > { %v6071_v54 = vpop.f32.mrf.mxu1 }
0x116d   : > { %v6072_v16 = vadd.f32 %v11801_v6, %v6071_v54  ;;  %v6119_v17 = vsel %vm1271_vm1, %v11847_v29, 0.0 }
0x116e   : > { %6120 = vadd.xlane.f32.xlu1 %v6119_v17  ;;  %v7868_v63 = vpop.f32.mrf.mxu1 }
0x116f   : > { %v11853_v31 = vadd.f32 %v8539_v25, %v6072_v16 }
0x1171   : > { %v6122_v10 = vsel %vm1271_vm1, %v11853_v31, 0.0 }
0x1172   : > { %6123 = vadd.xlane.f32.xlu0 %v6122_v10 }
0x1177   : > { %v6076_v56 = vpop.f32.mrf.mxu1 }
0x1178   : > { %v6077_v51 = vadd.f32 %v11801_v6, %v6076_v56 }
0x1179   : > { %v7871_v58 = vpop.f32.mrf.mxu1 }
0x117a   : > { %v11859_v52 = vadd.f32 %v8540_v49, %v6077_v51  ;;  %v6276_v49 = vld [vmem:[#allocation8 + $0x8] sm:$0xff] }
0x117b   : > { %7880 = vmatpush3.msra.mxu0 %v6276_v49 }
0x117c   : > { %12647 = vst [vmem:[#allocation48_spill] sm:$0xff] %v11859_v52  ;;  %v6125_v26 = vsel %vm1271_vm1, %v11859_v52, 0.0  ;;  %7881 = vmatprep.subr.mxu0 %v12513_v47 }
0x117d   : > { %6126 = vadd.xlane.f32.xlu1 %v6125_v26 }
0x118a   : > { %v6081_v34 = vpop.f32.mrf.mxu1 }
0x118b   : > { %v6082_v8 = vadd.f32 %v11801_v6, %v6081_v34 }
0x118c   : > { %v7874_v43 = vpop.f32.mrf.mxu1 }
0x118d   : > { %v11865_v12 = vadd.f32 %v8541_v42, %v6082_v8  ;;  %v6275_v43 = vld [vmem:[#allocation8] sm:$0xff] }
0x118e   : > { %7882 = vmatpush3.msra.mxu0 %v6275_v43 }
0x118f   : > { %12648 = vst [vmem:[#allocation40_spill] sm:$0xff] %v11865_v12  ;;  %v6128_v30 = vsel %vm1302_vm0, %v11865_v12, 0.0 }
0x1190   : > { %6129 = vadd.xlane.f32.xlu0 %v6128_v30 }
0x11d6   : > { %v6100_v14 = vpop.xlane.xlu0 %6099 }
0x11d7   : > { %v6131_v4 = vmul.f32 0.03125, %v6100_v14 }
0x11d9   : > { %v11872_v6 = vsub.f32 %v11805_v59, %v6131_v4 }
0x11db   : > { %v6103_v32 = vpop.xlane.xlu1 %6102  ;;  %v6153_v5 = vmul.f32 %v11872_v6, %v11872_v6 }
0x11dc   : > { %v6132_v40 = vmul.f32 0.03125, %v6103_v32 }
0x11dd   : > { %v6164_v27 = vsel %vm1271_vm1, %v6153_v5, 0.0 }
0x11de   : > { %v11878_v35 = vsub.f32 %v11811_v28, %v6132_v40  ;;  %6165 = vadd.xlane.f32.xlu1 %v6164_v27 }
0x11df   : > { %v6106_v53 = vpop.xlane.xlu0 %6105 }
0x11e0   : > { %v6133_v1 = vmul.f32 0.03125, %v6106_v53  ;;  %v6154_v46 = vmul.f32 %v11878_v35, %v11878_v35 }
0x11e2   : > { %v11883_v57 = vsub.f32 %v11817_v21, %v6133_v1  ;;  %v6167_v18 = vsel %vm1271_vm1, %v6154_v46, 0.0 }
0x11e3   : > { %v6109_v9 = vpop.xlane.xlu1 %6108  ;;  %6168 = vadd.xlane.f32.xlu0 %v6167_v18 }
0x11e4   : > { %v6134_v22 = vmul.f32 0.03125, %v6109_v9  ;;  %v6155_v33 = vmul.f32 %v11883_v57, %v11883_v57 }
0x11e6   : > { %v11889_v23 = vsub.f32 %v11823_v48, %v6134_v22  ;;  %v6170_v45 = vsel %vm1271_vm1, %v6155_v33, 0.0 }
0x11e7   : > { %6171 = vadd.xlane.f32.xlu1 %v6170_v45  ;;  %v6112_v39 = vpop.xlane.xlu0 %6111 }
0x11e8   : > { %v6156_v44 = vmul.f32 %v11889_v23, %v11889_v23  ;;  %v6135_v7 = vmul.f32 0.03125, %v6112_v39 }
0x11ea   : > { %v6173_v36 = vsel %vm1271_vm1, %v6156_v44, 0.0  ;;  %v11896_v15 = vsub.f32 %v11829_v2, %v6135_v7 }
0x11eb   : > { %6174 = vadd.xlane.f32.xlu0 %v6173_v36  ;;  %v6115_v61 = vpop.xlane.xlu1 %6114 }
0x11ec   : > { %v6136_v19 = vmul.f32 0.03125, %v6115_v61  ;;  %v6157_v3 = vmul.f32 %v11896_v15, %v11896_v15  ;;  %v11941_v61 = vld [vmem:[%s12369_s10] ss:$0 sm:$0xff] }
0x11ee   : > { %v11901_v11 = vsub.f32 %v11835_v38, %v6136_v19  ;;  %v6176_v0 = vsel %vm1271_vm1, %v6157_v3, 0.0 }
0x11ef   : > { %v6118_v50 = vpop.xlane.xlu0 %6117  ;;  %6177 = vadd.xlane.f32.xlu1 %v6176_v0 }
0x11f0   : > { %v6137_v13 = vmul.f32 0.03125, %v6118_v50  ;;  %v6158_v20 = vmul.f32 %v11901_v11, %v11901_v11  ;;  %v11947_v50 = vld [vmem:[%s12370_s11] ss:$0 sm:$0xff] }
0x11f2   : > { %v11907_v41 = vsub.f32 %v11841_v60, %v6137_v13  ;;  %v6179_v37 = vsel %vm1271_vm1, %v6158_v20, 0.0 }
0x11f3   : > { %6180 = vadd.xlane.f32.xlu0 %v6179_v37 }
0x11f4   : > { %v6159_v62 = vmul.f32 %v11907_v41, %v11907_v41 }
0x11f6   : > { %v6182_v16 = vsel %vm1271_vm1, %v6159_v62, 0.0 }
0x11f7   : > { %v6121_v54 = vpop.xlane.xlu1 %6120  ;;  %6183 = vadd.xlane.f32.xlu1 %v6182_v16 }
0x11f8   : > { %v6138_v17 = vmul.f32 0.03125, %v6121_v54 }
0x11fa   : > { %v11914_v63 = vsub.f32 %v11847_v29, %v6138_v17 }
0x11fb   : > { %v6124_v25 = vpop.xlane.xlu0 %6123 }
0x11fc   : > { %v6139_v10 = vmul.f32 0.03125, %v6124_v25  ;;  %v6160_v56 = vmul.f32 %v11914_v63, %v11914_v63 }
0x11fe   : > { %v11919_v51 = vsub.f32 %v11853_v31, %v6139_v10  ;;  %v6185_v58 = vsel %vm1271_vm1, %v6160_v56, 0.0 }
0x11ff   : > { %6186 = vadd.xlane.f32.xlu0 %v6185_v58 }
0x1200   : > { %v6161_v26 = vmul.f32 %v11919_v51, %v11919_v51 }
0x1202   : > { %v6188_v34 = vsel %vm1271_vm1, %v6161_v26, 0.0 }
0x1203   : > { %6189 = vadd.xlane.f32.xlu1 %v6188_v34 }
0x1206   : > { %v6127_v8 = vpop.xlane.xlu1 %6126 }
0x1207   : > { %v6140_v42 = vmul.f32 0.03125, %v6127_v8 }
0x1209   : > { %v11927_v30 = vsub.f32 %v11859_v52, %v6140_v42 }
0x120b   : > { %v6162_v55 = vmul.f32 %v11927_v30, %v11927_v30 }
0x120d   : > { %v6191_v24 = vsel %vm1271_vm1, %v6162_v55, 0.0 }
0x120e   : > { %6192 = vadd.xlane.f32.xlu0 %v6191_v24 }
0x1219   : > { %v6130_v14 = vpop.xlane.xlu0 %6129 }
0x121a   : > { %v6141_v4 = vmul.f32 0.03125, %v6130_v14 }
0x121c   : > { %v11933_v32 = vsub.f32 %v11865_v12, %v6141_v4 }
0x121e   : > { %v6163_v5 = vmul.f32 %v11933_v32, %v11933_v32 }
0x1220   : > { %v6194_v40 = vsel %vm1302_vm0, %v6163_v5, 0.0 }
0x1221   : > { %6195 = vadd.xlane.f32.xlu1 %v6194_v40 }
0x1267   : > { %v6166_v27 = vpop.xlane.xlu1 %6165 }
0x1268   : > { %v6197_v53 = vmul.f32 0.03125, %v6166_v27 }
0x126a   : > { %v6208_v1 = vadd.f32 1e-05, %v6197_v53 }
0x126c   : > { %8429 = vrsqrt.f32 %v6208_v1  ;;  %v6169_v46 = vpop.xlane.xlu0 %6168 }
0x126d   : > { %v6198_v18 = vmul.f32 0.03125, %v6169_v46 }
0x126f   : > { %v6209_v9 = vadd.f32 1e-05, %v6198_v18 }
0x1270   : > { %v6172_v22 = vpop.xlane.xlu1 %6171 }
0x1271   : > { %8431 = vrsqrt.f32 %v6209_v9  ;;  %v6199_v33 = vmul.f32 0.03125, %v6172_v22 }
0x1273   : > { %v6210_v45 = vadd.f32 1e-05, %v6199_v33 }
0x1274   : > { %v6175_v39 = vpop.xlane.xlu0 %6174 }
0x1275   : > { %8433 = vrsqrt.f32 %v6210_v45  ;;  %v6200_v44 = vmul.f32 0.03125, %v6175_v39 }
0x1277   : > { %v6211_v7 = vadd.f32 1e-05, %v6200_v44 }
0x1278   : > { %v6178_v19 = vpop.xlane.xlu1 %6177 }
0x1279   : > { %v8430_v36 = vpop.eup %8429  ;;  %8435 = vrsqrt.f32 %v6211_v7  ;;  %v6201_v0 = vmul.f32 0.03125, %v6178_v19 }
0x127a   : > { %v6230_v3 = vmul.f32 %v8430_v36, %v11872_v6 }
0x127b   : > { %v6212_v20 = vadd.f32 1e-05, %v6201_v0 }
0x127c   : > { %v6247_v13 = vmul.f32 %v11941_v61, %v6230_v3  ;;  %v6181_v37 = vpop.xlane.xlu0 %6180 }
0x127d   : > { %8437 = vrsqrt.f32 %v6212_v20  ;;  %v6202_v16 = vmul.f32 0.03125, %v6181_v37 }
0x127e   : > { %v8432_v62 = vpop.eup %8431  ;;  %v11951_v54 = vadd.f32 %v11947_v50, %v6247_v13 }
0x127f   : > { %v6231_v17 = vmul.f32 %v8432_v62, %v11878_v35  ;;  %v6213_v25 = vadd.f32 1e-05, %v6202_v16 }
0x1280   : > { %7884 = vmatmul.mubr.msk.f32.vlgmr.msra.gmra.mxu0 %vm1271_vm1, %v11951_v54  ;;  %v6184_v6 = vpop.xlane.xlu1 %6183 }
0x1281   : > { %7886 = vmatprep.mubr.msk.f32.mxu0 %vm8857_vm5, %v12513_v47  ;;  %v6248_v10 = vmul.f32 %v11941_v61, %v6231_v17  ;;  %8439 = vrsqrt.f32 %v6213_v25  ;;  %v6203_v58 = vmul.f32 0.03125, %v6184_v6 }
0x1282   : > { %v8434_v56 = vpop.eup %8433 }
0x1283   : > { %v6232_v49 = vmul.f32 %v8434_v56, %v11883_v57  ;;  %v11961_v26 = vadd.f32 %v11947_v50, %v6248_v10  ;;  %v6214_v34 = vadd.f32 1e-05, %v6203_v58 }
0x1285   : > { %7887 = vmatmul.mubr.msk.f32.gmra.mxu0 %vm1271_vm1, %v11961_v26  ;;  %v6249_v35 = vmul.f32 %v11941_v61, %v6232_v49  ;;  %8441 = vrsqrt.f32 %v6214_v34  ;;  %v6732_v34 = vld [vmem:[#allocation10 + $0x38] sm:$0xff] }
0x1286   : > { %v8436_v8 = vpop.eup %8435  ;;  %7889 = vmatprep.mubr.msk.f32.mxu0 %vm8857_vm5, %v12513_v47  ;;  %7917 = vmatpush3.msra.mxu1 %v6732_v34 }
0x1287   : > { %v6233_v43 = vmul.f32 %v8436_v8, %v11889_v23  ;;  %v11970_v42 = vadd.f32 %v11947_v50, %v6249_v35  ;;  %7918 = vmatprep.subr.mxu1 %v12513_v47  ;;  %v6731_v35 = vld [vmem:[#allocation10 + $0x30] sm:$0xff]  ;;  %v6730_v8 = vld [vmem:[#allocation10 + $0x28] sm:$0xff] }
0x1288   : > { %v6187_v57 = vpop.xlane.xlu0 %6186  ;;  %7919 = vmatpush3.msra.mxu1 %v6731_v35 }
0x1289   : > { %v6204_v55 = vmul.f32 0.03125, %v6187_v57  ;;  %7890 = vmatmul.mubr.msk.f32.gmra.mxu0 %vm1271_vm1, %v11970_v42  ;;  %v6250_v24 = vmul.f32 %v11941_v61, %v6233_v43  ;;  %7920 = vmatprep.subr.mxu1 %v12513_v47  ;;  %v6726_v43 = vld [vmem:[#allocation10 + $0x8] sm:$0xff]  ;;  %v6725_v57 = vld [vmem:[#allocation10] sm:$0xff] }
0x128a   : > { %7892 = vmatprep.mubr.msk.f32.mxu0 %vm8857_vm5, %v12513_v47  ;;  %v8438_v14 = vpop.eup %8437  ;;  %7921 = vmatpush3.msra.mxu1 %v6730_v8 }
0x128b   : > { %v6215_v4 = vadd.f32 1e-05, %v6204_v55  ;;  %v11978_v5 = vadd.f32 %v11947_v50, %v6250_v24  ;;  %v6234_v23 = vmul.f32 %v8438_v14, %v11896_v15  ;;  %7922 = vmatprep.subr.mxu1 %v12513_v47  ;;  %v12055_v55 = vld [vmem:[%s12372_s13] ss:$0 sm:$0xff] }
0x128c   : > { %v6190_v40 = vpop.xlane.xlu1 %6189 }
0x128d   : > { %8443 = vrsqrt.f32 %v6215_v4  ;;  %v6205_v27 = vmul.f32 0.03125, %v6190_v40  ;;  %7893 = vmatmul.mubr.msk.f32.gmra.mxu0 %vm1271_vm1, %v11978_v5  ;;  %v6251_v53 = vmul.f32 %v11941_v61, %v6234_v23 }
0x128e   : > { %7895 = vmatprep.mubr.msk.f32.mxu0 %vm8857_vm5, %v12513_v47  ;;  %v8440_v1 = vpop.eup %8439 }
0x128f   : > { %v6216_v46 = vadd.f32 1e-05, %v6205_v27  ;;  %v6235_v18 = vmul.f32 %v8440_v1, %v11901_v11  ;;  %v11988_v9 = vadd.f32 %v11947_v50, %v6251_v53 }
0x1291   : > { %8445 = vrsqrt.f32 %v6216_v46  ;;  %7896 = vmatmul.mubr.msk.f32.gmra.mxu0 %vm1271_vm1, %v11988_v9  ;;  %v6252_v15 = vmul.f32 %v11941_v61, %v6235_v18 }
0x1292   : > { %v8442_v22 = vpop.eup %8441  ;;  %7898 = vmatprep.mubr.msk.f32.mxu0 %vm8857_vm5, %v12513_v47 }
0x1293   : > { %v6236_v33 = vmul.f32 %v8442_v22, %v11907_v41  ;;  %v11997_v45 = vadd.f32 %v11947_v50, %v6252_v15 }
0x1295   : > { %7899 = vmatmul.mubr.msk.f32.gmra.mxu0 %vm1271_vm1, %v11997_v45  ;;  %v6253_v11 = vmul.f32 %v11941_v61, %v6236_v33 }
0x1296   : > { %7901 = vmatprep.mubr.msk.f32.mxu0 %vm8857_vm5, %v12513_v47 }
0x1297   : > { %v6193_v39 = vpop.xlane.xlu0 %6192  ;;  %v12005_v44 = vadd.f32 %v11947_v50, %v6253_v11 }
0x1298   : > { %v6206_v7 = vmul.f32 0.03125, %v6193_v39 }
0x1299   : > { %7902 = vmatmul.mubr.msk.f32.gmra.mxu0 %vm1271_vm1, %v12005_v44 }
0x129a   : > { %v8444_v36 = vpop.eup %8443  ;;  %v6217_v19 = vadd.f32 1e-05, %v6206_v7  ;;  %7904 = vmatprep.mubr.msk.f32.mxu0 %vm8857_vm5, %v12513_v47 }
0x129b   : > { %v6237_v41 = vmul.f32 %v8444_v36, %v11914_v63 }
0x129c   : > { %8447 = vrsqrt.f32 %v6217_v19 }
0x129d   : > { %v6254_v3 = vmul.f32 %v11941_v61, %v6237_v41 }
0x129e   : > { %v8446_v0 = vpop.eup %8445 }
0x129f   : > { %v6238_v13 = vmul.f32 %v8446_v0, %v11919_v51  ;;  %v12015_v20 = vadd.f32 %v11947_v50, %v6254_v3 }
0x12a1   : > { %7905 = vmatmul.mubr.msk.f32.gmra.mxu0 %vm1271_vm1, %v12015_v20  ;;  %v6255_v37 = vmul.f32 %v11941_v61, %v6238_v13 }
0x12a2   : > { %7907 = vmatprep.mubr.msk.f32.mxu0 %vm8857_vm5, %v12513_v47 }
0x12a3   : > { %v12023_v63 = vadd.f32 %v11947_v50, %v6255_v37 }
0x12a5   : > { %7908 = vmatmul.mubr.msk.f32.gmra.mxu0 %vm1271_vm1, %v12023_v63 }
0x12a6   : > { %7910 = vmatprep.mubr.msk.f32.mxu0 %vm8857_vm5, %v12513_v47 }
0x12a9   : > { %v8448_v51 = vpop.eup %8447 }
0x12aa   : > { %v6196_v62 = vpop.xlane.xlu1 %6195  ;;  %v6239_v16 = vmul.f32 %v8448_v51, %v11927_v30 }
0x12ab   : > { %v6207_v17 = vmul.f32 0.03125, %v6196_v62 }
0x12ac   : > { %v6256_v6 = vmul.f32 %v11941_v61, %v6239_v16 }
0x12ad   : > { %v6218_v25 = vadd.f32 1e-05, %v6207_v17 }
0x12ae   : > { %v12032_v10 = vadd.f32 %v11947_v50, %v6256_v6 }
0x12af   : > { %8449 = vrsqrt.f32 %v6218_v25 }
0x12b0   : > { %12649 = vst [vmem:[#allocation46_spill] sm:$0xff] %v12032_v10  ;;  %7911 = vmatmul.mubr.msk.f32.gmra.mxu0 %vm1271_vm1, %v12032_v10 }
0x12b1   : > { %7913 = vmatprep.mubr.msk.f32.mxu0 %vm8857_vm5, %v12513_v47 }
0x12bc   : > { %v8450_v56 = vpop.eup %8449 }
0x12bd   : > { %v6240_v58 = vmul.f32 %v8450_v56, %v11933_v32  ;;  %v6729_v32 = vld [vmem:[#allocation10 + $0x20] sm:$0xff] }
0x12be   : > { %7923 = vmatpush3.msra.mxu1 %v6729_v32 }
0x12bf   : > { %v6257_v49 = vmul.f32 %v11941_v61, %v6240_v58  ;;  %7924 = vmatprep.subr.mxu1 %v12513_v47  ;;  %v6728_v61 = vld [vmem:[#allocation10 + $0x18] sm:$0xff] }
0x12c0   : > { %7925 = vmatpush3.msra.mxu1 %v6728_v61 }
0x12c1   : > { %v12041_v30 = vadd.f32 %v11947_v50, %v6257_v49  ;;  %7926 = vmatprep.subr.mxu1 %v12513_v47  ;;  %v6727_v50 = vld [vmem:[#allocation10 + $0x10] sm:$0xff] }
0x12c2   : > { %7927 = vmatpush3.msra.mxu1 %v6727_v50 }
0x12c3   : > { %12650 = vst [vmem:[#allocation39_spill] sm:$0xff] %v12041_v30  ;;  %7914 = vmatmul.mubr.msk.f32.gmra.mxu0 %vm1271_vm1, %v12041_v30  ;;  %7928 = vmatprep.subr.mxu1 %v12513_v47 }
0x12c4   : > { %7929 = vmatpush3.msra.mxu1 %v6726_v43 }
0x12c5   : > { %7930 = vmatprep.subr.mxu1 %v12513_v47 }
0x12c6   : > { %7931 = vmatpush3.msra.mxu1 %v6725_v57 }
0x1340   : > { %v6385_v24 = vpop.f32.mrf.mxu0 }
0x1341   : > { %v12058_v14 = vadd.f32 %v12055_v55, %v6385_v24 }
0x1342   : > { %v7885_v4 = vpop.f32.mrf.mxu0 }
0x1343   : > { %v12442_v23 = vand.u32 2147483647, %v12058_v14 }
0x1345   : > { %v6450_v40 = vmul.f32 0.70710677, %v12442_v23  ;;  %v6390_v27 = vpop.f32.mrf.mxu0 }
0x1346   : > { %v12064_v53 = vadd.f32 %v12055_v55, %v6390_v27 }
0x1347   : > { %v6461_v1 = vmul.f32 0.3275911, %v6450_v40  ;;  %v7888_v46 = vpop.f32.mrf.mxu0  ;;  %v6626_v62 = vsub.f32 0.0, %v6450_v40 }
0x1348   : > { %v12440_v18 = vand.u32 2147483647, %v12064_v53 }
0x1349   : > { %v6472_v15 = vadd.f32 1.0, %v6461_v1  ;;  %v6395_v22 = vpop.f32.mrf.mxu0  ;;  %v6637_v8 = vmul.f32 %v6626_v62, %v6450_v40 }
0x134a   : > { %v6451_v33 = vmul.f32 0.70710677, %v12440_v18  ;;  %v12070_v11 = vadd.f32 %v12055_v55, %v6395_v22 }
0x134b   : > { %8451 = vrcp.f32 %v6472_v15  ;;  %v7891_v39 = vpop.f32.mrf.mxu0 }
0x134c   : > { %v6462_v7 = vmul.f32 0.3275911, %v6451_v33  ;;  %v12438_v36 = vand.u32 2147483647, %v12070_v11  ;;  %v6627_v16 = vsub.f32 0.0, %v6451_v33 }
0x134d   : > { %v6400_v41 = vpop.f32.mrf.mxu0  ;;  %v6648_v39 = vmul.f32 1.442695, %v6637_v8 }
0x134e   : > { %v6473_v19 = vadd.f32 1.0, %v6462_v7  ;;  %v6452_v3 = vmul.f32 0.70710677, %v12438_v36  ;;  %v12076_v0 = vadd.f32 %v12055_v55, %v6400_v41  ;;  %v6638_v32 = vmul.f32 %v6627_v16, %v6451_v33 }
0x134f   : > { %v7894_v13 = vpop.f32.mrf.mxu0 }
0x1350   : > { %8453 = vrcp.f32 %v6473_v19  ;;  %v6463_v37 = vmul.f32 0.3275911, %v6452_v3  ;;  %v12437_v51 = vand.u32 2147483647, %v12076_v0  ;;  %v6628_v49 = vsub.f32 0.0, %v6452_v3 }
0x1351   : > { %v6405_v25 = vpop.f32.mrf.mxu0  ;;  %v6650_v40 = vmul.f32 1.442695, %v6638_v32 }
0x1352   : > { %v6474_v17 = vadd.f32 1.0, %v6463_v37  ;;  %v6453_v6 = vmul.f32 0.70710677, %v12437_v51  ;;  %v12082_v56 = vadd.f32 %v12055_v55, %v6405_v25  ;;  %v6639_v46 = vmul.f32 %v6628_v49, %v6452_v3 }
0x1353   : > { %v7897_v58 = vpop.f32.mrf.mxu0 }
0x1354   : > { %8455 = vrcp.f32 %v6474_v17  ;;  %v6464_v34 = vmul.f32 0.3275911, %v6453_v6  ;;  %v12436_v35 = vand.u32 2147483647, %v12082_v56  ;;  %v6629_v4 = vsub.f32 0.0, %v6453_v6 }
0x1355   : > { %v6410_v61 = vpop.f32.mrf.mxu0  ;;  %v6652_v49 = vmul.f32 1.442695, %v6639_v46 }
0x1356   : > { %v12085_v50 = vadd.f32 1.0, %v6464_v34  ;;  %v6454_v43 = vmul.f32 0.70710677, %v12436_v35  ;;  %v12090_v57 = vadd.f32 %v12055_v55, %v6410_v61  ;;  %v6640_v16 = vmul.f32 %v6629_v4, %v6453_v6 }
0x1357   : > { %v7900_v27 = vpop.f32.mrf.mxu0 }
0x1358   : > { %v8452_v24 = vpop.eup %8451  ;;  %8457 = vrcp.f32 %v12085_v50  ;;  %v6465_v22 = vmul.f32 0.3275911, %v6454_v43  ;;  %v12435_v33 = vand.u32 2147483647, %v12090_v57  ;;  %v6630_v37 = vsub.f32 0.0, %v6454_v43 }
0x1359   : > { %v6494_v1 = vmul.f32 %v8452_v24, %v6472_v15  ;;  %v6415_v7 = vpop.f32.mrf.mxu0 }
0x135a   : > { %v12094_v13 = vadd.f32 1.0, %v6465_v22  ;;  %v12097_v62 = vadd.f32 %v12055_v55, %v6415_v7  ;;  %v6455_v15 = vmul.f32 0.70710677, %v12435_v33  ;;  %v6641_v27 = vmul.f32 %v6630_v37, %v6454_v43 }
0x135b   : > { %v6505_v41 = vsub.f32 2.0, %v6494_v1  ;;  %v7903_v3 = vpop.f32.mrf.mxu0  ;;  %v6654_v1 = vmul.f32 1.442695, %v6640_v16 }
0x135c   : > { %8459 = vrcp.f32 %v12094_v13  ;;  %v12434_v34 = vand.u32 2147483647, %v12097_v62  ;;  %v6466_v32 = vmul.f32 0.3275911, %v6455_v15 }
0x135d   : > { %v8454_v25 = vpop.eup %8453  ;;  %v12101_v58 = vmul.f32 %v8452_v24, %v6505_v41  ;;  %8461 = vpow2.f32 %v6648_v39  ;;  %v6631_v24 = vsub.f32 0.0, %v6455_v15 }
0x135e   : > { %v6495_v8 = vmul.f32 %v8454_v25, %v6473_v19  ;;  %8463 = vpow2.f32 %v6650_v40  ;;  %v6456_v6 = vmul.f32 0.70710677, %v12434_v34  ;;  %v12108_v22 = vadd.f32 1.0, %v6466_v32 }
0x135f   : > { %v6527_v61 = vmul.f32 1.0614054, %v12101_v58  ;;  %8465 = vpow2.f32 %v6652_v49  ;;  %v6656_v40 = vmul.f32 1.442695, %v6641_v27  ;;  %v6642_v49 = vmul.f32 %v6631_v24, %v6455_v15 }
0x1360   : > { %v6506_v4 = vsub.f32 2.0, %v6495_v8  ;;  %v6467_v41 = vmul.f32 0.3275911, %v6456_v6  ;;  %8467 = vrcp.f32 %v12108_v22 }
0x1361   : > { %v8456_v46 = vpop.eup %8455  ;;  %v6538_v7 = vadd.f32 -1.4531521, %v6527_v61  ;;  %v6420_v3 = vpop.f32.mrf.mxu0  ;;  %8469 = vpow2.f32 %v6654_v1 }
0x1362   : > { %v12110_v39 = vmul.f32 %v8454_v25, %v6506_v4  ;;  %v6496_v19 = vmul.f32 %v8456_v46, %v6474_v17  ;;  %v12114_v37 = vadd.f32 1.0, %v6467_v41  ;;  %v12117_v16 = vadd.f32 %v12055_v55, %v6420_v3 }
0x1363   : > { %v6549_v43 = vmul.f32 %v6538_v7, %v12101_v58  ;;  %v7906_v8 = vpop.f32.mrf.mxu0  ;;  %v6632_v41 = vsub.f32 0.0, %v6456_v6 }
0x1364   : > { %v6528_v32 = vmul.f32 1.0614054, %v12110_v39  ;;  %v6507_v61 = vsub.f32 2.0, %v6496_v19  ;;  %8471 = vrcp.f32 %v12114_v37  ;;  %v12439_v17 = vand.u32 2147483647, %v12117_v16 }
0x1365   : > { %v6560_v34 = vadd.f32 1.4214138, %v6549_v43  ;;  %v6425_v25 = vpop.f32.mrf.mxu0  ;;  %v8458_v4 = vpop.eup %8457  ;;  %8473 = vpow2.f32 %v6656_v40 }
0x1366   : > { %v6539_v7 = vadd.f32 -1.4531521, %v6528_v32  ;;  %v12122_v27 = vmul.f32 %v8456_v46, %v6507_v61  ;;  %v12125_v3 = vadd.f32 %v12055_v55, %v6425_v25  ;;  %v6497_v19 = vmul.f32 %v8458_v4, %v12085_v50 }
0x1367   : > { %v6571_v8 = vmul.f32 %v6560_v34, %v12101_v58  ;;  %v6457_v15 = vmul.f32 0.70710677, %v12439_v17  ;;  %v7909_v1 = vpop.f32.mrf.mxu0  ;;  %v6658_v32 = vmul.f32 1.442695, %v6642_v49  ;;  %v6643_v50 = vmul.f32 %v6632_v41, %v6456_v6 }
0x1368   : > { %v6550_v24 = vmul.f32 %v6539_v7, %v12110_v39  ;;  %v6529_v43 = vmul.f32 1.0614054, %v12122_v27  ;;  %v12441_v46 = vand.u32 2147483647, %v12125_v3  ;;  %v6508_v33 = vsub.f32 2.0, %v6497_v19 }
0x1369   : > { %v6582_v61 = vadd.f32 -0.28449672, %v6571_v8  ;;  %v6468_v25 = vmul.f32 0.3275911, %v6457_v15  ;;  %v6633_v35 = vsub.f32 0.0, %v6457_v15  ;;  %v8460_v51 = vpop.eup %8459 }
0x136a   : > { %v6561_v34 = vadd.f32 1.4214138, %v6550_v24  ;;  %v6540_v36 = vadd.f32 -1.4531521, %v6529_v43  ;;  %v12136_v40 = vmul.f32 0.70710677, %v12441_v46  ;;  %v8462_v1 = vpop.eup %8461  ;;  %v12139_v17 = vmul.f32 %v8458_v4, %v6508_v33 }
0x136b   : > { %v6593_v7 = vmul.f32 %v6582_v61, %v12101_v58  ;;  %v6498_v49 = vmul.f32 %v8460_v51, %v12094_v13  ;;  %v12142_v18 = vadd.f32 1.0, %v6468_v25  ;;  %v8464_v8 = vpop.eup %8463  ;;  %v6644_v43 = vmul.f32 %v6633_v35, %v6457_v15 }
0x136c   : > { %v6572_v19 = vmul.f32 %v6561_v34, %v12110_v39  ;;  %v6551_v24 = vmul.f32 %v6540_v36, %v12122_v27  ;;  %v6469_v6 = vmul.f32 0.3275911, %v12136_v40  ;;  %v6530_v46 = vmul.f32 1.0614054, %v12139_v17  ;;  %v8466_v33 = vpop.eup %8465 }
0x136d   : > { %v6604_v41 = vadd.f32 0.2548296, %v6593_v7  ;;  %v6509_v23 = vsub.f32 2.0, %v6498_v49  ;;  %8475 = vrcp.f32 %v12142_v18  ;;  %v6660_v13 = vmul.f32 1.442695, %v6643_v50  ;;  %v8468_v25 = vpop.eup %8467 }
0x136e   : > { %v6583_v4 = vadd.f32 -0.28449672, %v6572_v19  ;;  %v6562_v61 = vadd.f32 1.4214138, %v6551_v24  ;;  %8477 = vpow2.f32 %v6658_v32  ;;  %v6541_v34 = vadd.f32 -1.4531521, %v6530_v46  ;;  %v12157_v19 = vpop.eup %8469 }
0x136f   : > { %v6615_v12 = vmul.f32 %v6604_v41, %v12101_v58  ;;  %v12150_v30 = vmul.f32 %v8460_v51, %v6509_v23  ;;  %v12152_v36 = vadd.f32 1.0, %v6469_v6  ;;  %v6499_v7 = vmul.f32 %v8468_v25, %v12108_v22 }
0x1370   : > { %v6594_v35 = vmul.f32 %v6583_v4, %v12110_v39  ;;  %v6573_v15 = vmul.f32 %v6562_v61, %v12122_v27  ;;  %v6662_v49 = vmul.f32 1.442695, %v6644_v43  ;;  %v6552_v50 = vmul.f32 %v6541_v34, %v12139_v17  ;;  %v6430_v23 = vpop.f32.mrf.mxu0 }
0x1371   : > { %v6670_v32 = vmul.f32 %v8462_v1, %v6615_v12  ;;  %v6531_v58 = vmul.f32 1.0614054, %v12150_v30  ;;  %8479 = vrcp.f32 %v12152_v36  ;;  %v8472_v51 = vpop.eup %8471  ;;  %v6510_v6 = vsub.f32 2.0, %v6499_v7 }
0x1372   : > { %v6605_v46 = vadd.f32 0.2548296, %v6594_v35  ;;  %v6584_v24 = vadd.f32 -0.28449672, %v6573_v15  ;;  %8481 = vpow2.f32 %v6660_v13  ;;  %v6563_v4 = vadd.f32 1.4214138, %v6552_v50  ;;  %v7912_v61 = vpop.f32.mrf.mxu0  ;;  %v12163_v52 = vpop.eup %8473 }
0x1373   : > { %v6681_v41 = vsub.f32 1.0, %v6670_v32  ;;  %v6542_v22 = vadd.f32 -1.4531521, %v6531_v58  ;;  %v6500_v43 = vmul.f32 %v8472_v51, %v12114_v37  ;;  %v12167_v34 = vmul.f32 %v8468_v25, %v6510_v6 }
0x1374   : > { %v6616_v12 = vmul.f32 %v6605_v46, %v12110_v39  ;;  %v6595_v1 = vmul.f32 %v6584_v24, %v12122_v27  ;;  %v6634_v10 = vsub.f32 0.0, %v12136_v40  ;;  %v12651_v35 = vand.u32 2147483647, %v12058_v14 }
0x1375   : > { %v6574_v13 = vmul.f32 %v6563_v4, %v12139_v17  ;;  %v6553_v7 = vmul.f32 %v6542_v22, %v12150_v30  ;;  %v6511_v32 = vsub.f32 2.0, %v6500_v43  ;;  %v6532_v58 = vmul.f32 1.0614054, %v12167_v34 }
0x1376   : > { %v6692_v15 = vmul.f32 %v6681_v41, %v12651_v35  ;;  %v6671_v37 = vmul.f32 %v8464_v8, %v6616_v12  ;;  %v6606_v50 = vadd.f32 0.2548296, %v6595_v1  ;;  %8483 = vpow2.f32 %v6662_v49 }
0x1377   : > { %v6585_v46 = vadd.f32 -0.28449672, %v6574_v13  ;;  %v6564_v25 = vadd.f32 1.4214138, %v6553_v7  ;;  %v12176_v24 = vmul.f32 %v8472_v51, %v6511_v32  ;;  %v6543_v41 = vadd.f32 -1.4531521, %v6532_v58 }
0x1378   : > { %v6703_v39 = vadd.f32 %v6692_v15, %v12058_v14  ;;  %v6682_v6 = vsub.f32 1.0, %v6671_v37  ;;  %v6617_v61 = vmul.f32 %v6606_v50, %v12122_v27  ;;  %v12180_v4 = vmul.f32 %v6634_v10, %v12136_v40 }
0x1379   : > { %v6596_v8 = vmul.f32 %v6585_v46, %v12139_v17  ;;  %v6575_v43 = vmul.f32 %v6564_v25, %v12150_v30  ;;  %v6533_v49 = vmul.f32 1.0614054, %v12176_v24  ;;  %v12652_v14 = vand.u32 2147483647, %v12064_v53 }
0x137a   : > { %v6714_v22 = vmul.f32 0.5, %v6703_v39  ;;  %v8476_v12 = vpop.eup %8475  ;;  %v6672_v51 = vmul.f32 %v8466_v33, %v6617_v61  ;;  %v6554_v35 = vmul.f32 %v6543_v41, %v12167_v34  ;;  %v12189_v27 = vadd.f32 %v12055_v55, %v6430_v23 }
0x137b   : > { %v6693_v1 = vmul.f32 %v6682_v6, %v12652_v14  ;;  %v12191_v15 = vpop.eup %8477  ;;  %v6607_v10 = vadd.f32 0.2548296, %v6596_v8  ;;  %v6586_v40 = vadd.f32 -0.28449672, %v6575_v43  ;;  %v6544_v13 = vadd.f32 -1.4531521, %v6533_v49 }
0x137c   : > { %v6501_v7 = vmul.f32 %v8476_v12, %v12142_v18  ;;  %7933 = vmatmul.mubr.msk.f32.vlgmr.msra.gmra.mxu1 %vm6740_vm7, %v6714_v22  ;;  %v6683_v37 = vsub.f32 1.0, %v6672_v51  ;;  %v6565_v50 = vadd.f32 1.4214138, %v6554_v35  ;;  %v6448_v33 = vand.u32 2147483647, %v12189_v27 }
0x137d   : > { %v6704_v32 = vadd.f32 %v6693_v1, %v12064_v53  ;;  %7935 = vmatprep.mubr.msk.f32.mxu1 %vm8857_vm5, %v12513_v47  ;;  %v6618_v23 = vmul.f32 %v6607_v10, %v12139_v17  ;;  %v6597_v58 = vmul.f32 %v6586_v40, %v12150_v30  ;;  %v6555_v39 = vmul.f32 %v6544_v13, %v12176_v24 }
0x137e   : > { %v6512_v46 = vsub.f32 2.0, %v6501_v7  ;;  %v8480_v25 = vpop.eup %8479  ;;  %v12653_v6 = vand.u32 2147483647, %v12070_v11  ;;  %v6576_v53 = vmul.f32 %v6565_v50, %v12167_v34  ;;  %v12207_v41 = vmul.f32 0.70710677, %v6448_v33 }
0x137f   : > { %v6715_v18 = vmul.f32 0.5, %v6704_v32  ;;  %v8482_v22 = vpop.eup %8481  ;;  %v6673_v8 = vmul.f32 %v12157_v19, %v6618_v23  ;;  %v6608_v17 = vadd.f32 0.2548296, %v6597_v58  ;;  %v6566_v43 = vadd.f32 1.4214138, %v6555_v39 }
0x1380   : > { %v6694_v61 = vmul.f32 %v6683_v37, %v12653_v6  ;;  %v12210_v49 = vmul.f32 %v8476_v12, %v6512_v46  ;;  %v6587_v1 = vadd.f32 -0.28449672, %v6576_v53  ;;  %v6502_v51 = vmul.f32 %v8480_v25, %v12152_v36 }
0x1381   : > { %v6470_v35 = vmul.f32 0.3275911, %v12207_v41  ;;  %7936 = vmatmul.mubr.msk.f32.gmra.mxu1 %vm6740_vm7, %v6715_v18  ;;  %v6684_v10 = vsub.f32 1.0, %v6673_v8  ;;  %v6619_v40 = vmul.f32 %v6608_v17, %v12150_v30  ;;  %v6577_v13 = vmul.f32 %v6566_v43, %v12176_v24 }
0x1382   : > { %v6705_v14 = vadd.f32 %v6694_v61, %v12070_v11  ;;  %v6534_v19 = vmul.f32 1.0614054, %v12210_v49  ;;  %7938 = vmatprep.mubr.msk.f32.mxu1 %vm8857_vm5, %v12513_v47  ;;  %v6598_v11 = vmul.f32 %v6587_v1, %v12167_v34  ;;  %v6513_v7 = vsub.f32 2.0, %v6502_v51 }
0x1383   : > { %v6481_v32 = vadd.f32 1.0, %v6470_v35  ;;  %v8484_v36 = vpop.eup %8483  ;;  %v12654_v37 = vand.u32 2147483647, %v12076_v0  ;;  %v6674_v23 = vmul.f32 %v12163_v52, %v6619_v40  ;;  %v6588_v58 = vadd.f32 -0.28449672, %v6577_v13  ;;  %v6435_v39 = vpop.f32.mrf.mxu0 }
0x1384   : > { %v6716_v12 = vmul.f32 0.5, %v6705_v14  ;;  %v6545_v30 = vadd.f32 -1.4531521, %v6534_v19  ;;  %v6609_v46 = vadd.f32 0.2548296, %v6598_v11  ;;  %v6524_v18 = vmul.f32 %v8480_v25, %v6513_v7 }
0x1385   : > { %v6695_v50 = vmul.f32 %v6684_v10, %v12654_v37  ;;  %8485 = vrcp.f32 %v6481_v32  ;;  %v6685_v61 = vsub.f32 1.0, %v6674_v23  ;;  %v6599_v53 = vmul.f32 %v6588_v58, %v12176_v24  ;;  %v7915_v17 = vpop.f32.mrf.mxu0 }
0x1386   : > { %7939 = vmatmul.mubr.msk.f32.gmra.mxu1 %vm6740_vm7, %v6716_v12  ;;  %v6556_v8 = vmul.f32 %v6545_v30, %v12210_v49  ;;  %v6620_v52 = vmul.f32 %v6609_v46, %v12167_v34  ;;  %v6535_v43 = vmul.f32 1.0614054, %v6524_v18  ;;  %v6664_v14 = vmul.f32 1.442695, %v12180_v4 }
0x1387   : > { %v6706_v6 = vadd.f32 %v6695_v50, %v12076_v0  ;;  %7941 = vmatprep.mubr.msk.f32.mxu1 %vm8857_vm5, %v12513_v47  ;;  %v12234_v25 = vadd.f32 %v12055_v55, %v6435_v39  ;;  %v12655_v0 = vand.u32 2147483647, %v12082_v56  ;;  %v6610_v35 = vadd.f32 0.2548296, %v6599_v53 }
0x1388   : > { %v6567_v10 = vadd.f32 1.4214138, %v6556_v8  ;;  %v6675_v40 = vmul.f32 %v12191_v15, %v6620_v52  ;;  %v6546_v13 = vadd.f32 -1.4531521, %v6535_v43  ;;  %8487 = vpow2.f32 %v6664_v14 }
0x1389   : > { %v6717_v1 = vmul.f32 0.5, %v6706_v6  ;;  %v6696_v51 = vmul.f32 %v6685_v61, %v12655_v0  ;;  %v6449_v19 = vand.u32 2147483647, %v12234_v25  ;;  %v6621_v34 = vmul.f32 %v6610_v35, %v12176_v24 }
0x138a   : > { %v6578_v4 = vmul.f32 %v6567_v10, %v12210_v49  ;;  %v6686_v55 = vsub.f32 1.0, %v6675_v40  ;;  %v6557_v11 = vmul.f32 %v6546_v13, %v6524_v18  ;;  %v6635_v43 = vsub.f32 0.0, %v12207_v41 }
0x138b   : > { %v6707_v12 = vadd.f32 %v6696_v51, %v12082_v56  ;;  %7942 = vmatmul.mubr.msk.f32.gmra.mxu1 %vm6740_vm7, %v6717_v1  ;;  %v6460_v7 = vmul.f32 0.70710677, %v6449_v19  ;;  %v6676_v37 = vmul.f32 %v8482_v22, %v6621_v34  ;;  %v12656_v56 = vand.u32 2147483647, %v12090_v57 }
0x138c   : > { %7944 = vmatprep.mubr.msk.f32.mxu1 %vm8857_vm5, %v12513_v47  ;;  %v6589_v50 = vadd.f32 -0.28449672, %v6578_v4  ;;  %v6568_v24 = vadd.f32 1.4214138, %v6557_v11  ;;  %v12657_v22 = vand.u32 2147483647, %v12097_v62 }
0x138d   : > { %v6718_v15 = vmul.f32 0.5, %v6707_v12  ;;  %v6697_v23 = vmul.f32 %v6686_v55, %v12656_v56  ;;  %v6471_v58 = vmul.f32 0.3275911, %v6460_v7  ;;  %v6687_v30 = vsub.f32 1.0, %v6676_v37 }
0x138e   : > { %v6600_v39 = vmul.f32 %v6589_v50, %v12210_v49  ;;  %v6579_v6 = vmul.f32 %v6568_v24, %v6524_v18  ;;  %v6646_v12 = vmul.f32 %v6635_v43, %v12207_v41 }
0x138f   : > { %7945 = vmatmul.mubr.msk.f32.gmra.mxu1 %vm6740_vm7, %v6718_v15  ;;  %v6708_v46 = vadd.f32 %v6697_v23, %v12090_v57  ;;  %v6482_v61 = vadd.f32 1.0, %v6471_v58  ;;  %v6698_v53 = vmul.f32 %v6687_v30, %v12657_v22  ;;  %v6636_v58 = vsub.f32 0.0, %v6460_v7 }
0x1390   : > { %7947 = vmatprep.mubr.msk.f32.mxu1 %vm8857_vm5, %v12513_v47  ;;  %v6611_v8 = vadd.f32 0.2548296, %v6600_v39  ;;  %v6590_v52 = vadd.f32 -0.28449672, %v6579_v6  ;;  %v6666_v15 = vmul.f32 1.442695, %v6646_v12 }
0x1391   : > { %v6719_v17 = vmul.f32 0.5, %v6708_v46  ;;  %8489 = vrcp.f32 %v6482_v61  ;;  %v6709_v1 = vadd.f32 %v6698_v53, %v12097_v62 }
0x1392   : > { %v8486_v14 = vpop.eup %8485  ;;  %v6622_v0 = vmul.f32 %v6611_v8, %v12210_v49  ;;  %v6601_v57 = vmul.f32 %v6590_v52, %v6524_v18  ;;  %v12658_v49 = vand.u32 2147483647, %v12117_v16  ;;  %8491 = vpow2.f32 %v6666_v15 }
0x1393   : > { %v6503_v51 = vmul.f32 %v8486_v14, %v6481_v32  ;;  %7948 = vmatmul.mubr.msk.f32.gmra.mxu1 %vm6740_vm7, %v6719_v17  ;;  %v6720_v35 = vmul.f32 0.5, %v6709_v1  ;;  %v6647_v8 = vmul.f32 %v6636_v58, %v6460_v7 }
0x1394   : > { %v6677_v10 = vmul.f32 %v8484_v36, %v6622_v0  ;;  %7950 = vmatprep.mubr.msk.f32.mxu1 %vm8857_vm5, %v12513_v47  ;;  %v6612_v40 = vadd.f32 0.2548296, %v6601_v57 }
0x1395   : > { %v6514_v13 = vsub.f32 2.0, %v6503_v51  ;;  %v8488_v62 = vpop.eup %8487  ;;  %v6668_v1 = vmul.f32 1.442695, %v6647_v8 }
0x1396   : > { %v6688_v34 = vsub.f32 1.0, %v6677_v10  ;;  %v6623_v4 = vmul.f32 %v6612_v40, %v6524_v18  ;;  %v12659_v18 = vand.u32 2147483647, %v12125_v3 }
0x1397   : > { %v6525_v55 = vmul.f32 %v8486_v14, %v6514_v13  ;;  %7951 = vmatmul.mubr.msk.f32.gmra.mxu1 %vm6740_vm7, %v6720_v35  ;;  %8493 = vpow2.f32 %v6668_v1 }
0x1398   : > { %v6699_v32 = vmul.f32 %v6688_v34, %v12658_v49  ;;  %7953 = vmatprep.mubr.msk.f32.mxu1 %vm8857_vm5, %v12513_v47  ;;  %v6678_v36 = vmul.f32 %v8488_v62, %v6623_v4 }
0x1399   : > { %v6536_v11 = vmul.f32 1.0614054, %v6525_v55 }
0x139a   : > { %v6710_v37 = vadd.f32 %v6699_v32, %v12117_v16  ;;  %v6689_v50 = vsub.f32 1.0, %v6678_v36 }
0x139b   : > { %v6547_v56 = vadd.f32 -1.4531521, %v6536_v11 }
0x139c   : > { %v6721_v41 = vmul.f32 0.5, %v6710_v37  ;;  %v6700_v23 = vmul.f32 %v6689_v50, %v12659_v18 }
0x139d   : > { %v6558_v24 = vmul.f32 %v6547_v56, %v6525_v55 }
0x139e   : > { %v8490_v30 = vpop.eup %8489  ;;  %7954 = vmatmul.mubr.msk.f32.gmra.mxu1 %vm6740_vm7, %v6721_v41  ;;  %v6711_v39 = vadd.f32 %v6700_v23, %v12125_v3 }
0x139f   : > { %v6569_v46 = vadd.f32 1.4214138, %v6558_v24  ;;  %v6504_v6 = vmul.f32 %v8490_v30, %v6482_v61  ;;  %7956 = vmatprep.mubr.msk.f32.mxu1 %vm8857_vm5, %v12513_v47  ;;  %v8492_v51 = vpop.eup %8491 }
0x13a0   : > { %v6722_v16 = vmul.f32 0.5, %v6711_v39 }
0x13a1   : > { %v6580_v22 = vmul.f32 %v6569_v46, %v6525_v55  ;;  %v6515_v53 = vsub.f32 2.0, %v6504_v6 }
0x13a2   : > { %7957 = vmatmul.mubr.msk.f32.gmra.mxu1 %vm6740_vm7, %v6722_v16 }
0x13a3   : > { %v6591_v17 = vadd.f32 -0.28449672, %v6580_v22  ;;  %v6526_v52 = vmul.f32 %v8490_v30, %v6515_v53  ;;  %7959 = vmatprep.mubr.msk.f32.mxu1 %vm8857_vm5, %v12513_v47 }
0x13a5   : > { %v6602_v43 = vmul.f32 %v6591_v17, %v6525_v55  ;;  %v6537_v14 = vmul.f32 1.0614054, %v6526_v52 }
0x13a7   : > { %v6613_v3 = vadd.f32 0.2548296, %v6602_v43  ;;  %v6548_v0 = vadd.f32 -1.4531521, %v6537_v14 }
0x13a9   : > { %v6624_v61 = vmul.f32 %v6613_v3, %v6525_v55  ;;  %v6559_v57 = vmul.f32 %v6548_v0, %v6526_v52  ;;  %v8494_v55 = vpop.eup %8493 }
0x13ab   : > { %v6679_v35 = vmul.f32 %v8492_v51, %v6624_v61  ;;  %v6570_v10 = vadd.f32 1.4214138, %v6559_v57 }
0x13ad   : > { %v6690_v40 = vsub.f32 1.0, %v6679_v35  ;;  %v6581_v7 = vmul.f32 %v6570_v10, %v6526_v52 }
0x13af   : > { %v6701_v13 = vmul.f32 %v6690_v40, %v6448_v33  ;;  %v6592_v12 = vadd.f32 -0.28449672, %v6581_v7 }
0x13b1   : > { %v6712_v34 = vadd.f32 %v6701_v13, %v12189_v27  ;;  %v6603_v4 = vmul.f32 %v6592_v12, %v6526_v52  ;;  %v12292_v27 = vld [vmem:[%s12374_s15] ss:$0 sm:$0xff] }
0x13b3   : > { %v6723_v62 = vmul.f32 0.5, %v6712_v34  ;;  %v6614_v49 = vadd.f32 0.2548296, %v6603_v4 }
0x13b5   : > { %v6625_v32 = vmul.f32 %v6614_v49, %v6526_v52  ;;  %7960 = vmatmul.mubr.msk.f32.gmra.mxu1 %vm6740_vm7, %v6723_v62 }
0x13b6   : > { %7962 = vmatprep.mubr.msk.f32.mxu1 %vm8857_vm5, %v12513_v47 }
0x13b7   : > { %v6680_v36 = vmul.f32 %v8494_v55, %v6625_v32  ;;  %v12662_v55 = vld [vmem:[#allocation39_spill] sm:$0xff] }
0x13b9   : > { %v6691_v11 = vsub.f32 1.0, %v6680_v36  ;;  %v12663_v36 = vld [vmem:[#allocation40_spill] sm:$0xff] }
0x13bb   : > { %v6702_v15 = vmul.f32 %v6691_v11, %v6449_v19 }
0x13bd   : > { %v6713_v33 = vadd.f32 %v6702_v15, %v12234_v25 }
0x13bf   : > { %v6724_v37 = vmul.f32 0.5, %v6713_v33 }
0x13c1   : > { %7963 = vmatmul.mubr.msk.f32.gmra.mxu1 %vm6740_vm7, %v6724_v37 }
0x143c   : > { %v6840_v50 = vpop.f32.mrf.mxu1 }
0x143d   : > { %v6841_v56 = vadd.f32 %v12292_v27, %v6840_v50 }
0x143e   : > { %v7934_v41 = vpop.f32.mrf.mxu1 }
0x143f   : > { %v6894_v47 = vadd.f32 %v6841_v56, %v11951_v54 }
0x1441   : > { %v6905_v25 = vadd.f32 %v6894_v47, %v11805_v59  ;;  %v6845_v19 = vpop.f32.mrf.mxu1 }
0x1442   : > { %v6846_v18 = vadd.f32 %v12292_v27, %v6845_v19 }
0x1443   : > { %6916 = vst.msk [vmem:[%s12301_s26] sm:$0xff] %vm1271_vm1, %v6905_v25  ;;  %v7937_v23 = vpop.f32.mrf.mxu1 }
0x1444   : > { %v6895_v24 = vadd.f32 %v6846_v18, %v11961_v26 }
0x1446   : > { %v6850_v54 = vpop.f32.mrf.mxu1  ;;  %v6906_v58 = vadd.f32 %v6895_v24, %v11811_v28 }
0x1447   : > { %v6851_v30 = vadd.f32 %v12292_v27, %v6850_v54 }
0x1448   : > { %v7940_v39 = vpop.f32.mrf.mxu1  ;;  %6917 = vst.msk [vmem:[%s12301_s26 + $0x8] sm:$0xff] %vm1271_vm1, %v6906_v58 }
0x1449   : > { %v6896_v46 = vadd.f32 %v6851_v30, %v11970_v42 }
0x144b   : > { %v6907_v59 = vadd.f32 %v6896_v46, %v11817_v21  ;;  %v6855_v6 = vpop.f32.mrf.mxu1 }
0x144c   : > { %v6856_v16 = vadd.f32 %v12292_v27, %v6855_v6 }
0x144d   : > { %6918 = vst.msk [vmem:[%s12301_s26 + $0x10] sm:$0xff] %vm1271_vm1, %v6907_v59  ;;  %v7943_v26 = vpop.f32.mrf.mxu1 }
0x144e   : > { %v6897_v22 = vadd.f32 %v6856_v16, %v11978_v5 }
0x144f   : > { %v6860_v53 = vpop.f32.mrf.mxu1 }
0x1450   : > { %v6908_v28 = vadd.f32 %v6897_v22, %v11823_v48  ;;  %v6861_v8 = vadd.f32 %v12292_v27, %v6860_v53 }
0x1451   : > { %v7946_v17 = vpop.f32.mrf.mxu1 }
0x1452   : > { %6919 = vst.msk [vmem:[%s12301_s26 + $0x18] sm:$0xff] %vm1271_vm1, %v6908_v28  ;;  %v6898_v21 = vadd.f32 %v6861_v8, %v11988_v9 }
0x1453   : > { %v6865_v52 = vpop.f32.mrf.mxu1 }
0x1454   : > { %v6909_v42 = vadd.f32 %v6898_v21, %v11829_v2  ;;  %v6866_v43 = vadd.f32 %v12292_v27, %v6865_v52 }
0x1455   : > { %v7949_v5 = vpop.f32.mrf.mxu1 }
0x1456   : > { %6920 = vst.msk [vmem:[%s12301_s26 + $0x20] sm:$0xff] %vm1271_vm1, %v6909_v42  ;;  %v6899_v14 = vadd.f32 %v6866_v43, %v11997_v45 }
0x1457   : > { %v6870_v48 = vpop.f32.mrf.mxu1 }
0x1458   : > { %v6910_v1 = vadd.f32 %v6899_v14, %v11835_v38  ;;  %v6871_v3 = vadd.f32 %v12292_v27, %v6870_v48 }
0x1459   : > { %v7952_v0 = vpop.f32.mrf.mxu1 }
0x145a   : > { %6921 = vst.msk [vmem:[%s12301_s26 + $0x28] sm:$0xff] %vm1271_vm1, %v6910_v1  ;;  %v6900_v2 = vadd.f32 %v6871_v3, %v12005_v44 }
0x145c   : > { %v6911_v9 = vadd.f32 %v6900_v2, %v11841_v60 }
0x145e   : > { %6922 = vst.msk [vmem:[%s12301_s26 + $0x30] sm:$0xff] %vm1271_vm1, %v6911_v9  ;;  %v6875_v61 = vpop.f32.mrf.mxu1 }
0x145f   : > { %v6876_v57 = vadd.f32 %v12292_v27, %v6875_v61 }
0x1460   : > { %v7955_v45 = vpop.f32.mrf.mxu1 }
0x1461   : > { %v6901_v51 = vadd.f32 %v6876_v57, %v12015_v20  ;;  %v12660_v20 = vld [vmem:[#allocation46_spill] sm:$0xff] }
0x1462   : > { %v6880_v35 = vpop.f32.mrf.mxu1 }
0x1463   : > { %v6912_v38 = vadd.f32 %v6901_v51, %v11847_v29  ;;  %v6881_v10 = vadd.f32 %v12292_v27, %v6880_v35  ;;  %v12661_v29 = vld [vmem:[#allocation48_spill] sm:$0xff] }
0x1464   : > { %v7958_v44 = vpop.f32.mrf.mxu1 }
0x1465   : > { %6923 = vst.msk [vmem:[%s12301_s26 + $0x38] sm:$0xff] %vm1271_vm1, %v6912_v38  ;;  %v6902_v60 = vadd.f32 %v6881_v10, %v12023_v63 }
0x1467   : > { %v6913_v40 = vadd.f32 %v6902_v60, %v11853_v31 }
0x1469   : > { %6924 = vst.msk [vmem:[%s12301_s26 + $0x40] sm:$0xff] %vm1271_vm1, %v6913_v40 }
0x1475   : > { %v6885_v7 = vpop.f32.mrf.mxu1 }
0x1476   : > { %v6886_v13 = vadd.f32 %v12292_v27, %v6885_v7 }
0x1477   : > { %v7961_v12 = vpop.f32.mrf.mxu1 }
0x1478   : > { %v6903_v34 = vadd.f32 %v6886_v13, %v12660_v20 }
0x147a   : > { %v6914_v4 = vadd.f32 %v6903_v34, %v12661_v29 }
0x147c   : > { %6925 = vst.msk [vmem:[%s12301_s26 + $0x48] sm:$0xff] %vm1271_vm1, %v6914_v4 }
0x1481   : > { %v6890_v62 = vpop.f32.mrf.mxu1 }
0x1482   : > { %v6891_v49 = vadd.f32 %v12292_v27, %v6890_v62 }
0x1483   : > { %v7964_v32 = vpop.f32.mrf.mxu1 }
0x1484   : > { %v6904_v63 = vadd.f32 %v6891_v49, %v12662_v55 }
0x1486   : > { %v6915_v31 = vadd.f32 %v6904_v63, %v12663_v36 }
0x1488   : > { %6926 = vst.msk [vmem:[%s12301_s26 + $0x50] sm:$0x1] %vm1302_vm0, %v6915_v31 }
0x1489 PF: > { %s39_s4 = sadd.s32 1, %s8832_s4  }
0x148a   : > { %p36_p2 = scmp.ge.s32.totalorder %s39_s4, 4  }
0x148c   :  { %38 = sbr.rel (!%p36_p2) target bundleno = 17 (0x11), region = 183 }
0x1491   :  { %6948 = vsyncpa [#allocation4], 1 }
0x1492   :  { %6950 = vsyncpa [#allocation4 + $0x1], 1 }
0x1493   :  { %6951 = vsyncpa [#allocation6], 1 }
0x1494   :  { %6952 = vsyncpa [#allocation9], 1 }
0x1495   :  { %6953 = vsyncpa [#allocation12], 1 }
0x1496   :  { %6954 = vsyncpa [#allocation15], 1 }
0x1497   :  { %6955 = vsyncpa [#allocation18], 1 }

</bundles_post_ra>
